<compile_context>
chip_gen: v7x
topology: tpu7x:2x2x1
jax: 0.10.0
libtpu: 0.0.40
codegen_flags: <defaults>
</compile_context>

<pallas_src>
import functools

import jax
import jax.numpy as jnp
from jax.experimental import pallas as pl
from jax.experimental.pallas import tpu as pltpu


def _round_up(x, m):
    return -(-x // m) * m


def _char_lstm_kernel(
    # inputs
    x_ref,        # (T*Bg, V)      time-chunk of inputs (this batch group), flattened
    wih0_ref,     # (V, 4*HP)      layer 0 input->gates (transposed, gate-padded)
    whh0_ref,     # (HP, 4*HP)     layer 0 hidden->gates
    b0_ref,       # (1, 4*HP)      layer 0 bias (b_ih + b_hh), f32
    wih1_ref,     # (HP, 4*HP)     layer 1 input(=h0)->gates
    whh1_ref,     # (HP, 4*HP)     layer 1 hidden->gates
    b1_ref,       # (1, 4*HP)      layer 1 bias, f32
    wout_ref,     # (HP, VP)       output Linear weight (transposed, padded)
    bout_ref,     # (1, VP)        output Linear bias (padded), f32
    # outputs
    out_ref,      # (T*Bg, VP)     logits for the chunk (lane-dense)
    hout_ref,     # (2, Bg, HP)    final hidden state (this batch group)
    cout_ref,     # (2, Bg, HP)    final cell state
    # scratch
    gx_s,         # (T*Bg, 4*HP)   hoisted x-projection, f32
    h1buf_s,      # (T*Bg, HP)     per-step layer-1 hidden states (for output GEMM)
    h0_s, c0_s,   # (Bg, HP)       layer 0 carried state, f32
    h1_s, c1_s,   # (Bg, HP)       layer 1 carried state, f32
    *, t_chunk, hp, seq_len, needs_mask, unroll,
):
    T = t_chunk
    HP = hp
    Bg = h0_s.shape[0]
    cdt = h1buf_s.dtype          # matmul-operand dtype (f32 or bf16)
    c_idx = pl.program_id(1)     # time-chunk index (axis 0 = batch-group axis)

    @pl.when(c_idx == 0)
    def _init():
        # hidden=None semantics: zero-initialized h_0 / c_0 for this batch group.
        h0_s[...] = jnp.zeros_like(h0_s)
        c0_s[...] = jnp.zeros_like(c0_s)
        h1_s[...] = jnp.zeros_like(h1_s)
        c1_s[...] = jnp.zeros_like(c1_s)

    # ---- Phase 1: hoisted input projection + bias for the whole chunk (one GEMM) ----
    gx_s[...] = (
        jnp.dot(x_ref[...], wih0_ref[...], preferred_element_type=jnp.float32)
        + b0_ref[...]
    )

    # Hoist weight loads / bias broadcast out of the recurrent loop (not CSE'd by JAX).
    whh0 = whh0_ref[...]
    wih1 = wih1_ref[...]
    whh1 = whh1_ref[...]
    b1 = jnp.broadcast_to(b1_ref[...], (Bg, 4 * HP))

    def gates_split(g):
        # Gate slices are lane-aligned (HP multiple of 128) -> zero-cost vreg views.
        i_g = jax.nn.sigmoid(g[:, 0 * HP:1 * HP])
        f_g = jax.nn.sigmoid(g[:, 1 * HP:2 * HP])
        g_g = jnp.tanh(g[:, 2 * HP:3 * HP])
        o_g = jax.nn.sigmoid(g[:, 3 * HP:4 * HP])
        return i_g, f_g, g_g, o_g

    def run_chunk(masked):
        def step(i, carry):
            h0, c0, h1, c1 = carry
            row0 = i * Bg

            # Layer 0: x-projection precomputed -> only h_prev @ Whh0 remains.
            g0 = gx_s[pl.ds(row0, Bg), :] + jnp.dot(
                h0.astype(cdt), whh0, preferred_element_type=jnp.float32)
            i0, f0, gg0, o0 = gates_split(g0)
            c0n = f0 * c0 + i0 * gg0
            h0n = o0 * jnp.tanh(c0n)

            # (inter-layer dropout is identity at inference)
            # Layer 1: split dots (no per-step concatenate on the critical path).
            g1 = (jnp.dot(h0n.astype(cdt), wih1, preferred_element_type=jnp.float32)
                  + jnp.dot(h1.astype(cdt), whh1, preferred_element_type=jnp.float32)
                  + b1)
            i1, f1, gg1, o1 = gates_split(g1)
            c1n = f1 * c1 + i1 * gg1
            h1n = o1 * jnp.tanh(c1n)

            if masked:
                # Only the final chunk can contain padded (>= seq_len) time steps.
                valid = (c_idx * T + i) < seq_len
                h0n = jnp.where(valid, h0n, h0)
                c0n = jnp.where(valid, c0n, c0)
                h1n = jnp.where(valid, h1n, h1)
                c1n = jnp.where(valid, c1n, c1)

            h1buf_s[pl.ds(row0, Bg), :] = h1n.astype(cdt)
            return (h0n, c0n, h1n, c1n)

        carry0 = (h0_s[...], c0_s[...], h1_s[...], c1_s[...])
        h0, c0, h1, c1 = jax.lax.fori_loop(0, T, step, carry0, unroll=unroll)
        # Carry state to the next chunk.
        h0_s[...] = h0
        c0_s[...] = c0
        h1_s[...] = h1
        c1_s[...] = c1

    # ---- Phase 2: sequential recurrence over the chunk ----
    if needs_mask:
        last = pl.num_programs(1) - 1

        @pl.when(c_idx != last)
        def _unmasked():
            run_chunk(False)

        @pl.when(c_idx == last)
        def _masked():
            run_chunk(True)
    else:
        run_chunk(False)

    # ---- Phase 3: hoisted output Linear for the whole chunk (one GEMM, lane-dense) ----
    # (post-LSTM dropout is identity at inference)
    out_ref[...] = (
        jnp.dot(h1buf_s[...], wout_ref[...], preferred_element_type=jnp.float32)
        + bout_ref[...]
    ).astype(out_ref.dtype)

    # ---- Phase 4: final state writeback (this batch group's rows) ----
    @pl.when(c_idx == pl.num_programs(1) - 1)
    def _final():
        hout_ref[0] = h0_s[...]
        hout_ref[1] = h1_s[...]
        cout_ref[0] = c0_s[...]
        cout_ref[1] = c1_s[...]


def _pad_gate_weight_T(w, in_pad, H, HP):
    """PyTorch (4H, in_dim) gate-stacked weight -> (in_pad, 4*HP), transposed.

    Gate g (PyTorch order i,f,g,o) lands at columns [g*HP, g*HP + H); padding is zero.
    """
    in_dim = w.shape[1]
    wT = jnp.asarray(w, jnp.float32).T  # (in_dim, 4H)
    blocks = []
    for g in range(4):
        blk = wT[:, g * H:(g + 1) * H]
        blocks.append(jnp.pad(blk, ((0, in_pad - in_dim), (0, HP - H))))
    return jnp.concatenate(blocks, axis=1)  # (in_pad, 4*HP)


def _pad_gate_bias(b, H, HP):
    b = jnp.asarray(b, jnp.float32)
    blocks = [jnp.pad(b[g * H:(g + 1) * H], (0, HP - H)) for g in range(4)]
    return jnp.concatenate(blocks)[None, :]  # (1, 4*HP)


def character_lstm_forward(x_bsv, params, *, t_chunk=32, compute_dtype=jnp.float32,
                           out_dtype=jnp.float32, single_buffer_weights=True):
    """Forward pass matching CharacterLSTM.forward (hidden=None, eval mode).

    Args:
      x_bsv:  (batch, seq, vocab) float32 — batch_first like the PyTorch module.
      params: dict of LSTM / Linear parameters (PyTorch shapes).
      t_chunk: time steps per grid iteration (M of the hoisted GEMMs = t_chunk * 8).
      compute_dtype: matmul-operand dtype (jnp.float32 or jnp.bfloat16); gate math,
        biases and carried state stay f32.
      out_dtype: logits dtype.
      single_buffer_weights: single-buffer grid-invariant weights (pl.Buffered(1)).

    Returns:
      logits (batch, seq, vocab), (h_n, c_n) each (num_layers, batch, hidden).
    """
    x_bsv = jnp.asarray(x_bsv, jnp.float32)
    B, S, V = x_bsv.shape
    H = params["w_hh_l0"].shape[1]

    Bp = _round_up(max(B, 8), 8)          # pad batch to f32 sublane count
    HP = _round_up(H, 128)                # lane-aligned gate tiles
    VP = _round_up(V, 128)                # lane-dense logits stores / MXU N-dim

    # Batch-parallel groups: one per TensorCore on dual-TC parts (v7x). Only split
    # when each group still has >= 8 sublanes of real batch.
    G = 2 if (Bp >= 16 and Bp % 16 == 0) else 1
    Bg = Bp // G

    T = int(min(t_chunk, S))              # time steps per grid iteration
    S_pad = _round_up(S, T)
    n_chunks = S_pad // T
    needs_mask = S_pad != S
    unroll = max(1, min(8, T))            # partial unroll bounds vreg live ranges

    cdt = compute_dtype

    # --- weight prep (transpose + gate/lane padding + optional bf16), once outside ---
    wih0p = _pad_gate_weight_T(params["w_ih_l0"], V, H, HP).astype(cdt)      # (V, 4HP)
    whh0p = _pad_gate_weight_T(params["w_hh_l0"], HP, H, HP).astype(cdt)     # (HP, 4HP)
    b0p = _pad_gate_bias(params["b_ih_l0"] + params["b_hh_l0"], H, HP)       # (1, 4HP)
    wih1p = _pad_gate_weight_T(params["w_ih_l1"], HP, H, HP).astype(cdt)     # (HP, 4HP)
    whh1p = _pad_gate_weight_T(params["w_hh_l1"], HP, H, HP).astype(cdt)     # (HP, 4HP)
    b1p = _pad_gate_bias(params["b_ih_l1"] + params["b_hh_l1"], H, HP)       # (1, 4HP)
    woutp = jnp.pad(jnp.asarray(params["w_out"], jnp.float32).T,
                    ((0, HP - H), (0, VP - V))).astype(cdt)                  # (HP, VP)
    boutp = jnp.pad(jnp.asarray(params["b_out"], jnp.float32),
                    (0, VP - V))[None, :]                                    # (1, VP)

    # --- input prep: time-major, padded, batch-grouped, flattened (time*batch, V) ---
    x_sbv = jnp.transpose(x_bsv, (1, 0, 2))
    x_sbv = jnp.pad(x_sbv, ((0, S_pad - S), (0, Bp - B), (0, 0)))
    x_g = (x_sbv.reshape(S_pad, G, Bg, V)
           .transpose(1, 0, 2, 3)
           .reshape(G, S_pad * Bg, V)
           .astype(cdt))

    kernel = functools.partial(
        _char_lstm_kernel, t_chunk=T, hp=HP, seq_len=S,
        needs_mask=needs_mask, unroll=unroll)

    # --- VMEM budget: weights + streamed chunks + scratch, with headroom ---
    csz = jnp.dtype(cdt).itemsize
    osz = jnp.dtype(out_dtype).itemsize
    weight_bytes = ((V * 4 * HP + 3 * HP * 4 * HP + HP * VP) * csz
                    + (2 * 4 * HP + VP) * 4)
    stream_bytes = 2 * (T * Bg * V * csz + T * Bg * VP * osz + 2 * (2 * Bg * HP * 4))
    scratch_bytes = (T * Bg * 4 * HP * 4 + T * Bg * HP * csz + 4 * Bg * HP * 4)
    wbuf = 1 if single_buffer_weights else 2
    est = wbuf * weight_bytes + stream_bytes + scratch_bytes
    vmem_limit = int(min(max(2 * est, 32 << 20), 96 << 20))

    def build_and_run(single_buf):
        w_idx = lambda p, c: (0, 0)

        def wspec(shape):
            if single_buf:
                # Grid-invariant weights: single VMEM buffer, no double buffering.
                return pl.BlockSpec(shape, w_idx, pipeline_mode=pl.Buffered(1))
            return pl.BlockSpec(shape, w_idx)

        grid_spec = pltpu.PrefetchScalarGridSpec(
            num_scalar_prefetch=0,
            grid=(G, n_chunks),
            in_specs=[
                pl.BlockSpec((None, T * Bg, V), lambda p, c: (p, c, 0)),  # x chunk
                wspec((V, 4 * HP)),                                       # wih0
                wspec((HP, 4 * HP)),                                      # whh0
                wspec((1, 4 * HP)),                                       # b0
                wspec((HP, 4 * HP)),                                      # wih1
                wspec((HP, 4 * HP)),                                      # whh1
                wspec((1, 4 * HP)),                                       # b1
                wspec((HP, VP)),                                          # wout
                wspec((1, VP)),                                           # bout
            ],
            out_specs=(
                pl.BlockSpec((None, T * Bg, VP), lambda p, c: (p, c, 0)),  # logits
                pl.BlockSpec((2, Bg, HP), lambda p, c: (0, p, 0)),         # h_n
                pl.BlockSpec((2, Bg, HP), lambda p, c: (0, p, 0)),         # c_n
            ),
            scratch_shapes=[
                pltpu.VMEM((T * Bg, 4 * HP), jnp.float32),  # gx (hoisted x-projection)
                pltpu.VMEM((T * Bg, HP), cdt),              # per-step h1 buffer
                pltpu.VMEM((Bg, HP), jnp.float32),          # h0
                pltpu.VMEM((Bg, HP), jnp.float32),          # c0
                pltpu.VMEM((Bg, HP), jnp.float32),          # h1
                pltpu.VMEM((Bg, HP), jnp.float32),          # c1
            ],
        )
        return pl.pallas_call(
            kernel,
            out_shape=(
                jax.ShapeDtypeStruct((G, S_pad * Bg, VP), out_dtype),
                jax.ShapeDtypeStruct((2, Bp, HP), jnp.float32),
                jax.ShapeDtypeStruct((2, Bp, HP), jnp.float32),
            ),
            grid_spec=grid_spec,
            compiler_params=pltpu.CompilerParams(
                dimension_semantics=("parallel", "arbitrary"),
                vmem_limit_bytes=vmem_limit,
            ),
        )(x_g, wih0p, whh0p, b0p, wih1p, whh1p, b1p, woutp, boutp)

    if single_buffer_weights:
        try:
            out_g, h_n, c_n = build_and_run(True)
        except Exception:
            # pipeline_mode=pl.Buffered(1) unsupported by this JAX build: fall back
            # to default double-buffered weight blocks (correctness unaffected).
            out_g, h_n, c_n = build_and_run(False)
    else:
        out_g, h_n, c_n = build_and_run(False)

    logits = (out_g.reshape(G, S_pad, Bg, VP)
              .transpose(1, 0, 2, 3)
              .reshape(S_pad, Bp, VP)[:S, :B, :V])
    logits = jnp.transpose(logits, (1, 0, 2))          # back to batch-first
    return logits, (h_n[:, :B, :H], c_n[:, :B, :H])


def init_params(key, vocab_size, hidden_dim):
    """Deterministic init mimicking PyTorch LSTM/Linear uniform(-1/sqrt(H), 1/sqrt(H))."""
    ks = jax.random.split(key, 10)
    s = 1.0 / jnp.sqrt(hidden_dim)
    u = lambda k, shape: jax.random.uniform(k, shape, jnp.float32, -s, s)
    return {
        "w_ih_l0": u(ks[0], (4 * hidden_dim, vocab_size)),
        "w_hh_l0": u(ks[1], (4 * hidden_dim, hidden_dim)),
        "b_ih_l0": u(ks[2], (4 * hidden_dim,)),
        "b_hh_l0": u(ks[3], (4 * hidden_dim,)),
        "w_ih_l1": u(ks[4], (4 * hidden_dim, hidden_dim)),
        "w_hh_l1": u(ks[5], (4 * hidden_dim, hidden_dim)),
        "b_ih_l1": u(ks[6], (4 * hidden_dim,)),
        "b_hh_l1": u(ks[7], (4 * hidden_dim,)),
        "w_out": u(ks[8], (vocab_size, hidden_dim)),
        "b_out": u(ks[9], (vocab_size,)),
    }


def character_lstm_reference(x, params):
    """Pure-JAX reference of CharacterLSTM.forward (eval mode, hidden=None)."""
    B, S, _ = x.shape
    H = params["w_hh_l0"].shape[1]

    def cell(x_t, h, c, wih, whh, bih, bhh):
        gates = x_t @ wih.T + h @ whh.T + bih + bhh
        i_g, f_g, g_g, o_g = jnp.split(gates, 4, axis=-1)
        i_g, f_g, o_g = jax.nn.sigmoid(i_g), jax.nn.sigmoid(f_g), jax.nn.sigmoid(o_g)
        g_g = jnp.tanh(g_g)
        c_n = f_g * c + i_g * g_g
        return o_g * jnp.tanh(c_n), c_n

    h0 = jnp.zeros((B, H)); c0 = jnp.zeros((B, H))
    h1 = jnp.zeros((B, H)); c1 = jnp.zeros((B, H))
    outs = []
    for t in range(S):
        h0, c0 = cell(x[:, t], h0, c0, params["w_ih_l0"], params["w_hh_l0"],
                      params["b_ih_l0"], params["b_hh_l0"])
        h1, c1 = cell(h0, h1, c1, params["w_ih_l1"], params["w_hh_l1"],
                      params["b_ih_l1"], params["b_hh_l1"])
        outs.append(h1 @ params["w_out"].T + params["b_out"])
    logits = jnp.stack(outs, axis=1)
    return logits, (jnp.stack([h0, h1]), jnp.stack([c0, c1]))


if __name__ == "__main__":
    key = jax.random.PRNGKey(0)
    k_x, k_p, k_x2, k_x3 = jax.random.split(key, 4)

    # --- Test 1: base config (batch=2, seq=8, vocab=16, hidden=32), f32 path ---
    B, S, V, H = 2, 8, 16, 32
    idx = jax.random.randint(k_x, (B, S), 0, V)
    x = jax.nn.one_hot(idx, V, dtype=jnp.float32)
    params = init_params(k_p, V, H)

    logits, (h_n, c_n) = character_lstm_forward(x, params)
    jax.block_until_ready((logits, h_n, c_n))
    assert logits.shape == (B, S, V)
    assert h_n.shape == (2, B, H) and c_n.shape == (2, B, H)

    ref_logits, (ref_h, ref_c) = character_lstm_reference(x, params)
    assert jnp.allclose(logits, ref_logits, atol=1e-3, rtol=1e-3)
    assert jnp.allclose(h_n, ref_h, atol=1e-3, rtol=1e-3)
    assert jnp.allclose(c_n, ref_c, atol=1e-3, rtol=1e-3)

    # --- Test 2: multi-chunk + ragged tail (state carry across chunks + last-chunk mask) ---
    B2, S2 = 3, 13
    idx2 = jax.random.randint(k_x2, (B2, S2), 0, V)
    x2 = jax.nn.one_hot(idx2, V, dtype=jnp.float32)
    logits2, (h2, c2) = character_lstm_forward(x2, params, t_chunk=4)
    jax.block_until_ready((logits2, h2, c2))
    ref2, (rh2, rc2) = character_lstm_reference(x2, params)
    assert jnp.allclose(logits2, ref2, atol=1e-3, rtol=1e-3)
    assert jnp.allclose(h2, rh2, atol=1e-3, rtol=1e-3)
    assert jnp.allclose(c2, rc2, atol=1e-3, rtol=1e-3)

    # --- Test 3: batch large enough to engage the 2-way batch-parallel grid axis ---
    B3 = 16
    idx3 = jax.random.randint(k_x3, (B3, S), 0, V)
    x3 = jax.nn.one_hot(idx3, V, dtype=jnp.float32)
    logits3, (h3, c3) = character_lstm_forward(x3, params)
    jax.block_until_ready((logits3, h3, c3))
    ref3, (rh3, rc3) = character_lstm_reference(x3, params)
    assert jnp.allclose(logits3, ref3, atol=1e-3, rtol=1e-3)
    assert jnp.allclose(h3, rh3, atol=1e-3, rtol=1e-3)
    assert jnp.allclose(c3, rc3, atol=1e-3, rtol=1e-3)

    # --- Test 4: bf16 weight/matmul path (f32 gate math & state), loose tolerance ---
    logits_bf, _ = character_lstm_forward(x, params, compute_dtype=jnp.bfloat16)
    jax.block_until_ready(logits_bf)
    assert jnp.allclose(logits_bf, ref_logits, atol=1e-1, rtol=1e-1)

    print("KERNEL_OK")
</pallas_src>

<mosaic_0001>
module attributes {stable_mosaic.version = 11 : i64} {
  func.func @_char_lstm_kernel(%arg0: i32, %arg1: i32, %arg2: memref<1x64x16xf32, #tpu.memory_space<vmem>>, %arg3: memref<16x512xf32, #tpu.memory_space<vmem>>, %arg4: memref<128x512xf32, #tpu.memory_space<vmem>>, %arg5: memref<1x512xf32, #tpu.memory_space<vmem>>, %arg6: memref<128x512xf32, #tpu.memory_space<vmem>>, %arg7: memref<128x512xf32, #tpu.memory_space<vmem>>, %arg8: memref<1x512xf32, #tpu.memory_space<vmem>>, %arg9: memref<128x128xf32, #tpu.memory_space<vmem>>, %arg10: memref<1x128xf32, #tpu.memory_space<vmem>>, %arg11: memref<1x64x128xf32, #tpu.memory_space<vmem>>, %arg12: memref<2x8x128xf32, #tpu.memory_space<vmem>>, %arg13: memref<2x8x128xf32, #tpu.memory_space<vmem>>, %arg14: memref<64x512xf32, #tpu.memory_space<vmem>>, %arg15: memref<64x128xf32, #tpu.memory_space<vmem>>, %arg16: memref<8x128xf32, #tpu.memory_space<vmem>>, %arg17: memref<8x128xf32, #tpu.memory_space<vmem>>, %arg18: memref<8x128xf32, #tpu.memory_space<vmem>>, %arg19: memref<8x128xf32, #tpu.memory_space<vmem>>) attributes {dimension_semantics = [#tpu.dimension_semantics<parallel>, #tpu.dimension_semantics<arbitrary>], iteration_bounds = array<i64: 1, 1>, scalar_prefetch = 0 : i64, scratch_operands = 6 : i64, tpu.core_type = #tpu.core_type<tc>, window_params = [{transform_indices = @transform_0, window_bounds = array<i64: 1, 64, 16>}, {pipeline_mode = #tpu.pipeline_mode<synchronous>, transform_indices = @transform_1, window_bounds = array<i64: 16, 512>}, {pipeline_mode = #tpu.pipeline_mode<synchronous>, transform_indices = @transform_2, window_bounds = array<i64: 128, 512>}, {pipeline_mode = #tpu.pipeline_mode<synchronous>, transform_indices = @transform_3, window_bounds = array<i64: 1, 512>}, {pipeline_mode = #tpu.pipeline_mode<synchronous>, transform_indices = @transform_4, window_bounds = array<i64: 128, 512>}, {pipeline_mode = #tpu.pipeline_mode<synchronous>, transform_indices = @transform_5, window_bounds = array<i64: 128, 512>}, {pipeline_mode = #tpu.pipeline_mode<synchronous>, transform_indices = @transform_6, window_bounds = array<i64: 1, 512>}, {pipeline_mode = #tpu.pipeline_mode<synchronous>, transform_indices = @transform_7, window_bounds = array<i64: 128, 128>}, {pipeline_mode = #tpu.pipeline_mode<synchronous>, transform_indices = @transform_8, window_bounds = array<i64: 1, 128>}, {transform_indices = @transform_9, window_bounds = array<i64: 1, 64, 128>}, {transform_indices = @transform_10, window_bounds = array<i64: 2, 8, 128>}, {transform_indices = @transform_11, window_bounds = array<i64: 2, 8, 128>}]} {
    %c0_i32 = arith.constant 0 : i32
    %0 = arith.cmpi eq, %arg1, %c0_i32 : i32
    %1 = arith.extui %0 : i1 to i32
    %c0_i32_0 = arith.constant 0 : i32
    %2 = arith.cmpi ne, %1, %c0_i32_0 : i32
    scf.if %2 {
      %cst_142 = arith.constant 0.000000e+00 : f32
      %525 = vector.broadcast %cst_142 : f32 to vector<8x128xf32>
      %c0_143 = arith.constant 0 : index
      %c0_144 = arith.constant 0 : index
      %526 = vector.load %arg16[%c0_143, %c0_144] : memref<8x128xf32, #tpu.memory_space<vmem>>, vector<8x128xf32>
      tpu.vector_store %arg16[%c0_143, %c0_144], %525 {strides = array<i32>} : memref<8x128xf32, #tpu.memory_space<vmem>>, vector<8x128xf32>,
      %cst_145 = arith.constant 0.000000e+00 : f32
      %527 = vector.broadcast %cst_145 : f32 to vector<8x128xf32>
      %c0_146 = arith.constant 0 : index
      %c0_147 = arith.constant 0 : index
      %528 = vector.load %arg17[%c0_146, %c0_147] : memref<8x128xf32, #tpu.memory_space<vmem>>, vector<8x128xf32>
      tpu.vector_store %arg17[%c0_146, %c0_147], %527 {strides = array<i32>} : memref<8x128xf32, #tpu.memory_space<vmem>>, vector<8x128xf32>,
      %cst_148 = arith.constant 0.000000e+00 : f32
      %529 = vector.broadcast %cst_148 : f32 to vector<8x128xf32>
      %c0_149 = arith.constant 0 : index
      %c0_150 = arith.constant 0 : index
      %530 = vector.load %arg18[%c0_149, %c0_150] : memref<8x128xf32, #tpu.memory_space<vmem>>, vector<8x128xf32>
      tpu.vector_store %arg18[%c0_149, %c0_150], %529 {strides = array<i32>} : memref<8x128xf32, #tpu.memory_space<vmem>>, vector<8x128xf32>,
      %cst_151 = arith.constant 0.000000e+00 : f32
      %531 = vector.broadcast %cst_151 : f32 to vector<8x128xf32>
      %c0_152 = arith.constant 0 : index
      %c0_153 = arith.constant 0 : index
      %532 = vector.load %arg19[%c0_152, %c0_153] : memref<8x128xf32, #tpu.memory_space<vmem>>, vector<8x128xf32>
      tpu.vector_store %arg19[%c0_152, %c0_153], %531 {strides = array<i32>} : memref<8x128xf32, #tpu.memory_space<vmem>>, vector<8x128xf32>,
    } else {
    }
    %c0 = arith.constant 0 : index
    %c0_1 = arith.constant 0 : index
    %c0_2 = arith.constant 0 : index
    %3 = vector.load %arg2[%c0, %c0_1, %c0_2] : memref<1x64x16xf32, #tpu.memory_space<vmem>>, vector<1x64x16xf32>
    %4 = vector.shape_cast %3 : vector<1x64x16xf32> to vector<64x16xf32>
    %c0_3 = arith.constant 0 : index
    %c0_4 = arith.constant 0 : index
    %5 = vector.load %arg3[%c0_3, %c0_4] : memref<16x512xf32, #tpu.memory_space<vmem>>, vector<16x512xf32>
    %cst = arith.constant dense<0.000000e+00> : vector<64x512xf32>
    %6 = tpu.matmul %4, %5, %cst {dimension_numbers = #tpu.dot_dimension_numbers<[1], [0], [0], [1], [0, 0, 1, 1], [], []>} : vector<64x16xf32>, vector<16x512xf32>, vector<64x512xf32> -> vector<64x512xf32>
    %c0_5 = arith.constant 0 : index
    %c0_6 = arith.constant 0 : index
    %7 = vector.load %arg5[%c0_5, %c0_6] : memref<1x512xf32, #tpu.memory_space<vmem>>, vector<1x512xf32>
    %8 = vector.broadcast %7 : vector<1x512xf32> to vector<64x512xf32>
    %9 = arith.addf %6, %8 : vector<64x512xf32>
    %c0_7 = arith.constant 0 : index
    %c0_8 = arith.constant 0 : index
    %10 = vector.load %arg14[%c0_7, %c0_8] : memref<64x512xf32, #tpu.memory_space<vmem>>, vector<64x512xf32>
    tpu.vector_store %arg14[%c0_7, %c0_8], %9 {strides = array<i32>} : memref<64x512xf32, #tpu.memory_space<vmem>>, vector<64x512xf32>,
    %c0_9 = arith.constant 0 : index
    %c0_10 = arith.constant 0 : index
    %11 = vector.load %arg4[%c0_9, %c0_10] : memref<128x512xf32, #tpu.memory_space<vmem>>, vector<128x512xf32>
    %c0_11 = arith.constant 0 : index
    %c0_12 = arith.constant 0 : index
    %12 = vector.load %arg6[%c0_11, %c0_12] : memref<128x512xf32, #tpu.memory_space<vmem>>, vector<128x512xf32>
    %c0_13 = arith.constant 0 : index
    %c0_14 = arith.constant 0 : index
    %13 = vector.load %arg7[%c0_13, %c0_14] : memref<128x512xf32, #tpu.memory_space<vmem>>, vector<128x512xf32>
    %c0_15 = arith.constant 0 : index
    %c0_16 = arith.constant 0 : index
    %14 = vector.load %arg8[%c0_15, %c0_16] : memref<1x512xf32, #tpu.memory_space<vmem>>, vector<1x512xf32>
    %15 = vector.shape_cast %14 : vector<1x512xf32> to vector<1x512xf32>
    %16 = vector.broadcast %15 : vector<1x512xf32> to vector<8x512xf32>
    %c0_17 = arith.constant 0 : index
    %c0_18 = arith.constant 0 : index
    %17 = vector.load %arg16[%c0_17, %c0_18] : memref<8x128xf32, #tpu.memory_space<vmem>>, vector<8x128xf32>
    %c0_19 = arith.constant 0 : index
    %c0_20 = arith.constant 0 : index
    %18 = vector.load %arg17[%c0_19, %c0_20] : memref<8x128xf32, #tpu.memory_space<vmem>>, vector<8x128xf32>
    %c0_21 = arith.constant 0 : index
    %c0_22 = arith.constant 0 : index
    %19 = vector.load %arg18[%c0_21, %c0_22] : memref<8x128xf32, #tpu.memory_space<vmem>>, vector<8x128xf32>
    %c0_23 = arith.constant 0 : index
    %c0_24 = arith.constant 0 : index
    %20 = vector.load %arg19[%c0_23, %c0_24] : memref<8x128xf32, #tpu.memory_space<vmem>>, vector<8x128xf32>
    %c0_i32_25 = arith.constant 0 : i32
    %c8_i32 = arith.constant 8 : i32
    %21 = arith.muli %c0_i32_25, %c8_i32 : i32
    %22 = arith.index_cast %21 : i32 to index
    %c0_26 = arith.constant 0 : index
    %23 = vector.load %arg14[%22, %c0_26] : memref<64x512xf32, #tpu.memory_space<vmem>>, vector<8x512xf32>
    %cst_27 = arith.constant dense<0.000000e+00> : vector<8x512xf32>
    %24 = tpu.matmul %17, %11, %cst_27 {dimension_numbers = #tpu.dot_dimension_numbers<[1], [0], [0], [1], [0, 0, 1, 1], [], []>} : vector<8x128xf32>, vector<128x512xf32>, vector<8x512xf32> -> vector<8x512xf32>
    %25 = arith.addf %23, %24 : vector<8x512xf32>
    %26 = vector.extract_strided_slice %25 {offsets = [0, 0], sizes = [8, 128], strides = [1, 1]} : vector<8x512xf32> to vector<8x128xf32>
    %27 = arith.negf %26 : vector<8x128xf32>
    %28 = math.exp %27 : vector<8x128xf32>
    %cst_28 = arith.constant 1.000000e+00 : f32
    %29 = vector.broadcast %cst_28 : f32 to vector<8x128xf32>
    %30 = arith.addf %29, %28 : vector<8x128xf32>
    %31 = arith.divf %29, %30 : vector<8x128xf32>
    %32 = vector.extract_strided_slice %25 {offsets = [0, 128], sizes = [8, 128], strides = [1, 1]} : vector<8x512xf32> to vector<8x128xf32>
    %33 = arith.negf %32 : vector<8x128xf32>
    %34 = math.exp %33 : vector<8x128xf32>
    %cst_29 = arith.constant 1.000000e+00 : f32
    %35 = vector.broadcast %cst_29 : f32 to vector<8x128xf32>
    %36 = arith.addf %35, %34 : vector<8x128xf32>
    %37 = arith.divf %35, %36 : vector<8x128xf32>
    %38 = vector.extract_strided_slice %25 {offsets = [0, 256], sizes = [8, 128], strides = [1, 1]} : vector<8x512xf32> to vector<8x128xf32>
    %39 = math.tanh %38 : vector<8x128xf32>
    %40 = vector.extract_strided_slice %25 {offsets = [0, 384], sizes = [8, 128], strides = [1, 1]} : vector<8x512xf32> to vector<8x128xf32>
    %41 = arith.negf %40 : vector<8x128xf32>
    %42 = math.exp %41 : vector<8x128xf32>
    %cst_30 = arith.constant 1.000000e+00 : f32
    %43 = vector.broadcast %cst_30 : f32 to vector<8x128xf32>
    %44 = arith.addf %43, %42 : vector<8x128xf32>
    %45 = arith.divf %43, %44 : vector<8x128xf32>
    %46 = arith.mulf %37, %18 : vector<8x128xf32>
    %47 = arith.mulf %31, %39 : vector<8x128xf32>
    %48 = arith.addf %46, %47 : vector<8x128xf32>
    %49 = math.tanh %48 : vector<8x128xf32>
    %50 = arith.mulf %45, %49 : vector<8x128xf32>
    %cst_31 = arith.constant dense<0.000000e+00> : vector<8x512xf32>
    %51 = tpu.matmul %50, %12, %cst_31 {dimension_numbers = #tpu.dot_dimension_numbers<[1], [0], [0], [1], [0, 0, 1, 1], [], []>} : vector<8x128xf32>, vector<128x512xf32>, vector<8x512xf32> -> vector<8x512xf32>
    %cst_32 = arith.constant dense<0.000000e+00> : vector<8x512xf32>
    %52 = tpu.matmul %19, %13, %cst_32 {dimension_numbers = #tpu.dot_dimension_numbers<[1], [0], [0], [1], [0, 0, 1, 1], [], []>} : vector<8x128xf32>, vector<128x512xf32>, vector<8x512xf32> -> vector<8x512xf32>
    %53 = arith.addf %51, %52 : vector<8x512xf32>
    %54 = arith.addf %53, %16 : vector<8x512xf32>
    %55 = vector.extract_strided_slice %54 {offsets = [0, 0], sizes = [8, 128], strides = [1, 1]} : vector<8x512xf32> to vector<8x128xf32>
    %56 = arith.negf %55 : vector<8x128xf32>
    %57 = math.exp %56 : vector<8x128xf32>
    %cst_33 = arith.constant 1.000000e+00 : f32
    %58 = vector.broadcast %cst_33 : f32 to vector<8x128xf32>
    %59 = arith.addf %58, %57 : vector<8x128xf32>
    %60 = arith.divf %58, %59 : vector<8x128xf32>
    %61 = vector.extract_strided_slice %54 {offsets = [0, 128], sizes = [8, 128], strides = [1, 1]} : vector<8x512xf32> to vector<8x128xf32>
    %62 = arith.negf %61 : vector<8x128xf32>
    %63 = math.exp %62 : vector<8x128xf32>
    %cst_34 = arith.constant 1.000000e+00 : f32
    %64 = vector.broadcast %cst_34 : f32 to vector<8x128xf32>
    %65 = arith.addf %64, %63 : vector<8x128xf32>
    %66 = arith.divf %64, %65 : vector<8x128xf32>
    %67 = vector.extract_strided_slice %54 {offsets = [0, 256], sizes = [8, 128], strides = [1, 1]} : vector<8x512xf32> to vector<8x128xf32>
    %68 = math.tanh %67 : vector<8x128xf32>
    %69 = vector.extract_strided_slice %54 {offsets = [0, 384], sizes = [8, 128], strides = [1, 1]} : vector<8x512xf32> to vector<8x128xf32>
    %70 = arith.negf %69 : vector<8x128xf32>
    %71 = math.exp %70 : vector<8x128xf32>
    %cst_35 = arith.constant 1.000000e+00 : f32
    %72 = vector.broadcast %cst_35 : f32 to vector<8x128xf32>
    %73 = arith.addf %72, %71 : vector<8x128xf32>
    %74 = arith.divf %72, %73 : vector<8x128xf32>
    %75 = arith.mulf %66, %20 : vector<8x128xf32>
    %76 = arith.mulf %60, %68 : vector<8x128xf32>
    %77 = arith.addf %75, %76 : vector<8x128xf32>
    %78 = math.tanh %77 : vector<8x128xf32>
    %79 = arith.mulf %74, %78 : vector<8x128xf32>
    %80 = arith.index_cast %21 : i32 to index
    %c0_36 = arith.constant 0 : index
    %81 = vector.load %arg15[%80, %c0_36] : memref<64x128xf32, #tpu.memory_space<vmem>>, vector<8x128xf32>
    tpu.vector_store %arg15[%80, %c0_36], %79 {strides = array<i32>} : memref<64x128xf32, #tpu.memory_space<vmem>>, vector<8x128xf32>,
    %c1_i32 = arith.constant 1 : i32
    %c8_i32_37 = arith.constant 8 : i32
    %82 = arith.muli %c1_i32, %c8_i32_37 : i32
    %83 = arith.index_cast %82 : i32 to index
    %c0_38 = arith.constant 0 : index
    %84 = vector.load %arg14[%83, %c0_38] : memref<64x512xf32, #tpu.memory_space<vmem>>, vector<8x512xf32>
    %cst_39 = arith.constant dense<0.000000e+00> : vector<8x512xf32>
    %85 = tpu.matmul %50, %11, %cst_39 {dimension_numbers = #tpu.dot_dimension_numbers<[1], [0], [0], [1], [0, 0, 1, 1], [], []>} : vector<8x128xf32>, vector<128x512xf32>, vector<8x512xf32> -> vector<8x512xf32>
    %86 = arith.addf %84, %85 : vector<8x512xf32>
    %87 = vector.extract_strided_slice %86 {offsets = [0, 0], sizes = [8, 128], strides = [1, 1]} : vector<8x512xf32> to vector<8x128xf32>
    %88 = arith.negf %87 : vector<8x128xf32>
    %89 = math.exp %88 : vector<8x128xf32>
    %cst_40 = arith.constant 1.000000e+00 : f32
    %90 = vector.broadcast %cst_40 : f32 to vector<8x128xf32>
    %91 = arith.addf %90, %89 : vector<8x128xf32>
    %92 = arith.divf %90, %91 : vector<8x128xf32>
    %93 = vector.extract_strided_slice %86 {offsets = [0, 128], sizes = [8, 128], strides = [1, 1]} : vector<8x512xf32> to vector<8x128xf32>
    %94 = arith.negf %93 : vector<8x128xf32>
    %95 = math.exp %94 : vector<8x128xf32>
    %cst_41 = arith.constant 1.000000e+00 : f32
    %96 = vector.broadcast %cst_41 : f32 to vector<8x128xf32>
    %97 = arith.addf %96, %95 : vector<8x128xf32>
    %98 = arith.divf %96, %97 : vector<8x128xf32>
    %99 = vector.extract_strided_slice %86 {offsets = [0, 256], sizes = [8, 128], strides = [1, 1]} : vector<8x512xf32> to vector<8x128xf32>
    %100 = math.tanh %99 : vector<8x128xf32>
    %101 = vector.extract_strided_slice %86 {offsets = [0, 384], sizes = [8, 128], strides = [1, 1]} : vector<8x512xf32> to vector<8x128xf32>
    %102 = arith.negf %101 : vector<8x128xf32>
    %103 = math.exp %102 : vector<8x128xf32>
    %cst_42 = arith.constant 1.000000e+00 : f32
    %104 = vector.broadcast %cst_42 : f32 to vector<8x128xf32>
    %105 = arith.addf %104, %103 : vector<8x128xf32>
    %106 = arith.divf %104, %105 : vector<8x128xf32>
    %107 = arith.mulf %98, %48 : vector<8x128xf32>
    %108 = arith.mulf %92, %100 : vector<8x128xf32>
    %109 = arith.addf %107, %108 : vector<8x128xf32>
    %110 = math.tanh %109 : vector<8x128xf32>
    %111 = arith.mulf %106, %110 : vector<8x128xf32>
    %cst_43 = arith.constant dense<0.000000e+00> : vector<8x512xf32>
    %112 = tpu.matmul %111, %12, %cst_43 {dimension_numbers = #tpu.dot_dimension_numbers<[1], [0], [0], [1], [0, 0, 1, 1], [], []>} : vector<8x128xf32>, vector<128x512xf32>, vector<8x512xf32> -> vector<8x512xf32>
    %cst_44 = arith.constant dense<0.000000e+00> : vector<8x512xf32>
    %113 = tpu.matmul %79, %13, %cst_44 {dimension_numbers = #tpu.dot_dimension_numbers<[1], [0], [0], [1], [0, 0, 1, 1], [], []>} : vector<8x128xf32>, vector<128x512xf32>, vector<8x512xf32> -> vector<8x512xf32>
    %114 = arith.addf %112, %113 : vector<8x512xf32>
    %115 = arith.addf %114, %16 : vector<8x512xf32>
    %116 = vector.extract_strided_slice %115 {offsets = [0, 0], sizes = [8, 128], strides = [1, 1]} : vector<8x512xf32> to vector<8x128xf32>
    %117 = arith.negf %116 : vector<8x128xf32>
    %118 = math.exp %117 : vector<8x128xf32>
    %cst_45 = arith.constant 1.000000e+00 : f32
    %119 = vector.broadcast %cst_45 : f32 to vector<8x128xf32>
    %120 = arith.addf %119, %118 : vector<8x128xf32>
    %121 = arith.divf %119, %120 : vector<8x128xf32>
    %122 = vector.extract_strided_slice %115 {offsets = [0, 128], sizes = [8, 128], strides = [1, 1]} : vector<8x512xf32> to vector<8x128xf32>
    %123 = arith.negf %122 : vector<8x128xf32>
    %124 = math.exp %123 : vector<8x128xf32>
    %cst_46 = arith.constant 1.000000e+00 : f32
    %125 = vector.broadcast %cst_46 : f32 to vector<8x128xf32>
    %126 = arith.addf %125, %124 : vector<8x128xf32>
    %127 = arith.divf %125, %126 : vector<8x128xf32>
    %128 = vector.extract_strided_slice %115 {offsets = [0, 256], sizes = [8, 128], strides = [1, 1]} : vector<8x512xf32> to vector<8x128xf32>
    %129 = math.tanh %128 : vector<8x128xf32>
    %130 = vector.extract_strided_slice %115 {offsets = [0, 384], sizes = [8, 128], strides = [1, 1]} : vector<8x512xf32> to vector<8x128xf32>
    %131 = arith.negf %130 : vector<8x128xf32>
    %132 = math.exp %131 : vector<8x128xf32>
    %cst_47 = arith.constant 1.000000e+00 : f32
    %133 = vector.broadcast %cst_47 : f32 to vector<8x128xf32>
    %134 = arith.addf %133, %132 : vector<8x128xf32>
    %135 = arith.divf %133, %134 : vector<8x128xf32>
    %136 = arith.mulf %127, %77 : vector<8x128xf32>
    %137 = arith.mulf %121, %129 : vector<8x128xf32>
    %138 = arith.addf %136, %137 : vector<8x128xf32>
    %139 = math.tanh %138 : vector<8x128xf32>
    %140 = arith.mulf %135, %139 : vector<8x128xf32>
    %141 = arith.index_cast %82 : i32 to index
    %c0_48 = arith.constant 0 : index
    %142 = vector.load %arg15[%141, %c0_48] : memref<64x128xf32, #tpu.memory_space<vmem>>, vector<8x128xf32>
    tpu.vector_store %arg15[%141, %c0_48], %140 {strides = array<i32>} : memref<64x128xf32, #tpu.memory_space<vmem>>, vector<8x128xf32>,
    %c2_i32 = arith.constant 2 : i32
    %c8_i32_49 = arith.constant 8 : i32
    %143 = arith.muli %c2_i32, %c8_i32_49 : i32
    %144 = arith.index_cast %143 : i32 to index
    %c0_50 = arith.constant 0 : index
    %145 = vector.load %arg14[%144, %c0_50] : memref<64x512xf32, #tpu.memory_space<vmem>>, vector<8x512xf32>
    %cst_51 = arith.constant dense<0.000000e+00> : vector<8x512xf32>
    %146 = tpu.matmul %111, %11, %cst_51 {dimension_numbers = #tpu.dot_dimension_numbers<[1], [0], [0], [1], [0, 0, 1, 1], [], []>} : vector<8x128xf32>, vector<128x512xf32>, vector<8x512xf32> -> vector<8x512xf32>
    %147 = arith.addf %145, %146 : vector<8x512xf32>
    %148 = vector.extract_strided_slice %147 {offsets = [0, 0], sizes = [8, 128], strides = [1, 1]} : vector<8x512xf32> to vector<8x128xf32>
    %149 = arith.negf %148 : vector<8x128xf32>
    %150 = math.exp %149 : vector<8x128xf32>
    %cst_52 = arith.constant 1.000000e+00 : f32
    %151 = vector.broadcast %cst_52 : f32 to vector<8x128xf32>
    %152 = arith.addf %151, %150 : vector<8x128xf32>
    %153 = arith.divf %151, %152 : vector<8x128xf32>
    %154 = vector.extract_strided_slice %147 {offsets = [0, 128], sizes = [8, 128], strides = [1, 1]} : vector<8x512xf32> to vector<8x128xf32>
    %155 = arith.negf %154 : vector<8x128xf32>
    %156 = math.exp %155 : vector<8x128xf32>
    %cst_53 = arith.constant 1.000000e+00 : f32
    %157 = vector.broadcast %cst_53 : f32 to vector<8x128xf32>
    %158 = arith.addf %157, %156 : vector<8x128xf32>
    %159 = arith.divf %157, %158 : vector<8x128xf32>
    %160 = vector.extract_strided_slice %147 {offsets = [0, 256], sizes = [8, 128], strides = [1, 1]} : vector<8x512xf32> to vector<8x128xf32>
    %161 = math.tanh %160 : vector<8x128xf32>
    %162 = vector.extract_strided_slice %147 {offsets = [0, 384], sizes = [8, 128], strides = [1, 1]} : vector<8x512xf32> to vector<8x128xf32>
    %163 = arith.negf %162 : vector<8x128xf32>
    %164 = math.exp %163 : vector<8x128xf32>
    %cst_54 = arith.constant 1.000000e+00 : f32
    %165 = vector.broadcast %cst_54 : f32 to vector<8x128xf32>
    %166 = arith.addf %165, %164 : vector<8x128xf32>
    %167 = arith.divf %165, %166 : vector<8x128xf32>
    %168 = arith.mulf %159, %109 : vector<8x128xf32>
    %169 = arith.mulf %153, %161 : vector<8x128xf32>
    %170 = arith.addf %168, %169 : vector<8x128xf32>
    %171 = math.tanh %170 : vector<8x128xf32>
    %172 = arith.mulf %167, %171 : vector<8x128xf32>
    %cst_55 = arith.constant dense<0.000000e+00> : vector<8x512xf32>
    %173 = tpu.matmul %172, %12, %cst_55 {dimension_numbers = #tpu.dot_dimension_numbers<[1], [0], [0], [1], [0, 0, 1, 1], [], []>} : vector<8x128xf32>, vector<128x512xf32>, vector<8x512xf32> -> vector<8x512xf32>
    %cst_56 = arith.constant dense<0.000000e+00> : vector<8x512xf32>
    %174 = tpu.matmul %140, %13, %cst_56 {dimension_numbers = #tpu.dot_dimension_numbers<[1], [0], [0], [1], [0, 0, 1, 1], [], []>} : vector<8x128xf32>, vector<128x512xf32>, vector<8x512xf32> -> vector<8x512xf32>
    %175 = arith.addf %173, %174 : vector<8x512xf32>
    %176 = arith.addf %175, %16 : vector<8x512xf32>
    %177 = vector.extract_strided_slice %176 {offsets = [0, 0], sizes = [8, 128], strides = [1, 1]} : vector<8x512xf32> to vector<8x128xf32>
    %178 = arith.negf %177 : vector<8x128xf32>
    %179 = math.exp %178 : vector<8x128xf32>
    %cst_57 = arith.constant 1.000000e+00 : f32
    %180 = vector.broadcast %cst_57 : f32 to vector<8x128xf32>
    %181 = arith.addf %180, %179 : vector<8x128xf32>
    %182 = arith.divf %180, %181 : vector<8x128xf32>
    %183 = vector.extract_strided_slice %176 {offsets = [0, 128], sizes = [8, 128], strides = [1, 1]} : vector<8x512xf32> to vector<8x128xf32>
    %184 = arith.negf %183 : vector<8x128xf32>
    %185 = math.exp %184 : vector<8x128xf32>
    %cst_58 = arith.constant 1.000000e+00 : f32
    %186 = vector.broadcast %cst_58 : f32 to vector<8x128xf32>
    %187 = arith.addf %186, %185 : vector<8x128xf32>
    %188 = arith.divf %186, %187 : vector<8x128xf32>
    %189 = vector.extract_strided_slice %176 {offsets = [0, 256], sizes = [8, 128], strides = [1, 1]} : vector<8x512xf32> to vector<8x128xf32>
    %190 = math.tanh %189 : vector<8x128xf32>
    %191 = vector.extract_strided_slice %176 {offsets = [0, 384], sizes = [8, 128], strides = [1, 1]} : vector<8x512xf32> to vector<8x128xf32>
    %192 = arith.negf %191 : vector<8x128xf32>
    %193 = math.exp %192 : vector<8x128xf32>
    %cst_59 = arith.constant 1.000000e+00 : f32
    %194 = vector.broadcast %cst_59 : f32 to vector<8x128xf32>
    %195 = arith.addf %194, %193 : vector<8x128xf32>
    %196 = arith.divf %194, %195 : vector<8x128xf32>
    %197 = arith.mulf %188, %138 : vector<8x128xf32>
    %198 = arith.mulf %182, %190 : vector<8x128xf32>
    %199 = arith.addf %197, %198 : vector<8x128xf32>
    %200 = math.tanh %199 : vector<8x128xf32>
    %201 = arith.mulf %196, %200 : vector<8x128xf32>
    %202 = arith.index_cast %143 : i32 to index
    %c0_60 = arith.constant 0 : index
    %203 = vector.load %arg15[%202, %c0_60] : memref<64x128xf32, #tpu.memory_space<vmem>>, vector<8x128xf32>
    tpu.vector_store %arg15[%202, %c0_60], %201 {strides = array<i32>} : memref<64x128xf32, #tpu.memory_space<vmem>>, vector<8x128xf32>,
    %c3_i32 = arith.constant 3 : i32
    %c8_i32_61 = arith.constant 8 : i32
    %204 = arith.muli %c3_i32, %c8_i32_61 : i32
    %205 = arith.index_cast %204 : i32 to index
    %c0_62 = arith.constant 0 : index
    %206 = vector.load %arg14[%205, %c0_62] : memref<64x512xf32, #tpu.memory_space<vmem>>, vector<8x512xf32>
    %cst_63 = arith.constant dense<0.000000e+00> : vector<8x512xf32>
    %207 = tpu.matmul %172, %11, %cst_63 {dimension_numbers = #tpu.dot_dimension_numbers<[1], [0], [0], [1], [0, 0, 1, 1], [], []>} : vector<8x128xf32>, vector<128x512xf32>, vector<8x512xf32> -> vector<8x512xf32>
    %208 = arith.addf %206, %207 : vector<8x512xf32>
    %209 = vector.extract_strided_slice %208 {offsets = [0, 0], sizes = [8, 128], strides = [1, 1]} : vector<8x512xf32> to vector<8x128xf32>
    %210 = arith.negf %209 : vector<8x128xf32>
    %211 = math.exp %210 : vector<8x128xf32>
    %cst_64 = arith.constant 1.000000e+00 : f32
    %212 = vector.broadcast %cst_64 : f32 to vector<8x128xf32>
    %213 = arith.addf %212, %211 : vector<8x128xf32>
    %214 = arith.divf %212, %213 : vector<8x128xf32>
    %215 = vector.extract_strided_slice %208 {offsets = [0, 128], sizes = [8, 128], strides = [1, 1]} : vector<8x512xf32> to vector<8x128xf32>
    %216 = arith.negf %215 : vector<8x128xf32>
    %217 = math.exp %216 : vector<8x128xf32>
    %cst_65 = arith.constant 1.000000e+00 : f32
    %218 = vector.broadcast %cst_65 : f32 to vector<8x128xf32>
    %219 = arith.addf %218, %217 : vector<8x128xf32>
    %220 = arith.divf %218, %219 : vector<8x128xf32>
    %221 = vector.extract_strided_slice %208 {offsets = [0, 256], sizes = [8, 128], strides = [1, 1]} : vector<8x512xf32> to vector<8x128xf32>
    %222 = math.tanh %221 : vector<8x128xf32>
    %223 = vector.extract_strided_slice %208 {offsets = [0, 384], sizes = [8, 128], strides = [1, 1]} : vector<8x512xf32> to vector<8x128xf32>
    %224 = arith.negf %223 : vector<8x128xf32>
    %225 = math.exp %224 : vector<8x128xf32>
    %cst_66 = arith.constant 1.000000e+00 : f32
    %226 = vector.broadcast %cst_66 : f32 to vector<8x128xf32>
    %227 = arith.addf %226, %225 : vector<8x128xf32>
    %228 = arith.divf %226, %227 : vector<8x128xf32>
    %229 = arith.mulf %220, %170 : vector<8x128xf32>
    %230 = arith.mulf %214, %222 : vector<8x128xf32>
    %231 = arith.addf %229, %230 : vector<8x128xf32>
    %232 = math.tanh %231 : vector<8x128xf32>
    %233 = arith.mulf %228, %232 : vector<8x128xf32>
    %cst_67 = arith.constant dense<0.000000e+00> : vector<8x512xf32>
    %234 = tpu.matmul %233, %12, %cst_67 {dimension_numbers = #tpu.dot_dimension_numbers<[1], [0], [0], [1], [0, 0, 1, 1], [], []>} : vector<8x128xf32>, vector<128x512xf32>, vector<8x512xf32> -> vector<8x512xf32>
    %cst_68 = arith.constant dense<0.000000e+00> : vector<8x512xf32>
    %235 = tpu.matmul %201, %13, %cst_68 {dimension_numbers = #tpu.dot_dimension_numbers<[1], [0], [0], [1], [0, 0, 1, 1], [], []>} : vector<8x128xf32>, vector<128x512xf32>, vector<8x512xf32> -> vector<8x512xf32>
    %236 = arith.addf %234, %235 : vector<8x512xf32>
    %237 = arith.addf %236, %16 : vector<8x512xf32>
    %238 = vector.extract_strided_slice %237 {offsets = [0, 0], sizes = [8, 128], strides = [1, 1]} : vector<8x512xf32> to vector<8x128xf32>
    %239 = arith.negf %238 : vector<8x128xf32>
    %240 = math.exp %239 : vector<8x128xf32>
    %cst_69 = arith.constant 1.000000e+00 : f32
    %241 = vector.broadcast %cst_69 : f32 to vector<8x128xf32>
    %242 = arith.addf %241, %240 : vector<8x128xf32>
    %243 = arith.divf %241, %242 : vector<8x128xf32>
    %244 = vector.extract_strided_slice %237 {offsets = [0, 128], sizes = [8, 128], strides = [1, 1]} : vector<8x512xf32> to vector<8x128xf32>
    %245 = arith.negf %244 : vector<8x128xf32>
    %246 = math.exp %245 : vector<8x128xf32>
    %cst_70 = arith.constant 1.000000e+00 : f32
    %247 = vector.broadcast %cst_70 : f32 to vector<8x128xf32>
    %248 = arith.addf %247, %246 : vector<8x128xf32>
    %249 = arith.divf %247, %248 : vector<8x128xf32>
    %250 = vector.extract_strided_slice %237 {offsets = [0, 256], sizes = [8, 128], strides = [1, 1]} : vector<8x512xf32> to vector<8x128xf32>
    %251 = math.tanh %250 : vector<8x128xf32>
    %252 = vector.extract_strided_slice %237 {offsets = [0, 384], sizes = [8, 128], strides = [1, 1]} : vector<8x512xf32> to vector<8x128xf32>
    %253 = arith.negf %252 : vector<8x128xf32>
    %254 = math.exp %253 : vector<8x128xf32>
    %cst_71 = arith.constant 1.000000e+00 : f32
    %255 = vector.broadcast %cst_71 : f32 to vector<8x128xf32>
    %256 = arith.addf %255, %254 : vector<8x128xf32>
    %257 = arith.divf %255, %256 : vector<8x128xf32>
    %258 = arith.mulf %249, %199 : vector<8x128xf32>
    %259 = arith.mulf %243, %251 : vector<8x128xf32>
    %260 = arith.addf %258, %259 : vector<8x128xf32>
    %261 = math.tanh %260 : vector<8x128xf32>
    %262 = arith.mulf %257, %261 : vector<8x128xf32>
    %263 = arith.index_cast %204 : i32 to index
    %c0_72 = arith.constant 0 : index
    %264 = vector.load %arg15[%263, %c0_72] : memref<64x128xf32, #tpu.memory_space<vmem>>, vector<8x128xf32>
    tpu.vector_store %arg15[%263, %c0_72], %262 {strides = array<i32>} : memref<64x128xf32, #tpu.memory_space<vmem>>, vector<8x128xf32>,
    %c4_i32 = arith.constant 4 : i32
    %c8_i32_73 = arith.constant 8 : i32
    %265 = arith.muli %c4_i32, %c8_i32_73 : i32
    %266 = arith.index_cast %265 : i32 to index
    %c0_74 = arith.constant 0 : index
    %267 = vector.load %arg14[%266, %c0_74] : memref<64x512xf32, #tpu.memory_space<vmem>>, vector<8x512xf32>
    %cst_75 = arith.constant dense<0.000000e+00> : vector<8x512xf32>
    %268 = tpu.matmul %233, %11, %cst_75 {dimension_numbers = #tpu.dot_dimension_numbers<[1], [0], [0], [1], [0, 0, 1, 1], [], []>} : vector<8x128xf32>, vector<128x512xf32>, vector<8x512xf32> -> vector<8x512xf32>
    %269 = arith.addf %267, %268 : vector<8x512xf32>
    %270 = vector.extract_strided_slice %269 {offsets = [0, 0], sizes = [8, 128], strides = [1, 1]} : vector<8x512xf32> to vector<8x128xf32>
    %271 = arith.negf %270 : vector<8x128xf32>
    %272 = math.exp %271 : vector<8x128xf32>
    %cst_76 = arith.constant 1.000000e+00 : f32
    %273 = vector.broadcast %cst_76 : f32 to vector<8x128xf32>
    %274 = arith.addf %273, %272 : vector<8x128xf32>
    %275 = arith.divf %273, %274 : vector<8x128xf32>
    %276 = vector.extract_strided_slice %269 {offsets = [0, 128], sizes = [8, 128], strides = [1, 1]} : vector<8x512xf32> to vector<8x128xf32>
    %277 = arith.negf %276 : vector<8x128xf32>
    %278 = math.exp %277 : vector<8x128xf32>
    %cst_77 = arith.constant 1.000000e+00 : f32
    %279 = vector.broadcast %cst_77 : f32 to vector<8x128xf32>
    %280 = arith.addf %279, %278 : vector<8x128xf32>
    %281 = arith.divf %279, %280 : vector<8x128xf32>
    %282 = vector.extract_strided_slice %269 {offsets = [0, 256], sizes = [8, 128], strides = [1, 1]} : vector<8x512xf32> to vector<8x128xf32>
    %283 = math.tanh %282 : vector<8x128xf32>
    %284 = vector.extract_strided_slice %269 {offsets = [0, 384], sizes = [8, 128], strides = [1, 1]} : vector<8x512xf32> to vector<8x128xf32>
    %285 = arith.negf %284 : vector<8x128xf32>
    %286 = math.exp %285 : vector<8x128xf32>
    %cst_78 = arith.constant 1.000000e+00 : f32
    %287 = vector.broadcast %cst_78 : f32 to vector<8x128xf32>
    %288 = arith.addf %287, %286 : vector<8x128xf32>
    %289 = arith.divf %287, %288 : vector<8x128xf32>
    %290 = arith.mulf %281, %231 : vector<8x128xf32>
    %291 = arith.mulf %275, %283 : vector<8x128xf32>
    %292 = arith.addf %290, %291 : vector<8x128xf32>
    %293 = math.tanh %292 : vector<8x128xf32>
    %294 = arith.mulf %289, %293 : vector<8x128xf32>
    %cst_79 = arith.constant dense<0.000000e+00> : vector<8x512xf32>
    %295 = tpu.matmul %294, %12, %cst_79 {dimension_numbers = #tpu.dot_dimension_numbers<[1], [0], [0], [1], [0, 0, 1, 1], [], []>} : vector<8x128xf32>, vector<128x512xf32>, vector<8x512xf32> -> vector<8x512xf32>
    %cst_80 = arith.constant dense<0.000000e+00> : vector<8x512xf32>
    %296 = tpu.matmul %262, %13, %cst_80 {dimension_numbers = #tpu.dot_dimension_numbers<[1], [0], [0], [1], [0, 0, 1, 1], [], []>} : vector<8x128xf32>, vector<128x512xf32>, vector<8x512xf32> -> vector<8x512xf32>
    %297 = arith.addf %295, %296 : vector<8x512xf32>
    %298 = arith.addf %297, %16 : vector<8x512xf32>
    %299 = vector.extract_strided_slice %298 {offsets = [0, 0], sizes = [8, 128], strides = [1, 1]} : vector<8x512xf32> to vector<8x128xf32>
    %300 = arith.negf %299 : vector<8x128xf32>
    %301 = math.exp %300 : vector<8x128xf32>
    %cst_81 = arith.constant 1.000000e+00 : f32
    %302 = vector.broadcast %cst_81 : f32 to vector<8x128xf32>
    %303 = arith.addf %302, %301 : vector<8x128xf32>
    %304 = arith.divf %302, %303 : vector<8x128xf32>
    %305 = vector.extract_strided_slice %298 {offsets = [0, 128], sizes = [8, 128], strides = [1, 1]} : vector<8x512xf32> to vector<8x128xf32>
    %306 = arith.negf %305 : vector<8x128xf32>
    %307 = math.exp %306 : vector<8x128xf32>
    %cst_82 = arith.constant 1.000000e+00 : f32
    %308 = vector.broadcast %cst_82 : f32 to vector<8x128xf32>
    %309 = arith.addf %308, %307 : vector<8x128xf32>
    %310 = arith.divf %308, %309 : vector<8x128xf32>
    %311 = vector.extract_strided_slice %298 {offsets = [0, 256], sizes = [8, 128], strides = [1, 1]} : vector<8x512xf32> to vector<8x128xf32>
    %312 = math.tanh %311 : vector<8x128xf32>
    %313 = vector.extract_strided_slice %298 {offsets = [0, 384], sizes = [8, 128], strides = [1, 1]} : vector<8x512xf32> to vector<8x128xf32>
    %314 = arith.negf %313 : vector<8x128xf32>
    %315 = math.exp %314 : vector<8x128xf32>
    %cst_83 = arith.constant 1.000000e+00 : f32
    %316 = vector.broadcast %cst_83 : f32 to vector<8x128xf32>
    %317 = arith.addf %316, %315 : vector<8x128xf32>
    %318 = arith.divf %316, %317 : vector<8x128xf32>
    %319 = arith.mulf %310, %260 : vector<8x128xf32>
    %320 = arith.mulf %304, %312 : vector<8x128xf32>
    %321 = arith.addf %319, %320 : vector<8x128xf32>
    %322 = math.tanh %321 : vector<8x128xf32>
    %323 = arith.mulf %318, %322 : vector<8x128xf32>
    %324 = arith.index_cast %265 : i32 to index
    %c0_84 = arith.constant 0 : index
    %325 = vector.load %arg15[%324, %c0_84] : memref<64x128xf32, #tpu.memory_space<vmem>>, vector<8x128xf32>
    tpu.vector_store %arg15[%324, %c0_84], %323 {strides = array<i32>} : memref<64x128xf32, #tpu.memory_space<vmem>>, vector<8x128xf32>,
    %c5_i32 = arith.constant 5 : i32
    %c8_i32_85 = arith.constant 8 : i32
    %326 = arith.muli %c5_i32, %c8_i32_85 : i32
    %327 = arith.index_cast %326 : i32 to index
    %c0_86 = arith.constant 0 : index
    %328 = vector.load %arg14[%327, %c0_86] : memref<64x512xf32, #tpu.memory_space<vmem>>, vector<8x512xf32>
    %cst_87 = arith.constant dense<0.000000e+00> : vector<8x512xf32>
    %329 = tpu.matmul %294, %11, %cst_87 {dimension_numbers = #tpu.dot_dimension_numbers<[1], [0], [0], [1], [0, 0, 1, 1], [], []>} : vector<8x128xf32>, vector<128x512xf32>, vector<8x512xf32> -> vector<8x512xf32>
    %330 = arith.addf %328, %329 : vector<8x512xf32>
    %331 = vector.extract_strided_slice %330 {offsets = [0, 0], sizes = [8, 128], strides = [1, 1]} : vector<8x512xf32> to vector<8x128xf32>
    %332 = arith.negf %331 : vector<8x128xf32>
    %333 = math.exp %332 : vector<8x128xf32>
    %cst_88 = arith.constant 1.000000e+00 : f32
    %334 = vector.broadcast %cst_88 : f32 to vector<8x128xf32>
    %335 = arith.addf %334, %333 : vector<8x128xf32>
    %336 = arith.divf %334, %335 : vector<8x128xf32>
    %337 = vector.extract_strided_slice %330 {offsets = [0, 128], sizes = [8, 128], strides = [1, 1]} : vector<8x512xf32> to vector<8x128xf32>
    %338 = arith.negf %337 : vector<8x128xf32>
    %339 = math.exp %338 : vector<8x128xf32>
    %cst_89 = arith.constant 1.000000e+00 : f32
    %340 = vector.broadcast %cst_89 : f32 to vector<8x128xf32>
    %341 = arith.addf %340, %339 : vector<8x128xf32>
    %342 = arith.divf %340, %341 : vector<8x128xf32>
    %343 = vector.extract_strided_slice %330 {offsets = [0, 256], sizes = [8, 128], strides = [1, 1]} : vector<8x512xf32> to vector<8x128xf32>
    %344 = math.tanh %343 : vector<8x128xf32>
    %345 = vector.extract_strided_slice %330 {offsets = [0, 384], sizes = [8, 128], strides = [1, 1]} : vector<8x512xf32> to vector<8x128xf32>
    %346 = arith.negf %345 : vector<8x128xf32>
    %347 = math.exp %346 : vector<8x128xf32>
    %cst_90 = arith.constant 1.000000e+00 : f32
    %348 = vector.broadcast %cst_90 : f32 to vector<8x128xf32>
    %349 = arith.addf %348, %347 : vector<8x128xf32>
    %350 = arith.divf %348, %349 : vector<8x128xf32>
    %351 = arith.mulf %342, %292 : vector<8x128xf32>
    %352 = arith.mulf %336, %344 : vector<8x128xf32>
    %353 = arith.addf %351, %352 : vector<8x128xf32>
    %354 = math.tanh %353 : vector<8x128xf32>
    %355 = arith.mulf %350, %354 : vector<8x128xf32>
    %cst_91 = arith.constant dense<0.000000e+00> : vector<8x512xf32>
    %356 = tpu.matmul %355, %12, %cst_91 {dimension_numbers = #tpu.dot_dimension_numbers<[1], [0], [0], [1], [0, 0, 1, 1], [], []>} : vector<8x128xf32>, vector<128x512xf32>, vector<8x512xf32> -> vector<8x512xf32>
    %cst_92 = arith.constant dense<0.000000e+00> : vector<8x512xf32>
    %357 = tpu.matmul %323, %13, %cst_92 {dimension_numbers = #tpu.dot_dimension_numbers<[1], [0], [0], [1], [0, 0, 1, 1], [], []>} : vector<8x128xf32>, vector<128x512xf32>, vector<8x512xf32> -> vector<8x512xf32>
    %358 = arith.addf %356, %357 : vector<8x512xf32>
    %359 = arith.addf %358, %16 : vector<8x512xf32>
    %360 = vector.extract_strided_slice %359 {offsets = [0, 0], sizes = [8, 128], strides = [1, 1]} : vector<8x512xf32> to vector<8x128xf32>
    %361 = arith.negf %360 : vector<8x128xf32>
    %362 = math.exp %361 : vector<8x128xf32>
    %cst_93 = arith.constant 1.000000e+00 : f32
    %363 = vector.broadcast %cst_93 : f32 to vector<8x128xf32>
    %364 = arith.addf %363, %362 : vector<8x128xf32>
    %365 = arith.divf %363, %364 : vector<8x128xf32>
    %366 = vector.extract_strided_slice %359 {offsets = [0, 128], sizes = [8, 128], strides = [1, 1]} : vector<8x512xf32> to vector<8x128xf32>
    %367 = arith.negf %366 : vector<8x128xf32>
    %368 = math.exp %367 : vector<8x128xf32>
    %cst_94 = arith.constant 1.000000e+00 : f32
    %369 = vector.broadcast %cst_94 : f32 to vector<8x128xf32>
    %370 = arith.addf %369, %368 : vector<8x128xf32>
    %371 = arith.divf %369, %370 : vector<8x128xf32>
    %372 = vector.extract_strided_slice %359 {offsets = [0, 256], sizes = [8, 128], strides = [1, 1]} : vector<8x512xf32> to vector<8x128xf32>
    %373 = math.tanh %372 : vector<8x128xf32>
    %374 = vector.extract_strided_slice %359 {offsets = [0, 384], sizes = [8, 128], strides = [1, 1]} : vector<8x512xf32> to vector<8x128xf32>
    %375 = arith.negf %374 : vector<8x128xf32>
    %376 = math.exp %375 : vector<8x128xf32>
    %cst_95 = arith.constant 1.000000e+00 : f32
    %377 = vector.broadcast %cst_95 : f32 to vector<8x128xf32>
    %378 = arith.addf %377, %376 : vector<8x128xf32>
    %379 = arith.divf %377, %378 : vector<8x128xf32>
    %380 = arith.mulf %371, %321 : vector<8x128xf32>
    %381 = arith.mulf %365, %373 : vector<8x128xf32>
    %382 = arith.addf %380, %381 : vector<8x128xf32>
    %383 = math.tanh %382 : vector<8x128xf32>
    %384 = arith.mulf %379, %383 : vector<8x128xf32>
    %385 = arith.index_cast %326 : i32 to index
    %c0_96 = arith.constant 0 : index
    %386 = vector.load %arg15[%385, %c0_96] : memref<64x128xf32, #tpu.memory_space<vmem>>, vector<8x128xf32>
    tpu.vector_store %arg15[%385, %c0_96], %384 {strides = array<i32>} : memref<64x128xf32, #tpu.memory_space<vmem>>, vector<8x128xf32>,
    %c6_i32 = arith.constant 6 : i32
    %c8_i32_97 = arith.constant 8 : i32
    %387 = arith.muli %c6_i32, %c8_i32_97 : i32
    %388 = arith.index_cast %387 : i32 to index
    %c0_98 = arith.constant 0 : index
    %389 = vector.load %arg14[%388, %c0_98] : memref<64x512xf32, #tpu.memory_space<vmem>>, vector<8x512xf32>
    %cst_99 = arith.constant dense<0.000000e+00> : vector<8x512xf32>
    %390 = tpu.matmul %355, %11, %cst_99 {dimension_numbers = #tpu.dot_dimension_numbers<[1], [0], [0], [1], [0, 0, 1, 1], [], []>} : vector<8x128xf32>, vector<128x512xf32>, vector<8x512xf32> -> vector<8x512xf32>
    %391 = arith.addf %389, %390 : vector<8x512xf32>
    %392 = vector.extract_strided_slice %391 {offsets = [0, 0], sizes = [8, 128], strides = [1, 1]} : vector<8x512xf32> to vector<8x128xf32>
    %393 = arith.negf %392 : vector<8x128xf32>
    %394 = math.exp %393 : vector<8x128xf32>
    %cst_100 = arith.constant 1.000000e+00 : f32
    %395 = vector.broadcast %cst_100 : f32 to vector<8x128xf32>
    %396 = arith.addf %395, %394 : vector<8x128xf32>
    %397 = arith.divf %395, %396 : vector<8x128xf32>
    %398 = vector.extract_strided_slice %391 {offsets = [0, 128], sizes = [8, 128], strides = [1, 1]} : vector<8x512xf32> to vector<8x128xf32>
    %399 = arith.negf %398 : vector<8x128xf32>
    %400 = math.exp %399 : vector<8x128xf32>
    %cst_101 = arith.constant 1.000000e+00 : f32
    %401 = vector.broadcast %cst_101 : f32 to vector<8x128xf32>
    %402 = arith.addf %401, %400 : vector<8x128xf32>
    %403 = arith.divf %401, %402 : vector<8x128xf32>
    %404 = vector.extract_strided_slice %391 {offsets = [0, 256], sizes = [8, 128], strides = [1, 1]} : vector<8x512xf32> to vector<8x128xf32>
    %405 = math.tanh %404 : vector<8x128xf32>
    %406 = vector.extract_strided_slice %391 {offsets = [0, 384], sizes = [8, 128], strides = [1, 1]} : vector<8x512xf32> to vector<8x128xf32>
    %407 = arith.negf %406 : vector<8x128xf32>
    %408 = math.exp %407 : vector<8x128xf32>
    %cst_102 = arith.constant 1.000000e+00 : f32
    %409 = vector.broadcast %cst_102 : f32 to vector<8x128xf32>
    %410 = arith.addf %409, %408 : vector<8x128xf32>
    %411 = arith.divf %409, %410 : vector<8x128xf32>
    %412 = arith.mulf %403, %353 : vector<8x128xf32>
    %413 = arith.mulf %397, %405 : vector<8x128xf32>
    %414 = arith.addf %412, %413 : vector<8x128xf32>
    %415 = math.tanh %414 : vector<8x128xf32>
    %416 = arith.mulf %411, %415 : vector<8x128xf32>
    %cst_103 = arith.constant dense<0.000000e+00> : vector<8x512xf32>
    %417 = tpu.matmul %416, %12, %cst_103 {dimension_numbers = #tpu.dot_dimension_numbers<[1], [0], [0], [1], [0, 0, 1, 1], [], []>} : vector<8x128xf32>, vector<128x512xf32>, vector<8x512xf32> -> vector<8x512xf32>
    %cst_104 = arith.constant dense<0.000000e+00> : vector<8x512xf32>
    %418 = tpu.matmul %384, %13, %cst_104 {dimension_numbers = #tpu.dot_dimension_numbers<[1], [0], [0], [1], [0, 0, 1, 1], [], []>} : vector<8x128xf32>, vector<128x512xf32>, vector<8x512xf32> -> vector<8x512xf32>
    %419 = arith.addf %417, %418 : vector<8x512xf32>
    %420 = arith.addf %419, %16 : vector<8x512xf32>
    %421 = vector.extract_strided_slice %420 {offsets = [0, 0], sizes = [8, 128], strides = [1, 1]} : vector<8x512xf32> to vector<8x128xf32>
    %422 = arith.negf %421 : vector<8x128xf32>
    %423 = math.exp %422 : vector<8x128xf32>
    %cst_105 = arith.constant 1.000000e+00 : f32
    %424 = vector.broadcast %cst_105 : f32 to vector<8x128xf32>
    %425 = arith.addf %424, %423 : vector<8x128xf32>
    %426 = arith.divf %424, %425 : vector<8x128xf32>
    %427 = vector.extract_strided_slice %420 {offsets = [0, 128], sizes = [8, 128], strides = [1, 1]} : vector<8x512xf32> to vector<8x128xf32>
    %428 = arith.negf %427 : vector<8x128xf32>
    %429 = math.exp %428 : vector<8x128xf32>
    %cst_106 = arith.constant 1.000000e+00 : f32
    %430 = vector.broadcast %cst_106 : f32 to vector<8x128xf32>
    %431 = arith.addf %430, %429 : vector<8x128xf32>
    %432 = arith.divf %430, %431 : vector<8x128xf32>
    %433 = vector.extract_strided_slice %420 {offsets = [0, 256], sizes = [8, 128], strides = [1, 1]} : vector<8x512xf32> to vector<8x128xf32>
    %434 = math.tanh %433 : vector<8x128xf32>
    %435 = vector.extract_strided_slice %420 {offsets = [0, 384], sizes = [8, 128], strides = [1, 1]} : vector<8x512xf32> to vector<8x128xf32>
    %436 = arith.negf %435 : vector<8x128xf32>
    %437 = math.exp %436 : vector<8x128xf32>
    %cst_107 = arith.constant 1.000000e+00 : f32
    %438 = vector.broadcast %cst_107 : f32 to vector<8x128xf32>
    %439 = arith.addf %438, %437 : vector<8x128xf32>
    %440 = arith.divf %438, %439 : vector<8x128xf32>
    %441 = arith.mulf %432, %382 : vector<8x128xf32>
    %442 = arith.mulf %426, %434 : vector<8x128xf32>
    %443 = arith.addf %441, %442 : vector<8x128xf32>
    %444 = math.tanh %443 : vector<8x128xf32>
    %445 = arith.mulf %440, %444 : vector<8x128xf32>
    %446 = arith.index_cast %387 : i32 to index
    %c0_108 = arith.constant 0 : index
    %447 = vector.load %arg15[%446, %c0_108] : memref<64x128xf32, #tpu.memory_space<vmem>>, vector<8x128xf32>
    tpu.vector_store %arg15[%446, %c0_108], %445 {strides = array<i32>} : memref<64x128xf32, #tpu.memory_space<vmem>>, vector<8x128xf32>,
    %c7_i32 = arith.constant 7 : i32
    %c8_i32_109 = arith.constant 8 : i32
    %448 = arith.muli %c7_i32, %c8_i32_109 : i32
    %449 = arith.index_cast %448 : i32 to index
    %c0_110 = arith.constant 0 : index
    %450 = vector.load %arg14[%449, %c0_110] : memref<64x512xf32, #tpu.memory_space<vmem>>, vector<8x512xf32>
    %cst_111 = arith.constant dense<0.000000e+00> : vector<8x512xf32>
    %451 = tpu.matmul %416, %11, %cst_111 {dimension_numbers = #tpu.dot_dimension_numbers<[1], [0], [0], [1], [0, 0, 1, 1], [], []>} : vector<8x128xf32>, vector<128x512xf32>, vector<8x512xf32> -> vector<8x512xf32>
    %452 = arith.addf %450, %451 : vector<8x512xf32>
    %453 = vector.extract_strided_slice %452 {offsets = [0, 0], sizes = [8, 128], strides = [1, 1]} : vector<8x512xf32> to vector<8x128xf32>
    %454 = arith.negf %453 : vector<8x128xf32>
    %455 = math.exp %454 : vector<8x128xf32>
    %cst_112 = arith.constant 1.000000e+00 : f32
    %456 = vector.broadcast %cst_112 : f32 to vector<8x128xf32>
    %457 = arith.addf %456, %455 : vector<8x128xf32>
    %458 = arith.divf %456, %457 : vector<8x128xf32>
    %459 = vector.extract_strided_slice %452 {offsets = [0, 128], sizes = [8, 128], strides = [1, 1]} : vector<8x512xf32> to vector<8x128xf32>
    %460 = arith.negf %459 : vector<8x128xf32>
    %461 = math.exp %460 : vector<8x128xf32>
    %cst_113 = arith.constant 1.000000e+00 : f32
    %462 = vector.broadcast %cst_113 : f32 to vector<8x128xf32>
    %463 = arith.addf %462, %461 : vector<8x128xf32>
    %464 = arith.divf %462, %463 : vector<8x128xf32>
    %465 = vector.extract_strided_slice %452 {offsets = [0, 256], sizes = [8, 128], strides = [1, 1]} : vector<8x512xf32> to vector<8x128xf32>
    %466 = math.tanh %465 : vector<8x128xf32>
    %467 = vector.extract_strided_slice %452 {offsets = [0, 384], sizes = [8, 128], strides = [1, 1]} : vector<8x512xf32> to vector<8x128xf32>
    %468 = arith.negf %467 : vector<8x128xf32>
    %469 = math.exp %468 : vector<8x128xf32>
    %cst_114 = arith.constant 1.000000e+00 : f32
    %470 = vector.broadcast %cst_114 : f32 to vector<8x128xf32>
    %471 = arith.addf %470, %469 : vector<8x128xf32>
    %472 = arith.divf %470, %471 : vector<8x128xf32>
    %473 = arith.mulf %464, %414 : vector<8x128xf32>
    %474 = arith.mulf %458, %466 : vector<8x128xf32>
    %475 = arith.addf %473, %474 : vector<8x128xf32>
    %476 = math.tanh %475 : vector<8x128xf32>
    %477 = arith.mulf %472, %476 : vector<8x128xf32>
    %cst_115 = arith.constant dense<0.000000e+00> : vector<8x512xf32>
    %478 = tpu.matmul %477, %12, %cst_115 {dimension_numbers = #tpu.dot_dimension_numbers<[1], [0], [0], [1], [0, 0, 1, 1], [], []>} : vector<8x128xf32>, vector<128x512xf32>, vector<8x512xf32> -> vector<8x512xf32>
    %cst_116 = arith.constant dense<0.000000e+00> : vector<8x512xf32>
    %479 = tpu.matmul %445, %13, %cst_116 {dimension_numbers = #tpu.dot_dimension_numbers<[1], [0], [0], [1], [0, 0, 1, 1], [], []>} : vector<8x128xf32>, vector<128x512xf32>, vector<8x512xf32> -> vector<8x512xf32>
    %480 = arith.addf %478, %479 : vector<8x512xf32>
    %481 = arith.addf %480, %16 : vector<8x512xf32>
    %482 = vector.extract_strided_slice %481 {offsets = [0, 0], sizes = [8, 128], strides = [1, 1]} : vector<8x512xf32> to vector<8x128xf32>
    %483 = arith.negf %482 : vector<8x128xf32>
    %484 = math.exp %483 : vector<8x128xf32>
    %cst_117 = arith.constant 1.000000e+00 : f32
    %485 = vector.broadcast %cst_117 : f32 to vector<8x128xf32>
    %486 = arith.addf %485, %484 : vector<8x128xf32>
    %487 = arith.divf %485, %486 : vector<8x128xf32>
    %488 = vector.extract_strided_slice %481 {offsets = [0, 128], sizes = [8, 128], strides = [1, 1]} : vector<8x512xf32> to vector<8x128xf32>
    %489 = arith.negf %488 : vector<8x128xf32>
    %490 = math.exp %489 : vector<8x128xf32>
    %cst_118 = arith.constant 1.000000e+00 : f32
    %491 = vector.broadcast %cst_118 : f32 to vector<8x128xf32>
    %492 = arith.addf %491, %490 : vector<8x128xf32>
    %493 = arith.divf %491, %492 : vector<8x128xf32>
    %494 = vector.extract_strided_slice %481 {offsets = [0, 256], sizes = [8, 128], strides = [1, 1]} : vector<8x512xf32> to vector<8x128xf32>
    %495 = math.tanh %494 : vector<8x128xf32>
    %496 = vector.extract_strided_slice %481 {offsets = [0, 384], sizes = [8, 128], strides = [1, 1]} : vector<8x512xf32> to vector<8x128xf32>
    %497 = arith.negf %496 : vector<8x128xf32>
    %498 = math.exp %497 : vector<8x128xf32>
    %cst_119 = arith.constant 1.000000e+00 : f32
    %499 = vector.broadcast %cst_119 : f32 to vector<8x128xf32>
    %500 = arith.addf %499, %498 : vector<8x128xf32>
    %501 = arith.divf %499, %500 : vector<8x128xf32>
    %502 = arith.mulf %493, %443 : vector<8x128xf32>
    %503 = arith.mulf %487, %495 : vector<8x128xf32>
    %504 = arith.addf %502, %503 : vector<8x128xf32>
    %505 = math.tanh %504 : vector<8x128xf32>
    %506 = arith.mulf %501, %505 : vector<8x128xf32>
    %507 = arith.index_cast %448 : i32 to index
    %c0_120 = arith.constant 0 : index
    %508 = vector.load %arg15[%507, %c0_120] : memref<64x128xf32, #tpu.memory_space<vmem>>, vector<8x128xf32>
    tpu.vector_store %arg15[%507, %c0_120], %506 {strides = array<i32>} : memref<64x128xf32, #tpu.memory_space<vmem>>, vector<8x128xf32>,
    %c8_i32_121 = arith.constant 8 : i32
    %c0_122 = arith.constant 0 : index
    %c0_123 = arith.constant 0 : index
    %509 = vector.load %arg16[%c0_122, %c0_123] : memref<8x128xf32, #tpu.memory_space<vmem>>, vector<8x128xf32>
    tpu.vector_store %arg16[%c0_122, %c0_123], %477 {strides = array<i32>} : memref<8x128xf32, #tpu.memory_space<vmem>>, vector<8x128xf32>,
    %c0_124 = arith.constant 0 : index
    %c0_125 = arith.constant 0 : index
    %510 = vector.load %arg17[%c0_124, %c0_125] : memref<8x128xf32, #tpu.memory_space<vmem>>, vector<8x128xf32>
    tpu.vector_store %arg17[%c0_124, %c0_125], %475 {strides = array<i32>} : memref<8x128xf32, #tpu.memory_space<vmem>>, vector<8x128xf32>,
    %c0_126 = arith.constant 0 : index
    %c0_127 = arith.constant 0 : index
    %511 = vector.load %arg18[%c0_126, %c0_127] : memref<8x128xf32, #tpu.memory_space<vmem>>, vector<8x128xf32>
    tpu.vector_store %arg18[%c0_126, %c0_127], %506 {strides = array<i32>} : memref<8x128xf32, #tpu.memory_space<vmem>>, vector<8x128xf32>,
    %c0_128 = arith.constant 0 : index
    %c0_129 = arith.constant 0 : index
    %512 = vector.load %arg19[%c0_128, %c0_129] : memref<8x128xf32, #tpu.memory_space<vmem>>, vector<8x128xf32>
    tpu.vector_store %arg19[%c0_128, %c0_129], %504 {strides = array<i32>} : memref<8x128xf32, #tpu.memory_space<vmem>>, vector<8x128xf32>,
    %c0_130 = arith.constant 0 : index
    %c0_131 = arith.constant 0 : index
    %513 = vector.load %arg15[%c0_130, %c0_131] : memref<64x128xf32, #tpu.memory_space<vmem>>, vector<64x128xf32>
    %c0_132 = arith.constant 0 : index
    %c0_133 = arith.constant 0 : index
    %514 = vector.load %arg9[%c0_132, %c0_133] : memref<128x128xf32, #tpu.memory_space<vmem>>, vector<128x128xf32>
    %cst_134 = arith.constant dense<0.000000e+00> : vector<64x128xf32>
    %515 = tpu.matmul %513, %514, %cst_134 {dimension_numbers = #tpu.dot_dimension_numbers<[1], [0], [0], [1], [0, 0, 1, 1], [], []>} : vector<64x128xf32>, vector<128x128xf32>, vector<64x128xf32> -> vector<64x128xf32>
    %c0_135 = arith.constant 0 : index
    %c0_136 = arith.constant 0 : index
    %516 = vector.load %arg10[%c0_135, %c0_136] : memref<1x128xf32, #tpu.memory_space<vmem>>, vector<1x128xf32>
    %517 = vector.broadcast %516 : vector<1x128xf32> to vector<64x128xf32>
    %518 = arith.addf %515, %517 : vector<64x128xf32>
    %c0_137 = arith.constant 0 : index
    %c0_138 = arith.constant 0 : index
    %c0_139 = arith.constant 0 : index
    %519 = vector.load %arg11[%c0_137, %c0_138, %c0_139] : memref<1x64x128xf32, #tpu.memory_space<vmem>>, vector<1x64x128xf32>
    %520 = vector.shape_cast %519 : vector<1x64x128xf32> to vector<64x128xf32>
    %521 = vector.shape_cast %518 : vector<64x128xf32> to vector<1x64x128xf32>
    tpu.vector_store %arg11[%c0_137, %c0_138, %c0_139], %521 {strides = array<i32>} : memref<1x64x128xf32, #tpu.memory_space<vmem>>, vector<1x64x128xf32>,
    %c0_i32_140 = arith.constant 0 : i32
    %522 = arith.cmpi eq, %arg1, %c0_i32_140 : i32
    %523 = arith.extui %522 : i1 to i32
    %c0_i32_141 = arith.constant 0 : i32
    %524 = arith.cmpi ne, %523, %c0_i32_141 : i32
    scf.if %524 {
      %c0_142 = arith.constant 0 : index
      %c0_143 = arith.constant 0 : index
      %525 = vector.load %arg16[%c0_142, %c0_143] : memref<8x128xf32, #tpu.memory_space<vmem>>, vector<8x128xf32>
      %c0_144 = arith.constant 0 : index
      %c0_145 = arith.constant 0 : index
      %c0_146 = arith.constant 0 : index
      %526 = vector.load %arg12[%c0_144, %c0_145, %c0_146] : memref<2x8x128xf32, #tpu.memory_space<vmem>>, vector<1x8x128xf32>
      %527 = vector.shape_cast %526 : vector<1x8x128xf32> to vector<8x128xf32>
      %528 = vector.shape_cast %525 : vector<8x128xf32> to vector<1x8x128xf32>
      tpu.vector_store %arg12[%c0_144, %c0_145, %c0_146], %528 {strides = array<i32>} : memref<2x8x128xf32, #tpu.memory_space<vmem>>, vector<1x8x128xf32>,
      %c0_147 = arith.constant 0 : index
      %c0_148 = arith.constant 0 : index
      %529 = vector.load %arg18[%c0_147, %c0_148] : memref<8x128xf32, #tpu.memory_space<vmem>>, vector<8x128xf32>
      %c1 = arith.constant 1 : index
      %c0_149 = arith.constant 0 : index
      %c0_150 = arith.constant 0 : index
      %530 = vector.load %arg12[%c1, %c0_149, %c0_150] : memref<2x8x128xf32, #tpu.memory_space<vmem>>, vector<1x8x128xf32>
      %531 = vector.shape_cast %530 : vector<1x8x128xf32> to vector<8x128xf32>
      %532 = vector.shape_cast %529 : vector<8x128xf32> to vector<1x8x128xf32>
      tpu.vector_store %arg12[%c1, %c0_149, %c0_150], %532 {strides = array<i32>} : memref<2x8x128xf32, #tpu.memory_space<vmem>>, vector<1x8x128xf32>,
      %c0_151 = arith.constant 0 : index
      %c0_152 = arith.constant 0 : index
      %533 = vector.load %arg17[%c0_151, %c0_152] : memref<8x128xf32, #tpu.memory_space<vmem>>, vector<8x128xf32>
      %c0_153 = arith.constant 0 : index
      %c0_154 = arith.constant 0 : index
      %c0_155 = arith.constant 0 : index
      %534 = vector.load %arg13[%c0_153, %c0_154, %c0_155] : memref<2x8x128xf32, #tpu.memory_space<vmem>>, vector<1x8x128xf32>
      %535 = vector.shape_cast %534 : vector<1x8x128xf32> to vector<8x128xf32>
      %536 = vector.shape_cast %533 : vector<8x128xf32> to vector<1x8x128xf32>
      tpu.vector_store %arg13[%c0_153, %c0_154, %c0_155], %536 {strides = array<i32>} : memref<2x8x128xf32, #tpu.memory_space<vmem>>, vector<1x8x128xf32>,
      %c0_156 = arith.constant 0 : index
      %c0_157 = arith.constant 0 : index
      %537 = vector.load %arg19[%c0_156, %c0_157] : memref<8x128xf32, #tpu.memory_space<vmem>>, vector<8x128xf32>
      %c1_158 = arith.constant 1 : index
      %c0_159 = arith.constant 0 : index
      %c0_160 = arith.constant 0 : index
      %538 = vector.load %arg13[%c1_158, %c0_159, %c0_160] : memref<2x8x128xf32, #tpu.memory_space<vmem>>, vector<1x8x128xf32>
      %539 = vector.shape_cast %538 : vector<1x8x128xf32> to vector<8x128xf32>
      %540 = vector.shape_cast %537 : vector<8x128xf32> to vector<1x8x128xf32>
      tpu.vector_store %arg13[%c1_158, %c0_159, %c0_160], %540 {strides = array<i32>} : memref<2x8x128xf32, #tpu.memory_space<vmem>>, vector<1x8x128xf32>,
    } else {
    }
    return
  }
  func.func @transform_0(%arg0: i32, %arg1: i32) -> (i32, i32, i32) {
    %c0_i32 = arith.constant 0 : i32
    %c0_i32_0 = arith.constant 0 : i32
    return %arg0, %arg1, %c0_i32 : i32, i32, i32
  }
  func.func @transform_1(%arg0: i32, %arg1: i32) -> (i32, i32) {
    %c0_i32 = arith.constant 0 : i32
    %c0_i32_0 = arith.constant 0 : i32
    %c0_i32_1 = arith.constant 0 : i32
    return %c0_i32, %c0_i32_0 : i32, i32
  }
  func.func @transform_2(%arg0: i32, %arg1: i32) -> (i32, i32) {
    %c0_i32 = arith.constant 0 : i32
    %c0_i32_0 = arith.constant 0 : i32
    %c0_i32_1 = arith.constant 0 : i32
    return %c0_i32, %c0_i32_0 : i32, i32
  }
  func.func @transform_3(%arg0: i32, %arg1: i32) -> (i32, i32) {
    %c0_i32 = arith.constant 0 : i32
    %c0_i32_0 = arith.constant 0 : i32
    %c0_i32_1 = arith.constant 0 : i32
    return %c0_i32, %c0_i32_0 : i32, i32
  }
  func.func @transform_4(%arg0: i32, %arg1: i32) -> (i32, i32) {
    %c0_i32 = arith.constant 0 : i32
    %c0_i32_0 = arith.constant 0 : i32
    %c0_i32_1 = arith.constant 0 : i32
    return %c0_i32, %c0_i32_0 : i32, i32
  }
  func.func @transform_5(%arg0: i32, %arg1: i32) -> (i32, i32) {
    %c0_i32 = arith.constant 0 : i32
    %c0_i32_0 = arith.constant 0 : i32
    %c0_i32_1 = arith.constant 0 : i32
    return %c0_i32, %c0_i32_0 : i32, i32
  }
  func.func @transform_6(%arg0: i32, %arg1: i32) -> (i32, i32) {
    %c0_i32 = arith.constant 0 : i32
    %c0_i32_0 = arith.constant 0 : i32
    %c0_i32_1 = arith.constant 0 : i32
    return %c0_i32, %c0_i32_0 : i32, i32
  }
  func.func @transform_7(%arg0: i32, %arg1: i32) -> (i32, i32) {
    %c0_i32 = arith.constant 0 : i32
    %c0_i32_0 = arith.constant 0 : i32
    %c0_i32_1 = arith.constant 0 : i32
    return %c0_i32, %c0_i32_0 : i32, i32
  }
  func.func @transform_8(%arg0: i32, %arg1: i32) -> (i32, i32) {
    %c0_i32 = arith.constant 0 : i32
    %c0_i32_0 = arith.constant 0 : i32
    %c0_i32_1 = arith.constant 0 : i32
    return %c0_i32, %c0_i32_0 : i32, i32
  }
  func.func @transform_9(%arg0: i32, %arg1: i32) -> (i32, i32, i32) {
    %c0_i32 = arith.constant 0 : i32
    %c0_i32_0 = arith.constant 0 : i32
    return %arg0, %arg1, %c0_i32 : i32, i32, i32
  }
  func.func @transform_10(%arg0: i32, %arg1: i32) -> (i32, i32, i32) {
    %c0_i32 = arith.constant 0 : i32
    %c0_i32_0 = arith.constant 0 : i32
    %c0_i32_1 = arith.constant 0 : i32
    return %c0_i32, %arg0, %c0_i32_0 : i32, i32, i32
  }
  func.func @transform_11(%arg0: i32, %arg1: i32) -> (i32, i32, i32) {
    %c0_i32 = arith.constant 0 : i32
    %c0_i32_0 = arith.constant 0 : i32
    %c0_i32_1 = arith.constant 0 : i32
    return %c0_i32, %arg0, %c0_i32_0 : i32, i32, i32
  }
}

module attributes {stable_mosaic.version = 11 : i64} {
  func.func @_char_lstm_kernel(%arg0: i32, %arg1: i32, %arg2: memref<1x64x16xf32, #tpu.memory_space<vmem>>, %arg3: memref<16x512xf32, #tpu.memory_space<vmem>>, %arg4: memref<128x512xf32, #tpu.memory_space<vmem>>, %arg5: memref<1x512xf32, #tpu.memory_space<vmem>>, %arg6: memref<128x512xf32, #tpu.memory_space<vmem>>, %arg7: memref<128x512xf32, #tpu.memory_space<vmem>>, %arg8: memref<1x512xf32, #tpu.memory_space<vmem>>, %arg9: memref<128x128xf32, #tpu.memory_space<vmem>>, %arg10: memref<1x128xf32, #tpu.memory_space<vmem>>, %arg11: memref<1x64x128xf32, #tpu.memory_space<vmem>>, %arg12: memref<2x8x128xf32, #tpu.memory_space<vmem>>, %arg13: memref<2x8x128xf32, #tpu.memory_space<vmem>>, %arg14: memref<64x512xf32, #tpu.memory_space<vmem>>, %arg15: memref<64x128xf32, #tpu.memory_space<vmem>>, %arg16: memref<8x128xf32, #tpu.memory_space<vmem>>, %arg17: memref<8x128xf32, #tpu.memory_space<vmem>>, %arg18: memref<8x128xf32, #tpu.memory_space<vmem>>, %arg19: memref<8x128xf32, #tpu.memory_space<vmem>>) attributes {dimension_semantics = [#tpu.dimension_semantics<parallel>, #tpu.dimension_semantics<arbitrary>], iteration_bounds = array<i64: 1, 1>, scalar_prefetch = 0 : i64, scratch_operands = 6 : i64, tpu.core_type = #tpu.core_type<tc>, window_params = [{transform_indices = @transform_0, window_bounds = array<i64: 1, 64, 16>}, {pipeline_mode = #tpu.pipeline_mode<synchronous>, transform_indices = @transform_1, window_bounds = array<i64: 16, 512>}, {pipeline_mode = #tpu.pipeline_mode<synchronous>, transform_indices = @transform_2, window_bounds = array<i64: 128, 512>}, {pipeline_mode = #tpu.pipeline_mode<synchronous>, transform_indices = @transform_3, window_bounds = array<i64: 1, 512>}, {pipeline_mode = #tpu.pipeline_mode<synchronous>, transform_indices = @transform_4, window_bounds = array<i64: 128, 512>}, {pipeline_mode = #tpu.pipeline_mode<synchronous>, transform_indices = @transform_5, window_bounds = array<i64: 128, 512>}, {pipeline_mode = #tpu.pipeline_mode<synchronous>, transform_indices = @transform_6, window_bounds = array<i64: 1, 512>}, {pipeline_mode = #tpu.pipeline_mode<synchronous>, transform_indices = @transform_7, window_bounds = array<i64: 128, 128>}, {pipeline_mode = #tpu.pipeline_mode<synchronous>, transform_indices = @transform_8, window_bounds = array<i64: 1, 128>}, {transform_indices = @transform_9, window_bounds = array<i64: 1, 64, 128>}, {transform_indices = @transform_10, window_bounds = array<i64: 2, 8, 128>}, {transform_indices = @transform_11, window_bounds = array<i64: 2, 8, 128>}]} {
    %c0_i32 = arith.constant 0 : i32
    %0 = arith.cmpi eq, %arg1, %c0_i32 : i32
    %1 = arith.extui %0 : i1 to i32
    %c0_i32_0 = arith.constant 0 : i32
    %2 = arith.cmpi ne, %1, %c0_i32_0 : i32
    scf.if %2 {
      %cst_142 = arith.constant 0.000000e+00 : f32
      %525 = vector.broadcast %cst_142 : f32 to vector<8x128xf32>
      %c0_143 = arith.constant 0 : index
      %c0_144 = arith.constant 0 : index
      %526 = vector.load %arg16[%c0_143, %c0_144] : memref<8x128xf32, #tpu.memory_space<vmem>>, vector<8x128xf32>
      tpu.vector_store %arg16[%c0_143, %c0_144], %525 {strides = array<i32>} : memref<8x128xf32, #tpu.memory_space<vmem>>, vector<8x128xf32>,
      %cst_145 = arith.constant 0.000000e+00 : f32
      %527 = vector.broadcast %cst_145 : f32 to vector<8x128xf32>
      %c0_146 = arith.constant 0 : index
      %c0_147 = arith.constant 0 : index
      %528 = vector.load %arg17[%c0_146, %c0_147] : memref<8x128xf32, #tpu.memory_space<vmem>>, vector<8x128xf32>
      tpu.vector_store %arg17[%c0_146, %c0_147], %527 {strides = array<i32>} : memref<8x128xf32, #tpu.memory_space<vmem>>, vector<8x128xf32>,
      %cst_148 = arith.constant 0.000000e+00 : f32
      %529 = vector.broadcast %cst_148 : f32 to vector<8x128xf32>
      %c0_149 = arith.constant 0 : index
      %c0_150 = arith.constant 0 : index
      %530 = vector.load %arg18[%c0_149, %c0_150] : memref<8x128xf32, #tpu.memory_space<vmem>>, vector<8x128xf32>
      tpu.vector_store %arg18[%c0_149, %c0_150], %529 {strides = array<i32>} : memref<8x128xf32, #tpu.memory_space<vmem>>, vector<8x128xf32>,
      %cst_151 = arith.constant 0.000000e+00 : f32
      %531 = vector.broadcast %cst_151 : f32 to vector<8x128xf32>
      %c0_152 = arith.constant 0 : index
      %c0_153 = arith.constant 0 : index
      %532 = vector.load %arg19[%c0_152, %c0_153] : memref<8x128xf32, #tpu.memory_space<vmem>>, vector<8x128xf32>
      tpu.vector_store %arg19[%c0_152, %c0_153], %531 {strides = array<i32>} : memref<8x128xf32, #tpu.memory_space<vmem>>, vector<8x128xf32>,
    } else {
    }
    %c0 = arith.constant 0 : index
    %c0_1 = arith.constant 0 : index
    %c0_2 = arith.constant 0 : index
    %3 = vector.load %arg2[%c0, %c0_1, %c0_2] : memref<1x64x16xf32, #tpu.memory_space<vmem>>, vector<1x64x16xf32>
    %4 = vector.shape_cast %3 : vector<1x64x16xf32> to vector<64x16xf32>
    %c0_3 = arith.constant 0 : index
    %c0_4 = arith.constant 0 : index
    %5 = vector.load %arg3[%c0_3, %c0_4] : memref<16x512xf32, #tpu.memory_space<vmem>>, vector<16x512xf32>
    %cst = arith.constant dense<0.000000e+00> : vector<64x512xf32>
    %6 = tpu.matmul %4, %5, %cst {dimension_numbers = #tpu.dot_dimension_numbers<[1], [0], [0], [1], [0, 0, 1, 1], [], []>} : vector<64x16xf32>, vector<16x512xf32>, vector<64x512xf32> -> vector<64x512xf32>
    %c0_5 = arith.constant 0 : index
    %c0_6 = arith.constant 0 : index
    %7 = vector.load %arg5[%c0_5, %c0_6] : memref<1x512xf32, #tpu.memory_space<vmem>>, vector<1x512xf32>
    %8 = vector.broadcast %7 : vector<1x512xf32> to vector<64x512xf32>
    %9 = arith.addf %6, %8 : vector<64x512xf32>
    %c0_7 = arith.constant 0 : index
    %c0_8 = arith.constant 0 : index
    %10 = vector.load %arg14[%c0_7, %c0_8] : memref<64x512xf32, #tpu.memory_space<vmem>>, vector<64x512xf32>
    tpu.vector_store %arg14[%c0_7, %c0_8], %9 {strides = array<i32>} : memref<64x512xf32, #tpu.memory_space<vmem>>, vector<64x512xf32>,
    %c0_9 = arith.constant 0 : index
    %c0_10 = arith.constant 0 : index
    %11 = vector.load %arg4[%c0_9, %c0_10] : memref<128x512xf32, #tpu.memory_space<vmem>>, vector<128x512xf32>
    %c0_11 = arith.constant 0 : index
    %c0_12 = arith.constant 0 : index
    %12 = vector.load %arg6[%c0_11, %c0_12] : memref<128x512xf32, #tpu.memory_space<vmem>>, vector<128x512xf32>
    %c0_13 = arith.constant 0 : index
    %c0_14 = arith.constant 0 : index
    %13 = vector.load %arg7[%c0_13, %c0_14] : memref<128x512xf32, #tpu.memory_space<vmem>>, vector<128x512xf32>
    %c0_15 = arith.constant 0 : index
    %c0_16 = arith.constant 0 : index
    %14 = vector.load %arg8[%c0_15, %c0_16] : memref<1x512xf32, #tpu.memory_space<vmem>>, vector<1x512xf32>
    %15 = vector.shape_cast %14 : vector<1x512xf32> to vector<1x512xf32>
    %16 = vector.broadcast %15 : vector<1x512xf32> to vector<8x512xf32>
    %c0_17 = arith.constant 0 : index
    %c0_18 = arith.constant 0 : index
    %17 = vector.load %arg16[%c0_17, %c0_18] : memref<8x128xf32, #tpu.memory_space<vmem>>, vector<8x128xf32>
    %c0_19 = arith.constant 0 : index
    %c0_20 = arith.constant 0 : index
    %18 = vector.load %arg17[%c0_19, %c0_20] : memref<8x128xf32, #tpu.memory_space<vmem>>, vector<8x128xf32>
    %c0_21 = arith.constant 0 : index
    %c0_22 = arith.constant 0 : index
    %19 = vector.load %arg18[%c0_21, %c0_22] : memref<8x128xf32, #tpu.memory_space<vmem>>, vector<8x128xf32>
    %c0_23 = arith.constant 0 : index
    %c0_24 = arith.constant 0 : index
    %20 = vector.load %arg19[%c0_23, %c0_24] : memref<8x128xf32, #tpu.memory_space<vmem>>, vector<8x128xf32>
    %c0_i32_25 = arith.constant 0 : i32
    %c8_i32 = arith.constant 8 : i32
    %21 = arith.muli %c0_i32_25, %c8_i32 : i32
    %22 = arith.index_cast %21 : i32 to index
    %c0_26 = arith.constant 0 : index
    %23 = vector.load %arg14[%22, %c0_26] : memref<64x512xf32, #tpu.memory_space<vmem>>, vector<8x512xf32>
    %cst_27 = arith.constant dense<0.000000e+00> : vector<8x512xf32>
    %24 = tpu.matmul %17, %11, %cst_27 {dimension_numbers = #tpu.dot_dimension_numbers<[1], [0], [0], [1], [0, 0, 1, 1], [], []>} : vector<8x128xf32>, vector<128x512xf32>, vector<8x512xf32> -> vector<8x512xf32>
    %25 = arith.addf %23, %24 : vector<8x512xf32>
    %26 = vector.extract_strided_slice %25 {offsets = [0, 0], sizes = [8, 128], strides = [1, 1]} : vector<8x512xf32> to vector<8x128xf32>
    %27 = arith.negf %26 : vector<8x128xf32>
    %28 = math.exp %27 : vector<8x128xf32>
    %cst_28 = arith.constant 1.000000e+00 : f32
    %29 = vector.broadcast %cst_28 : f32 to vector<8x128xf32>
    %30 = arith.addf %29, %28 : vector<8x128xf32>
    %31 = arith.divf %29, %30 : vector<8x128xf32>
    %32 = vector.extract_strided_slice %25 {offsets = [0, 128], sizes = [8, 128], strides = [1, 1]} : vector<8x512xf32> to vector<8x128xf32>
    %33 = arith.negf %32 : vector<8x128xf32>
    %34 = math.exp %33 : vector<8x128xf32>
    %cst_29 = arith.constant 1.000000e+00 : f32
    %35 = vector.broadcast %cst_29 : f32 to vector<8x128xf32>
    %36 = arith.addf %35, %34 : vector<8x128xf32>
    %37 = arith.divf %35, %36 : vector<8x128xf32>
    %38 = vector.extract_strided_slice %25 {offsets = [0, 256], sizes = [8, 128], strides = [1, 1]} : vector<8x512xf32> to vector<8x128xf32>
    %39 = math.tanh %38 : vector<8x128xf32>
    %40 = vector.extract_strided_slice %25 {offsets = [0, 384], sizes = [8, 128], strides = [1, 1]} : vector<8x512xf32> to vector<8x128xf32>
    %41 = arith.negf %40 : vector<8x128xf32>
    %42 = math.exp %41 : vector<8x128xf32>
    %cst_30 = arith.constant 1.000000e+00 : f32
    %43 = vector.broadcast %cst_30 : f32 to vector<8x128xf32>
    %44 = arith.addf %43, %42 : vector<8x128xf32>
    %45 = arith.divf %43, %44 : vector<8x128xf32>
    %46 = arith.mulf %37, %18 : vector<8x128xf32>
    %47 = arith.mulf %31, %39 : vector<8x128xf32>
    %48 = arith.addf %46, %47 : vector<8x128xf32>
    %49 = math.tanh %48 : vector<8x128xf32>
    %50 = arith.mulf %45, %49 : vector<8x128xf32>
    %cst_31 = arith.constant dense<0.000000e+00> : vector<8x512xf32>
    %51 = tpu.matmul %50, %12, %cst_31 {dimension_numbers = #tpu.dot_dimension_numbers<[1], [0], [0], [1], [0, 0, 1, 1], [], []>} : vector<8x128xf32>, vector<128x512xf32>, vector<8x512xf32> -> vector<8x512xf32>
    %cst_32 = arith.constant dense<0.000000e+00> : vector<8x512xf32>
    %52 = tpu.matmul %19, %13, %cst_32 {dimension_numbers = #tpu.dot_dimension_numbers<[1], [0], [0], [1], [0, 0, 1, 1], [], []>} : vector<8x128xf32>, vector<128x512xf32>, vector<8x512xf32> -> vector<8x512xf32>
    %53 = arith.addf %51, %52 : vector<8x512xf32>
    %54 = arith.addf %53, %16 : vector<8x512xf32>
    %55 = vector.extract_strided_slice %54 {offsets = [0, 0], sizes = [8, 128], strides = [1, 1]} : vector<8x512xf32> to vector<8x128xf32>
    %56 = arith.negf %55 : vector<8x128xf32>
    %57 = math.exp %56 : vector<8x128xf32>
    %cst_33 = arith.constant 1.000000e+00 : f32
    %58 = vector.broadcast %cst_33 : f32 to vector<8x128xf32>
    %59 = arith.addf %58, %57 : vector<8x128xf32>
    %60 = arith.divf %58, %59 : vector<8x128xf32>
    %61 = vector.extract_strided_slice %54 {offsets = [0, 128], sizes = [8, 128], strides = [1, 1]} : vector<8x512xf32> to vector<8x128xf32>
    %62 = arith.negf %61 : vector<8x128xf32>
    %63 = math.exp %62 : vector<8x128xf32>
    %cst_34 = arith.constant 1.000000e+00 : f32
    %64 = vector.broadcast %cst_34 : f32 to vector<8x128xf32>
    %65 = arith.addf %64, %63 : vector<8x128xf32>
    %66 = arith.divf %64, %65 : vector<8x128xf32>
    %67 = vector.extract_strided_slice %54 {offsets = [0, 256], sizes = [8, 128], strides = [1, 1]} : vector<8x512xf32> to vector<8x128xf32>
    %68 = math.tanh %67 : vector<8x128xf32>
    %69 = vector.extract_strided_slice %54 {offsets = [0, 384], sizes = [8, 128], strides = [1, 1]} : vector<8x512xf32> to vector<8x128xf32>
    %70 = arith.negf %69 : vector<8x128xf32>
    %71 = math.exp %70 : vector<8x128xf32>
    %cst_35 = arith.constant 1.000000e+00 : f32
    %72 = vector.broadcast %cst_35 : f32 to vector<8x128xf32>
    %73 = arith.addf %72, %71 : vector<8x128xf32>
    %74 = arith.divf %72, %73 : vector<8x128xf32>
    %75 = arith.mulf %66, %20 : vector<8x128xf32>
    %76 = arith.mulf %60, %68 : vector<8x128xf32>
    %77 = arith.addf %75, %76 : vector<8x128xf32>
    %78 = math.tanh %77 : vector<8x128xf32>
    %79 = arith.mulf %74, %78 : vector<8x128xf32>
    %80 = arith.index_cast %21 : i32 to index
    %c0_36 = arith.constant 0 : index
    %81 = vector.load %arg15[%80, %c0_36] : memref<64x128xf32, #tpu.memory_space<vmem>>, vector<8x128xf32>
    tpu.vector_store %arg15[%80, %c0_36], %79 {strides = array<i32>} : memref<64x128xf32, #tpu.memory_space<vmem>>, vector<8x128xf32>,
    %c1_i32 = arith.constant 1 : i32
    %c8_i32_37 = arith.constant 8 : i32
    %82 = arith.muli %c1_i32, %c8_i32_37 : i32
    %83 = arith.index_cast %82 : i32 to index
    %c0_38 = arith.constant 0 : index
    %84 = vector.load %arg14[%83, %c0_38] : memref<64x512xf32, #tpu.memory_space<vmem>>, vector<8x512xf32>
    %cst_39 = arith.constant dense<0.000000e+00> : vector<8x512xf32>
    %85 = tpu.matmul %50, %11, %cst_39 {dimension_numbers = #tpu.dot_dimension_numbers<[1], [0], [0], [1], [0, 0, 1, 1], [], []>} : vector<8x128xf32>, vector<128x512xf32>, vector<8x512xf32> -> vector<8x512xf32>
    %86 = arith.addf %84, %85 : vector<8x512xf32>
    %87 = vector.extract_strided_slice %86 {offsets = [0, 0], sizes = [8, 128], strides = [1, 1]} : vector<8x512xf32> to vector<8x128xf32>
    %88 = arith.negf %87 : vector<8x128xf32>
    %89 = math.exp %88 : vector<8x128xf32>
    %cst_40 = arith.constant 1.000000e+00 : f32
    %90 = vector.broadcast %cst_40 : f32 to vector<8x128xf32>
    %91 = arith.addf %90, %89 : vector<8x128xf32>
    %92 = arith.divf %90, %91 : vector<8x128xf32>
    %93 = vector.extract_strided_slice %86 {offsets = [0, 128], sizes = [8, 128], strides = [1, 1]} : vector<8x512xf32> to vector<8x128xf32>
    %94 = arith.negf %93 : vector<8x128xf32>
    %95 = math.exp %94 : vector<8x128xf32>
    %cst_41 = arith.constant 1.000000e+00 : f32
    %96 = vector.broadcast %cst_41 : f32 to vector<8x128xf32>
    %97 = arith.addf %96, %95 : vector<8x128xf32>
    %98 = arith.divf %96, %97 : vector<8x128xf32>
    %99 = vector.extract_strided_slice %86 {offsets = [0, 256], sizes = [8, 128], strides = [1, 1]} : vector<8x512xf32> to vector<8x128xf32>
    %100 = math.tanh %99 : vector<8x128xf32>
    %101 = vector.extract_strided_slice %86 {offsets = [0, 384], sizes = [8, 128], strides = [1, 1]} : vector<8x512xf32> to vector<8x128xf32>
    %102 = arith.negf %101 : vector<8x128xf32>
    %103 = math.exp %102 : vector<8x128xf32>
    %cst_42 = arith.constant 1.000000e+00 : f32
    %104 = vector.broadcast %cst_42 : f32 to vector<8x128xf32>
    %105 = arith.addf %104, %103 : vector<8x128xf32>
    %106 = arith.divf %104, %105 : vector<8x128xf32>
    %107 = arith.mulf %98, %48 : vector<8x128xf32>
    %108 = arith.mulf %92, %100 : vector<8x128xf32>
    %109 = arith.addf %107, %108 : vector<8x128xf32>
    %110 = math.tanh %109 : vector<8x128xf32>
    %111 = arith.mulf %106, %110 : vector<8x128xf32>
    %cst_43 = arith.constant dense<0.000000e+00> : vector<8x512xf32>
    %112 = tpu.matmul %111, %12, %cst_43 {dimension_numbers = #tpu.dot_dimension_numbers<[1], [0], [0], [1], [0, 0, 1, 1], [], []>} : vector<8x128xf32>, vector<128x512xf32>, vector<8x512xf32> -> vector<8x512xf32>
    %cst_44 = arith.constant dense<0.000000e+00> : vector<8x512xf32>
    %113 = tpu.matmul %79, %13, %cst_44 {dimension_numbers = #tpu.dot_dimension_numbers<[1], [0], [0], [1], [0, 0, 1, 1], [], []>} : vector<8x128xf32>, vector<128x512xf32>, vector<8x512xf32> -> vector<8x512xf32>
    %114 = arith.addf %112, %113 : vector<8x512xf32>
    %115 = arith.addf %114, %16 : vector<8x512xf32>
    %116 = vector.extract_strided_slice %115 {offsets = [0, 0], sizes = [8, 128], strides = [1, 1]} : vector<8x512xf32> to vector<8x128xf32>
    %117 = arith.negf %116 : vector<8x128xf32>
    %118 = math.exp %117 : vector<8x128xf32>
    %cst_45 = arith.constant 1.000000e+00 : f32
    %119 = vector.broadcast %cst_45 : f32 to vector<8x128xf32>
    %120 = arith.addf %119, %118 : vector<8x128xf32>
    %121 = arith.divf %119, %120 : vector<8x128xf32>
    %122 = vector.extract_strided_slice %115 {offsets = [0, 128], sizes = [8, 128], strides = [1, 1]} : vector<8x512xf32> to vector<8x128xf32>
    %123 = arith.negf %122 : vector<8x128xf32>
    %124 = math.exp %123 : vector<8x128xf32>
    %cst_46 = arith.constant 1.000000e+00 : f32
    %125 = vector.broadcast %cst_46 : f32 to vector<8x128xf32>
    %126 = arith.addf %125, %124 : vector<8x128xf32>
    %127 = arith.divf %125, %126 : vector<8x128xf32>
    %128 = vector.extract_strided_slice %115 {offsets = [0, 256], sizes = [8, 128], strides = [1, 1]} : vector<8x512xf32> to vector<8x128xf32>
    %129 = math.tanh %128 : vector<8x128xf32>
    %130 = vector.extract_strided_slice %115 {offsets = [0, 384], sizes = [8, 128], strides = [1, 1]} : vector<8x512xf32> to vector<8x128xf32>
    %131 = arith.negf %130 : vector<8x128xf32>
    %132 = math.exp %131 : vector<8x128xf32>
    %cst_47 = arith.constant 1.000000e+00 : f32
    %133 = vector.broadcast %cst_47 : f32 to vector<8x128xf32>
    %134 = arith.addf %133, %132 : vector<8x128xf32>
    %135 = arith.divf %133, %134 : vector<8x128xf32>
    %136 = arith.mulf %127, %77 : vector<8x128xf32>
    %137 = arith.mulf %121, %129 : vector<8x128xf32>
    %138 = arith.addf %136, %137 : vector<8x128xf32>
    %139 = math.tanh %138 : vector<8x128xf32>
    %140 = arith.mulf %135, %139 : vector<8x128xf32>
    %141 = arith.index_cast %82 : i32 to index
    %c0_48 = arith.constant 0 : index
    %142 = vector.load %arg15[%141, %c0_48] : memref<64x128xf32, #tpu.memory_space<vmem>>, vector<8x128xf32>
    tpu.vector_store %arg15[%141, %c0_48], %140 {strides = array<i32>} : memref<64x128xf32, #tpu.memory_space<vmem>>, vector<8x128xf32>,
    %c2_i32 = arith.constant 2 : i32
    %c8_i32_49 = arith.constant 8 : i32
    %143 = arith.muli %c2_i32, %c8_i32_49 : i32
    %144 = arith.index_cast %143 : i32 to index
    %c0_50 = arith.constant 0 : index
    %145 = vector.load %arg14[%144, %c0_50] : memref<64x512xf32, #tpu.memory_space<vmem>>, vector<8x512xf32>
    %cst_51 = arith.constant dense<0.000000e+00> : vector<8x512xf32>
    %146 = tpu.matmul %111, %11, %cst_51 {dimension_numbers = #tpu.dot_dimension_numbers<[1], [0], [0], [1], [0, 0, 1, 1], [], []>} : vector<8x128xf32>, vector<128x512xf32>, vector<8x512xf32> -> vector<8x512xf32>
    %147 = arith.addf %145, %146 : vector<8x512xf32>
    %148 = vector.extract_strided_slice %147 {offsets = [0, 0], sizes = [8, 128], strides = [1, 1]} : vector<8x512xf32> to vector<8x128xf32>
    %149 = arith.negf %148 : vector<8x128xf32>
    %150 = math.exp %149 : vector<8x128xf32>
    %cst_52 = arith.constant 1.000000e+00 : f32
    %151 = vector.broadcast %cst_52 : f32 to vector<8x128xf32>
    %152 = arith.addf %151, %150 : vector<8x128xf32>
    %153 = arith.divf %151, %152 : vector<8x128xf32>
    %154 = vector.extract_strided_slice %147 {offsets = [0, 128], sizes = [8, 128], strides = [1, 1]} : vector<8x512xf32> to vector<8x128xf32>
    %155 = arith.negf %154 : vector<8x128xf32>
    %156 = math.exp %155 : vector<8x128xf32>
    %cst_53 = arith.constant 1.000000e+00 : f32
    %157 = vector.broadcast %cst_53 : f32 to vector<8x128xf32>
    %158 = arith.addf %157, %156 : vector<8x128xf32>
    %159 = arith.divf %157, %158 : vector<8x128xf32>
    %160 = vector.extract_strided_slice %147 {offsets = [0, 256], sizes = [8, 128], strides = [1, 1]} : vector<8x512xf32> to vector<8x128xf32>
    %161 = math.tanh %160 : vector<8x128xf32>
    %162 = vector.extract_strided_slice %147 {offsets = [0, 384], sizes = [8, 128], strides = [1, 1]} : vector<8x512xf32> to vector<8x128xf32>
    %163 = arith.negf %162 : vector<8x128xf32>
    %164 = math.exp %163 : vector<8x128xf32>
    %cst_54 = arith.constant 1.000000e+00 : f32
    %165 = vector.broadcast %cst_54 : f32 to vector<8x128xf32>
    %166 = arith.addf %165, %164 : vector<8x128xf32>
    %167 = arith.divf %165, %166 : vector<8x128xf32>
    %168 = arith.mulf %159, %109 : vector<8x128xf32>
    %169 = arith.mulf %153, %161 : vector<8x128xf32>
    %170 = arith.addf %168, %169 : vector<8x128xf32>
    %171 = math.tanh %170 : vector<8x128xf32>
    %172 = arith.mulf %167, %171 : vector<8x128xf32>
    %cst_55 = arith.constant dense<0.000000e+00> : vector<8x512xf32>
    %173 = tpu.matmul %172, %12, %cst_55 {dimension_numbers = #tpu.dot_dimension_numbers<[1], [0], [0], [1], [0, 0, 1, 1], [], []>} : vector<8x128xf32>, vector<128x512xf32>, vector<8x512xf32> -> vector<8x512xf32>
    %cst_56 = arith.constant dense<0.000000e+00> : vector<8x512xf32>
    %174 = tpu.matmul %140, %13, %cst_56 {dimension_numbers = #tpu.dot_dimension_numbers<[1], [0], [0], [1], [0, 0, 1, 1], [], []>} : vector<8x128xf32>, vector<128x512xf32>, vector<8x512xf32> -> vector<8x512xf32>
    %175 = arith.addf %173, %174 : vector<8x512xf32>
    %176 = arith.addf %175, %16 : vector<8x512xf32>
    %177 = vector.extract_strided_slice %176 {offsets = [0, 0], sizes = [8, 128], strides = [1, 1]} : vector<8x512xf32> to vector<8x128xf32>
    %178 = arith.negf %177 : vector<8x128xf32>
    %179 = math.exp %178 : vector<8x128xf32>
    %cst_57 = arith.constant 1.000000e+00 : f32
    %180 = vector.broadcast %cst_57 : f32 to vector<8x128xf32>
    %181 = arith.addf %180, %179 : vector<8x128xf32>
    %182 = arith.divf %180, %181 : vector<8x128xf32>
    %183 = vector.extract_strided_slice %176 {offsets = [0, 128], sizes = [8, 128], strides = [1, 1]} : vector<8x512xf32> to vector<8x128xf32>
    %184 = arith.negf %183 : vector<8x128xf32>
    %185 = math.exp %184 : vector<8x128xf32>
    %cst_58 = arith.constant 1.000000e+00 : f32
    %186 = vector.broadcast %cst_58 : f32 to vector<8x128xf32>
    %187 = arith.addf %186, %185 : vector<8x128xf32>
    %188 = arith.divf %186, %187 : vector<8x128xf32>
    %189 = vector.extract_strided_slice %176 {offsets = [0, 256], sizes = [8, 128], strides = [1, 1]} : vector<8x512xf32> to vector<8x128xf32>
    %190 = math.tanh %189 : vector<8x128xf32>
    %191 = vector.extract_strided_slice %176 {offsets = [0, 384], sizes = [8, 128], strides = [1, 1]} : vector<8x512xf32> to vector<8x128xf32>
    %192 = arith.negf %191 : vector<8x128xf32>
    %193 = math.exp %192 : vector<8x128xf32>
    %cst_59 = arith.constant 1.000000e+00 : f32
    %194 = vector.broadcast %cst_59 : f32 to vector<8x128xf32>
    %195 = arith.addf %194, %193 : vector<8x128xf32>
    %196 = arith.divf %194, %195 : vector<8x128xf32>
    %197 = arith.mulf %188, %138 : vector<8x128xf32>
    %198 = arith.mulf %182, %190 : vector<8x128xf32>
    %199 = arith.addf %197, %198 : vector<8x128xf32>
    %200 = math.tanh %199 : vector<8x128xf32>
    %201 = arith.mulf %196, %200 : vector<8x128xf32>
    %202 = arith.index_cast %143 : i32 to index
    %c0_60 = arith.constant 0 : index
    %203 = vector.load %arg15[%202, %c0_60] : memref<64x128xf32, #tpu.memory_space<vmem>>, vector<8x128xf32>
    tpu.vector_store %arg15[%202, %c0_60], %201 {strides = array<i32>} : memref<64x128xf32, #tpu.memory_space<vmem>>, vector<8x128xf32>,
    %c3_i32 = arith.constant 3 : i32
    %c8_i32_61 = arith.constant 8 : i32
    %204 = arith.muli %c3_i32, %c8_i32_61 : i32
    %205 = arith.index_cast %204 : i32 to index
    %c0_62 = arith.constant 0 : index
    %206 = vector.load %arg14[%205, %c0_62] : memref<64x512xf32, #tpu.memory_space<vmem>>, vector<8x512xf32>
    %cst_63 = arith.constant dense<0.000000e+00> : vector<8x512xf32>
    %207 = tpu.matmul %172, %11, %cst_63 {dimension_numbers = #tpu.dot_dimension_numbers<[1], [0], [0], [1], [0, 0, 1, 1], [], []>} : vector<8x128xf32>, vector<128x512xf32>, vector<8x512xf32> -> vector<8x512xf32>
    %208 = arith.addf %206, %207 : vector<8x512xf32>
    %209 = vector.extract_strided_slice %208 {offsets = [0, 0], sizes = [8, 128], strides = [1, 1]} : vector<8x512xf32> to vector<8x128xf32>
    %210 = arith.negf %209 : vector<8x128xf32>
    %211 = math.exp %210 : vector<8x128xf32>
    %cst_64 = arith.constant 1.000000e+00 : f32
    %212 = vector.broadcast %cst_64 : f32 to vector<8x128xf32>
    %213 = arith.addf %212, %211 : vector<8x128xf32>
    %214 = arith.divf %212, %213 : vector<8x128xf32>
    %215 = vector.extract_strided_slice %208 {offsets = [0, 128], sizes = [8, 128], strides = [1, 1]} : vector<8x512xf32> to vector<8x128xf32>
    %216 = arith.negf %215 : vector<8x128xf32>
    %217 = math.exp %216 : vector<8x128xf32>
    %cst_65 = arith.constant 1.000000e+00 : f32
    %218 = vector.broadcast %cst_65 : f32 to vector<8x128xf32>
    %219 = arith.addf %218, %217 : vector<8x128xf32>
    %220 = arith.divf %218, %219 : vector<8x128xf32>
    %221 = vector.extract_strided_slice %208 {offsets = [0, 256], sizes = [8, 128], strides = [1, 1]} : vector<8x512xf32> to vector<8x128xf32>
    %222 = math.tanh %221 : vector<8x128xf32>
    %223 = vector.extract_strided_slice %208 {offsets = [0, 384], sizes = [8, 128], strides = [1, 1]} : vector<8x512xf32> to vector<8x128xf32>
    %224 = arith.negf %223 : vector<8x128xf32>
    %225 = math.exp %224 : vector<8x128xf32>
    %cst_66 = arith.constant 1.000000e+00 : f32
    %226 = vector.broadcast %cst_66 : f32 to vector<8x128xf32>
    %227 = arith.addf %226, %225 : vector<8x128xf32>
    %228 = arith.divf %226, %227 : vector<8x128xf32>
    %229 = arith.mulf %220, %170 : vector<8x128xf32>
    %230 = arith.mulf %214, %222 : vector<8x128xf32>
    %231 = arith.addf %229, %230 : vector<8x128xf32>
    %232 = math.tanh %231 : vector<8x128xf32>
    %233 = arith.mulf %228, %232 : vector<8x128xf32>
    %cst_67 = arith.constant dense<0.000000e+00> : vector<8x512xf32>
    %234 = tpu.matmul %233, %12, %cst_67 {dimension_numbers = #tpu.dot_dimension_numbers<[1], [0], [0], [1], [0, 0, 1, 1], [], []>} : vector<8x128xf32>, vector<128x512xf32>, vector<8x512xf32> -> vector<8x512xf32>
    %cst_68 = arith.constant dense<0.000000e+00> : vector<8x512xf32>
    %235 = tpu.matmul %201, %13, %cst_68 {dimension_numbers = #tpu.dot_dimension_numbers<[1], [0], [0], [1], [0, 0, 1, 1], [], []>} : vector<8x128xf32>, vector<128x512xf32>, vector<8x512xf32> -> vector<8x512xf32>
    %236 = arith.addf %234, %235 : vector<8x512xf32>
    %237 = arith.addf %236, %16 : vector<8x512xf32>
    %238 = vector.extract_strided_slice %237 {offsets = [0, 0], sizes = [8, 128], strides = [1, 1]} : vector<8x512xf32> to vector<8x128xf32>
    %239 = arith.negf %238 : vector<8x128xf32>
    %240 = math.exp %239 : vector<8x128xf32>
    %cst_69 = arith.constant 1.000000e+00 : f32
    %241 = vector.broadcast %cst_69 : f32 to vector<8x128xf32>
    %242 = arith.addf %241, %240 : vector<8x128xf32>
    %243 = arith.divf %241, %242 : vector<8x128xf32>
    %244 = vector.extract_strided_slice %237 {offsets = [0, 128], sizes = [8, 128], strides = [1, 1]} : vector<8x512xf32> to vector<8x128xf32>
    %245 = arith.negf %244 : vector<8x128xf32>
    %246 = math.exp %245 : vector<8x128xf32>
    %cst_70 = arith.constant 1.000000e+00 : f32
    %247 = vector.broadcast %cst_70 : f32 to vector<8x128xf32>
    %248 = arith.addf %247, %246 : vector<8x128xf32>
    %249 = arith.divf %247, %248 : vector<8x128xf32>
    %250 = vector.extract_strided_slice %237 {offsets = [0, 256], sizes = [8, 128], strides = [1, 1]} : vector<8x512xf32> to vector<8x128xf32>
    %251 = math.tanh %250 : vector<8x128xf32>
    %252 = vector.extract_strided_slice %237 {offsets = [0, 384], sizes = [8, 128], strides = [1, 1]} : vector<8x512xf32> to vector<8x128xf32>
    %253 = arith.negf %252 : vector<8x128xf32>
    %254 = math.exp %253 : vector<8x128xf32>
    %cst_71 = arith.constant 1.000000e+00 : f32
    %255 = vector.broadcast %cst_71 : f32 to vector<8x128xf32>
    %256 = arith.addf %255, %254 : vector<8x128xf32>
    %257 = arith.divf %255, %256 : vector<8x128xf32>
    %258 = arith.mulf %249, %199 : vector<8x128xf32>
    %259 = arith.mulf %243, %251 : vector<8x128xf32>
    %260 = arith.addf %258, %259 : vector<8x128xf32>
    %261 = math.tanh %260 : vector<8x128xf32>
    %262 = arith.mulf %257, %261 : vector<8x128xf32>
    %263 = arith.index_cast %204 : i32 to index
    %c0_72 = arith.constant 0 : index
    %264 = vector.load %arg15[%263, %c0_72] : memref<64x128xf32, #tpu.memory_space<vmem>>, vector<8x128xf32>
    tpu.vector_store %arg15[%263, %c0_72], %262 {strides = array<i32>} : memref<64x128xf32, #tpu.memory_space<vmem>>, vector<8x128xf32>,
    %c4_i32 = arith.constant 4 : i32
    %c8_i32_73 = arith.constant 8 : i32
    %265 = arith.muli %c4_i32, %c8_i32_73 : i32
    %266 = arith.index_cast %265 : i32 to index
    %c0_74 = arith.constant 0 : index
    %267 = vector.load %arg14[%266, %c0_74] : memref<64x512xf32, #tpu.memory_space<vmem>>, vector<8x512xf32>
    %cst_75 = arith.constant dense<0.000000e+00> : vector<8x512xf32>
    %268 = tpu.matmul %233, %11, %cst_75 {dimension_numbers = #tpu.dot_dimension_numbers<[1], [0], [0], [1], [0, 0, 1, 1], [], []>} : vector<8x128xf32>, vector<128x512xf32>, vector<8x512xf32> -> vector<8x512xf32>
    %269 = arith.addf %267, %268 : vector<8x512xf32>
    %270 = vector.extract_strided_slice %269 {offsets = [0, 0], sizes = [8, 128], strides = [1, 1]} : vector<8x512xf32> to vector<8x128xf32>
    %271 = arith.negf %270 : vector<8x128xf32>
    %272 = math.exp %271 : vector<8x128xf32>
    %cst_76 = arith.constant 1.000000e+00 : f32
    %273 = vector.broadcast %cst_76 : f32 to vector<8x128xf32>
    %274 = arith.addf %273, %272 : vector<8x128xf32>
    %275 = arith.divf %273, %274 : vector<8x128xf32>
    %276 = vector.extract_strided_slice %269 {offsets = [0, 128], sizes = [8, 128], strides = [1, 1]} : vector<8x512xf32> to vector<8x128xf32>
    %277 = arith.negf %276 : vector<8x128xf32>
    %278 = math.exp %277 : vector<8x128xf32>
    %cst_77 = arith.constant 1.000000e+00 : f32
    %279 = vector.broadcast %cst_77 : f32 to vector<8x128xf32>
    %280 = arith.addf %279, %278 : vector<8x128xf32>
    %281 = arith.divf %279, %280 : vector<8x128xf32>
    %282 = vector.extract_strided_slice %269 {offsets = [0, 256], sizes = [8, 128], strides = [1, 1]} : vector<8x512xf32> to vector<8x128xf32>
    %283 = math.tanh %282 : vector<8x128xf32>
    %284 = vector.extract_strided_slice %269 {offsets = [0, 384], sizes = [8, 128], strides = [1, 1]} : vector<8x512xf32> to vector<8x128xf32>
    %285 = arith.negf %284 : vector<8x128xf32>
    %286 = math.exp %285 : vector<8x128xf32>
    %cst_78 = arith.constant 1.000000e+00 : f32
    %287 = vector.broadcast %cst_78 : f32 to vector<8x128xf32>
    %288 = arith.addf %287, %286 : vector<8x128xf32>
    %289 = arith.divf %287, %288 : vector<8x128xf32>
    %290 = arith.mulf %281, %231 : vector<8x128xf32>
    %291 = arith.mulf %275, %283 : vector<8x128xf32>
    %292 = arith.addf %290, %291 : vector<8x128xf32>
    %293 = math.tanh %292 : vector<8x128xf32>
    %294 = arith.mulf %289, %293 : vector<8x128xf32>
    %cst_79 = arith.constant dense<0.000000e+00> : vector<8x512xf32>
    %295 = tpu.matmul %294, %12, %cst_79 {dimension_numbers = #tpu.dot_dimension_numbers<[1], [0], [0], [1], [0, 0, 1, 1], [], []>} : vector<8x128xf32>, vector<128x512xf32>, vector<8x512xf32> -> vector<8x512xf32>
    %cst_80 = arith.constant dense<0.000000e+00> : vector<8x512xf32>
    %296 = tpu.matmul %262, %13, %cst_80 {dimension_numbers = #tpu.dot_dimension_numbers<[1], [0], [0], [1], [0, 0, 1, 1], [], []>} : vector<8x128xf32>, vector<128x512xf32>, vector<8x512xf32> -> vector<8x512xf32>
    %297 = arith.addf %295, %296 : vector<8x512xf32>
    %298 = arith.addf %297, %16 : vector<8x512xf32>
    %299 = vector.extract_strided_slice %298 {offsets = [0, 0], sizes = [8, 128], strides = [1, 1]} : vector<8x512xf32> to vector<8x128xf32>
    %300 = arith.negf %299 : vector<8x128xf32>
    %301 = math.exp %300 : vector<8x128xf32>
    %cst_81 = arith.constant 1.000000e+00 : f32
    %302 = vector.broadcast %cst_81 : f32 to vector<8x128xf32>
    %303 = arith.addf %302, %301 : vector<8x128xf32>
    %304 = arith.divf %302, %303 : vector<8x128xf32>
    %305 = vector.extract_strided_slice %298 {offsets = [0, 128], sizes = [8, 128], strides = [1, 1]} : vector<8x512xf32> to vector<8x128xf32>
    %306 = arith.negf %305 : vector<8x128xf32>
    %307 = math.exp %306 : vector<8x128xf32>
    %cst_82 = arith.constant 1.000000e+00 : f32
    %308 = vector.broadcast %cst_82 : f32 to vector<8x128xf32>
    %309 = arith.addf %308, %307 : vector<8x128xf32>
    %310 = arith.divf %308, %309 : vector<8x128xf32>
    %311 = vector.extract_strided_slice %298 {offsets = [0, 256], sizes = [8, 128], strides = [1, 1]} : vector<8x512xf32> to vector<8x128xf32>
    %312 = math.tanh %311 : vector<8x128xf32>
    %313 = vector.extract_strided_slice %298 {offsets = [0, 384], sizes = [8, 128], strides = [1, 1]} : vector<8x512xf32> to vector<8x128xf32>
    %314 = arith.negf %313 : vector<8x128xf32>
    %315 = math.exp %314 : vector<8x128xf32>
    %cst_83 = arith.constant 1.000000e+00 : f32
    %316 = vector.broadcast %cst_83 : f32 to vector<8x128xf32>
    %317 = arith.addf %316, %315 : vector<8x128xf32>
    %318 = arith.divf %316, %317 : vector<8x128xf32>
    %319 = arith.mulf %310, %260 : vector<8x128xf32>
    %320 = arith.mulf %304, %312 : vector<8x128xf32>
    %321 = arith.addf %319, %320 : vector<8x128xf32>
    %322 = math.tanh %321 : vector<8x128xf32>
    %323 = arith.mulf %318, %322 : vector<8x128xf32>
    %324 = arith.index_cast %265 : i32 to index
    %c0_84 = arith.constant 0 : index
    %325 = vector.load %arg15[%324, %c0_84] : memref<64x128xf32, #tpu.memory_space<vmem>>, vector<8x128xf32>
    tpu.vector_store %arg15[%324, %c0_84], %323 {strides = array<i32>} : memref<64x128xf32, #tpu.memory_space<vmem>>, vector<8x128xf32>,
    %c5_i32 = arith.constant 5 : i32
    %c8_i32_85 = arith.constant 8 : i32
    %326 = arith.muli %c5_i32, %c8_i32_85 : i32
    %327 = arith.index_cast %326 : i32 to index
    %c0_86 = arith.constant 0 : index
    %328 = vector.load %arg14[%327, %c0_86] : memref<64x512xf32, #tpu.memory_space<vmem>>, vector<8x512xf32>
    %cst_87 = arith.constant dense<0.000000e+00> : vector<8x512xf32>
    %329 = tpu.matmul %294, %11, %cst_87 {dimension_numbers = #tpu.dot_dimension_numbers<[1], [0], [0], [1], [0, 0, 1, 1], [], []>} : vector<8x128xf32>, vector<128x512xf32>, vector<8x512xf32> -> vector<8x512xf32>
    %330 = arith.addf %328, %329 : vector<8x512xf32>
    %331 = vector.extract_strided_slice %330 {offsets = [0, 0], sizes = [8, 128], strides = [1, 1]} : vector<8x512xf32> to vector<8x128xf32>
    %332 = arith.negf %331 : vector<8x128xf32>
    %333 = math.exp %332 : vector<8x128xf32>
    %cst_88 = arith.constant 1.000000e+00 : f32
    %334 = vector.broadcast %cst_88 : f32 to vector<8x128xf32>
    %335 = arith.addf %334, %333 : vector<8x128xf32>
    %336 = arith.divf %334, %335 : vector<8x128xf32>
    %337 = vector.extract_strided_slice %330 {offsets = [0, 128], sizes = [8, 128], strides = [1, 1]} : vector<8x512xf32> to vector<8x128xf32>
    %338 = arith.negf %337 : vector<8x128xf32>
    %339 = math.exp %338 : vector<8x128xf32>
    %cst_89 = arith.constant 1.000000e+00 : f32
    %340 = vector.broadcast %cst_89 : f32 to vector<8x128xf32>
    %341 = arith.addf %340, %339 : vector<8x128xf32>
    %342 = arith.divf %340, %341 : vector<8x128xf32>
    %343 = vector.extract_strided_slice %330 {offsets = [0, 256], sizes = [8, 128], strides = [1, 1]} : vector<8x512xf32> to vector<8x128xf32>
    %344 = math.tanh %343 : vector<8x128xf32>
    %345 = vector.extract_strided_slice %330 {offsets = [0, 384], sizes = [8, 128], strides = [1, 1]} : vector<8x512xf32> to vector<8x128xf32>
    %346 = arith.negf %345 : vector<8x128xf32>
    %347 = math.exp %346 : vector<8x128xf32>
    %cst_90 = arith.constant 1.000000e+00 : f32
    %348 = vector.broadcast %cst_90 : f32 to vector<8x128xf32>
    %349 = arith.addf %348, %347 : vector<8x128xf32>
    %350 = arith.divf %348, %349 : vector<8x128xf32>
    %351 = arith.mulf %342, %292 : vector<8x128xf32>
    %352 = arith.mulf %336, %344 : vector<8x128xf32>
    %353 = arith.addf %351, %352 : vector<8x128xf32>
    %354 = math.tanh %353 : vector<8x128xf32>
    %355 = arith.mulf %350, %354 : vector<8x128xf32>
    %cst_91 = arith.constant dense<0.000000e+00> : vector<8x512xf32>
    %356 = tpu.matmul %355, %12, %cst_91 {dimension_numbers = #tpu.dot_dimension_numbers<[1], [0], [0], [1], [0, 0, 1, 1], [], []>} : vector<8x128xf32>, vector<128x512xf32>, vector<8x512xf32> -> vector<8x512xf32>
    %cst_92 = arith.constant dense<0.000000e+00> : vector<8x512xf32>
    %357 = tpu.matmul %323, %13, %cst_92 {dimension_numbers = #tpu.dot_dimension_numbers<[1], [0], [0], [1], [0, 0, 1, 1], [], []>} : vector<8x128xf32>, vector<128x512xf32>, vector<8x512xf32> -> vector<8x512xf32>
    %358 = arith.addf %356, %357 : vector<8x512xf32>
    %359 = arith.addf %358, %16 : vector<8x512xf32>
    %360 = vector.extract_strided_slice %359 {offsets = [0, 0], sizes = [8, 128], strides = [1, 1]} : vector<8x512xf32> to vector<8x128xf32>
    %361 = arith.negf %360 : vector<8x128xf32>
    %362 = math.exp %361 : vector<8x128xf32>
    %cst_93 = arith.constant 1.000000e+00 : f32
    %363 = vector.broadcast %cst_93 : f32 to vector<8x128xf32>
    %364 = arith.addf %363, %362 : vector<8x128xf32>
    %365 = arith.divf %363, %364 : vector<8x128xf32>
    %366 = vector.extract_strided_slice %359 {offsets = [0, 128], sizes = [8, 128], strides = [1, 1]} : vector<8x512xf32> to vector<8x128xf32>
    %367 = arith.negf %366 : vector<8x128xf32>
    %368 = math.exp %367 : vector<8x128xf32>
    %cst_94 = arith.constant 1.000000e+00 : f32
    %369 = vector.broadcast %cst_94 : f32 to vector<8x128xf32>
    %370 = arith.addf %369, %368 : vector<8x128xf32>
    %371 = arith.divf %369, %370 : vector<8x128xf32>
    %372 = vector.extract_strided_slice %359 {offsets = [0, 256], sizes = [8, 128], strides = [1, 1]} : vector<8x512xf32> to vector<8x128xf32>
    %373 = math.tanh %372 : vector<8x128xf32>
    %374 = vector.extract_strided_slice %359 {offsets = [0, 384], sizes = [8, 128], strides = [1, 1]} : vector<8x512xf32> to vector<8x128xf32>
    %375 = arith.negf %374 : vector<8x128xf32>
    %376 = math.exp %375 : vector<8x128xf32>
    %cst_95 = arith.constant 1.000000e+00 : f32
    %377 = vector.broadcast %cst_95 : f32 to vector<8x128xf32>
    %378 = arith.addf %377, %376 : vector<8x128xf32>
    %379 = arith.divf %377, %378 : vector<8x128xf32>
    %380 = arith.mulf %371, %321 : vector<8x128xf32>
    %381 = arith.mulf %365, %373 : vector<8x128xf32>
    %382 = arith.addf %380, %381 : vector<8x128xf32>
    %383 = math.tanh %382 : vector<8x128xf32>
    %384 = arith.mulf %379, %383 : vector<8x128xf32>
    %385 = arith.index_cast %326 : i32 to index
    %c0_96 = arith.constant 0 : index
    %386 = vector.load %arg15[%385, %c0_96] : memref<64x128xf32, #tpu.memory_space<vmem>>, vector<8x128xf32>
    tpu.vector_store %arg15[%385, %c0_96], %384 {strides = array<i32>} : memref<64x128xf32, #tpu.memory_space<vmem>>, vector<8x128xf32>,
    %c6_i32 = arith.constant 6 : i32
    %c8_i32_97 = arith.constant 8 : i32
    %387 = arith.muli %c6_i32, %c8_i32_97 : i32
    %388 = arith.index_cast %387 : i32 to index
    %c0_98 = arith.constant 0 : index
    %389 = vector.load %arg14[%388, %c0_98] : memref<64x512xf32, #tpu.memory_space<vmem>>, vector<8x512xf32>
    %cst_99 = arith.constant dense<0.000000e+00> : vector<8x512xf32>
    %390 = tpu.matmul %355, %11, %cst_99 {dimension_numbers = #tpu.dot_dimension_numbers<[1], [0], [0], [1], [0, 0, 1, 1], [], []>} : vector<8x128xf32>, vector<128x512xf32>, vector<8x512xf32> -> vector<8x512xf32>
    %391 = arith.addf %389, %390 : vector<8x512xf32>
    %392 = vector.extract_strided_slice %391 {offsets = [0, 0], sizes = [8, 128], strides = [1, 1]} : vector<8x512xf32> to vector<8x128xf32>
    %393 = arith.negf %392 : vector<8x128xf32>
    %394 = math.exp %393 : vector<8x128xf32>
    %cst_100 = arith.constant 1.000000e+00 : f32
    %395 = vector.broadcast %cst_100 : f32 to vector<8x128xf32>
    %396 = arith.addf %395, %394 : vector<8x128xf32>
    %397 = arith.divf %395, %396 : vector<8x128xf32>
    %398 = vector.extract_strided_slice %391 {offsets = [0, 128], sizes = [8, 128], strides = [1, 1]} : vector<8x512xf32> to vector<8x128xf32>
    %399 = arith.negf %398 : vector<8x128xf32>
    %400 = math.exp %399 : vector<8x128xf32>
    %cst_101 = arith.constant 1.000000e+00 : f32
    %401 = vector.broadcast %cst_101 : f32 to vector<8x128xf32>
    %402 = arith.addf %401, %400 : vector<8x128xf32>
    %403 = arith.divf %401, %402 : vector<8x128xf32>
    %404 = vector.extract_strided_slice %391 {offsets = [0, 256], sizes = [8, 128], strides = [1, 1]} : vector<8x512xf32> to vector<8x128xf32>
    %405 = math.tanh %404 : vector<8x128xf32>
    %406 = vector.extract_strided_slice %391 {offsets = [0, 384], sizes = [8, 128], strides = [1, 1]} : vector<8x512xf32> to vector<8x128xf32>
    %407 = arith.negf %406 : vector<8x128xf32>
    %408 = math.exp %407 : vector<8x128xf32>
    %cst_102 = arith.constant 1.000000e+00 : f32
    %409 = vector.broadcast %cst_102 : f32 to vector<8x128xf32>
    %410 = arith.addf %409, %408 : vector<8x128xf32>
    %411 = arith.divf %409, %410 : vector<8x128xf32>
    %412 = arith.mulf %403, %353 : vector<8x128xf32>
    %413 = arith.mulf %397, %405 : vector<8x128xf32>
    %414 = arith.addf %412, %413 : vector<8x128xf32>
    %415 = math.tanh %414 : vector<8x128xf32>
    %416 = arith.mulf %411, %415 : vector<8x128xf32>
    %cst_103 = arith.constant dense<0.000000e+00> : vector<8x512xf32>
    %417 = tpu.matmul %416, %12, %cst_103 {dimension_numbers = #tpu.dot_dimension_numbers<[1], [0], [0], [1], [0, 0, 1, 1], [], []>} : vector<8x128xf32>, vector<128x512xf32>, vector<8x512xf32> -> vector<8x512xf32>
    %cst_104 = arith.constant dense<0.000000e+00> : vector<8x512xf32>
    %418 = tpu.matmul %384, %13, %cst_104 {dimension_numbers = #tpu.dot_dimension_numbers<[1], [0], [0], [1], [0, 0, 1, 1], [], []>} : vector<8x128xf32>, vector<128x512xf32>, vector<8x512xf32> -> vector<8x512xf32>
    %419 = arith.addf %417, %418 : vector<8x512xf32>
    %420 = arith.addf %419, %16 : vector<8x512xf32>
    %421 = vector.extract_strided_slice %420 {offsets = [0, 0], sizes = [8, 128], strides = [1, 1]} : vector<8x512xf32> to vector<8x128xf32>
    %422 = arith.negf %421 : vector<8x128xf32>
    %423 = math.exp %422 : vector<8x128xf32>
    %cst_105 = arith.constant 1.000000e+00 : f32
    %424 = vector.broadcast %cst_105 : f32 to vector<8x128xf32>
    %425 = arith.addf %424, %423 : vector<8x128xf32>
    %426 = arith.divf %424, %425 : vector<8x128xf32>
    %427 = vector.extract_strided_slice %420 {offsets = [0, 128], sizes = [8, 128], strides = [1, 1]} : vector<8x512xf32> to vector<8x128xf32>
    %428 = arith.negf %427 : vector<8x128xf32>
    %429 = math.exp %428 : vector<8x128xf32>
    %cst_106 = arith.constant 1.000000e+00 : f32
    %430 = vector.broadcast %cst_106 : f32 to vector<8x128xf32>
    %431 = arith.addf %430, %429 : vector<8x128xf32>
    %432 = arith.divf %430, %431 : vector<8x128xf32>
    %433 = vector.extract_strided_slice %420 {offsets = [0, 256], sizes = [8, 128], strides = [1, 1]} : vector<8x512xf32> to vector<8x128xf32>
    %434 = math.tanh %433 : vector<8x128xf32>
    %435 = vector.extract_strided_slice %420 {offsets = [0, 384], sizes = [8, 128], strides = [1, 1]} : vector<8x512xf32> to vector<8x128xf32>
    %436 = arith.negf %435 : vector<8x128xf32>
    %437 = math.exp %436 : vector<8x128xf32>
    %cst_107 = arith.constant 1.000000e+00 : f32
    %438 = vector.broadcast %cst_107 : f32 to vector<8x128xf32>
    %439 = arith.addf %438, %437 : vector<8x128xf32>
    %440 = arith.divf %438, %439 : vector<8x128xf32>
    %441 = arith.mulf %432, %382 : vector<8x128xf32>
    %442 = arith.mulf %426, %434 : vector<8x128xf32>
    %443 = arith.addf %441, %442 : vector<8x128xf32>
    %444 = math.tanh %443 : vector<8x128xf32>
    %445 = arith.mulf %440, %444 : vector<8x128xf32>
    %446 = arith.index_cast %387 : i32 to index
    %c0_108 = arith.constant 0 : index
    %447 = vector.load %arg15[%446, %c0_108] : memref<64x128xf32, #tpu.memory_space<vmem>>, vector<8x128xf32>
    tpu.vector_store %arg15[%446, %c0_108], %445 {strides = array<i32>} : memref<64x128xf32, #tpu.memory_space<vmem>>, vector<8x128xf32>,
    %c7_i32 = arith.constant 7 : i32
    %c8_i32_109 = arith.constant 8 : i32
    %448 = arith.muli %c7_i32, %c8_i32_109 : i32
    %449 = arith.index_cast %448 : i32 to index
    %c0_110 = arith.constant 0 : index
    %450 = vector.load %arg14[%449, %c0_110] : memref<64x512xf32, #tpu.memory_space<vmem>>, vector<8x512xf32>
    %cst_111 = arith.constant dense<0.000000e+00> : vector<8x512xf32>
    %451 = tpu.matmul %416, %11, %cst_111 {dimension_numbers = #tpu.dot_dimension_numbers<[1], [0], [0], [1], [0, 0, 1, 1], [], []>} : vector<8x128xf32>, vector<128x512xf32>, vector<8x512xf32> -> vector<8x512xf32>
    %452 = arith.addf %450, %451 : vector<8x512xf32>
    %453 = vector.extract_strided_slice %452 {offsets = [0, 0], sizes = [8, 128], strides = [1, 1]} : vector<8x512xf32> to vector<8x128xf32>
    %454 = arith.negf %453 : vector<8x128xf32>
    %455 = math.exp %454 : vector<8x128xf32>
    %cst_112 = arith.constant 1.000000e+00 : f32
    %456 = vector.broadcast %cst_112 : f32 to vector<8x128xf32>
    %457 = arith.addf %456, %455 : vector<8x128xf32>
    %458 = arith.divf %456, %457 : vector<8x128xf32>
    %459 = vector.extract_strided_slice %452 {offsets = [0, 128], sizes = [8, 128], strides = [1, 1]} : vector<8x512xf32> to vector<8x128xf32>
    %460 = arith.negf %459 : vector<8x128xf32>
    %461 = math.exp %460 : vector<8x128xf32>
    %cst_113 = arith.constant 1.000000e+00 : f32
    %462 = vector.broadcast %cst_113 : f32 to vector<8x128xf32>
    %463 = arith.addf %462, %461 : vector<8x128xf32>
    %464 = arith.divf %462, %463 : vector<8x128xf32>
    %465 = vector.extract_strided_slice %452 {offsets = [0, 256], sizes = [8, 128], strides = [1, 1]} : vector<8x512xf32> to vector<8x128xf32>
    %466 = math.tanh %465 : vector<8x128xf32>
    %467 = vector.extract_strided_slice %452 {offsets = [0, 384], sizes = [8, 128], strides = [1, 1]} : vector<8x512xf32> to vector<8x128xf32>
    %468 = arith.negf %467 : vector<8x128xf32>
    %469 = math.exp %468 : vector<8x128xf32>
    %cst_114 = arith.constant 1.000000e+00 : f32
    %470 = vector.broadcast %cst_114 : f32 to vector<8x128xf32>
    %471 = arith.addf %470, %469 : vector<8x128xf32>
    %472 = arith.divf %470, %471 : vector<8x128xf32>
    %473 = arith.mulf %464, %414 : vector<8x128xf32>
    %474 = arith.mulf %458, %466 : vector<8x128xf32>
    %475 = arith.addf %473, %474 : vector<8x128xf32>
    %476 = math.tanh %475 : vector<8x128xf32>
    %477 = arith.mulf %472, %476 : vector<8x128xf32>
    %cst_115 = arith.constant dense<0.000000e+00> : vector<8x512xf32>
    %478 = tpu.matmul %477, %12, %cst_115 {dimension_numbers = #tpu.dot_dimension_numbers<[1], [0], [0], [1], [0, 0, 1, 1], [], []>} : vector<8x128xf32>, vector<128x512xf32>, vector<8x512xf32> -> vector<8x512xf32>
    %cst_116 = arith.constant dense<0.000000e+00> : vector<8x512xf32>
    %479 = tpu.matmul %445, %13, %cst_116 {dimension_numbers = #tpu.dot_dimension_numbers<[1], [0], [0], [1], [0, 0, 1, 1], [], []>} : vector<8x128xf32>, vector<128x512xf32>, vector<8x512xf32> -> vector<8x512xf32>
    %480 = arith.addf %478, %479 : vector<8x512xf32>
    %481 = arith.addf %480, %16 : vector<8x512xf32>
    %482 = vector.extract_strided_slice %481 {offsets = [0, 0], sizes = [8, 128], strides = [1, 1]} : vector<8x512xf32> to vector<8x128xf32>
    %483 = arith.negf %482 : vector<8x128xf32>
    %484 = math.exp %483 : vector<8x128xf32>
    %cst_117 = arith.constant 1.000000e+00 : f32
    %485 = vector.broadcast %cst_117 : f32 to vector<8x128xf32>
    %486 = arith.addf %485, %484 : vector<8x128xf32>
    %487 = arith.divf %485, %486 : vector<8x128xf32>
    %488 = vector.extract_strided_slice %481 {offsets = [0, 128], sizes = [8, 128], strides = [1, 1]} : vector<8x512xf32> to vector<8x128xf32>
    %489 = arith.negf %488 : vector<8x128xf32>
    %490 = math.exp %489 : vector<8x128xf32>
    %cst_118 = arith.constant 1.000000e+00 : f32
    %491 = vector.broadcast %cst_118 : f32 to vector<8x128xf32>
    %492 = arith.addf %491, %490 : vector<8x128xf32>
    %493 = arith.divf %491, %492 : vector<8x128xf32>
    %494 = vector.extract_strided_slice %481 {offsets = [0, 256], sizes = [8, 128], strides = [1, 1]} : vector<8x512xf32> to vector<8x128xf32>
    %495 = math.tanh %494 : vector<8x128xf32>
    %496 = vector.extract_strided_slice %481 {offsets = [0, 384], sizes = [8, 128], strides = [1, 1]} : vector<8x512xf32> to vector<8x128xf32>
    %497 = arith.negf %496 : vector<8x128xf32>
    %498 = math.exp %497 : vector<8x128xf32>
    %cst_119 = arith.constant 1.000000e+00 : f32
    %499 = vector.broadcast %cst_119 : f32 to vector<8x128xf32>
    %500 = arith.addf %499, %498 : vector<8x128xf32>
    %501 = arith.divf %499, %500 : vector<8x128xf32>
    %502 = arith.mulf %493, %443 : vector<8x128xf32>
    %503 = arith.mulf %487, %495 : vector<8x128xf32>
    %504 = arith.addf %502, %503 : vector<8x128xf32>
    %505 = math.tanh %504 : vector<8x128xf32>
    %506 = arith.mulf %501, %505 : vector<8x128xf32>
    %507 = arith.index_cast %448 : i32 to index
    %c0_120 = arith.constant 0 : index
    %508 = vector.load %arg15[%507, %c0_120] : memref<64x128xf32, #tpu.memory_space<vmem>>, vector<8x128xf32>
    tpu.vector_store %arg15[%507, %c0_120], %506 {strides = array<i32>} : memref<64x128xf32, #tpu.memory_space<vmem>>, vector<8x128xf32>,
    %c8_i32_121 = arith.constant 8 : i32
    %c0_122 = arith.constant 0 : index
    %c0_123 = arith.constant 0 : index
    %509 = vector.load %arg16[%c0_122, %c0_123] : memref<8x128xf32, #tpu.memory_space<vmem>>, vector<8x128xf32>
    tpu.vector_store %arg16[%c0_122, %c0_123], %477 {strides = array<i32>} : memref<8x128xf32, #tpu.memory_space<vmem>>, vector<8x128xf32>,
    %c0_124 = arith.constant 0 : index
    %c0_125 = arith.constant 0 : index
    %510 = vector.load %arg17[%c0_124, %c0_125] : memref<8x128xf32, #tpu.memory_space<vmem>>, vector<8x128xf32>
    tpu.vector_store %arg17[%c0_124, %c0_125], %475 {strides = array<i32>} : memref<8x128xf32, #tpu.memory_space<vmem>>, vector<8x128xf32>,
    %c0_126 = arith.constant 0 : index
    %c0_127 = arith.constant 0 : index
    %511 = vector.load %arg18[%c0_126, %c0_127] : memref<8x128xf32, #tpu.memory_space<vmem>>, vector<8x128xf32>
    tpu.vector_store %arg18[%c0_126, %c0_127], %506 {strides = array<i32>} : memref<8x128xf32, #tpu.memory_space<vmem>>, vector<8x128xf32>,
    %c0_128 = arith.constant 0 : index
    %c0_129 = arith.constant 0 : index
    %512 = vector.load %arg19[%c0_128, %c0_129] : memref<8x128xf32, #tpu.memory_space<vmem>>, vector<8x128xf32>
    tpu.vector_store %arg19[%c0_128, %c0_129], %504 {strides = array<i32>} : memref<8x128xf32, #tpu.memory_space<vmem>>, vector<8x128xf32>,
    %c0_130 = arith.constant 0 : index
    %c0_131 = arith.constant 0 : index
    %513 = vector.load %arg15[%c0_130, %c0_131] : memref<64x128xf32, #tpu.memory_space<vmem>>, vector<64x128xf32>
    %c0_132 = arith.constant 0 : index
    %c0_133 = arith.constant 0 : index
    %514 = vector.load %arg9[%c0_132, %c0_133] : memref<128x128xf32, #tpu.memory_space<vmem>>, vector<128x128xf32>
    %cst_134 = arith.constant dense<0.000000e+00> : vector<64x128xf32>
    %515 = tpu.matmul %513, %514, %cst_134 {dimension_numbers = #tpu.dot_dimension_numbers<[1], [0], [0], [1], [0, 0, 1, 1], [], []>} : vector<64x128xf32>, vector<128x128xf32>, vector<64x128xf32> -> vector<64x128xf32>
    %c0_135 = arith.constant 0 : index
    %c0_136 = arith.constant 0 : index
    %516 = vector.load %arg10[%c0_135, %c0_136] : memref<1x128xf32, #tpu.memory_space<vmem>>, vector<1x128xf32>
    %517 = vector.broadcast %516 : vector<1x128xf32> to vector<64x128xf32>
    %518 = arith.addf %515, %517 : vector<64x128xf32>
    %c0_137 = arith.constant 0 : index
    %c0_138 = arith.constant 0 : index
    %c0_139 = arith.constant 0 : index
    %519 = vector.load %arg11[%c0_137, %c0_138, %c0_139] : memref<1x64x128xf32, #tpu.memory_space<vmem>>, vector<1x64x128xf32>
    %520 = vector.shape_cast %519 : vector<1x64x128xf32> to vector<64x128xf32>
    %521 = vector.shape_cast %518 : vector<64x128xf32> to vector<1x64x128xf32>
    tpu.vector_store %arg11[%c0_137, %c0_138, %c0_139], %521 {strides = array<i32>} : memref<1x64x128xf32, #tpu.memory_space<vmem>>, vector<1x64x128xf32>,
    %c0_i32_140 = arith.constant 0 : i32
    %522 = arith.cmpi eq, %arg1, %c0_i32_140 : i32
    %523 = arith.extui %522 : i1 to i32
    %c0_i32_141 = arith.constant 0 : i32
    %524 = arith.cmpi ne, %523, %c0_i32_141 : i32
    scf.if %524 {
      %c0_142 = arith.constant 0 : index
      %c0_143 = arith.constant 0 : index
      %525 = vector.load %arg16[%c0_142, %c0_143] : memref<8x128xf32, #tpu.memory_space<vmem>>, vector<8x128xf32>
      %c0_144 = arith.constant 0 : index
      %c0_145 = arith.constant 0 : index
      %c0_146 = arith.constant 0 : index
      %526 = vector.load %arg12[%c0_144, %c0_145, %c0_146] : memref<2x8x128xf32, #tpu.memory_space<vmem>>, vector<1x8x128xf32>
      %527 = vector.shape_cast %526 : vector<1x8x128xf32> to vector<8x128xf32>
      %528 = vector.shape_cast %525 : vector<8x128xf32> to vector<1x8x128xf32>
      tpu.vector_store %arg12[%c0_144, %c0_145, %c0_146], %528 {strides = array<i32>} : memref<2x8x128xf32, #tpu.memory_space<vmem>>, vector<1x8x128xf32>,
      %c0_147 = arith.constant 0 : index
      %c0_148 = arith.constant 0 : index
      %529 = vector.load %arg18[%c0_147, %c0_148] : memref<8x128xf32, #tpu.memory_space<vmem>>, vector<8x128xf32>
      %c1 = arith.constant 1 : index
      %c0_149 = arith.constant 0 : index
      %c0_150 = arith.constant 0 : index
      %530 = vector.load %arg12[%c1, %c0_149, %c0_150] : memref<2x8x128xf32, #tpu.memory_space<vmem>>, vector<1x8x128xf32>
      %531 = vector.shape_cast %530 : vector<1x8x128xf32> to vector<8x128xf32>
      %532 = vector.shape_cast %529 : vector<8x128xf32> to vector<1x8x128xf32>
      tpu.vector_store %arg12[%c1, %c0_149, %c0_150], %532 {strides = array<i32>} : memref<2x8x128xf32, #tpu.memory_space<vmem>>, vector<1x8x128xf32>,
      %c0_151 = arith.constant 0 : index
      %c0_152 = arith.constant 0 : index
      %533 = vector.load %arg17[%c0_151, %c0_152] : memref<8x128xf32, #tpu.memory_space<vmem>>, vector<8x128xf32>
      %c0_153 = arith.constant 0 : index
      %c0_154 = arith.constant 0 : index
      %c0_155 = arith.constant 0 : index
      %534 = vector.load %arg13[%c0_153, %c0_154, %c0_155] : memref<2x8x128xf32, #tpu.memory_space<vmem>>, vector<1x8x128xf32>
      %535 = vector.shape_cast %534 : vector<1x8x128xf32> to vector<8x128xf32>
      %536 = vector.shape_cast %533 : vector<8x128xf32> to vector<1x8x128xf32>
      tpu.vector_store %arg13[%c0_153, %c0_154, %c0_155], %536 {strides = array<i32>} : memref<2x8x128xf32, #tpu.memory_space<vmem>>, vector<1x8x128xf32>,
      %c0_156 = arith.constant 0 : index
      %c0_157 = arith.constant 0 : index
      %537 = vector.load %arg19[%c0_156, %c0_157] : memref<8x128xf32, #tpu.memory_space<vmem>>, vector<8x128xf32>
      %c1_158 = arith.constant 1 : index
      %c0_159 = arith.constant 0 : index
      %c0_160 = arith.constant 0 : index
      %538 = vector.load %arg13[%c1_158, %c0_159, %c0_160] : memref<2x8x128xf32, #tpu.memory_space<vmem>>, vector<1x8x128xf32>
      %539 = vector.shape_cast %538 : vector<1x8x128xf32> to vector<8x128xf32>
      %540 = vector.shape_cast %537 : vector<8x128xf32> to vector<1x8x128xf32>
      tpu.vector_store %arg13[%c1_158, %c0_159, %c0_160], %540 {strides = array<i32>} : memref<2x8x128xf32, #tpu.memory_space<vmem>>, vector<1x8x128xf32>,
    } else {
    }
    return
  }
  func.func @transform_0(%arg0: i32, %arg1: i32) -> (i32, i32, i32) {
    %c0_i32 = arith.constant 0 : i32
    %c0_i32_0 = arith.constant 0 : i32
    return %arg0, %arg1, %c0_i32 : i32, i32, i32
  }
  func.func @transform_1(%arg0: i32, %arg1: i32) -> (i32, i32) {
    %c0_i32 = arith.constant 0 : i32
    %c0_i32_0 = arith.constant 0 : i32
    %c0_i32_1 = arith.constant 0 : i32
    return %c0_i32, %c0_i32_0 : i32, i32
  }
  func.func @transform_2(%arg0: i32, %arg1: i32) -> (i32, i32) {
    %c0_i32 = arith.constant 0 : i32
    %c0_i32_0 = arith.constant 0 : i32
    %c0_i32_1 = arith.constant 0 : i32
    return %c0_i32, %c0_i32_0 : i32, i32
  }
  func.func @transform_3(%arg0: i32, %arg1: i32) -> (i32, i32) {
    %c0_i32 = arith.constant 0 : i32
    %c0_i32_0 = arith.constant 0 : i32
    %c0_i32_1 = arith.constant 0 : i32
    return %c0_i32, %c0_i32_0 : i32, i32
  }
  func.func @transform_4(%arg0: i32, %arg1: i32) -> (i32, i32) {
    %c0_i32 = arith.constant 0 : i32
    %c0_i32_0 = arith.constant 0 : i32
    %c0_i32_1 = arith.constant 0 : i32
    return %c0_i32, %c0_i32_0 : i32, i32
  }
  func.func @transform_5(%arg0: i32, %arg1: i32) -> (i32, i32) {
    %c0_i32 = arith.constant 0 : i32
    %c0_i32_0 = arith.constant 0 : i32
    %c0_i32_1 = arith.constant 0 : i32
    return %c0_i32, %c0_i32_0 : i32, i32
  }
  func.func @transform_6(%arg0: i32, %arg1: i32) -> (i32, i32) {
    %c0_i32 = arith.constant 0 : i32
    %c0_i32_0 = arith.constant 0 : i32
    %c0_i32_1 = arith.constant 0 : i32
    return %c0_i32, %c0_i32_0 : i32, i32
  }
  func.func @transform_7(%arg0: i32, %arg1: i32) -> (i32, i32) {
    %c0_i32 = arith.constant 0 : i32
    %c0_i32_0 = arith.constant 0 : i32
    %c0_i32_1 = arith.constant 0 : i32
    return %c0_i32, %c0_i32_0 : i32, i32
  }
  func.func @transform_8(%arg0: i32, %arg1: i32) -> (i32, i32) {
    %c0_i32 = arith.constant 0 : i32
    %c0_i32_0 = arith.constant 0 : i32
    %c0_i32_1 = arith.constant 0 : i32
    return %c0_i32, %c0_i32_0 : i32, i32
  }
  func.func @transform_9(%arg0: i32, %arg1: i32) -> (i32, i32, i32) {
    %c0_i32 = arith.constant 0 : i32
    %c0_i32_0 = arith.constant 0 : i32
    return %arg0, %arg1, %c0_i32 : i32, i32, i32
  }
  func.func @transform_10(%arg0: i32, %arg1: i32) -> (i32, i32, i32) {
    %c0_i32 = arith.constant 0 : i32
    %c0_i32_0 = arith.constant 0 : i32
    %c0_i32_1 = arith.constant 0 : i32
    return %c0_i32, %arg0, %c0_i32_0 : i32, i32, i32
  }
  func.func @transform_11(%arg0: i32, %arg1: i32) -> (i32, i32, i32) {
    %c0_i32 = arith.constant 0 : i32
    %c0_i32_0 = arith.constant 0 : i32
    %c0_i32_1 = arith.constant 0 : i32
    return %c0_i32, %arg0, %c0_i32_0 : i32, i32, i32
  }
}

</mosaic_0001>

<bundles_post_ra>
// kernel: tpu_custom_call.1
= control target key start
LH: loop header
LB: loop body
LE: loop exit
PB: predicated region body
PF: predicated region fallthrough
CT: control target
= control target key end

     0   :  { %17 = vsyncpa [#allocation9], 0  ;;  %s8478_s0 = inlined_call_operand.vmem [shape: f32[1,64,16], index: 0, kind: input, shape index: {}]   ;;  %s8479_s1 = inlined_call_operand.vmem [shape: f32[16,512], index: 1, kind: input, shape index: {}]   ;;  %s8480_s2 = inlined_call_operand.hbm [shape: f32[128,512], index: 2, kind: input, shape index: {}]   ;;  %s8481_s3 = inlined_call_operand.vmem [shape: f32[1,512], index: 3, kind: input, shape index: {}]   ;;  %s8482_s4 = inlined_call_operand.hbm [shape: f32[128,512], index: 4, kind: input, shape index: {}]   ;;  %s8483_s5 = inlined_call_operand.hbm [shape: f32[128,512], index: 5, kind: input, shape index: {}]   ;;  %s8484_s6 = inlined_call_operand.vmem [shape: f32[1,512], index: 6, kind: input, shape index: {}]   ;;  %s8485_s7 = inlined_call_operand.hbm [shape: f32[128,128], index: 7, kind: input, shape index: {}]   ;;  %s8486_s8 = inlined_call_operand.vmem [shape: f32[1,128], index: 8, kind: input, shape index: {}]   ;;  %s8487_s9 = inlined_call_operand.hbm [shape: f32[1,64,128], index: 9, kind: output, shape index: {0}]   ;;  %s8488_s10 = inlined_call_operand.hbm [shape: f32[2,8,128], index: 10, kind: output, shape index: {1}]   ;;  %s8489_s11 = inlined_call_operand.hbm [shape: f32[2,8,128], index: 11, kind: output, shape index: {2}]  }
   0x1   :  { %18 = vsyncpa [#allocation12], 0 }
   0x2   :  { %19 = vsyncpa [#allocation15], 0 }
   0x3   :  { %20 = vsyncpa [#allocation10], 0 }
   0x4   :  { %21 = vsyncpa [#allocation18], 0  ;;  %s6983_s17 = smov [#allocation11]   ;;  %s6984_s19 = smov [#allocation8]  }
   0x5   :  { %s45_s18 = sshll.u32 %s6983_s17, 4  ;;  %s31_s20 = sshll.u32 %s6984_s19, 4  ;;  %s46_s18 = int_to_ptr.vmem [resolvable:$true] %s45_s18  ;;  %s7055_s20 = int_to_ptr.vmem [resolvable:$true] %s31_s20 }
   0x6   :  { %s6819_s23 = scalar_lea.hbm %s8482_s4, 8192 }
   0x7   :  { %p6820_p0 = scmp.ne.s32.totalorder %s8482_s4, %s6819_s23  ;;  %p6823_p1 = scmp.lt.u32.totalorder %s6819_s23, %s8482_s4 }
   0x9   :  { %p6825_p2 = pnand %p6823_p1, %p6820_p0 }
   0xb   :  { %6828 = shalt.err (!%p6825_p2)
}
   0xc   :  { %s6829_s28 = scalar_lea.vmem %s46_s18, 8192  ;;  %p6834_p4 = scmp.lt.s32.totalorder %s46_s18, %s46_s18 }
   0xd   :  { %p6830_p3 = scmp.ne.s32.totalorder %s46_s18, %s6829_s28  ;;  %p6835_p5 = scmp.lt.s32.totalorder %s6829_s28, %s6829_s28 }
   0xf   :  { %p6836_p6 = por %p6835_p5, %p6834_p4 }
  0x11   :  { %p6837_p7 = pnand %p6836_p6, %p6830_p3 }
  0x13   :  { %6840 = shalt.err (!%p6837_p7)
}
  0x14   :  { %s6985_s29 = smov 512   ;;  %s6986_s30 = smov 32  }
  0x15   :  { %51 = dma.hbm_to_vmem [thread:$0]  %s8482_s4, 8192, %s46_s18, [#allocation12], %s6985_s29, %s6985_s29, %s6986_s30  }
  0x16   :  { %s6841_s16 = scalar_lea.hbm %s8480_s2, 8192 }
  0x17   :  { %p6842_p8 = scmp.ne.s32.totalorder %s8480_s2, %s6841_s16  ;;  %p6845_p9 = scmp.lt.u32.totalorder %s6841_s16, %s8480_s2 }
  0x19   :  { %p6847_p10 = pnand %p6845_p9, %p6842_p8 }
  0x1b   :  { %6850 = shalt.err (!%p6847_p10)
}
  0x1c   :  { %s6851_s23 = scalar_lea.vmem %s7055_s20, 8192  ;;  %p6856_p12 = scmp.lt.s32.totalorder %s7055_s20, %s7055_s20 }
  0x1d   :  { %p6852_p11 = scmp.ne.s32.totalorder %s7055_s20, %s6851_s23  ;;  %p6857_p13 = scmp.lt.s32.totalorder %s6851_s23, %s6851_s23 }
  0x1f   :  { %p6858_p0 = por %p6857_p13, %p6856_p12 }
  0x21   :  { %p6859_p1 = pnand %p6858_p0, %p6852_p11 }
  0x23   :  { %6862 = shalt.err (!%p6859_p1)
}
  0x24   :  { %37 = dma.hbm_to_vmem [thread:$0]  %s8480_s2, 8192, %s7055_s20, [#allocation9], %s6985_s29, %s6985_s29, %s6986_s30  }
  0x25   :  { %s6987_s24 = smov [#allocation13]   ;;  %s6988_s26 = smov [#allocation14]  }
  0x26   :  { %s57_s25 = sshll.u32 %s6987_s24, 4  ;;  %s71_s27 = sshll.u32 %s6988_s26, 4  ;;  %s58_s25 = int_to_ptr.vmem [resolvable:$true] %s57_s25  ;;  %s7092_s27 = int_to_ptr.vmem [resolvable:$true] %s71_s27 }
  0x27   :  { %s6863_s13 = scalar_lea.hbm %s8483_s5, 8192 }
  0x28   :  { %p6864_p2 = scmp.ne.s32.totalorder %s8483_s5, %s6863_s13  ;;  %p6867_p3 = scmp.lt.u32.totalorder %s6863_s13, %s8483_s5 }
  0x2a   :  { %p6869_p4 = pnand %p6867_p3, %p6864_p2 }
  0x2c   :  { %6872 = shalt.err (!%p6869_p4)
}
  0x2d   :  { %s6873_s2 = scalar_lea.vmem %s58_s25, 8192  ;;  %p6878_p6 = scmp.lt.s32.totalorder %s58_s25, %s58_s25 }
  0x2e   :  { %p6874_p5 = scmp.ne.s32.totalorder %s58_s25, %s6873_s2  ;;  %p6879_p7 = scmp.lt.s32.totalorder %s6873_s2, %s6873_s2 }
  0x30   :  { %p6880_p8 = por %p6879_p7, %p6878_p6 }
  0x32   :  { %p6881_p9 = pnand %p6880_p8, %p6874_p5 }
  0x34   :  { %6884 = shalt.err (!%p6881_p9)
}
  0x35   :  { %63 = dma.hbm_to_vmem [thread:$0]  %s8483_s5, 8192, %s58_s25, [#allocation12], %s6985_s29, %s6985_s29, %s6986_s30  }
  0x36   :  { %s6885_s23 = scalar_lea.hbm %s8485_s7, 2048 }
  0x37   :  { %p6886_p10 = scmp.ne.s32.totalorder %s8485_s7, %s6885_s23  ;;  %p6889_p11 = scmp.lt.u32.totalorder %s6885_s23, %s8485_s7 }
  0x39   :  { %p6891_p12 = pnand %p6889_p11, %p6886_p10 }
  0x3b   :  { %6894 = shalt.err (!%p6891_p12)
}
  0x3c   :  { %s6895_s28 = scalar_lea.vmem %s7092_s27, 2048  ;;  %p6900_p0 = scmp.lt.s32.totalorder %s7092_s27, %s7092_s27 }
  0x3d   :  { %p6896_p13 = scmp.ne.s32.totalorder %s7092_s27, %s6895_s28  ;;  %p6901_p1 = scmp.lt.s32.totalorder %s6895_s28, %s6895_s28 }
  0x3f   :  { %p6902_p2 = por %p6901_p1, %p6900_p0 }
  0x41   :  { %p6903_p3 = pnand %p6902_p2, %p6896_p13 }
  0x43   :  { %6906 = shalt.err (!%p6903_p3)
}
  0x44   :  { %s6989_s5 = smov 128   ;;  %s6990_s29 = smov 8  }
  0x45   :  { %77 = dma.hbm_to_vmem [thread:$0]  %s8485_s7, 2048, %s7092_s27, [#allocation15], %s6989_s5, %s6989_s5, %s6990_s29  }
  0x46   :  { %6973 = dma.done.wait [#allocation9], 8192  }
  0x47   :  { %6974 = vsyncadd [#allocation9], 4294959104 }
  0x48   :  { %6975 = dma.done.wait [#allocation12], 16384  }
  0x49   :  { %6976 = vsyncadd [#allocation12], 4294950912 }
  0x4a   :  { %6977 = dma.done.wait [#allocation15], 2048  }
  0x4b   :  { %6978 = vsyncadd [#allocation15], 4294965248  ;;  %v8490_v0 = vmov 0.0   ;;  %v111_v1 = vld [vmem:[%s8479_s1 + $0x18] sm:$0xff]  ;;  %v110_v3 = vld [vmem:[%s8479_s1 + $0x10] sm:$0xff]  ;;  %vm138_vm0 = vcmask 130048  }
  0x4c   :  { %340 = vmatprep.mubr.f32.mxu1 %v8490_v0  ;;  %227 = vmatprep.mubr.f32.mxu0 %v8490_v0  ;;  %v115_v2 = vld [vmem:[%s8479_s1 + $0x38] sm:$0xff]  ;;  %v114_v5 = vld [vmem:[%s8479_s1 + $0x30] sm:$0xff]  ;;  %v422_v6 = vld [vmem:[#allocation8 + $0x8] sm:$0xff] }
  0x4d   :  { %v4883_v4 = vpack.c.bf16 %v115_v2, %v111_v1  ;;  %v4885_v7 = vpack.c.bf16 %v114_v5, %v110_v3  ;;  %v426_v8 = vld [vmem:[#allocation8 + $0x28] sm:$0xff]  ;;  %v421_v9 = vld [vmem:[#allocation8] sm:$0xff]  ;;  %v102_v28 = vld [vmem:[%s8478_s0 + $0x10] sm:$0xff] }
  0x4e   :  { %v425_v10 = vld [vmem:[#allocation8 + $0x20] sm:$0xff]  ;;  %v7143_v11 = vpack.c.bf16 %v426_v8, %v422_v6  ;;  %v430_v12 = vld [vmem:[#allocation8 + $0x48] sm:$0xff]  ;;  %v103_v41 = vld [vmem:[%s8478_s0 + $0x18] sm:$0xff] }
  0x4f   :  { %4884 = vmatprep.subr.bf16.mxu1 %v4883_v4  ;;  %v434_v13 = vld [vmem:[#allocation8 + $0x68] sm:$0xff]  ;;  %v100_v14 = vld [vmem:[%s8478_s0] sm:$0xff]  ;;  %v7148_v15 = vpack.c.bf16 %v425_v10, %v421_v9  ;;  %v106_v62 = vld [vmem:[%s8478_s0 + $0x30] sm:$0xff] }
  0x50   :  { %8691 = vst [vmem:[#allocation25_spill] sm:$0xff] %v7143_v11  ;;  %4886 = vmatpush1.bf16.msra.mxu1 %v4885_v7  ;;  %v7151_v16 = vpack.c.bf16 %v434_v13, %v430_v12  ;;  %v429_v17 = vld [vmem:[#allocation8 + $0x40] sm:$0xff]  ;;  %v438_v19 = vld [vmem:[#allocation8 + $0x88] sm:$0xff]  ;;  %v424_v4 = vld [vmem:[#allocation8 + $0x18] sm:$0xff] }
  0x51   :  { %4888 = vmatprep.subr.bf16.mxu1 %v7143_v11  ;;  %v433_v18 = vld [vmem:[#allocation8 + $0x60] sm:$0xff]  ;;  %v442_v20 = vld [vmem:[#allocation8 + $0xa8] sm:$0xff]  ;;  %v428_v5 = vld [vmem:[#allocation8 + $0x38] sm:$0xff] }
  0x52   :  { %v101_v21 = vld [vmem:[%s8478_s0 + $0x8] sm:$0xff]  ;;  %v7159_v22 = vpack.c.bf16 %v433_v18, %v429_v17  ;;  %v7162_v23 = vpack.c.bf16 %v442_v20, %v438_v19  ;;  %v437_v24 = vld [vmem:[#allocation8 + $0x80] sm:$0xff]  ;;  %v107_v6 = vld [vmem:[%s8478_s0 + $0x38] sm:$0xff]  ;;  %v7246_v8 = vpack.c.bf16 %v428_v5, %v424_v4 }
  0x53   :  { %4754 = vmatmul.mubr.msk.f32.vlgmr.msra.gmra.mrb[0].mxu1 %vm138_vm0, %v100_v14  ;;  %v441_v25 = vld [vmem:[#allocation8 + $0xa0] sm:$0xff]  ;;  %v446_v26 = vld [vmem:[#allocation8 + $0xc8] sm:$0xff]  ;;  %v423_v9 = vld [vmem:[#allocation8 + $0x10] sm:$0xff] }
  0x54   :  { %4890 = vmatpush1.bf16.msra.mxu1 %v7148_v15  ;;  %346 = vmatprep.mubr.f32.mxu1 %v8490_v0  ;;  %8692 = vst [vmem:[#allocation26_spill] sm:$0xff] %v7162_v23  ;;  %v450_v27 = vld [vmem:[#allocation8 + $0xe8] sm:$0xff]  ;;  %v7170_v29 = vpack.c.bf16 %v441_v25, %v437_v24  ;;  %v445_v30 = vld [vmem:[#allocation8 + $0xc0] sm:$0xff]  ;;  %8704 = vst [vmem:[#allocation38_spill] sm:$0xff] %v7246_v8 }
  0x55   :  { %4892 = vmatprep.subr.bf16.mxu1 %v7151_v16  ;;  %v449_v31 = vld [vmem:[#allocation8 + $0xe0] sm:$0xff]  ;;  %v7173_v32 = vpack.c.bf16 %v450_v27, %v446_v26  ;;  %v109_v33 = vld [vmem:[%s8479_s1 + $0x8] sm:$0xff]  ;;  %v427_v10 = vld [vmem:[#allocation8 + $0x30] sm:$0xff] }
  0x56   :  { %8693 = vst [vmem:[#allocation27_spill] sm:$0xff] %v7170_v29  ;;  %v113_v34 = vld [vmem:[%s8479_s1 + $0x28] sm:$0xff]  ;;  %v108_v35 = vld [vmem:[%s8479_s1] sm:$0xff]  ;;  %v7193_v42 = vpack.c.bf16 %v449_v31, %v445_v30  ;;  %v432_v12 = vld [vmem:[#allocation8 + $0x58] sm:$0xff] }
  0x57   :  { %4755 = vmatmul.mubr.msk.f32.gmra.mrb[2].mxu1 %vm138_vm0, %v101_v21  ;;  %8694 = vst [vmem:[#allocation28_spill] sm:$0xff] %v7173_v32  ;;  %v454_v36 = vld [vmem:[#allocation8 + $0x108] sm:$0xff]  ;;  %v4879_v38 = vpack.c.bf16 %v113_v34, %v109_v33  ;;  %v112_v39 = vld [vmem:[%s8479_s1 + $0x20] sm:$0xff]  ;;  %v436_v13 = vld [vmem:[#allocation8 + $0x78] sm:$0xff] }
  0x58   :  { %4894 = vmatpush1.bf16.msra.mxu1 %v7159_v22  ;;  %352 = vmatprep.mubr.f32.mxu1 %v8490_v0  ;;  %v458_v37 = vld [vmem:[#allocation8 + $0x128] sm:$0xff]  ;;  %v4881_v40 = vpack.c.bf16 %v112_v39, %v108_v35  ;;  %8695 = vst [vmem:[#allocation29_spill] sm:$0xff] %v7193_v42  ;;  %v453_v44 = vld [vmem:[#allocation8 + $0x100] sm:$0xff]  ;;  %v7256_v17 = vpack.c.bf16 %v436_v13, %v432_v12  ;;  %v431_v18 = vld [vmem:[#allocation8 + $0x50] sm:$0xff] }
  0x59   :  { %4896 = vmatprep.subr.bf16.mxu1 %v7162_v23  ;;  %v7196_v43 = vpack.c.bf16 %v458_v37, %v454_v36  ;;  %v457_v45 = vld [vmem:[#allocation8 + $0x120] sm:$0xff]  ;;  %4880 = vmatprep.subr.bf16.mxu0 %v4879_v38  ;;  %v462_v46 = vld [vmem:[#allocation8 + $0x148] sm:$0xff]  ;;  %v435_v19 = vld [vmem:[#allocation8 + $0x70] sm:$0xff] }
  0x5a   :  { %v466_v47 = vld [vmem:[#allocation8 + $0x168] sm:$0xff]  ;;  %4882 = vmatpush1.bf16.msra.mxu0 %v4881_v40  ;;  %v104_v48 = vld [vmem:[%s8478_s0 + $0x20] sm:$0xff]  ;;  %v7204_v49 = vpack.c.bf16 %v457_v45, %v453_v44  ;;  %v440_v20 = vld [vmem:[#allocation8 + $0x98] sm:$0xff]  ;;  %v7262_v24 = vpack.c.bf16 %v435_v19, %v431_v18 }
  0x5b   :  { %4756 = vmatmul.mubr.msk.f32.gmra.mrb[4].mxu1 %vm138_vm0, %v102_v28  ;;  %8696 = vst [vmem:[#allocation30_spill] sm:$0xff] %v7196_v43  ;;  %v7207_v50 = vpack.c.bf16 %v466_v47, %v462_v46  ;;  %v461_v51 = vld [vmem:[#allocation8 + $0x140] sm:$0xff]  ;;  %v470_v53 = vld [vmem:[#allocation8 + $0x188] sm:$0xff]  ;;  %v439_v26 = vld [vmem:[#allocation8 + $0x90] sm:$0xff] }
  0x5c   :  { %4898 = vmatpush1.bf16.msra.mxu1 %v7170_v29  ;;  %358 = vmatprep.mubr.f32.mxu1 %v8490_v0  ;;  %8697 = vst [vmem:[#allocation31_spill] sm:$0xff] %v7204_v49  ;;  %v465_v52 = vld [vmem:[#allocation8 + $0x160] sm:$0xff]  ;;  %v474_v54 = vld [vmem:[#allocation8 + $0x1a8] sm:$0xff]  ;;  %v443_v27 = vld [vmem:[#allocation8 + $0xb0] sm:$0xff] }
  0x5d   :  { %4900 = vmatprep.subr.bf16.mxu1 %v7173_v32  ;;  %8698 = vst [vmem:[#allocation32_spill] sm:$0xff] %v7207_v50  ;;  %4746 = vmatmul.mubr.msk.f32.vlgmr.msra.gmra.mrb[0].mxu0 %vm138_vm0, %v100_v14  ;;  %v105_v55 = vld [vmem:[%s8478_s0 + $0x28] sm:$0xff]  ;;  %v7217_v56 = vpack.c.bf16 %v465_v52, %v461_v51  ;;  %v7220_v57 = vpack.c.bf16 %v474_v54, %v470_v53  ;;  %v469_v58 = vld [vmem:[#allocation8 + $0x180] sm:$0xff]  ;;  %v452_v30 = vld [vmem:[#allocation8 + $0xf8] sm:$0xff] }
  0x5e   :  { %233 = vmatprep.mubr.f32.mxu0 %v8490_v0  ;;  %v473_v59 = vld [vmem:[#allocation8 + $0x1a0] sm:$0xff]  ;;  %v478_v60 = vld [vmem:[#allocation8 + $0x1c8] sm:$0xff]  ;;  %v7253_v14 = vpack.c.bf16 %v427_v10, %v423_v9  ;;  %v7271_v31 = vpack.c.bf16 %v443_v27, %v439_v26  ;;  %v447_v34 = vld [vmem:[#allocation8 + $0xd0] sm:$0xff] }
  0x5f   :  { %4757 = vmatmul.mubr.msk.f32.gmra.mrb[6].mxu1 %vm138_vm0, %v103_v41  ;;  %8699 = vst [vmem:[#allocation33_spill] sm:$0xff] %v7217_v56  ;;  %8700 = vst [vmem:[#allocation34_spill] sm:$0xff] %v7220_v57  ;;  %v482_v61 = vld [vmem:[#allocation8 + $0x1e8] sm:$0xff]  ;;  %v7230_v63 = vpack.c.bf16 %v473_v59, %v469_v58  ;;  %v477_v2 = vld [vmem:[#allocation8 + $0x1c0] sm:$0xff] }
  0x60   :  { %4902 = vmatpush1.bf16.msra.mxu1 %v7193_v42  ;;  %364 = vmatprep.mubr.f32.mxu1 %v8490_v0  ;;  %v7233_v1 = vpack.c.bf16 %v482_v61, %v478_v60  ;;  %v481_v3 = vld [vmem:[#allocation8 + $0x1e0] sm:$0xff]  ;;  %8706 = vst [vmem:[#allocation40_spill] sm:$0xff] %v7271_v31  ;;  %v451_v35 = vld [vmem:[#allocation8 + $0xf0] sm:$0xff]  ;;  %v456_v36 = vld [vmem:[#allocation8 + $0x118] sm:$0xff] }
  0x61   :  { %4904 = vmatprep.subr.bf16.mxu1 %v7196_v43  ;;  %4747 = vmatmul.mubr.msk.f32.gmra.mrb[2].mxu0 %vm138_vm0, %v101_v21  ;;  %8701 = vst [vmem:[#allocation35_spill] sm:$0xff] %v7230_v63  ;;  %v7243_v7 = vpack.c.bf16 %v481_v3, %v477_v2  ;;  %v444_v21 = vld [vmem:[#allocation8 + $0xb8] sm:$0xff]  ;;  %v7279_v38 = vpack.c.bf16 %v451_v35, %v447_v34  ;;  %v455_v40 = vld [vmem:[#allocation8 + $0x110] sm:$0xff]  ;;  %v554_v9 = vld [vmem:[#allocation13 + $0x28] sm:$0xff] }
  0x62   :  { %239 = vmatprep.mubr.f32.mxu0 %v8490_v0  ;;  %8702 = vst [vmem:[#allocation36_spill] sm:$0xff] %v7233_v1  ;;  %v7266_v25 = vpack.c.bf16 %v444_v21, %v440_v20  ;;  %v460_v37 = vld [vmem:[#allocation8 + $0x138] sm:$0xff]  ;;  %v467_v51 = vld [vmem:[#allocation8 + $0x170] sm:$0xff]  ;;  %v549_v19 = vld [vmem:[#allocation13] sm:$0xff] }
  0x63   :  { %4758 = vmatmul.mubr.msk.f32.gmra.mrb[8].mxu1 %vm138_vm0, %v104_v48  ;;  %8703 = vst [vmem:[#allocation37_spill] sm:$0xff] %v7243_v7  ;;  %8708 = vst [vmem:[#allocation42_spill] sm:$0xff] %v7279_v38  ;;  %v7282_v39 = vpack.c.bf16 %v460_v37, %v456_v36  ;;  %v464_v44 = vld [vmem:[#allocation8 + $0x158] sm:$0xff]  ;;  %v471_v58 = vld [vmem:[#allocation8 + $0x190] sm:$0xff] }
  0x64   :  { %4906 = vmatpush1.bf16.msra.mxu1 %v7204_v49  ;;  %370 = vmatprep.mubr.f32.mxu1 %v8490_v0  ;;  %8705 = vst [vmem:[#allocation39_spill] sm:$0xff] %v7266_v25  ;;  %v468_v45 = vld [vmem:[#allocation8 + $0x178] sm:$0xff]  ;;  %v475_v59 = vld [vmem:[#allocation8 + $0x1b0] sm:$0xff]  ;;  %v553_v20 = vld [vmem:[#allocation13 + $0x20] sm:$0xff] }
  0x65   :  { %4908 = vmatprep.subr.bf16.mxu1 %v7207_v50  ;;  %4748 = vmatmul.mubr.msk.f32.gmra.mrb[4].mxu0 %vm138_vm0, %v102_v28  ;;  %v448_v28 = vld [vmem:[#allocation8 + $0xd8] sm:$0xff]  ;;  %8709 = vst [vmem:[#allocation43_spill] sm:$0xff] %v7282_v39  ;;  %v7290_v47 = vpack.c.bf16 %v468_v45, %v464_v44  ;;  %v479_v3 = vld [vmem:[#allocation8 + $0x1d0] sm:$0xff]  ;;  %v7317_v26 = vpack.c.bf16 %v553_v20, %v549_v19  ;;  %v562_v34 = vld [vmem:[#allocation13 + $0x68] sm:$0xff] }
  0x66   :  { %245 = vmatprep.mubr.f32.mxu0 %v8490_v0  ;;  %v7274_v33 = vpack.c.bf16 %v452_v30, %v448_v28  ;;  %v472_v52 = vld [vmem:[#allocation8 + $0x198] sm:$0xff]  ;;  %v483_v4 = vld [vmem:[#allocation8 + $0x1f0] sm:$0xff]  ;;  %v558_v30 = vld [vmem:[#allocation13 + $0x48] sm:$0xff] }
  0x67   :  { %4759 = vmatmul.mubr.msk.f32.gmra.mrb[10].mxu1 %vm138_vm0, %v105_v55  ;;  %8711 = vst [vmem:[#allocation45_spill] sm:$0xff] %v7290_v47  ;;  %v476_v53 = vld [vmem:[#allocation8 + $0x1b8] sm:$0xff]  ;;  %v7305_v5 = vpack.c.bf16 %v483_v4, %v479_v3  ;;  %v551_v21 = vld [vmem:[#allocation13 + $0x10] sm:$0xff]  ;;  %8719 = vst [vmem:[#allocation53_spill] sm:$0xff] %v7317_v26  ;;  %v7323_v36 = vpack.c.bf16 %v562_v34, %v558_v30 }
  0x68   :  { %4910 = vmatpush1.bf16.msra.mxu1 %v7217_v56  ;;  %376 = vmatprep.mubr.f32.mxu1 %v8490_v0  ;;  %8707 = vst [vmem:[#allocation41_spill] sm:$0xff] %v7274_v33  ;;  %v480_v60 = vld [vmem:[#allocation8 + $0x1d8] sm:$0xff]  ;;  %v555_v27 = vld [vmem:[#allocation13 + $0x30] sm:$0xff]  ;;  %v565_v3 = vld [vmem:[#allocation13 + $0x80] sm:$0xff] }
  0x69   :  { %4912 = vmatprep.subr.bf16.mxu1 %v7220_v57  ;;  %4749 = vmatmul.mubr.msk.f32.gmra.mrb[6].mxu0 %vm138_vm0, %v103_v41  ;;  %v459_v41 = vld [vmem:[#allocation8 + $0x130] sm:$0xff]  ;;  %v484_v61 = vld [vmem:[#allocation8 + $0x1f8] sm:$0xff]  ;;  %8716 = vst [vmem:[#allocation50_spill] sm:$0xff] %v7305_v5  ;;  %v7319_v28 = vpack.c.bf16 %v555_v27, %v551_v21  ;;  %8721 = vst [vmem:[#allocation55_spill] sm:$0xff] %v7323_v36 }
  0x6a   :  { %251 = vmatprep.mubr.f32.mxu0 %v8490_v0  ;;  %v7287_v46 = vpack.c.bf16 %v459_v41, %v455_v40  ;;  %v7302_v2 = vpack.c.bf16 %v484_v61, %v480_v60  ;;  %v552_v10 = vld [vmem:[#allocation13 + $0x18] sm:$0xff]  ;;  %v557_v40 = vld [vmem:[#allocation13 + $0x40] sm:$0xff]  ;;  %v574_v20 = vld [vmem:[#allocation13 + $0xc8] sm:$0xff] }
  0x6b   :  { %4760 = vmatmul.mubr.msk.f32.gmra.mrb[12].mxu1 %vm138_vm0, %v106_v62  ;;  %v556_v13 = vld [vmem:[#allocation13 + $0x38] sm:$0xff]  ;;  %8720 = vst [vmem:[#allocation54_spill] sm:$0xff] %v7319_v28  ;;  %v561_v41 = vld [vmem:[#allocation13 + $0x60] sm:$0xff]  ;;  %v578_v21 = vld [vmem:[#allocation13 + $0xe8] sm:$0xff] }
  0x6c   :  { %4914 = vmatpush1.bf16.msra.mxu1 %v7230_v63  ;;  %382 = vmatprep.mubr.f32.mxu1 %v8490_v0  ;;  %8710 = vst [vmem:[#allocation44_spill] sm:$0xff] %v7287_v46  ;;  %8715 = vst [vmem:[#allocation49_spill] sm:$0xff] %v7302_v2  ;;  %v7313_v18 = vpack.c.bf16 %v556_v13, %v552_v10  ;;  %v560_v35 = vld [vmem:[#allocation13 + $0x58] sm:$0xff]  ;;  %v7327_v45 = vpack.c.bf16 %v561_v41, %v557_v40  ;;  %v569_v4 = vld [vmem:[#allocation13 + $0xa0] sm:$0xff] }
  0x6d   :  { %4916 = vmatprep.subr.bf16.mxu1 %v7233_v1  ;;  %4750 = vmatmul.mubr.msk.f32.gmra.mrb[8].mxu0 %vm138_vm0, %v104_v48  ;;  %v463_v48 = vld [vmem:[#allocation8 + $0x150] sm:$0xff]  ;;  %v564_v37 = vld [vmem:[#allocation13 + $0x78] sm:$0xff]  ;;  %v7347_v30 = vpack.c.bf16 %v578_v21, %v574_v20 }
  0x6e   :  { %257 = vmatprep.mubr.f32.mxu0 %v8490_v0  ;;  %v7293_v54 = vpack.c.bf16 %v467_v51, %v463_v48  ;;  %8718 = vst [vmem:[#allocation52_spill] sm:$0xff] %v7313_v18  ;;  %v7325_v44 = vpack.c.bf16 %v564_v37, %v560_v35  ;;  %8723 = vst [vmem:[#allocation57_spill] sm:$0xff] %v7327_v45  ;;  %v559_v48 = vld [vmem:[#allocation13 + $0x50] sm:$0xff]  ;;  %v572_v61 = vld [vmem:[#allocation13 + $0xb8] sm:$0xff] }
  0x6f   :  { %4761 = vmatmul.mubr.msk.f32.gmra.mrb[14].mxu1 %vm138_vm0, %v107_v6  ;;  %v563_v51 = vld [vmem:[#allocation13 + $0x70] sm:$0xff]  ;;  %v576_v27 = vld [vmem:[#allocation13 + $0xd8] sm:$0xff]  ;;  %8729 = vst [vmem:[#allocation63_spill] sm:$0xff] %v7347_v30  ;;  %v573_v35 = vld [vmem:[#allocation13 + $0xc0] sm:$0xff] }
  0x70   :  { %4918 = vmatpush1.bf16.msra.mxu1 %v7243_v7  ;;  %707 = vmatprep.mubr.f32.mxu1 %v8490_v0  ;;  %8712 = vst [vmem:[#allocation46_spill] sm:$0xff] %v7293_v54  ;;  %8722 = vst [vmem:[#allocation56_spill] sm:$0xff] %v7325_v44  ;;  %v567_v10 = vld [vmem:[#allocation13 + $0x90] sm:$0xff]  ;;  %v580_v34 = vld [vmem:[#allocation13 + $0xf8] sm:$0xff] }
  0x71   :  { %4920 = vmatprep.subr.bf16.mxu1 %v7246_v8  ;;  %4751 = vmatmul.mubr.msk.f32.gmra.mrb[10].mxu0 %vm138_vm0, %v105_v55  ;;  %v7296_v55 = vpack.c.bf16 %v476_v53, %v472_v52  ;;  %v7330_v52 = vpack.c.bf16 %v563_v51, %v559_v48  ;;  %v566_v53 = vld [vmem:[#allocation13 + $0x88] sm:$0xff]  ;;  %v571_v13 = vld [vmem:[#allocation13 + $0xb0] sm:$0xff]  ;;  %v577_v37 = vld [vmem:[#allocation13 + $0xe0] sm:$0xff]  ;;  %v7349_v40 = vpack.c.bf16 %v580_v34, %v576_v27 }
  0x72   :  { %263 = vmatprep.mubr.f32.mxu0 %v8490_v0  ;;  %v7342_v19 = vpack.c.bf16 %v571_v13, %v567_v10  ;;  %v7351_v41 = vpack.c.bf16 %v577_v37, %v573_v35  ;;  %v575_v48 = vld [vmem:[#allocation13 + $0xd0] sm:$0xff]  ;;  %v581_v10 = vld [vmem:[#allocation13 + $0x100] sm:$0xff]  ;;  %v590_v37 = vld [vmem:[#allocation13 + $0x148] sm:$0xff] }
  0x73   :  { %708 = vmatmul.mubr.f32.vlgmr.msra.gmra.mrb[16].mxu1 %v8490_v0  ;;  %8713 = vst [vmem:[#allocation47_spill] sm:$0xff] %v7296_v55  ;;  %8724 = vst [vmem:[#allocation58_spill] sm:$0xff] %v7330_v52  ;;  %v579_v51 = vld [vmem:[#allocation13 + $0xf0] sm:$0xff]  ;;  %v585_v13 = vld [vmem:[#allocation13 + $0x120] sm:$0xff] }
  0x74   :  { %4922 = vmatpush1.bf16.msra.mxu1 %v7253_v14  ;;  %778 = vmatprep.mubr.f32.mxu1 %v8490_v0  ;;  %8728 = vst [vmem:[#allocation62_spill] sm:$0xff] %v7342_v19  ;;  %8730 = vst [vmem:[#allocation64_spill] sm:$0xff] %v7349_v40  ;;  %v7363_v21 = vpack.c.bf16 %v585_v13, %v581_v10  ;;  %v583_v27 = vld [vmem:[#allocation13 + $0x110] sm:$0xff] }
  0x75   :  { %4924 = vmatprep.subr.bf16.mxu1 %v7256_v17  ;;  %4752 = vmatmul.mubr.msk.f32.gmra.mrb[12].mxu0 %vm138_vm0, %v106_v62  ;;  %v7299_v62 = vpack.c.bf16 %v475_v59, %v471_v58  ;;  %v570_v58 = vld [vmem:[#allocation13 + $0xa8] sm:$0xff]  ;;  %v568_v59 = vld [vmem:[#allocation13 + $0x98] sm:$0xff]  ;;  %8731 = vst [vmem:[#allocation65_spill] sm:$0xff] %v7351_v41  ;;  %v587_v34 = vld [vmem:[#allocation13 + $0x130] sm:$0xff] }
  0x76   :  { %269 = vmatprep.mubr.f32.mxu0 %v8490_v0  ;;  %v7335_v60 = vpack.c.bf16 %v570_v58, %v566_v53  ;;  %v7354_v53 = vpack.c.bf16 %v579_v51, %v575_v48  ;;  %v582_v58 = vld [vmem:[#allocation13 + $0x108] sm:$0xff]  ;;  %8735 = vst [vmem:[#allocation69_spill] sm:$0xff] %v7363_v21  ;;  %v7366_v35 = vpack.c.bf16 %v587_v34, %v583_v27  ;;  %v592_v51 = vld [vmem:[#allocation13 + $0x158] sm:$0xff]  ;;  %v591_v27 = vld [vmem:[#allocation13 + $0x150] sm:$0xff] }
  0x77   :  { %8714 = vst [vmem:[#allocation48_spill] sm:$0xff] %v7299_v62  ;;  %v594_v48 = vld [vmem:[#allocation13 + $0x168] sm:$0xff]  ;;  %v595_v34 = vld [vmem:[#allocation13 + $0x170] sm:$0xff] }
  0x78   :  { %4926 = vmatpush1.bf16.msra.mxu1 %v7262_v24  ;;  %8725 = vst [vmem:[#allocation59_spill] sm:$0xff] %v7335_v60  ;;  %8732 = vst [vmem:[#allocation66_spill] sm:$0xff] %v7354_v53 }
  0x79   :  { %4928 = vmatprep.subr.bf16.mxu1 %v7266_v25  ;;  %4753 = vmatmul.mubr.msk.f32.gmra.mrb[14].mxu0 %vm138_vm0, %v107_v6  ;;  %v550_v6 = vld [vmem:[#allocation13 + $0x8] sm:$0xff]  ;;  %8736 = vst [vmem:[#allocation70_spill] sm:$0xff] %v7366_v35 }
  0x7a   :  { %877 = vmatprep.mubr.f32.mxu0 %v8490_v0  ;;  %v7311_v12 = vpack.c.bf16 %v554_v9, %v550_v6  ;;  %v7337_v6 = vpack.c.bf16 %v572_v61, %v568_v59  ;;  %v7339_v9 = vpack.c.bf16 %v569_v4, %v565_v3  ;;  %v586_v59 = vld [vmem:[#allocation13 + $0x128] sm:$0xff]  ;;  %v584_v61 = vld [vmem:[#allocation13 + $0x118] sm:$0xff] }
  0x7b   :  { %v7359_v3 = vpack.c.bf16 %v586_v59, %v582_v58  ;;  %v588_v4 = vld [vmem:[#allocation13 + $0x138] sm:$0xff]  ;;  %v7371_v58 = vpack.c.bf16 %v594_v48, %v590_v37  ;;  %v602_v37 = vld [vmem:[#allocation13 + $0x1a8] sm:$0xff] }
  0x7c   :  { %4930 = vmatpush1.bf16.msra.mxu1 %v7271_v31  ;;  %8717 = vst [vmem:[#allocation51_spill] sm:$0xff] %v7311_v12  ;;  %4952 = vmatprep.subr.bf16.mxu0 %v7311_v12  ;;  %8726 = vst [vmem:[#allocation60_spill] sm:$0xff] %v7337_v6  ;;  %v7361_v20 = vpack.c.bf16 %v588_v4, %v584_v61  ;;  %v596_v59 = vld [vmem:[#allocation13 + $0x178] sm:$0xff]  ;;  %v589_v61 = vld [vmem:[#allocation13 + $0x140] sm:$0xff] }
  0x7d   :  { %4932 = vmatprep.subr.bf16.mxu1 %v7274_v33  ;;  %4954 = vmatpush1.bf16.msra.mxu0 %v7317_v26  ;;  %8727 = vst [vmem:[#allocation61_spill] sm:$0xff] %v7339_v9  ;;  %8733 = vst [vmem:[#allocation67_spill] sm:$0xff] %v7359_v3  ;;  %v593_v4 = vld [vmem:[#allocation13 + $0x160] sm:$0xff]  ;;  %v7373_v10 = vpack.c.bf16 %v596_v59, %v592_v51  ;;  %v600_v48 = vld [vmem:[#allocation13 + $0x198] sm:$0xff] }
  0x7e   :  { %4956 = vmatprep.subr.bf16.mxu0 %v7323_v36  ;;  %8734 = vst [vmem:[#allocation68_spill] sm:$0xff] %v7361_v20  ;;  %8737 = vst [vmem:[#allocation71_spill] sm:$0xff] %v7371_v58  ;;  %v7375_v13 = vpack.c.bf16 %v593_v4, %v589_v61  ;;  %v604_v51 = vld [vmem:[#allocation13 + $0x1b8] sm:$0xff]  ;;  %v597_v59 = vld [vmem:[#allocation13 + $0x180] sm:$0xff] }
  0x7f   :  { %8738 = vst [vmem:[#allocation72_spill] sm:$0xff] %v7373_v10  ;;  %v601_v61 = vld [vmem:[#allocation13 + $0x1a0] sm:$0xff]  ;;  %v7385_v4 = vpack.c.bf16 %v604_v51, %v600_v48  ;;  %v612_v48 = vld [vmem:[#allocation13 + $0x1f8] sm:$0xff] }
  0x80   :  { %4934 = vmatpush1.bf16.msra.mxu1 %v7279_v38  ;;  %8739 = vst [vmem:[#allocation73_spill] sm:$0xff] %v7375_v13  ;;  %v605_v51 = vld [vmem:[#allocation13 + $0x1c0] sm:$0xff] }
  0x81   :  { %4936 = vmatprep.subr.bf16.mxu1 %v7282_v39  ;;  %4958 = vmatpush1.bf16.msra.mxu0 %v7327_v45  ;;  %8742 = vst [vmem:[#allocation76_spill] sm:$0xff] %v7385_v4 }
  0x82   :  { %4960 = vmatprep.subr.bf16.mxu0 %v7335_v60 }
  0x84   :  { %4938 = vmatpush1.bf16.msra.mxu1 %v7287_v46 }
  0x85   :  { %4940 = vmatprep.subr.bf16.mxu1 %v7290_v47  ;;  %4962 = vmatpush1.bf16.msra.mxu0 %v7339_v9 }
  0x86   :  { %4964 = vmatprep.subr.bf16.mxu0 %v7347_v30 }
  0x88   :  { %4942 = vmatpush1.bf16.msra.mxu1 %v7293_v54 }
  0x89   :  { %4944 = vmatprep.subr.bf16.mxu1 %v7296_v55  ;;  %4966 = vmatpush1.bf16.msra.mxu0 %v7351_v41  ;;  %v537_v41 = vld [vmem:[#allocation11 + $0x1a0] sm:$0xff] }
  0x8a   :  { %4968 = vmatprep.subr.bf16.mxu0 %v7359_v3 }
  0x8c   :  { %4946 = vmatpush1.bf16.msra.mxu1 %v7299_v62 }
  0x8d   :  { %4948 = vmatprep.subr.bf16.mxu1 %v7302_v2  ;;  %4970 = vmatpush1.bf16.msra.mxu0 %v7363_v21 }
  0x8e   :  { %4972 = vmatprep.subr.bf16.mxu0 %v7371_v58 }
  0x90   :  { %4950 = vmatpush1.bf16.msra.mxu1 %v7305_v5 }
  0x91   :  { %4984 = vmatprep.subr.bf16.mxu1 %v7313_v18  ;;  %4974 = vmatpush1.bf16.msra.mxu0 %v7375_v13 }
  0x93   :  { %779 = vmatmul.mubr.f32.vlgmr.msra.gmra.mrb[0].mxu1 %v8490_v0 }
  0x94   :  { %948 = vmatprep.mubr.f32.mxu1 %v8490_v0  ;;  %4986 = vmatpush1.bf16.msra.mxu1 %v7319_v28  ;;  %v7378_v0 = vpack.c.bf16 %v595_v34, %v591_v27  ;;  %v599_v27 = vld [vmem:[#allocation13 + $0x190] sm:$0xff] }
  0x95   :  { %4988 = vmatprep.subr.bf16.mxu1 %v7325_v44  ;;  %v603_v34 = vld [vmem:[#allocation13 + $0x1b0] sm:$0xff] }
  0x96   :  { %8740 = vst [vmem:[#allocation74_spill] sm:$0xff] %v7378_v0 }
  0x98   :  { %4990 = vmatpush1.bf16.msra.mxu1 %v7330_v52 }
  0x99   :  { %4992 = vmatprep.subr.bf16.mxu1 %v7337_v6 }
  0x9c   :  { %4994 = vmatpush1.bf16.msra.mxu1 %v7342_v19 }
  0x9d   :  { %4996 = vmatprep.subr.bf16.mxu1 %v7349_v40 }
  0xa0   :  { %4998 = vmatpush1.bf16.msra.mxu1 %v7354_v53  ;;  %v538_v53 = vld [vmem:[#allocation11 + $0x1a8] sm:$0xff] }
  0xa1   :  { %5000 = vmatprep.subr.bf16.mxu1 %v7361_v20  ;;  %v7387_v20 = vpack.c.bf16 %v601_v61, %v597_v59  ;;  %v609_v59 = vld [vmem:[#allocation13 + $0x1e0] sm:$0xff] }
  0xa2   :  { %v7399_v58 = vpack.c.bf16 %v609_v59, %v605_v51  ;;  %v489_v51 = vld [vmem:[#allocation11 + $0x20] sm:$0xff] }
  0xa3   :  { %8743 = vst [vmem:[#allocation77_spill] sm:$0xff] %v7387_v20 }
  0xa4   :  { %5002 = vmatpush1.bf16.msra.mxu1 %v7366_v35  ;;  %v598_v35 = vld [vmem:[#allocation13 + $0x188] sm:$0xff]  ;;  %8747 = vst [vmem:[#allocation81_spill] sm:$0xff] %v7399_v58 }
  0xa5   :  { %5004 = vmatprep.subr.bf16.mxu1 %v7373_v10  ;;  %v7383_v21 = vpack.c.bf16 %v602_v37, %v598_v35  ;;  %v7390_v10 = vpack.c.bf16 %v603_v34, %v599_v27  ;;  %v610_v35 = vld [vmem:[#allocation13 + $0x1e8] sm:$0xff]  ;;  %v608_v37 = vld [vmem:[#allocation13 + $0x1d8] sm:$0xff]  ;;  %v607_v27 = vld [vmem:[#allocation13 + $0x1d0] sm:$0xff] }
  0xa6   :  { %v7397_v61 = vpack.c.bf16 %v612_v48, %v608_v37  ;;  %v611_v34 = vld [vmem:[#allocation13 + $0x1f0] sm:$0xff]  ;;  %v492_v37 = vld [vmem:[#allocation11 + $0x38] sm:$0xff]  ;;  %v485_v48 = vld [vmem:[#allocation11] sm:$0xff] }
  0xa7   :  { %8741 = vst [vmem:[#allocation75_spill] sm:$0xff] %v7383_v21  ;;  %4976 = vmatprep.subr.bf16.mxu0 %v7383_v21  ;;  %8744 = vst [vmem:[#allocation78_spill] sm:$0xff] %v7390_v10  ;;  %v7411_v21 = vpack.c.bf16 %v489_v51, %v485_v48  ;;  %v493_v48 = vld [vmem:[#allocation11 + $0x40] sm:$0xff] }
  0xa8   :  { %5006 = vmatpush1.bf16.msra.mxu1 %v7378_v0  ;;  %4978 = vmatpush1.bf16.msra.mxu0 %v7387_v20  ;;  %v606_v0 = vld [vmem:[#allocation13 + $0x1c8] sm:$0xff]  ;;  %8746 = vst [vmem:[#allocation80_spill] sm:$0xff] %v7397_v61  ;;  %v497_v51 = vld [vmem:[#allocation11 + $0x60] sm:$0xff] }
  0xa9   :  { %5008 = vmatprep.subr.bf16.mxu1 %v7385_v4  ;;  %v7395_v13 = vpack.c.bf16 %v610_v35, %v606_v0  ;;  %v7402_v4 = vpack.c.bf16 %v611_v34, %v607_v27  ;;  %v490_v0 = vld [vmem:[#allocation11 + $0x28] sm:$0xff]  ;;  %v488_v35 = vld [vmem:[#allocation11 + $0x18] sm:$0xff]  ;;  %8751 = vst [vmem:[#allocation85_spill] sm:$0xff] %v7411_v21  ;;  %v487_v27 = vld [vmem:[#allocation11 + $0x10] sm:$0xff] }
  0xaa   :  { %v7409_v59 = vpack.c.bf16 %v492_v37, %v488_v35  ;;  %v491_v34 = vld [vmem:[#allocation11 + $0x30] sm:$0xff]  ;;  %v500_v37 = vld [vmem:[#allocation11 + $0x78] sm:$0xff] }
  0xab   :  { %8745 = vst [vmem:[#allocation79_spill] sm:$0xff] %v7395_v13  ;;  %4980 = vmatprep.subr.bf16.mxu0 %v7395_v13  ;;  %8748 = vst [vmem:[#allocation82_spill] sm:$0xff] %v7402_v4 }
  0xac   :  { %5010 = vmatpush1.bf16.msra.mxu1 %v7390_v10  ;;  %4982 = vmatpush1.bf16.msra.mxu0 %v7399_v58  ;;  %v486_v10 = vld [vmem:[#allocation11 + $0x8] sm:$0xff]  ;;  %8750 = vst [vmem:[#allocation84_spill] sm:$0xff] %v7409_v59  ;;  %v7415_v58 = vpack.c.bf16 %v491_v34, %v487_v27  ;;  %v7425_v27 = vpack.c.bf16 %v497_v51, %v493_v48  ;;  %v495_v34 = vld [vmem:[#allocation11 + $0x50] sm:$0xff]  ;;  %v501_v48 = vld [vmem:[#allocation11 + $0x80] sm:$0xff] }
  0xad   :  { %5012 = vmatprep.subr.bf16.mxu1 %v7397_v61  ;;  %v7407_v20 = vpack.c.bf16 %v490_v0, %v486_v10  ;;  %v8752_v61 = vmov 0.0   ;;  %v494_v10 = vld [vmem:[#allocation11 + $0x48] sm:$0xff]  ;;  %v505_v51 = vld [vmem:[#allocation11 + $0xa0] sm:$0xff] }
  0xae   :  { %8753 = vst [vmem:[#allocation86_spill] sm:$0xff] %v7415_v58  ;;  %v498_v0 = vld [vmem:[#allocation11 + $0x68] sm:$0xff]  ;;  %8756 = vst [vmem:[#allocation89_spill] sm:$0xff] %v7425_v27  ;;  %v7439_v3 = vpack.c.bf16 %v505_v51, %v501_v48 }
  0xaf   :  { %8749 = vst [vmem:[#allocation83_spill] sm:$0xff] %v7407_v20  ;;  %5016 = vmatprep.subr.bf16.mxu0 %v7407_v20  ;;  %878 = vmatmul.mubr.f32.vlgmr.msra.gmra.mrb[16].mxu0 %v8752_v61  ;;  %v7421_v35 = vpack.c.bf16 %v498_v0, %v494_v10  ;;  %v502_v10 = vld [vmem:[#allocation11 + $0x88] sm:$0xff] }
  0xb0   :  { %5014 = vmatpush1.bf16.msra.mxu1 %v7402_v4  ;;  %v496_v4 = vld [vmem:[#allocation11 + $0x58] sm:$0xff]  ;;  %5018 = vmatpush1.bf16.msra.mxu0 %v7411_v21  ;;  %v506_v0 = vld [vmem:[#allocation11 + $0xa8] sm:$0xff]  ;;  %8760 = vst [vmem:[#allocation93_spill] sm:$0xff] %v7439_v3 }
  0xb1   :  { %5048 = vmatprep.subr.bf16.mxu1 %v7409_v59  ;;  %8754 = vst [vmem:[#allocation87_spill] sm:$0xff] %v7421_v35  ;;  %v7423_v20 = vpack.c.bf16 %v500_v37, %v496_v4  ;;  %v499_v59 = vld [vmem:[#allocation11 + $0x70] sm:$0xff]  ;;  %1019 = vmatprep.mubr.f32.mxu0 %v8752_v61  ;;  %v7435_v4 = vpack.c.bf16 %v506_v0, %v502_v10  ;;  %v508_v37 = vld [vmem:[#allocation11 + $0xb8] sm:$0xff]  ;;  %v509_v0 = vld [vmem:[#allocation11 + $0xc0] sm:$0xff] }
  0xb2   :  { %5020 = vmatprep.subr.bf16.mxu0 %v7421_v35  ;;  %v7430_v21 = vpack.c.bf16 %v499_v59, %v495_v34  ;;  %v503_v59 = vld [vmem:[#allocation11 + $0x90] sm:$0xff]  ;;  %v514_v35 = vld [vmem:[#allocation11 + $0xe8] sm:$0xff] }
  0xb3   :  { %949 = vmatmul.mubr.f32.vlgmr.msra.gmra.mrb[18].mxu1 %v8752_v61  ;;  %8755 = vst [vmem:[#allocation88_spill] sm:$0xff] %v7423_v20  ;;  %8758 = vst [vmem:[#allocation91_spill] sm:$0xff] %v7435_v4  ;;  %v507_v34 = vld [vmem:[#allocation11 + $0xb0] sm:$0xff] }
  0xb4   :  { %5050 = vmatpush1.bf16.msra.mxu1 %v7415_v58  ;;  %1090 = vmatprep.mubr.f32.mxu1 %v8752_v61  ;;  %8757 = vst [vmem:[#allocation90_spill] sm:$0xff] %v7430_v21  ;;  %v504_v58 = vld [vmem:[#allocation11 + $0x98] sm:$0xff] }
  0xb5   :  { %5052 = vmatprep.subr.bf16.mxu1 %v7423_v20  ;;  %5022 = vmatpush1.bf16.msra.mxu0 %v7425_v27  ;;  %v7437_v13 = vpack.c.bf16 %v508_v37, %v504_v58  ;;  %v7442_v20 = vpack.c.bf16 %v507_v34, %v503_v59  ;;  %v510_v27 = vld [vmem:[#allocation11 + $0xc8] sm:$0xff]  ;;  %v516_v58 = vld [vmem:[#allocation11 + $0xf8] sm:$0xff]  ;;  %v513_v37 = vld [vmem:[#allocation11 + $0xe0] sm:$0xff] }
  0xb6   :  { %5024 = vmatprep.subr.bf16.mxu0 %v7435_v4  ;;  %v7447_v10 = vpack.c.bf16 %v514_v35, %v510_v27  ;;  %v7451_v51 = vpack.c.bf16 %v513_v37, %v509_v0  ;;  %v511_v59 = vld [vmem:[#allocation11 + $0xd0] sm:$0xff]  ;;  %v522_v4 = vld [vmem:[#allocation11 + $0x128] sm:$0xff]  ;;  %v517_v27 = vld [vmem:[#allocation11 + $0x100] sm:$0xff] }
  0xb7   :  { %8759 = vst [vmem:[#allocation92_spill] sm:$0xff] %v7437_v13  ;;  %8761 = vst [vmem:[#allocation94_spill] sm:$0xff] %v7442_v20  ;;  %v515_v34 = vld [vmem:[#allocation11 + $0xf0] sm:$0xff] }
  0xb8   :  { %5054 = vmatpush1.bf16.msra.mxu1 %v7430_v21  ;;  %v512_v21 = vld [vmem:[#allocation11 + $0xd8] sm:$0xff]  ;;  %8762 = vst [vmem:[#allocation95_spill] sm:$0xff] %v7447_v10  ;;  %8764 = vst [vmem:[#allocation97_spill] sm:$0xff] %v7451_v51 }
  0xb9   :  { %5056 = vmatprep.subr.bf16.mxu1 %v7437_v13  ;;  %5026 = vmatpush1.bf16.msra.mxu0 %v7439_v3  ;;  %v7449_v48 = vpack.c.bf16 %v516_v58, %v512_v21  ;;  %v7454_v13 = vpack.c.bf16 %v515_v34, %v511_v59  ;;  %v518_v3 = vld [vmem:[#allocation11 + $0x108] sm:$0xff]  ;;  %v524_v21 = vld [vmem:[#allocation11 + $0x138] sm:$0xff]  ;;  %v521_v58 = vld [vmem:[#allocation11 + $0x120] sm:$0xff] }
  0xba   :  { %5028 = vmatprep.subr.bf16.mxu0 %v7447_v10  ;;  %v7459_v35 = vpack.c.bf16 %v522_v4, %v518_v3  ;;  %v7463_v37 = vpack.c.bf16 %v521_v58, %v517_v27  ;;  %v519_v59 = vld [vmem:[#allocation11 + $0x110] sm:$0xff]  ;;  %v530_v10 = vld [vmem:[#allocation11 + $0x168] sm:$0xff]  ;;  %v525_v4 = vld [vmem:[#allocation11 + $0x140] sm:$0xff] }
  0xbb   :  { %8763 = vst [vmem:[#allocation96_spill] sm:$0xff] %v7449_v48  ;;  %8765 = vst [vmem:[#allocation98_spill] sm:$0xff] %v7454_v13  ;;  %v523_v34 = vld [vmem:[#allocation11 + $0x130] sm:$0xff] }
  0xbc   :  { %5058 = vmatpush1.bf16.msra.mxu1 %v7442_v20  ;;  %v520_v20 = vld [vmem:[#allocation11 + $0x118] sm:$0xff]  ;;  %8766 = vst [vmem:[#allocation99_spill] sm:$0xff] %v7459_v35  ;;  %8768 = vst [vmem:[#allocation101_spill] sm:$0xff] %v7463_v37 }
  0xbd   :  { %5060 = vmatprep.subr.bf16.mxu1 %v7449_v48  ;;  %5030 = vmatpush1.bf16.msra.mxu0 %v7451_v51  ;;  %v7461_v0 = vpack.c.bf16 %v524_v21, %v520_v20  ;;  %v7466_v48 = vpack.c.bf16 %v523_v34, %v519_v59  ;;  %v526_v51 = vld [vmem:[#allocation11 + $0x148] sm:$0xff]  ;;  %v532_v20 = vld [vmem:[#allocation11 + $0x178] sm:$0xff]  ;;  %v529_v21 = vld [vmem:[#allocation11 + $0x160] sm:$0xff] }
  0xbe   :  { %5032 = vmatprep.subr.bf16.mxu0 %v7459_v35  ;;  %v7471_v3 = vpack.c.bf16 %v530_v10, %v526_v51  ;;  %v7475_v58 = vpack.c.bf16 %v529_v21, %v525_v4  ;;  %v527_v59 = vld [vmem:[#allocation11 + $0x150] sm:$0xff]  ;;  %v534_v35 = vld [vmem:[#allocation11 + $0x188] sm:$0xff]  ;;  %v540_v51 = vld [vmem:[#allocation11 + $0x1b8] sm:$0xff] }
  0xbf   :  { %8767 = vst [vmem:[#allocation100_spill] sm:$0xff] %v7461_v0  ;;  %8769 = vst [vmem:[#allocation102_spill] sm:$0xff] %v7466_v48  ;;  %v531_v34 = vld [vmem:[#allocation11 + $0x170] sm:$0xff]  ;;  %v7481_v10 = vpack.c.bf16 %v538_v53, %v534_v35  ;;  %v546_v53 = vld [vmem:[#allocation11 + $0x1e8] sm:$0xff] }
  0xc0   :  { %5062 = vmatpush1.bf16.msra.mxu1 %v7454_v13  ;;  %v528_v13 = vld [vmem:[#allocation11 + $0x158] sm:$0xff]  ;;  %8770 = vst [vmem:[#allocation103_spill] sm:$0xff] %v7471_v3  ;;  %8772 = vst [vmem:[#allocation105_spill] sm:$0xff] %v7475_v58  ;;  %v535_v4 = vld [vmem:[#allocation11 + $0x190] sm:$0xff] }
  0xc1   :  { %5064 = vmatprep.subr.bf16.mxu1 %v7461_v0  ;;  %5034 = vmatpush1.bf16.msra.mxu0 %v7463_v37  ;;  %v7473_v27 = vpack.c.bf16 %v532_v20, %v528_v13  ;;  %v7478_v0 = vpack.c.bf16 %v531_v34, %v527_v59  ;;  %v536_v37 = vld [vmem:[#allocation11 + $0x198] sm:$0xff]  ;;  %8774 = vst [vmem:[#allocation107_spill] sm:$0xff] %v7481_v10  ;;  %v539_v21 = vld [vmem:[#allocation11 + $0x1b0] sm:$0xff]  ;;  %v542_v59 = vld [vmem:[#allocation11 + $0x1c8] sm:$0xff] }
  0xc2   :  { %5036 = vmatprep.subr.bf16.mxu0 %v7471_v3  ;;  %v7485_v13 = vpack.c.bf16 %v540_v51, %v536_v37  ;;  %v7490_v34 = vpack.c.bf16 %v539_v21, %v535_v4  ;;  %v544_v35 = vld [vmem:[#allocation11 + $0x1d8] sm:$0xff]  ;;  %v7493_v3 = vpack.c.bf16 %v546_v53, %v542_v59  ;;  %v541_v37 = vld [vmem:[#allocation11 + $0x1c0] sm:$0xff] }
  0xc3   :  { %8771 = vst [vmem:[#allocation104_spill] sm:$0xff] %v7473_v27  ;;  %8773 = vst [vmem:[#allocation106_spill] sm:$0xff] %v7478_v0  ;;  %v545_v51 = vld [vmem:[#allocation11 + $0x1e0] sm:$0xff] }
  0xc4   :  { %5066 = vmatpush1.bf16.msra.mxu1 %v7466_v48  ;;  %v533_v48 = vld [vmem:[#allocation11 + $0x180] sm:$0xff]  ;;  %8775 = vst [vmem:[#allocation108_spill] sm:$0xff] %v7485_v13  ;;  %8777 = vst [vmem:[#allocation110_spill] sm:$0xff] %v7490_v34 }
  0xc5   :  { %5068 = vmatprep.subr.bf16.mxu1 %v7473_v27  ;;  %5038 = vmatpush1.bf16.msra.mxu0 %v7475_v58  ;;  %v7487_v20 = vpack.c.bf16 %v537_v41, %v533_v48  ;;  %v548_v27 = vld [vmem:[#allocation11 + $0x1f8] sm:$0xff]  ;;  %8778 = vst [vmem:[#allocation111_spill] sm:$0xff] %v7493_v3  ;;  %v543_v41 = vld [vmem:[#allocation11 + $0x1d0] sm:$0xff] }
  0xc6   :  { %5040 = vmatprep.subr.bf16.mxu0 %v7481_v10  ;;  %v7495_v58 = vpack.c.bf16 %v548_v27, %v544_v35  ;;  %v547_v48 = vld [vmem:[#allocation11 + $0x1f0] sm:$0xff]  ;;  %v7499_v10 = vpack.c.bf16 %v545_v51, %v541_v37  ;;  %v118_v27 = vlaneseq  ;;  %v116_v37 = vld [vmem:[%s8481_s3] sm:$0xf] }
  0xc7   :  { %8776 = vst [vmem:[#allocation109_spill] sm:$0xff] %v7487_v20  ;;  %v7501_v4 = vpack.c.bf16 %v547_v48, %v543_v41 }
  0xc8   :  { %5070 = vmatpush1.bf16.msra.mxu1 %v7478_v0  ;;  %8779 = vst [vmem:[#allocation112_spill] sm:$0xff] %v7495_v58  ;;  %8780 = vst [vmem:[#allocation113_spill] sm:$0xff] %v7499_v10  ;;  %v7509_v53 = vshrl.u32 %v118_v27, 7 }
  0xc9   :  { %5072 = vmatprep.subr.bf16.mxu1 %v7485_v13  ;;  %5042 = vmatpush1.bf16.msra.mxu0 %v7487_v20  ;;  %8781 = vst [vmem:[#allocation114_spill] sm:$0xff] %v7501_v4 }
  0xca   :  { %5044 = vmatprep.subr.bf16.mxu0 %v7493_v3  ;;  %v8592_v35 = vsub.s32 0, %v7509_v53  ;;  %v8597_v51 = vsub.s32 1, %v7509_v53  ;;  %v8598_v20 = vsub.s32 2, %v7509_v53  ;;  %v8603_v13 = vsub.s32 3, %v7509_v53 }
  0xcc   :  { %5074 = vmatpush1.bf16.msra.mxu1 %v7490_v34  ;;  %v7518_v41 = vrot.slane %v116_v37, %v8592_v35  ;;  %v7522_v48 = vrot.slane %v116_v37, %v8597_v51 }
  0xcd   :  { %5076 = vmatprep.subr.bf16.mxu1 %v7495_v58  ;;  %5046 = vmatpush1.bf16.msra.mxu0 %v7499_v10 }
  0xce   :  { %5080 = vmatprep.subr.bf16.mxu0 %v7143_v11  ;;  %8782 = vst [vmem:[#allocation115_spill] sm:$0xff] %v7518_v41  ;;  %8783 = vst [vmem:[#allocation116_spill] sm:$0xff] %v7522_v48 }
  0xd0   :  { %5078 = vmatpush1.bf16.msra.mxu1 %v7501_v4 }
  0xd1   :  { %5112 = vmatprep.subr.bf16.mxu1 %v7246_v8 }
 0x130   :  { %v229_v21 = vpop.f32.mrb[0].mxu0 }
 0x131   :  { %v231_v59 = vpop.f32.mrb[1].mxu0  ;;  %v230_v8 = vadd.f32 %v229_v21, %v7518_v41  ;;  %v7530_v21 = vrot.slane %v116_v37, %v8598_v20 }
 0x132   :  { %v232_v27 = vadd.f32 %v231_v59, %v7522_v48 }
 0x146   :  { %v709_v11 = vpop.f32.mrb[16].mxu1 }
 0x147   :  { %v785_v4 = vadd.f32 %v709_v11, %v230_v8  ;;  %v711_v10 = vpop.f32.mrb[17].mxu1  ;;  %v7534_v11 = vrot.slane %v116_v37, %v8603_v13  ;;  %v8798_v13 = vld [vmem:[#allocation79_spill] sm:$0xff] }
 0x148   :  { %v786_v58 = vadd.f32 %v711_v10, %v232_v27 }
 0x149   :  { %v4762_v34 = vmul.f32 -1.442695, %v785_v4 }
 0x14a   :  { %v4763_v3 = vmul.f32 -1.442695, %v786_v58 }
 0x14c   :  { %6563 = vpow2.f32 %v4763_v3 }
 0x14d   :  { %6565 = vpow2.f32 %v4762_v34 }
 0x156   :  { %v6564_v35 = vpop.eup %6563 }
 0x157   :  { %v6566_v0 = vpop.eup %6565  ;;  %v798_v51 = vadd.f32 1.0, %v6564_v35 }
 0x158   :  { %v792_v59 = vadd.f32 1.0, %v6566_v0 }
 0x159   :  { %6567 = vrcp.f32 %v798_v51 }
 0x15a   :  { %6569 = vrcp.f32 %v792_v59 }
 0x163   :  { %v6568_v4 = vpop.eup %6567 }
 0x164   :  { %v6570_v35 = vpop.eup %6569  ;;  %v808_v20 = vmul.f32 0.0, %v6568_v4  ;;  %v8790_v4 = vld [vmem:[#allocation71_spill] sm:$0xff] }
 0x166   :  { %v780_v8 = vpop.f32.mrb[0].mxu1 }
 0x167   :  { %v6473_v3 = vadd.f32 %v780_v8, %v7530_v21  ;;  %v782_v58 = vpop.f32.mrb[1].mxu1 }
 0x168   :  { %v6474_v10 = vadd.f32 %v782_v58, %v7534_v11  ;;  %v8787_v58 = vld [vmem:[#allocation68_spill] sm:$0xff] }
 0x169   :  { %6571 = vtanh.f32 %v6473_v3  ;;  %v8786_v3 = vld [vmem:[#allocation67_spill] sm:$0xff] }
 0x16a   :  { %v4764_v34 = vmul.f32 -1.442695, %v6474_v10  ;;  %v8788_v10 = vld [vmem:[#allocation69_spill] sm:$0xff] }
 0x16c   :  { %6573 = vpow2.f32 %v4764_v34  ;;  %v8789_v34 = vld [vmem:[#allocation70_spill] sm:$0xff] }
 0x173   :  { %v6572_v27 = vpop.eup %6571 }
 0x174   :  { %v809_v0 = vmul.f32 %v6572_v27, %v6570_v35  ;;  %v8791_v35 = vld [vmem:[#allocation72_spill] sm:$0xff]  ;;  %v8792_v27 = vld [vmem:[#allocation73_spill] sm:$0xff] }
 0x176   :  { %v6574_v48 = vpop.eup %6573  ;;  %v7538_v41 = vadd.f32 %v809_v0, %v808_v20  ;;  %v8784_v20 = vld [vmem:[#allocation65_spill] sm:$0xff]  ;;  %v8793_v0 = vld [vmem:[#allocation74_spill] sm:$0xff] }
 0x177   :  { %v805_v37 = vadd.f32 1.0, %v6574_v48  ;;  %v8785_v48 = vld [vmem:[#allocation66_spill] sm:$0xff] }
 0x178   :  { %6575 = vtanh.f32 %v7538_v41 }
 0x179   :  { %6577 = vrcp.f32 %v805_v37  ;;  %v8794_v37 = vld [vmem:[#allocation75_spill] sm:$0xff] }
 0x182   :  { %v6576_v51 = vpop.eup %6575 }
 0x183   :  { %v6578_v8 = vpop.eup %6577 }
 0x184   :  { %v812_v59 = vmul.f32 %v6578_v8, %v6576_v51  ;;  %v8795_v51 = vld [vmem:[#allocation76_spill] sm:$0xff]  ;;  %v8796_v8 = vld [vmem:[#allocation77_spill] sm:$0xff] }
 0x186   :  { %1020 = vmatmul.mubr.f32.vlgmr.msra.gmra.mrb[16].mxu0 %v812_v59  ;;  %1091 = vmatmul.mubr.f32.vlgmr.msra.gmra.mrb[18].mxu1 %v812_v59 }
 0x187   :  { %5082 = vmatpush1.bf16.msra.mxu0 %v7148_v15  ;;  %5114 = vmatpush1.bf16.msra.mxu1 %v7253_v14 }
 0x188   :  { %5084 = vmatprep.subr.bf16.mxu0 %v7151_v16  ;;  %5116 = vmatprep.subr.bf16.mxu1 %v7256_v17 }
 0x189   :  { %1194 = vmatprep.mubr.f32.mxu0 %v8752_v61  ;;  %1265 = vmatprep.mubr.f32.mxu1 %v8752_v61 }
 0x18b   :  { %5086 = vmatpush1.bf16.msra.mxu0 %v7159_v22  ;;  %5118 = vmatpush1.bf16.msra.mxu1 %v7262_v24 }
 0x18c   :  { %5088 = vmatprep.subr.bf16.mxu0 %v7162_v23  ;;  %5120 = vmatprep.subr.bf16.mxu1 %v7266_v25 }
 0x18f   :  { %5090 = vmatpush1.bf16.msra.mxu0 %v7170_v29  ;;  %5122 = vmatpush1.bf16.msra.mxu1 %v7271_v31 }
 0x190   :  { %5092 = vmatprep.subr.bf16.mxu0 %v7173_v32  ;;  %5124 = vmatprep.subr.bf16.mxu1 %v7274_v33 }
 0x193   :  { %5094 = vmatpush1.bf16.msra.mxu0 %v7193_v42  ;;  %5126 = vmatpush1.bf16.msra.mxu1 %v7279_v38 }
 0x194   :  { %5096 = vmatprep.subr.bf16.mxu0 %v7196_v43  ;;  %5128 = vmatprep.subr.bf16.mxu1 %v7282_v39 }
 0x197   :  { %5098 = vmatpush1.bf16.msra.mxu0 %v7204_v49  ;;  %5130 = vmatpush1.bf16.msra.mxu1 %v7287_v46 }
 0x198   :  { %5100 = vmatprep.subr.bf16.mxu0 %v7207_v50  ;;  %5132 = vmatprep.subr.bf16.mxu1 %v7290_v47 }
 0x19b   :  { %5102 = vmatpush1.bf16.msra.mxu0 %v7217_v56  ;;  %5134 = vmatpush1.bf16.msra.mxu1 %v7293_v54 }
 0x19c   :  { %5104 = vmatprep.subr.bf16.mxu0 %v7220_v57  ;;  %5136 = vmatprep.subr.bf16.mxu1 %v7296_v55 }
 0x19f   :  { %5106 = vmatpush1.bf16.msra.mxu0 %v7230_v63  ;;  %5138 = vmatpush1.bf16.msra.mxu1 %v7299_v62 }
 0x1a0   :  { %5108 = vmatprep.subr.bf16.mxu0 %v7233_v1  ;;  %5140 = vmatprep.subr.bf16.mxu1 %v7302_v2 }
 0x1a3   :  { %5110 = vmatpush1.bf16.msra.mxu0 %v7243_v7  ;;  %5142 = vmatpush1.bf16.msra.mxu1 %v7305_v5 }
 0x1a4   :  { %5144 = vmatprep.subr.bf16.mxu0 %v7311_v12  ;;  %5176 = vmatprep.subr.bf16.mxu1 %v7313_v18 }
 0x1a6   :  { %1195 = vmatmul.mubr.f32.vlgmr.msra.gmra.mrb[2].mxu0 %v812_v59  ;;  %1266 = vmatmul.mubr.f32.vlgmr.msra.gmra.mrb[2].mxu1 %v812_v59  ;;  %v8797_v59 = vld [vmem:[#allocation78_spill] sm:$0xff] }
 0x1a7   :  { %5146 = vmatpush1.bf16.msra.mxu0 %v7317_v26  ;;  %5178 = vmatpush1.bf16.msra.mxu1 %v7319_v28 }
 0x1a8   :  { %5148 = vmatprep.subr.bf16.mxu0 %v7323_v36  ;;  %5180 = vmatprep.subr.bf16.mxu1 %v7325_v44 }
 0x1a9   :  { %1364 = vmatprep.mubr.f32.mxu0 %v8752_v61  ;;  %1435 = vmatprep.mubr.f32.mxu1 %v8752_v61 }
 0x1ab   :  { %5150 = vmatpush1.bf16.msra.mxu0 %v7327_v45  ;;  %5182 = vmatpush1.bf16.msra.mxu1 %v7330_v52 }
 0x1ac   :  { %5152 = vmatprep.subr.bf16.mxu0 %v7335_v60  ;;  %5184 = vmatprep.subr.bf16.mxu1 %v7337_v6 }
 0x1af   :  { %5154 = vmatpush1.bf16.msra.mxu0 %v7339_v9  ;;  %5186 = vmatpush1.bf16.msra.mxu1 %v7342_v19 }
 0x1b0   :  { %5156 = vmatprep.subr.bf16.mxu0 %v7347_v30  ;;  %5188 = vmatprep.subr.bf16.mxu1 %v7349_v40 }
 0x1b3   :  { %5158 = vmatpush1.bf16.msra.mxu0 %v8784_v20  ;;  %5190 = vmatpush1.bf16.msra.mxu1 %v8785_v48  ;;  %v8807_v48 = vsub.s32 3, %v7509_v53 }
 0x1b4   :  { %5160 = vmatprep.subr.bf16.mxu0 %v8786_v3  ;;  %5192 = vmatprep.subr.bf16.mxu1 %v8787_v58 }
 0x1b7   :  { %5162 = vmatpush1.bf16.msra.mxu0 %v8788_v10  ;;  %5194 = vmatpush1.bf16.msra.mxu1 %v8789_v34  ;;  %v8799_v10 = vld [vmem:[#allocation80_spill] sm:$0xff]  ;;  %v8800_v34 = vld [vmem:[#allocation81_spill] sm:$0xff] }
 0x1b8   :  { %5164 = vmatprep.subr.bf16.mxu0 %v8790_v4  ;;  %5196 = vmatprep.subr.bf16.mxu1 %v8791_v35  ;;  %v8801_v4 = vld [vmem:[#allocation82_spill] sm:$0xff]  ;;  %v8802_v35 = vld [vmem:[#allocation83_spill] sm:$0xff] }
 0x1bb   :  { %5166 = vmatpush1.bf16.msra.mxu0 %v8792_v27  ;;  %5198 = vmatpush1.bf16.msra.mxu1 %v8793_v0  ;;  %v8803_v27 = vld [vmem:[#allocation84_spill] sm:$0xff] }
 0x1bc   :  { %5168 = vmatprep.subr.bf16.mxu0 %v8794_v37  ;;  %5200 = vmatprep.subr.bf16.mxu1 %v8795_v51  ;;  %v613_v51 = vld [vmem:[%s8484_s6] sm:$0xf] }
 0x1bd   :  { %v7624_v20 = vrot.slane %v613_v51, %v8807_v48 }
 0x1bf   :  { %5170 = vmatpush1.bf16.msra.mxu0 %v8796_v8  ;;  %5202 = vmatpush1.bf16.msra.mxu1 %v8797_v59  ;;  %v8804_v8 = vsub.s32 0, %v7509_v53  ;;  %8808 = vst [vmem:[#allocation118_spill] sm:$0xff] %v7624_v20 }
 0x1c0   :  { %5172 = vmatprep.subr.bf16.mxu0 %v8798_v13  ;;  %5204 = vmatprep.subr.bf16.mxu1 %v8799_v10  ;;  %v8806_v13 = vsub.s32 1, %v7509_v53 }
 0x1c1   :  { %v7614_v37 = vrot.slane %v613_v51, %v8804_v8 }
 0x1c2   :  { %v7618_v59 = vrot.slane %v613_v51, %v8806_v13  ;;  %v8809_v13 = vsub.s32 2, %v7509_v53 }
 0x1c3   :  { %5174 = vmatpush1.bf16.msra.mxu0 %v8800_v34  ;;  %5206 = vmatpush1.bf16.msra.mxu1 %v8801_v4  ;;  %8805 = vst [vmem:[#allocation117_spill] sm:$0xff] %v7614_v37 }
 0x1c4   :  { %5208 = vmatprep.subr.bf16.mxu0 %v8802_v35  ;;  %5240 = vmatprep.subr.bf16.mxu1 %v8803_v27  ;;  %v7629_v40 = vrot.slane %v613_v51, %v8809_v13 }
 0x1c6   :  { %8810 = vst [vmem:[#allocation119_spill] sm:$0xff] %v7629_v40 }
 0x259   :  { %v1021_v10 = vpop.f32.mrb[16].mxu0  ;;  %v1092_v34 = vpop.f32.mrb[18].mxu1 }
 0x25a   :  { %v1097_v4 = vadd.f32 %v1021_v10, %v7614_v37  ;;  %v1023_v0 = vpop.f32.mrb[17].mxu0  ;;  %v1094_v35 = vpop.f32.mrb[19].mxu1  ;;  %v1099_v10 = vadd.f32 %v1092_v34, %v7629_v40  ;;  %v8811_v34 = vld [vmem:[#allocation115_spill] sm:$0xff] }
 0x25b   :  { %v1098_v27 = vadd.f32 %v1023_v0, %v7618_v59  ;;  %v1100_v8 = vadd.f32 %v1094_v35, %v7624_v20 }
 0x25c   :  { %v4765_v58 = vmul.f32 -1.442695, %v1097_v4 }
 0x25d   :  { %v4766_v3 = vmul.f32 -1.442695, %v1098_v27  ;;  %v4767_v30 = vmul.f32 -1.442695, %v1100_v8 }
 0x25e   :  { %6579 = vpow2.f32 %v4765_v58 }
 0x25f   :  { %6581 = vpow2.f32 %v4766_v3 }
 0x260   :  { %6583 = vpow2.f32 %v4767_v30 }
 0x261   :  { %6585 = vtanh.f32 %v1099_v10 }
 0x268   :  { %v6580_v37 = vpop.eup %6579 }
 0x269   :  { %v6582_v19 = vpop.eup %6581  ;;  %v1104_v0 = vadd.f32 1.0, %v6580_v37 }
 0x26a   :  { %v1110_v4 = vadd.f32 1.0, %v6582_v19  ;;  %v6584_v48 = vpop.eup %6583  ;;  %v8812_v19 = vld [vmem:[#allocation116_spill] sm:$0xff] }
 0x26b   :  { %6587 = vrcp.f32 %v1104_v0  ;;  %v6586_v58 = vpop.eup %6585  ;;  %v1117_v20 = vadd.f32 1.0, %v6584_v48 }
 0x26c   :  { %6589 = vrcp.f32 %v1110_v4 }
 0x26d   :  { %6591 = vrcp.f32 %v1117_v20 }
 0x275   :  { %v6588_v3 = vpop.eup %6587 }
 0x276   :  { %v6590_v27 = vpop.eup %6589  ;;  %v1121_v35 = vmul.f32 %v6588_v3, %v6586_v58 }
 0x277   :  { %v1120_v53 = vmul.f32 0.0, %v6590_v27  ;;  %v6592_v58 = vpop.eup %6591 }
 0x279   :  { %v7632_v51 = vadd.f32 %v1121_v35, %v1120_v53  ;;  %v1196_v8 = vpop.f32.mrb[2].mxu0  ;;  %v1267_v13 = vpop.f32.mrb[2].mxu1 }
 0x27a   :  { %v6459_v40 = vadd.f32 %v1196_v8, %v8811_v34  ;;  %v1198_v37 = vpop.f32.mrb[3].mxu0  ;;  %v1269_v30 = vpop.f32.mrb[3].mxu1  ;;  %v6475_v35 = vadd.f32 %v1267_v13, %v7530_v21  ;;  %v8818_v13 = vld [vmem:[#allocation89_spill] sm:$0xff] }
 0x27b   :  { %6593 = vtanh.f32 %v7632_v51  ;;  %v6460_v10 = vadd.f32 %v1198_v37, %v8812_v19  ;;  %v6476_v48 = vadd.f32 %v1269_v30, %v7534_v11 }
 0x27c   :  { %v4768_v0 = vmul.f32 -1.442695, %v6459_v40  ;;  %v8814_v40 = vld [vmem:[#allocation85_spill] sm:$0xff] }
 0x27d   :  { %v4769_v4 = vmul.f32 -1.442695, %v6460_v10  ;;  %v4770_v27 = vmul.f32 -1.442695, %v6476_v48  ;;  %v8815_v10 = vld [vmem:[#allocation86_spill] sm:$0xff] }
 0x27e   :  { %6595 = vpow2.f32 %v4768_v0  ;;  %v8816_v0 = vld [vmem:[#allocation87_spill] sm:$0xff]  ;;  %v8819_v48 = vld [vmem:[#allocation90_spill] sm:$0xff] }
 0x27f   :  { %6597 = vpow2.f32 %v4769_v4  ;;  %v8817_v4 = vld [vmem:[#allocation88_spill] sm:$0xff] }
 0x280   :  { %6599 = vpow2.f32 %v4770_v27  ;;  %v8822_v27 = vld [vmem:[#allocation93_spill] sm:$0xff] }
 0x281   :  { %6601 = vtanh.f32 %v6475_v35  ;;  %v8823_v35 = vld [vmem:[#allocation94_spill] sm:$0xff] }
 0x285   :  { %v6594_v3 = vpop.eup %6593 }
 0x286   :  { %v7639_v20 = vmul.f32 %v6594_v3, %v6592_v58  ;;  %v8820_v58 = vld [vmem:[#allocation91_spill] sm:$0xff]  ;;  %v8821_v3 = vld [vmem:[#allocation92_spill] sm:$0xff] }
 0x288   :  { %8813 = vst [vmem:[#allocation115_spill] sm:$0xff] %v7639_v20  ;;  %v6596_v53 = vpop.eup %6595  ;;  %1365 = vmatmul.mubr.f32.vlgmr.msra.gmra.mrb[18].mxu0 %v7639_v20  ;;  %1436 = vmatmul.mubr.f32.vlgmr.msra.gmra.mrb[20].mxu1 %v7639_v20 }
 0x289   :  { %v6598_v8 = vpop.eup %6597  ;;  %v1279_v37 = vadd.f32 1.0, %v6596_v53  ;;  %5210 = vmatpush1.bf16.msra.mxu0 %v8814_v40  ;;  %5242 = vmatpush1.bf16.msra.mxu1 %v8815_v10  ;;  %v8824_v53 = vld [vmem:[#allocation95_spill] sm:$0xff] }
 0x28a   :  { %v1285_v30 = vadd.f32 1.0, %v6598_v8  ;;  %5212 = vmatprep.subr.bf16.mxu0 %v8816_v0  ;;  %5244 = vmatprep.subr.bf16.mxu1 %v8817_v4  ;;  %v8825_v8 = vld [vmem:[#allocation96_spill] sm:$0xff]  ;;  %v8828_v10 = vld [vmem:[#allocation99_spill] sm:$0xff] }
 0x28b   :  { %6603 = vrcp.f32 %v1279_v37  ;;  %1506 = vmatprep.mubr.f32.mxu0 %v8752_v61  ;;  %1577 = vmatprep.mubr.f32.mxu1 %v8752_v61  ;;  %v6600_v37 = vpop.eup %6599  ;;  %v8832_v40 = vld [vmem:[#allocation103_spill] sm:$0xff] }
 0x28c   :  { %6605 = vrcp.f32 %v1285_v30  ;;  %v6602_v20 = vpop.eup %6601  ;;  %v8826_v30 = vld [vmem:[#allocation97_spill] sm:$0xff] }
 0x28d   :  { %5214 = vmatpush1.bf16.msra.mxu0 %v8818_v13  ;;  %5246 = vmatpush1.bf16.msra.mxu1 %v8819_v48  ;;  %v8827_v13 = vld [vmem:[#allocation98_spill] sm:$0xff] }
 0x28e   :  { %5216 = vmatprep.subr.bf16.mxu0 %v8820_v58  ;;  %5248 = vmatprep.subr.bf16.mxu1 %v8821_v3  ;;  %v1292_v58 = vadd.f32 1.0, %v6600_v37  ;;  %v8829_v3 = vld [vmem:[#allocation100_spill] sm:$0xff]  ;;  %v8836_v37 = vld [vmem:[#allocation107_spill] sm:$0xff] }
 0x290   :  { %6607 = vrcp.f32 %v1292_v58  ;;  %v8841_v58 = vld [vmem:[#allocation112_spill] sm:$0xff] }
 0x291   :  { %5218 = vmatpush1.bf16.msra.mxu0 %v8822_v27  ;;  %5250 = vmatpush1.bf16.msra.mxu1 %v8823_v35 }
 0x292   :  { %5220 = vmatprep.subr.bf16.mxu0 %v8824_v53  ;;  %5252 = vmatprep.subr.bf16.mxu1 %v8825_v8  ;;  %v8830_v53 = vld [vmem:[#allocation101_spill] sm:$0xff]  ;;  %v8831_v8 = vld [vmem:[#allocation102_spill] sm:$0xff] }
 0x295   :  { %v6604_v4 = vpop.eup %6603  ;;  %5222 = vmatpush1.bf16.msra.mxu0 %v8826_v30  ;;  %5254 = vmatpush1.bf16.msra.mxu1 %v8827_v13  ;;  %v8833_v30 = vld [vmem:[#allocation104_spill] sm:$0xff] }
 0x296   :  { %v6606_v48 = vpop.eup %6605  ;;  %v1296_v0 = vmul.f32 %v6604_v4, %v6602_v20  ;;  %5224 = vmatprep.subr.bf16.mxu0 %v8828_v10  ;;  %5256 = vmatprep.subr.bf16.mxu1 %v8829_v3  ;;  %v8834_v20 = vld [vmem:[#allocation105_spill] sm:$0xff]  ;;  %v8835_v4 = vld [vmem:[#allocation106_spill] sm:$0xff] }
 0x297   :  { %v1295_v35 = vmul.f32 %v6606_v48, %v7538_v41  ;;  %v8837_v41 = vld [vmem:[#allocation108_spill] sm:$0xff]  ;;  %v8839_v48 = vld [vmem:[#allocation110_spill] sm:$0xff] }
 0x299   :  { %v7662_v27 = vadd.f32 %v1296_v0, %v1295_v35  ;;  %5226 = vmatpush1.bf16.msra.mxu0 %v8830_v53  ;;  %5258 = vmatpush1.bf16.msra.mxu1 %v8831_v8  ;;  %v8838_v0 = vld [vmem:[#allocation109_spill] sm:$0xff]  ;;  %v8840_v35 = vld [vmem:[#allocation111_spill] sm:$0xff]  ;;  %v8843_v53 = vld [vmem:[#allocation114_spill] sm:$0xff] }
 0x29a   :  { %5228 = vmatprep.subr.bf16.mxu0 %v8832_v40  ;;  %5260 = vmatprep.subr.bf16.mxu1 %v8833_v30  ;;  %v6608_v40 = vpop.eup %6607  ;;  %v8842_v8 = vld [vmem:[#allocation113_spill] sm:$0xff] }
 0x29b   :  { %6609 = vtanh.f32 %v7662_v27 }
 0x29d   :  { %5230 = vmatpush1.bf16.msra.mxu0 %v8834_v20  ;;  %5262 = vmatpush1.bf16.msra.mxu1 %v8835_v4  ;;  %v8844_v4 = vld [vmem:[#allocation25_spill] sm:$0xff] }
 0x29e   :  { %5232 = vmatprep.subr.bf16.mxu0 %v8836_v37  ;;  %5264 = vmatprep.subr.bf16.mxu1 %v8837_v41  ;;  %v8845_v37 = vld [vmem:[#allocation38_spill] sm:$0xff] }
 0x2a1   :  { %5234 = vmatpush1.bf16.msra.mxu0 %v8838_v0  ;;  %5266 = vmatpush1.bf16.msra.mxu1 %v8839_v48 }
 0x2a2   :  { %5236 = vmatprep.subr.bf16.mxu0 %v8840_v35  ;;  %5268 = vmatprep.subr.bf16.mxu1 %v8841_v58 }
 0x2a5   :  { %v6610_v30 = vpop.eup %6609  ;;  %5238 = vmatpush1.bf16.msra.mxu0 %v8842_v8  ;;  %5270 = vmatpush1.bf16.msra.mxu1 %v8843_v53 }
 0x2a6   :  { %v1299_v20 = vmul.f32 %v6610_v30, %v6608_v40  ;;  %5272 = vmatprep.subr.bf16.mxu0 %v8844_v4  ;;  %5304 = vmatprep.subr.bf16.mxu1 %v8845_v37  ;;  %v8846_v40 = vld [vmem:[#allocation62_spill] sm:$0xff]  ;;  %v8847_v30 = vld [vmem:[#allocation63_spill] sm:$0xff] }
 0x2a8   :  { %1507 = vmatmul.mubr.f32.vlgmr.msra.gmra.mrb[18].mxu0 %v1299_v20  ;;  %1578 = vmatmul.mubr.f32.vlgmr.msra.gmra.mrb[20].mxu1 %v1299_v20 }
 0x2a9   :  { %5274 = vmatpush1.bf16.msra.mxu0 %v7148_v15  ;;  %5306 = vmatpush1.bf16.msra.mxu1 %v7253_v14 }
 0x2aa   :  { %5276 = vmatprep.subr.bf16.mxu0 %v7151_v16  ;;  %5308 = vmatprep.subr.bf16.mxu1 %v7256_v17 }
 0x2ab   :  { %1681 = vmatprep.mubr.f32.mxu0 %v8752_v61  ;;  %1752 = vmatprep.mubr.f32.mxu1 %v8752_v61 }
 0x2ad   :  { %5278 = vmatpush1.bf16.msra.mxu0 %v7159_v22  ;;  %5310 = vmatpush1.bf16.msra.mxu1 %v7262_v24 }
 0x2ae   :  { %5280 = vmatprep.subr.bf16.mxu0 %v7162_v23  ;;  %5312 = vmatprep.subr.bf16.mxu1 %v7266_v25 }
 0x2b1   :  { %5282 = vmatpush1.bf16.msra.mxu0 %v7170_v29  ;;  %5314 = vmatpush1.bf16.msra.mxu1 %v7271_v31 }
 0x2b2   :  { %5284 = vmatprep.subr.bf16.mxu0 %v7173_v32  ;;  %5316 = vmatprep.subr.bf16.mxu1 %v7274_v33 }
 0x2b5   :  { %5286 = vmatpush1.bf16.msra.mxu0 %v7193_v42  ;;  %5318 = vmatpush1.bf16.msra.mxu1 %v7279_v38 }
 0x2b6   :  { %5288 = vmatprep.subr.bf16.mxu0 %v7196_v43  ;;  %5320 = vmatprep.subr.bf16.mxu1 %v7282_v39 }
 0x2b9   :  { %5290 = vmatpush1.bf16.msra.mxu0 %v7204_v49  ;;  %5322 = vmatpush1.bf16.msra.mxu1 %v7287_v46 }
 0x2ba   :  { %5292 = vmatprep.subr.bf16.mxu0 %v7207_v50  ;;  %5324 = vmatprep.subr.bf16.mxu1 %v7290_v47 }
 0x2bd   :  { %5294 = vmatpush1.bf16.msra.mxu0 %v7217_v56  ;;  %5326 = vmatpush1.bf16.msra.mxu1 %v7293_v54 }
 0x2be   :  { %5296 = vmatprep.subr.bf16.mxu0 %v7220_v57  ;;  %5328 = vmatprep.subr.bf16.mxu1 %v7296_v55 }
 0x2c1   :  { %5298 = vmatpush1.bf16.msra.mxu0 %v7230_v63  ;;  %5330 = vmatpush1.bf16.msra.mxu1 %v7299_v62 }
 0x2c2   :  { %5300 = vmatprep.subr.bf16.mxu0 %v7233_v1  ;;  %5332 = vmatprep.subr.bf16.mxu1 %v7302_v2 }
 0x2c5   :  { %5302 = vmatpush1.bf16.msra.mxu0 %v7243_v7  ;;  %5334 = vmatpush1.bf16.msra.mxu1 %v7305_v5 }
 0x2c6   :  { %5336 = vmatprep.subr.bf16.mxu0 %v7311_v12  ;;  %5368 = vmatprep.subr.bf16.mxu1 %v7313_v18 }
 0x2c8   :  { %1682 = vmatmul.mubr.f32.vlgmr.msra.gmra.mrb[4].mxu0 %v1299_v20  ;;  %1753 = vmatmul.mubr.f32.vlgmr.msra.gmra.mrb[4].mxu1 %v1299_v20  ;;  %v8848_v20 = vld [vmem:[#allocation64_spill] sm:$0xff] }
 0x2c9   :  { %5338 = vmatpush1.bf16.msra.mxu0 %v7317_v26  ;;  %5370 = vmatpush1.bf16.msra.mxu1 %v7319_v28  ;;  %v8851_v28 = vld [vmem:[#allocation67_spill] sm:$0xff]  ;;  %v8869_v26 = vld [vmem:[#allocation117_spill] sm:$0xff] }
 0x2ca   :  { %5340 = vmatprep.subr.bf16.mxu0 %v7323_v36  ;;  %5372 = vmatprep.subr.bf16.mxu1 %v7325_v44  ;;  %v8849_v44 = vld [vmem:[#allocation65_spill] sm:$0xff]  ;;  %v8850_v36 = vld [vmem:[#allocation66_spill] sm:$0xff] }
 0x2cb   :  { %1851 = vmatprep.mubr.f32.mxu0 %v8752_v61  ;;  %1922 = vmatprep.mubr.f32.mxu1 %v8752_v61 }
 0x2cd   :  { %5342 = vmatpush1.bf16.msra.mxu0 %v7327_v45  ;;  %5374 = vmatpush1.bf16.msra.mxu1 %v7330_v52  ;;  %v8852_v45 = vld [vmem:[#allocation68_spill] sm:$0xff]  ;;  %v8853_v52 = vld [vmem:[#allocation69_spill] sm:$0xff] }
 0x2ce   :  { %5344 = vmatprep.subr.bf16.mxu0 %v7335_v60  ;;  %5376 = vmatprep.subr.bf16.mxu1 %v7337_v6  ;;  %v8854_v60 = vld [vmem:[#allocation70_spill] sm:$0xff]  ;;  %v8855_v6 = vld [vmem:[#allocation71_spill] sm:$0xff] }
 0x2d1   :  { %5346 = vmatpush1.bf16.msra.mxu0 %v7339_v9  ;;  %5378 = vmatpush1.bf16.msra.mxu1 %v8846_v40  ;;  %v8856_v9 = vld [vmem:[#allocation72_spill] sm:$0xff]  ;;  %v8857_v40 = vld [vmem:[#allocation73_spill] sm:$0xff] }
 0x2d2   :  { %5348 = vmatprep.subr.bf16.mxu0 %v8847_v30  ;;  %5380 = vmatprep.subr.bf16.mxu1 %v8848_v20  ;;  %v8858_v30 = vld [vmem:[#allocation74_spill] sm:$0xff]  ;;  %v8859_v20 = vld [vmem:[#allocation75_spill] sm:$0xff] }
 0x2d5   :  { %5350 = vmatpush1.bf16.msra.mxu0 %v8849_v44  ;;  %5382 = vmatpush1.bf16.msra.mxu1 %v8850_v36  ;;  %v8860_v44 = vld [vmem:[#allocation76_spill] sm:$0xff]  ;;  %v8861_v36 = vld [vmem:[#allocation77_spill] sm:$0xff] }
 0x2d6   :  { %5352 = vmatprep.subr.bf16.mxu0 %v8851_v28  ;;  %5384 = vmatprep.subr.bf16.mxu1 %v8852_v45  ;;  %v8862_v28 = vld [vmem:[#allocation78_spill] sm:$0xff]  ;;  %v8863_v45 = vld [vmem:[#allocation79_spill] sm:$0xff] }
 0x2d9   :  { %5354 = vmatpush1.bf16.msra.mxu0 %v8853_v52  ;;  %5386 = vmatpush1.bf16.msra.mxu1 %v8854_v60  ;;  %v8864_v52 = vld [vmem:[#allocation80_spill] sm:$0xff]  ;;  %v8865_v60 = vld [vmem:[#allocation81_spill] sm:$0xff] }
 0x2da   :  { %5356 = vmatprep.subr.bf16.mxu0 %v8855_v6  ;;  %5388 = vmatprep.subr.bf16.mxu1 %v8856_v9  ;;  %v8866_v6 = vld [vmem:[#allocation82_spill] sm:$0xff]  ;;  %v8867_v9 = vld [vmem:[#allocation83_spill] sm:$0xff] }
 0x2dd   :  { %5358 = vmatpush1.bf16.msra.mxu0 %v8857_v40  ;;  %5390 = vmatpush1.bf16.msra.mxu1 %v8858_v30  ;;  %v8868_v40 = vld [vmem:[#allocation84_spill] sm:$0xff] }
 0x2de   :  { %5360 = vmatprep.subr.bf16.mxu0 %v8859_v20  ;;  %5392 = vmatprep.subr.bf16.mxu1 %v8860_v44 }
 0x2e1   :  { %5362 = vmatpush1.bf16.msra.mxu0 %v8861_v36  ;;  %5394 = vmatpush1.bf16.msra.mxu1 %v8862_v28 }
 0x2e2   :  { %5364 = vmatprep.subr.bf16.mxu0 %v8863_v45  ;;  %5396 = vmatprep.subr.bf16.mxu1 %v8864_v52  ;;  %v8870_v52 = vld [vmem:[#allocation118_spill] sm:$0xff] }
 0x2e5   :  { %5366 = vmatpush1.bf16.msra.mxu0 %v8865_v60  ;;  %5398 = vmatpush1.bf16.msra.mxu1 %v8866_v6  ;;  %v8871_v6 = vld [vmem:[#allocation119_spill] sm:$0xff] }
 0x2e6   :  { %5400 = vmatprep.subr.bf16.mxu0 %v8867_v9  ;;  %5432 = vmatprep.subr.bf16.mxu1 %v8868_v40 }
 0x37b   :  { %v1508_v30 = vpop.f32.mrb[18].mxu0  ;;  %v1579_v20 = vpop.f32.mrb[20].mxu1 }
 0x37c   :  { %v1584_v44 = vadd.f32 %v1508_v30, %v8869_v26  ;;  %v1510_v18 = vpop.f32.mrb[19].mxu0  ;;  %v1581_v36 = vpop.f32.mrb[21].mxu1  ;;  %v1586_v7 = vadd.f32 %v1579_v20, %v8871_v6 }
 0x37d   :  { %v1585_v28 = vadd.f32 %v1510_v18, %v7618_v59  ;;  %v1587_v60 = vadd.f32 %v1581_v36, %v8870_v52 }
 0x37e   :  { %v4771_v12 = vmul.f32 -1.442695, %v1584_v44 }
 0x37f   :  { %v4772_v45 = vmul.f32 -1.442695, %v1585_v28  ;;  %v4773_v5 = vmul.f32 -1.442695, %v1587_v60 }
 0x380   :  { %6611 = vpow2.f32 %v4771_v12 }
 0x381   :  { %6613 = vpow2.f32 %v4772_v45 }
 0x382   :  { %6615 = vpow2.f32 %v4773_v5 }
 0x383   :  { %6617 = vtanh.f32 %v1586_v7 }
 0x38a   :  { %v6612_v9 = vpop.eup %6611 }
 0x38b   :  { %v6614_v2 = vpop.eup %6613  ;;  %v1591_v40 = vadd.f32 1.0, %v6612_v9 }
 0x38c   :  { %v1597_v1 = vadd.f32 1.0, %v6614_v2  ;;  %v6616_v30 = vpop.eup %6615 }
 0x38d   :  { %6619 = vrcp.f32 %v1591_v40  ;;  %v6618_v26 = vpop.eup %6617  ;;  %v1604_v12 = vadd.f32 1.0, %v6616_v30 }
 0x38e   :  { %6621 = vrcp.f32 %v1597_v1 }
 0x38f   :  { %6623 = vrcp.f32 %v1604_v12 }
 0x397   :  { %v6620_v18 = vpop.eup %6619 }
 0x398   :  { %v6622_v44 = vpop.eup %6621  ;;  %v1608_v28 = vmul.f32 %v6620_v18, %v6618_v26 }
 0x399   :  { %v1607_v45 = vmul.f32 %v6622_v44, %v7632_v51  ;;  %v6624_v51 = vpop.eup %6623 }
 0x39b   :  { %v7754_v36 = vadd.f32 %v1608_v28, %v1607_v45  ;;  %v1683_v60 = vpop.f32.mrb[4].mxu0  ;;  %v1754_v20 = vpop.f32.mrb[4].mxu1 }
 0x39c   :  { %v6461_v9 = vadd.f32 %v1683_v60, %v8811_v34  ;;  %v1685_v5 = vpop.f32.mrb[5].mxu0  ;;  %v1756_v7 = vpop.f32.mrb[5].mxu1  ;;  %v6477_v44 = vadd.f32 %v1754_v20, %v7530_v21  ;;  %v8877_v20 = vld [vmem:[#allocation89_spill] sm:$0xff] }
 0x39d   :  { %v6462_v2 = vadd.f32 %v1685_v5, %v8812_v19  ;;  %6625 = vtanh.f32 %v7754_v36  ;;  %v6478_v26 = vadd.f32 %v1756_v7, %v7534_v11  ;;  %v8874_v5 = vld [vmem:[#allocation86_spill] sm:$0xff] }
 0x39e   :  { %v4774_v1 = vmul.f32 -1.442695, %v6461_v9  ;;  %v8873_v9 = vld [vmem:[#allocation85_spill] sm:$0xff] }
 0x39f   :  { %v4775_v40 = vmul.f32 -1.442695, %v6462_v2  ;;  %v4776_v18 = vmul.f32 -1.442695, %v6478_v26  ;;  %v8875_v2 = vld [vmem:[#allocation87_spill] sm:$0xff] }
 0x3a0   :  { %6627 = vpow2.f32 %v4774_v1  ;;  %v8876_v1 = vld [vmem:[#allocation88_spill] sm:$0xff]  ;;  %v8879_v26 = vld [vmem:[#allocation91_spill] sm:$0xff] }
 0x3a1   :  { %6629 = vpow2.f32 %v4775_v40  ;;  %v8878_v40 = vld [vmem:[#allocation90_spill] sm:$0xff] }
 0x3a2   :  { %6631 = vpow2.f32 %v4776_v18  ;;  %v8882_v18 = vld [vmem:[#allocation94_spill] sm:$0xff] }
 0x3a3   :  { %6633 = vtanh.f32 %v6477_v44  ;;  %v8883_v44 = vld [vmem:[#allocation95_spill] sm:$0xff] }
 0x3a7   :  { %v6626_v30 = vpop.eup %6625 }
 0x3a8   :  { %v7761_v28 = vmul.f32 %v6626_v30, %v6624_v51  ;;  %v8880_v51 = vld [vmem:[#allocation92_spill] sm:$0xff]  ;;  %v8881_v30 = vld [vmem:[#allocation93_spill] sm:$0xff] }
 0x3aa   :  { %8872 = vst [vmem:[#allocation116_spill] sm:$0xff] %v7761_v28  ;;  %v6628_v12 = vpop.eup %6627  ;;  %1852 = vmatmul.mubr.f32.vlgmr.msra.gmra.mrb[20].mxu0 %v7761_v28  ;;  %1923 = vmatmul.mubr.f32.vlgmr.msra.gmra.mrb[22].mxu1 %v7761_v28 }
 0x3ab   :  { %v6630_v45 = vpop.eup %6629  ;;  %v1766_v60 = vadd.f32 1.0, %v6628_v12  ;;  %5402 = vmatpush1.bf16.msra.mxu0 %v8873_v9  ;;  %5434 = vmatpush1.bf16.msra.mxu1 %v8874_v5  ;;  %v8884_v12 = vld [vmem:[#allocation96_spill] sm:$0xff] }
 0x3ac   :  { %v1772_v7 = vadd.f32 1.0, %v6630_v45  ;;  %5404 = vmatprep.subr.bf16.mxu0 %v8875_v2  ;;  %5436 = vmatprep.subr.bf16.mxu1 %v8876_v1  ;;  %v6632_v45 = vpop.eup %6631 }
 0x3ad   :  { %6635 = vrcp.f32 %v1766_v60  ;;  %1993 = vmatprep.mubr.f32.mxu0 %v8752_v61  ;;  %2064 = vmatprep.mubr.f32.mxu1 %v8752_v61  ;;  %v6634_v60 = vpop.eup %6633 }
 0x3ae   :  { %6637 = vrcp.f32 %v1772_v7  ;;  %v8885_v7 = vld [vmem:[#allocation97_spill] sm:$0xff] }
 0x3af   :  { %5406 = vmatpush1.bf16.msra.mxu0 %v8877_v20  ;;  %5438 = vmatpush1.bf16.msra.mxu1 %v8878_v40 }
 0x3b0   :  { %5408 = vmatprep.subr.bf16.mxu0 %v8879_v26  ;;  %5440 = vmatprep.subr.bf16.mxu1 %v8880_v51  ;;  %v1779_v26 = vadd.f32 1.0, %v6632_v45  ;;  %v8888_v51 = vld [vmem:[#allocation103_spill] sm:$0xff]  ;;  %v8891_v45 = vld [vmem:[#allocation106_spill] sm:$0xff] }
 0x3b2   :  { %6639 = vrcp.f32 %v1779_v26  ;;  %v8893_v26 = vld [vmem:[#allocation36_spill] sm:$0xff] }
 0x3b3   :  { %5410 = vmatpush1.bf16.msra.mxu0 %v8881_v30  ;;  %5442 = vmatpush1.bf16.msra.mxu1 %v8882_v18 }
 0x3b4   :  { %5412 = vmatprep.subr.bf16.mxu0 %v8883_v44  ;;  %5444 = vmatprep.subr.bf16.mxu1 %v8884_v12  ;;  %v8886_v44 = vld [vmem:[#allocation101_spill] sm:$0xff]  ;;  %v8887_v12 = vld [vmem:[#allocation102_spill] sm:$0xff] }
 0x3b7   :  { %v6636_v28 = vpop.eup %6635  ;;  %5414 = vmatpush1.bf16.msra.mxu0 %v8885_v7  ;;  %5446 = vmatpush1.bf16.msra.mxu1 %v8827_v13  ;;  %v8889_v7 = vld [vmem:[#allocation104_spill] sm:$0xff] }
 0x3b8   :  { %v6638_v40 = vpop.eup %6637  ;;  %v1783_v20 = vmul.f32 %v6636_v28, %v6634_v60  ;;  %5416 = vmatprep.subr.bf16.mxu0 %v8828_v10  ;;  %5448 = vmatprep.subr.bf16.mxu1 %v8829_v3  ;;  %v8890_v28 = vld [vmem:[#allocation105_spill] sm:$0xff]  ;;  %v8892_v60 = vld [vmem:[#allocation107_spill] sm:$0xff] }
 0x3b9   :  { %v1782_v18 = vmul.f32 %v6638_v40, %v7662_v27 }
 0x3bb   :  { %v7784_v30 = vadd.f32 %v1783_v20, %v1782_v18  ;;  %5418 = vmatpush1.bf16.msra.mxu0 %v8886_v44  ;;  %5450 = vmatpush1.bf16.msra.mxu1 %v8887_v12  ;;  %v8894_v18 = vld [vmem:[#allocation49_spill] sm:$0xff] }
 0x3bc   :  { %5420 = vmatprep.subr.bf16.mxu0 %v8888_v51  ;;  %5452 = vmatprep.subr.bf16.mxu1 %v8889_v7  ;;  %v6640_v27 = vpop.eup %6639 }
 0x3bd   :  { %6641 = vtanh.f32 %v7784_v30 }
 0x3bf   :  { %5422 = vmatpush1.bf16.msra.mxu0 %v8890_v28  ;;  %5454 = vmatpush1.bf16.msra.mxu1 %v8891_v45 }
 0x3c0   :  { %5424 = vmatprep.subr.bf16.mxu0 %v8892_v60  ;;  %5456 = vmatprep.subr.bf16.mxu1 %v8837_v41 }
 0x3c3   :  { %5426 = vmatpush1.bf16.msra.mxu0 %v8838_v0  ;;  %5458 = vmatpush1.bf16.msra.mxu1 %v8839_v48 }
 0x3c4   :  { %5428 = vmatprep.subr.bf16.mxu0 %v8840_v35  ;;  %5460 = vmatprep.subr.bf16.mxu1 %v8841_v58 }
 0x3c7   :  { %v6642_v20 = vpop.eup %6641  ;;  %5430 = vmatpush1.bf16.msra.mxu0 %v8842_v8  ;;  %5462 = vmatpush1.bf16.msra.mxu1 %v8843_v53 }
 0x3c8   :  { %5464 = vmatprep.subr.bf16.mxu0 %v8844_v4  ;;  %5496 = vmatprep.subr.bf16.mxu1 %v8845_v37  ;;  %v1786_v40 = vmul.f32 %v6642_v20, %v6640_v27  ;;  %v8895_v27 = vld [vmem:[#allocation37_spill] sm:$0xff]  ;;  %v8896_v20 = vld [vmem:[#allocation50_spill] sm:$0xff] }
 0x3ca   :  { %1994 = vmatmul.mubr.f32.vlgmr.msra.gmra.mrb[20].mxu0 %v1786_v40  ;;  %2065 = vmatmul.mubr.f32.vlgmr.msra.gmra.mrb[22].mxu1 %v1786_v40 }
 0x3cb   :  { %5466 = vmatpush1.bf16.msra.mxu0 %v7148_v15  ;;  %5498 = vmatpush1.bf16.msra.mxu1 %v7253_v14 }
 0x3cc   :  { %5468 = vmatprep.subr.bf16.mxu0 %v7151_v16  ;;  %5500 = vmatprep.subr.bf16.mxu1 %v7256_v17 }
 0x3cd   :  { %2168 = vmatprep.mubr.f32.mxu0 %v8752_v61  ;;  %2239 = vmatprep.mubr.f32.mxu1 %v8752_v61 }
 0x3cf   :  { %5470 = vmatpush1.bf16.msra.mxu0 %v7159_v22  ;;  %5502 = vmatpush1.bf16.msra.mxu1 %v7262_v24 }
 0x3d0   :  { %5472 = vmatprep.subr.bf16.mxu0 %v7162_v23  ;;  %5504 = vmatprep.subr.bf16.mxu1 %v7266_v25 }
 0x3d3   :  { %5474 = vmatpush1.bf16.msra.mxu0 %v7170_v29  ;;  %5506 = vmatpush1.bf16.msra.mxu1 %v7271_v31 }
 0x3d4   :  { %5476 = vmatprep.subr.bf16.mxu0 %v7173_v32  ;;  %5508 = vmatprep.subr.bf16.mxu1 %v7274_v33 }
 0x3d7   :  { %5478 = vmatpush1.bf16.msra.mxu0 %v7193_v42  ;;  %5510 = vmatpush1.bf16.msra.mxu1 %v7279_v38 }
 0x3d8   :  { %5480 = vmatprep.subr.bf16.mxu0 %v7196_v43  ;;  %5512 = vmatprep.subr.bf16.mxu1 %v7282_v39 }
 0x3db   :  { %5482 = vmatpush1.bf16.msra.mxu0 %v7204_v49  ;;  %5514 = vmatpush1.bf16.msra.mxu1 %v7287_v46 }
 0x3dc   :  { %5484 = vmatprep.subr.bf16.mxu0 %v7207_v50  ;;  %5516 = vmatprep.subr.bf16.mxu1 %v7290_v47  ;;  %v8897_v47 = vld [vmem:[#allocation51_spill] sm:$0xff] }
 0x3df   :  { %5486 = vmatpush1.bf16.msra.mxu0 %v7217_v56  ;;  %5518 = vmatpush1.bf16.msra.mxu1 %v7293_v54  ;;  %v8898_v56 = vld [vmem:[#allocation52_spill] sm:$0xff]  ;;  %v8931_v54 = vld [vmem:[#allocation117_spill] sm:$0xff] }
 0x3e0   :  { %5488 = vmatprep.subr.bf16.mxu0 %v7220_v57  ;;  %5520 = vmatprep.subr.bf16.mxu1 %v7296_v55  ;;  %v8899_v57 = vld [vmem:[#allocation53_spill] sm:$0xff]  ;;  %v8900_v55 = vld [vmem:[#allocation54_spill] sm:$0xff] }
 0x3e3   :  { %5490 = vmatpush1.bf16.msra.mxu0 %v7230_v63  ;;  %5522 = vmatpush1.bf16.msra.mxu1 %v7299_v62  ;;  %v8901_v63 = vld [vmem:[#allocation55_spill] sm:$0xff]  ;;  %v8902_v62 = vld [vmem:[#allocation56_spill] sm:$0xff] }
 0x3e4   :  { %5492 = vmatprep.subr.bf16.mxu0 %v8893_v26  ;;  %5524 = vmatprep.subr.bf16.mxu1 %v8894_v18  ;;  %v8912_v18 = vld [vmem:[#allocation66_spill] sm:$0xff]  ;;  %v8913_v26 = vld [vmem:[#allocation67_spill] sm:$0xff] }
 0x3e7   :  { %5494 = vmatpush1.bf16.msra.mxu0 %v8895_v27  ;;  %5526 = vmatpush1.bf16.msra.mxu1 %v8896_v20  ;;  %v8903_v27 = vld [vmem:[#allocation57_spill] sm:$0xff]  ;;  %v8904_v20 = vld [vmem:[#allocation58_spill] sm:$0xff] }
 0x3e8   :  { %5528 = vmatprep.subr.bf16.mxu0 %v8897_v47  ;;  %5560 = vmatprep.subr.bf16.mxu1 %v8898_v56  ;;  %v8905_v47 = vld [vmem:[#allocation59_spill] sm:$0xff]  ;;  %v8906_v56 = vld [vmem:[#allocation60_spill] sm:$0xff] }
 0x3ea   :  { %2169 = vmatmul.mubr.f32.vlgmr.msra.gmra.mrb[6].mxu0 %v1786_v40  ;;  %2240 = vmatmul.mubr.f32.vlgmr.msra.gmra.mrb[6].mxu1 %v1786_v40  ;;  %v8907_v40 = vld [vmem:[#allocation61_spill] sm:$0xff] }
 0x3eb   :  { %5530 = vmatpush1.bf16.msra.mxu0 %v8899_v57  ;;  %5562 = vmatpush1.bf16.msra.mxu1 %v8900_v55  ;;  %v8908_v57 = vld [vmem:[#allocation62_spill] sm:$0xff]  ;;  %v8909_v55 = vld [vmem:[#allocation63_spill] sm:$0xff] }
 0x3ec   :  { %5532 = vmatprep.subr.bf16.mxu0 %v8901_v63  ;;  %5564 = vmatprep.subr.bf16.mxu1 %v8902_v62  ;;  %v8910_v63 = vld [vmem:[#allocation64_spill] sm:$0xff]  ;;  %v8911_v62 = vld [vmem:[#allocation65_spill] sm:$0xff] }
 0x3ed   :  { %2338 = vmatprep.mubr.f32.mxu0 %v8752_v61  ;;  %2409 = vmatprep.mubr.f32.mxu1 %v8752_v61 }
 0x3ef   :  { %5534 = vmatpush1.bf16.msra.mxu0 %v8903_v27  ;;  %5566 = vmatpush1.bf16.msra.mxu1 %v8904_v20  ;;  %v8914_v27 = vld [vmem:[#allocation68_spill] sm:$0xff]  ;;  %v8915_v20 = vld [vmem:[#allocation69_spill] sm:$0xff] }
 0x3f0   :  { %5536 = vmatprep.subr.bf16.mxu0 %v8905_v47  ;;  %5568 = vmatprep.subr.bf16.mxu1 %v8906_v56  ;;  %v8916_v47 = vld [vmem:[#allocation70_spill] sm:$0xff]  ;;  %v8917_v56 = vld [vmem:[#allocation71_spill] sm:$0xff] }
 0x3f3   :  { %5538 = vmatpush1.bf16.msra.mxu0 %v8907_v40  ;;  %5570 = vmatpush1.bf16.msra.mxu1 %v8908_v57  ;;  %v8918_v40 = vld [vmem:[#allocation72_spill] sm:$0xff]  ;;  %v8919_v57 = vld [vmem:[#allocation73_spill] sm:$0xff] }
 0x3f4   :  { %5540 = vmatprep.subr.bf16.mxu0 %v8909_v55  ;;  %5572 = vmatprep.subr.bf16.mxu1 %v8910_v63  ;;  %v8920_v55 = vld [vmem:[#allocation74_spill] sm:$0xff]  ;;  %v8921_v63 = vld [vmem:[#allocation75_spill] sm:$0xff] }
 0x3f7   :  { %5542 = vmatpush1.bf16.msra.mxu0 %v8911_v62  ;;  %5574 = vmatpush1.bf16.msra.mxu1 %v8912_v18  ;;  %v8922_v62 = vld [vmem:[#allocation76_spill] sm:$0xff]  ;;  %v8923_v18 = vld [vmem:[#allocation77_spill] sm:$0xff] }
 0x3f8   :  { %5544 = vmatprep.subr.bf16.mxu0 %v8913_v26  ;;  %5576 = vmatprep.subr.bf16.mxu1 %v8914_v27  ;;  %v8924_v26 = vld [vmem:[#allocation78_spill] sm:$0xff]  ;;  %v8925_v27 = vld [vmem:[#allocation79_spill] sm:$0xff] }
 0x3fb   :  { %5546 = vmatpush1.bf16.msra.mxu0 %v8915_v20  ;;  %5578 = vmatpush1.bf16.msra.mxu1 %v8916_v47  ;;  %v8926_v20 = vld [vmem:[#allocation80_spill] sm:$0xff]  ;;  %v8927_v47 = vld [vmem:[#allocation81_spill] sm:$0xff] }
 0x3fc   :  { %5548 = vmatprep.subr.bf16.mxu0 %v8917_v56  ;;  %5580 = vmatprep.subr.bf16.mxu1 %v8918_v40  ;;  %v8928_v56 = vld [vmem:[#allocation82_spill] sm:$0xff]  ;;  %v8929_v40 = vld [vmem:[#allocation83_spill] sm:$0xff] }
 0x3ff   :  { %5550 = vmatpush1.bf16.msra.mxu0 %v8919_v57  ;;  %5582 = vmatpush1.bf16.msra.mxu1 %v8920_v55  ;;  %v8930_v57 = vld [vmem:[#allocation84_spill] sm:$0xff] }
 0x400   :  { %5552 = vmatprep.subr.bf16.mxu0 %v8921_v63  ;;  %5584 = vmatprep.subr.bf16.mxu1 %v8922_v62 }
 0x403   :  { %5554 = vmatpush1.bf16.msra.mxu0 %v8923_v18  ;;  %5586 = vmatpush1.bf16.msra.mxu1 %v8924_v26 }
 0x404   :  { %5556 = vmatprep.subr.bf16.mxu0 %v8925_v27  ;;  %5588 = vmatprep.subr.bf16.mxu1 %v8926_v20 }
 0x407   :  { %5558 = vmatpush1.bf16.msra.mxu0 %v8927_v47  ;;  %5590 = vmatpush1.bf16.msra.mxu1 %v8928_v56 }
 0x408   :  { %5592 = vmatprep.subr.bf16.mxu0 %v8929_v40  ;;  %5624 = vmatprep.subr.bf16.mxu1 %v8930_v57 }
 0x49d   :  { %v1995_v55 = vpop.f32.mrb[20].mxu0  ;;  %v2066_v63 = vpop.f32.mrb[22].mxu1 }
 0x49e   :  { %v2071_v62 = vadd.f32 %v1995_v55, %v8931_v54  ;;  %v1997_v50 = vpop.f32.mrb[21].mxu0  ;;  %v2068_v18 = vpop.f32.mrb[23].mxu1  ;;  %v2073_v56 = vadd.f32 %v2066_v63, %v8871_v6 }
 0x49f   :  { %v2072_v26 = vadd.f32 %v1997_v50, %v7618_v59  ;;  %v2074_v47 = vadd.f32 %v2068_v18, %v8870_v52 }
 0x4a0   :  { %v4777_v46 = vmul.f32 -1.442695, %v2071_v62 }
 0x4a1   :  { %v4778_v27 = vmul.f32 -1.442695, %v2072_v26  ;;  %v4779_v20 = vmul.f32 -1.442695, %v2074_v47 }
 0x4a2   :  { %6643 = vpow2.f32 %v4777_v46 }
 0x4a3   :  { %6645 = vpow2.f32 %v4778_v27 }
 0x4a4   :  { %6647 = vpow2.f32 %v4779_v20 }
 0x4a5   :  { %6649 = vtanh.f32 %v2073_v56 }
 0x4ac   :  { %v6644_v40 = vpop.eup %6643 }
 0x4ad   :  { %v6646_v49 = vpop.eup %6645  ;;  %v2078_v57 = vadd.f32 1.0, %v6644_v40 }
 0x4ae   :  { %v2084_v39 = vadd.f32 1.0, %v6646_v49  ;;  %v6648_v55 = vpop.eup %6647 }
 0x4af   :  { %6651 = vrcp.f32 %v2078_v57  ;;  %v6650_v54 = vpop.eup %6649  ;;  %v2091_v46 = vadd.f32 1.0, %v6648_v55 }
 0x4b0   :  { %6653 = vrcp.f32 %v2084_v39 }
 0x4b1   :  { %6655 = vrcp.f32 %v2091_v46 }
 0x4b9   :  { %v6652_v50 = vpop.eup %6651 }
 0x4ba   :  { %v6654_v62 = vpop.eup %6653  ;;  %v2095_v26 = vmul.f32 %v6652_v50, %v6650_v54 }
 0x4bb   :  { %v2094_v27 = vmul.f32 %v6654_v62, %v7754_v36  ;;  %v6656_v36 = vpop.eup %6655 }
 0x4bd   :  { %v7876_v18 = vadd.f32 %v2095_v26, %v2094_v27  ;;  %v2170_v47 = vpop.f32.mrb[6].mxu0  ;;  %v2241_v63 = vpop.f32.mrb[6].mxu1 }
 0x4be   :  { %v6463_v40 = vadd.f32 %v2170_v47, %v8811_v34  ;;  %v2172_v20 = vpop.f32.mrb[7].mxu0  ;;  %v2243_v56 = vpop.f32.mrb[7].mxu1  ;;  %v6479_v62 = vadd.f32 %v2241_v63, %v7530_v21  ;;  %v8933_v63 = vld [vmem:[#allocation89_spill] sm:$0xff] }
 0x4bf   :  { %v6464_v49 = vadd.f32 %v2172_v20, %v8812_v19  ;;  %6657 = vtanh.f32 %v7876_v18  ;;  %v6480_v54 = vadd.f32 %v2243_v56, %v7534_v11  ;;  %v8934_v20 = vld [vmem:[#allocation90_spill] sm:$0xff]  ;;  %v8935_v56 = vld [vmem:[#allocation91_spill] sm:$0xff] }
 0x4c0   :  { %v4780_v57 = vmul.f32 -1.442695, %v6463_v40 }
 0x4c1   :  { %v4781_v39 = vmul.f32 -1.442695, %v6464_v49  ;;  %v4782_v50 = vmul.f32 -1.442695, %v6480_v54  ;;  %v8936_v49 = vld [vmem:[#allocation92_spill] sm:$0xff]  ;;  %v8939_v54 = vld [vmem:[#allocation95_spill] sm:$0xff] }
 0x4c2   :  { %6659 = vpow2.f32 %v4780_v57  ;;  %v8937_v57 = vld [vmem:[#allocation93_spill] sm:$0xff] }
 0x4c3   :  { %6661 = vpow2.f32 %v4781_v39  ;;  %v8938_v39 = vld [vmem:[#allocation94_spill] sm:$0xff] }
 0x4c4   :  { %6663 = vpow2.f32 %v4782_v50 }
 0x4c5   :  { %6665 = vtanh.f32 %v6479_v62 }
 0x4c9   :  { %v6658_v55 = vpop.eup %6657 }
 0x4ca   :  { %v7883_v26 = vmul.f32 %v6658_v55, %v6656_v36  ;;  %v8940_v36 = vld [vmem:[#allocation96_spill] sm:$0xff] }
 0x4cc   :  { %8932 = vst [vmem:[#allocation98_spill] sm:$0xff] %v7883_v26  ;;  %v6660_v46 = vpop.eup %6659  ;;  %2339 = vmatmul.mubr.f32.vlgmr.msra.gmra.mrb[22].mxu0 %v7883_v26  ;;  %2410 = vmatmul.mubr.f32.vlgmr.msra.gmra.mrb[24].mxu1 %v7883_v26 }
 0x4cd   :  { %v6662_v27 = vpop.eup %6661  ;;  %v2253_v47 = vadd.f32 1.0, %v6660_v46  ;;  %5594 = vmatpush1.bf16.msra.mxu0 %v8873_v9  ;;  %5626 = vmatpush1.bf16.msra.mxu1 %v8874_v5  ;;  %v8941_v46 = vld [vmem:[#allocation97_spill] sm:$0xff] }
 0x4ce   :  { %v2259_v40 = vadd.f32 1.0, %v6662_v27  ;;  %5596 = vmatprep.subr.bf16.mxu0 %v8875_v2  ;;  %5628 = vmatprep.subr.bf16.mxu1 %v8876_v1  ;;  %v6664_v55 = vpop.eup %6663 }
 0x4cf   :  { %6667 = vrcp.f32 %v2253_v47  ;;  %2480 = vmatprep.mubr.f32.mxu0 %v8752_v61  ;;  %2551 = vmatprep.mubr.f32.mxu1 %v8752_v61  ;;  %v6666_v50 = vpop.eup %6665 }
 0x4d0   :  { %6669 = vrcp.f32 %v2259_v40  ;;  %v2266_v40 = vadd.f32 1.0, %v6664_v55 }
 0x4d1   :  { %5598 = vmatpush1.bf16.msra.mxu0 %v8933_v63  ;;  %5630 = vmatpush1.bf16.msra.mxu1 %v8934_v20 }
 0x4d2   :  { %5600 = vmatprep.subr.bf16.mxu0 %v8935_v56  ;;  %5632 = vmatprep.subr.bf16.mxu1 %v8936_v49  ;;  %6671 = vrcp.f32 %v2266_v40  ;;  %v8946_v40 = vld [vmem:[#allocation45_spill] sm:$0xff] }
 0x4d5   :  { %5602 = vmatpush1.bf16.msra.mxu0 %v8937_v57  ;;  %5634 = vmatpush1.bf16.msra.mxu1 %v8938_v39 }
 0x4d6   :  { %5604 = vmatprep.subr.bf16.mxu0 %v8939_v54  ;;  %5636 = vmatprep.subr.bf16.mxu1 %v8940_v36 }
 0x4d9   :  { %v6668_v62 = vpop.eup %6667  ;;  %5606 = vmatpush1.bf16.msra.mxu0 %v8941_v46  ;;  %5638 = vmatpush1.bf16.msra.mxu1 %v8827_v13 }
 0x4da   :  { %v6670_v27 = vpop.eup %6669  ;;  %v2270_v47 = vmul.f32 %v6668_v62, %v6666_v50  ;;  %5608 = vmatprep.subr.bf16.mxu0 %v8828_v10  ;;  %5640 = vmatprep.subr.bf16.mxu1 %v8829_v3  ;;  %v8942_v50 = vld [vmem:[#allocation43_spill] sm:$0xff] }
 0x4db   :  { %v2269_v26 = vmul.f32 %v6670_v27, %v7784_v30  ;;  %v8943_v62 = vld [vmem:[#allocation31_spill] sm:$0xff]  ;;  %v8944_v27 = vld [vmem:[#allocation44_spill] sm:$0xff] }
 0x4dc   :  { %v6672_v30 = vpop.eup %6671 }
 0x4dd   :  { %v7906_v39 = vadd.f32 %v2270_v47, %v2269_v26  ;;  %5610 = vmatpush1.bf16.msra.mxu0 %v8886_v44  ;;  %5642 = vmatpush1.bf16.msra.mxu1 %v8887_v12  ;;  %v8945_v47 = vld [vmem:[#allocation32_spill] sm:$0xff] }
 0x4de   :  { %5612 = vmatprep.subr.bf16.mxu0 %v8888_v51  ;;  %5644 = vmatprep.subr.bf16.mxu1 %v8889_v7 }
 0x4df   :  { %6673 = vtanh.f32 %v7906_v39 }
 0x4e1   :  { %5614 = vmatpush1.bf16.msra.mxu0 %v8890_v28  ;;  %5646 = vmatpush1.bf16.msra.mxu1 %v8891_v45 }
 0x4e2   :  { %5616 = vmatprep.subr.bf16.mxu0 %v8892_v60  ;;  %5648 = vmatprep.subr.bf16.mxu1 %v8837_v41 }
 0x4e5   :  { %5618 = vmatpush1.bf16.msra.mxu0 %v8838_v0  ;;  %5650 = vmatpush1.bf16.msra.mxu1 %v8839_v48 }
 0x4e6   :  { %5620 = vmatprep.subr.bf16.mxu0 %v8840_v35  ;;  %5652 = vmatprep.subr.bf16.mxu1 %v8841_v58 }
 0x4e9   :  { %v6674_v26 = vpop.eup %6673  ;;  %5622 = vmatpush1.bf16.msra.mxu0 %v8842_v8  ;;  %5654 = vmatpush1.bf16.msra.mxu1 %v8843_v53 }
 0x4ea   :  { %v2273_v55 = vmul.f32 %v6674_v26, %v6672_v30  ;;  %5656 = vmatprep.subr.bf16.mxu0 %v8844_v4  ;;  %5688 = vmatprep.subr.bf16.mxu1 %v8845_v37  ;;  %v8947_v30 = vld [vmem:[#allocation33_spill] sm:$0xff]  ;;  %v8948_v26 = vld [vmem:[#allocation46_spill] sm:$0xff] }
 0x4ec   :  { %2481 = vmatmul.mubr.f32.vlgmr.msra.gmra.mrb[22].mxu0 %v2273_v55  ;;  %2552 = vmatmul.mubr.f32.vlgmr.msra.gmra.mrb[24].mxu1 %v2273_v55 }
 0x4ed   :  { %5658 = vmatpush1.bf16.msra.mxu0 %v7148_v15  ;;  %5690 = vmatpush1.bf16.msra.mxu1 %v7253_v14 }
 0x4ee   :  { %5660 = vmatprep.subr.bf16.mxu0 %v7151_v16  ;;  %5692 = vmatprep.subr.bf16.mxu1 %v7256_v17 }
 0x4ef   :  { %2655 = vmatprep.mubr.f32.mxu0 %v8752_v61  ;;  %2726 = vmatprep.mubr.f32.mxu1 %v8752_v61 }
 0x4f1   :  { %5662 = vmatpush1.bf16.msra.mxu0 %v7159_v22  ;;  %5694 = vmatpush1.bf16.msra.mxu1 %v7262_v24 }
 0x4f2   :  { %5664 = vmatprep.subr.bf16.mxu0 %v7162_v23  ;;  %5696 = vmatprep.subr.bf16.mxu1 %v7266_v25 }
 0x4f5   :  { %5666 = vmatpush1.bf16.msra.mxu0 %v7170_v29  ;;  %5698 = vmatpush1.bf16.msra.mxu1 %v7271_v31 }
 0x4f6   :  { %5668 = vmatprep.subr.bf16.mxu0 %v7173_v32  ;;  %5700 = vmatprep.subr.bf16.mxu1 %v7274_v33  ;;  %v8949_v33 = vld [vmem:[#allocation34_spill] sm:$0xff] }
 0x4f9   :  { %5670 = vmatpush1.bf16.msra.mxu0 %v7193_v42  ;;  %5702 = vmatpush1.bf16.msra.mxu1 %v7279_v38  ;;  %v8950_v42 = vld [vmem:[#allocation47_spill] sm:$0xff] }
 0x4fa   :  { %5672 = vmatprep.subr.bf16.mxu0 %v7196_v43  ;;  %5704 = vmatprep.subr.bf16.mxu1 %v8942_v50  ;;  %v8951_v38 = vld [vmem:[#allocation35_spill] sm:$0xff]  ;;  %v8952_v43 = vld [vmem:[#allocation48_spill] sm:$0xff] }
 0x4fb   :  { %v8953_v50 = vld [vmem:[#allocation36_spill] sm:$0xff] }
 0x4fd   :  { %5674 = vmatpush1.bf16.msra.mxu0 %v8943_v62  ;;  %5706 = vmatpush1.bf16.msra.mxu1 %v8944_v27  ;;  %v8954_v62 = vld [vmem:[#allocation49_spill] sm:$0xff] }
 0x4fe   :  { %5676 = vmatprep.subr.bf16.mxu0 %v8945_v47  ;;  %5708 = vmatprep.subr.bf16.mxu1 %v8946_v40  ;;  %v8955_v27 = vld [vmem:[#allocation37_spill] sm:$0xff]  ;;  %v8956_v47 = vld [vmem:[#allocation50_spill] sm:$0xff]  ;;  %v8957_v40 = vld [vmem:[#allocation51_spill] sm:$0xff] }
 0x501   :  { %5678 = vmatpush1.bf16.msra.mxu0 %v8947_v30  ;;  %5710 = vmatpush1.bf16.msra.mxu1 %v8948_v26  ;;  %v8958_v30 = vld [vmem:[#allocation52_spill] sm:$0xff]  ;;  %v8991_v26 = vld [vmem:[#allocation117_spill] sm:$0xff] }
 0x502   :  { %5680 = vmatprep.subr.bf16.mxu0 %v8949_v33  ;;  %5712 = vmatprep.subr.bf16.mxu1 %v8950_v42  ;;  %v8959_v33 = vld [vmem:[#allocation53_spill] sm:$0xff]  ;;  %v8960_v42 = vld [vmem:[#allocation54_spill] sm:$0xff] }
 0x505   :  { %5682 = vmatpush1.bf16.msra.mxu0 %v8951_v38  ;;  %5714 = vmatpush1.bf16.msra.mxu1 %v8952_v43  ;;  %v8961_v38 = vld [vmem:[#allocation55_spill] sm:$0xff]  ;;  %v8962_v43 = vld [vmem:[#allocation56_spill] sm:$0xff] }
 0x506   :  { %5684 = vmatprep.subr.bf16.mxu0 %v8953_v50  ;;  %5716 = vmatprep.subr.bf16.mxu1 %v8954_v62  ;;  %v8972_v62 = vld [vmem:[#allocation66_spill] sm:$0xff]  ;;  %v8973_v50 = vld [vmem:[#allocation67_spill] sm:$0xff] }
 0x509   :  { %5686 = vmatpush1.bf16.msra.mxu0 %v8955_v27  ;;  %5718 = vmatpush1.bf16.msra.mxu1 %v8956_v47  ;;  %v8963_v27 = vld [vmem:[#allocation57_spill] sm:$0xff]  ;;  %v8964_v47 = vld [vmem:[#allocation58_spill] sm:$0xff] }
 0x50a   :  { %5720 = vmatprep.subr.bf16.mxu0 %v8957_v40  ;;  %5752 = vmatprep.subr.bf16.mxu1 %v8958_v30  ;;  %v8965_v40 = vld [vmem:[#allocation59_spill] sm:$0xff]  ;;  %v8966_v30 = vld [vmem:[#allocation60_spill] sm:$0xff] }
 0x50c   :  { %2656 = vmatmul.mubr.f32.vlgmr.msra.gmra.mrb[8].mxu0 %v2273_v55  ;;  %2727 = vmatmul.mubr.f32.vlgmr.msra.gmra.mrb[8].mxu1 %v2273_v55  ;;  %v8967_v55 = vld [vmem:[#allocation61_spill] sm:$0xff] }
 0x50d   :  { %5722 = vmatpush1.bf16.msra.mxu0 %v8959_v33  ;;  %5754 = vmatpush1.bf16.msra.mxu1 %v8960_v42  ;;  %v8968_v33 = vld [vmem:[#allocation62_spill] sm:$0xff]  ;;  %v8969_v42 = vld [vmem:[#allocation63_spill] sm:$0xff] }
 0x50e   :  { %5724 = vmatprep.subr.bf16.mxu0 %v8961_v38  ;;  %5756 = vmatprep.subr.bf16.mxu1 %v8962_v43  ;;  %v8970_v38 = vld [vmem:[#allocation64_spill] sm:$0xff]  ;;  %v8971_v43 = vld [vmem:[#allocation65_spill] sm:$0xff] }
 0x50f   :  { %2825 = vmatprep.mubr.f32.mxu0 %v8752_v61  ;;  %2896 = vmatprep.mubr.f32.mxu1 %v8752_v61 }
 0x511   :  { %5726 = vmatpush1.bf16.msra.mxu0 %v8963_v27  ;;  %5758 = vmatpush1.bf16.msra.mxu1 %v8964_v47  ;;  %v8974_v27 = vld [vmem:[#allocation68_spill] sm:$0xff]  ;;  %v8975_v47 = vld [vmem:[#allocation69_spill] sm:$0xff] }
 0x512   :  { %5728 = vmatprep.subr.bf16.mxu0 %v8965_v40  ;;  %5760 = vmatprep.subr.bf16.mxu1 %v8966_v30  ;;  %v8976_v40 = vld [vmem:[#allocation70_spill] sm:$0xff]  ;;  %v8977_v30 = vld [vmem:[#allocation71_spill] sm:$0xff] }
 0x515   :  { %5730 = vmatpush1.bf16.msra.mxu0 %v8967_v55  ;;  %5762 = vmatpush1.bf16.msra.mxu1 %v8968_v33  ;;  %v8978_v55 = vld [vmem:[#allocation72_spill] sm:$0xff]  ;;  %v8979_v33 = vld [vmem:[#allocation73_spill] sm:$0xff] }
 0x516   :  { %5732 = vmatprep.subr.bf16.mxu0 %v8969_v42  ;;  %5764 = vmatprep.subr.bf16.mxu1 %v8970_v38  ;;  %v8980_v42 = vld [vmem:[#allocation74_spill] sm:$0xff]  ;;  %v8981_v38 = vld [vmem:[#allocation75_spill] sm:$0xff] }
 0x519   :  { %5734 = vmatpush1.bf16.msra.mxu0 %v8971_v43  ;;  %5766 = vmatpush1.bf16.msra.mxu1 %v8972_v62  ;;  %v8982_v43 = vld [vmem:[#allocation76_spill] sm:$0xff]  ;;  %v8983_v62 = vld [vmem:[#allocation77_spill] sm:$0xff] }
 0x51a   :  { %5736 = vmatprep.subr.bf16.mxu0 %v8973_v50  ;;  %5768 = vmatprep.subr.bf16.mxu1 %v8974_v27  ;;  %v8984_v50 = vld [vmem:[#allocation78_spill] sm:$0xff]  ;;  %v8985_v27 = vld [vmem:[#allocation79_spill] sm:$0xff] }
 0x51d   :  { %5738 = vmatpush1.bf16.msra.mxu0 %v8975_v47  ;;  %5770 = vmatpush1.bf16.msra.mxu1 %v8976_v40  ;;  %v8986_v47 = vld [vmem:[#allocation80_spill] sm:$0xff]  ;;  %v8987_v40 = vld [vmem:[#allocation81_spill] sm:$0xff] }
 0x51e   :  { %5740 = vmatprep.subr.bf16.mxu0 %v8977_v30  ;;  %5772 = vmatprep.subr.bf16.mxu1 %v8978_v55  ;;  %v8988_v30 = vld [vmem:[#allocation82_spill] sm:$0xff]  ;;  %v8989_v55 = vld [vmem:[#allocation83_spill] sm:$0xff] }
 0x521   :  { %5742 = vmatpush1.bf16.msra.mxu0 %v8979_v33  ;;  %5774 = vmatpush1.bf16.msra.mxu1 %v8980_v42  ;;  %v8990_v33 = vld [vmem:[#allocation84_spill] sm:$0xff] }
 0x522   :  { %5744 = vmatprep.subr.bf16.mxu0 %v8981_v38  ;;  %5776 = vmatprep.subr.bf16.mxu1 %v8982_v43 }
 0x525   :  { %5746 = vmatpush1.bf16.msra.mxu0 %v8983_v62  ;;  %5778 = vmatpush1.bf16.msra.mxu1 %v8984_v50 }
 0x526   :  { %5748 = vmatprep.subr.bf16.mxu0 %v8985_v27  ;;  %5780 = vmatprep.subr.bf16.mxu1 %v8986_v47 }
 0x529   :  { %5750 = vmatpush1.bf16.msra.mxu0 %v8987_v40  ;;  %5782 = vmatpush1.bf16.msra.mxu1 %v8988_v30 }
 0x52a   :  { %5784 = vmatprep.subr.bf16.mxu0 %v8989_v55  ;;  %5816 = vmatprep.subr.bf16.mxu1 %v8990_v33 }
 0x5bf   :  { %v2482_v42 = vpop.f32.mrb[22].mxu0  ;;  %v2553_v38 = vpop.f32.mrb[24].mxu1 }
 0x5c0   :  { %v2558_v43 = vadd.f32 %v2482_v42, %v8991_v26  ;;  %v2484_v32 = vpop.f32.mrb[23].mxu0  ;;  %v2555_v62 = vpop.f32.mrb[25].mxu1  ;;  %v2560_v30 = vadd.f32 %v2553_v38, %v8871_v6 }
 0x5c1   :  { %v2559_v50 = vadd.f32 %v2484_v32, %v7618_v59  ;;  %v2561_v40 = vadd.f32 %v2555_v62, %v8870_v52 }
 0x5c2   :  { %v4783_v31 = vmul.f32 -1.442695, %v2558_v43 }
 0x5c3   :  { %v4784_v27 = vmul.f32 -1.442695, %v2559_v50  ;;  %v4785_v47 = vmul.f32 -1.442695, %v2561_v40 }
 0x5c4   :  { %6675 = vpow2.f32 %v4783_v31 }
 0x5c5   :  { %6677 = vpow2.f32 %v4784_v27 }
 0x5c6   :  { %6679 = vpow2.f32 %v4785_v47 }
 0x5c7   :  { %6681 = vtanh.f32 %v2560_v30 }
 0x5ce   :  { %v6676_v55 = vpop.eup %6675 }
 0x5cf   :  { %v6678_v29 = vpop.eup %6677  ;;  %v2565_v33 = vadd.f32 1.0, %v6676_v55 }
 0x5d0   :  { %v2571_v25 = vadd.f32 1.0, %v6678_v29  ;;  %v6680_v42 = vpop.eup %6679 }
 0x5d1   :  { %6683 = vrcp.f32 %v2565_v33  ;;  %v6682_v26 = vpop.eup %6681  ;;  %v2578_v31 = vadd.f32 1.0, %v6680_v42 }
 0x5d2   :  { %6685 = vrcp.f32 %v2571_v25 }
 0x5d3   :  { %6687 = vrcp.f32 %v2578_v31 }
 0x5db   :  { %v6684_v32 = vpop.eup %6683 }
 0x5dc   :  { %v6686_v43 = vpop.eup %6685  ;;  %v2582_v50 = vmul.f32 %v6684_v32, %v6682_v26 }
 0x5dd   :  { %v2581_v27 = vmul.f32 %v6686_v43, %v7876_v18  ;;  %v6688_v18 = vpop.eup %6687 }
 0x5df   :  { %v7998_v62 = vadd.f32 %v2582_v50, %v2581_v27  ;;  %v2657_v40 = vpop.f32.mrb[8].mxu0  ;;  %v2728_v38 = vpop.f32.mrb[8].mxu1 }
 0x5e0   :  { %v6465_v55 = vadd.f32 %v2657_v40, %v8811_v34  ;;  %v2659_v47 = vpop.f32.mrb[9].mxu0  ;;  %v2730_v30 = vpop.f32.mrb[9].mxu1  ;;  %v6481_v43 = vadd.f32 %v2728_v38, %v7530_v21  ;;  %v8993_v38 = vld [vmem:[#allocation94_spill] sm:$0xff] }
 0x5e1   :  { %v6466_v29 = vadd.f32 %v2659_v47, %v8812_v19  ;;  %6689 = vtanh.f32 %v7998_v62  ;;  %v6482_v26 = vadd.f32 %v2730_v30, %v7534_v11 }
 0x5e2   :  { %v4786_v25 = vmul.f32 -1.442695, %v6465_v55 }
 0x5e3   :  { %v4787_v33 = vmul.f32 -1.442695, %v6466_v29  ;;  %v4788_v32 = vmul.f32 -1.442695, %v6482_v26 }
 0x5e4   :  { %6691 = vpow2.f32 %v4786_v25 }
 0x5e5   :  { %6693 = vpow2.f32 %v4787_v33 }
 0x5e6   :  { %6695 = vpow2.f32 %v4788_v32 }
 0x5e7   :  { %6697 = vtanh.f32 %v6481_v43 }
 0x5eb   :  { %v6690_v42 = vpop.eup %6689 }
 0x5ec   :  { %v8005_v50 = vmul.f32 %v6690_v42, %v6688_v18 }
 0x5ee   :  { %8992 = vst [vmem:[#allocation99_spill] sm:$0xff] %v8005_v50  ;;  %v6692_v31 = vpop.eup %6691  ;;  %2826 = vmatmul.mubr.f32.vlgmr.msra.gmra.mrb[24].mxu0 %v8005_v50  ;;  %2897 = vmatmul.mubr.f32.vlgmr.msra.gmra.mrb[26].mxu1 %v8005_v50  ;;  %v9007_v50 = vld [vmem:[#allocation33_spill] sm:$0xff] }
 0x5ef   :  { %v6694_v27 = vpop.eup %6693  ;;  %v2740_v40 = vadd.f32 1.0, %v6692_v31  ;;  %5786 = vmatpush1.bf16.msra.mxu0 %v8873_v9  ;;  %5818 = vmatpush1.bf16.msra.mxu1 %v8874_v5  ;;  %v8994_v31 = vld [vmem:[#allocation39_spill] sm:$0xff] }
 0x5f0   :  { %v2746_v55 = vadd.f32 1.0, %v6694_v27  ;;  %5788 = vmatprep.subr.bf16.mxu0 %v8875_v2  ;;  %5820 = vmatprep.subr.bf16.mxu1 %v8876_v1  ;;  %v6696_v47 = vpop.eup %6695  ;;  %v8995_v27 = vld [vmem:[#allocation27_spill] sm:$0xff] }
 0x5f1   :  { %6699 = vrcp.f32 %v2740_v40  ;;  %2967 = vmatprep.mubr.f32.mxu0 %v8752_v61  ;;  %3038 = vmatprep.mubr.f32.mxu1 %v8752_v61  ;;  %v6698_v30 = vpop.eup %6697  ;;  %v2753_v26 = vadd.f32 1.0, %v6696_v47  ;;  %v8996_v40 = vld [vmem:[#allocation40_spill] sm:$0xff]  ;;  %v8998_v47 = vld [vmem:[#allocation41_spill] sm:$0xff] }
 0x5f2   :  { %6701 = vrcp.f32 %v2746_v55  ;;  %v8997_v55 = vld [vmem:[#allocation28_spill] sm:$0xff] }
 0x5f3   :  { %5790 = vmatpush1.bf16.msra.mxu0 %v8933_v63  ;;  %5822 = vmatpush1.bf16.msra.mxu1 %v8934_v20  ;;  %6703 = vrcp.f32 %v2753_v26  ;;  %v9003_v26 = vld [vmem:[#allocation31_spill] sm:$0xff] }
 0x5f4   :  { %5792 = vmatprep.subr.bf16.mxu0 %v8935_v56  ;;  %5824 = vmatprep.subr.bf16.mxu1 %v8936_v49 }
 0x5f7   :  { %5794 = vmatpush1.bf16.msra.mxu0 %v8937_v57  ;;  %5826 = vmatpush1.bf16.msra.mxu1 %v8993_v38 }
 0x5f8   :  { %5796 = vmatprep.subr.bf16.mxu0 %v8939_v54  ;;  %5828 = vmatprep.subr.bf16.mxu1 %v8940_v36 }
 0x5fb   :  { %v6700_v29 = vpop.eup %6699  ;;  %5798 = vmatpush1.bf16.msra.mxu0 %v8941_v46  ;;  %5830 = vmatpush1.bf16.msra.mxu1 %v8827_v13 }
 0x5fc   :  { %v6702_v25 = vpop.eup %6701  ;;  %v2757_v33 = vmul.f32 %v6700_v29, %v6698_v30  ;;  %5800 = vmatprep.subr.bf16.mxu0 %v8828_v10  ;;  %5832 = vmatprep.subr.bf16.mxu1 %v8829_v3  ;;  %v8999_v30 = vld [vmem:[#allocation29_spill] sm:$0xff]  ;;  %v9000_v29 = vld [vmem:[#allocation42_spill] sm:$0xff] }
 0x5fd   :  { %v2756_v18 = vmul.f32 %v6702_v25, %v7906_v39  ;;  %v6704_v39 = vpop.eup %6703  ;;  %v9001_v25 = vld [vmem:[#allocation30_spill] sm:$0xff] }
 0x5ff   :  { %v8028_v42 = vadd.f32 %v2757_v33, %v2756_v18  ;;  %5802 = vmatpush1.bf16.msra.mxu0 %v8886_v44  ;;  %5834 = vmatpush1.bf16.msra.mxu1 %v8887_v12  ;;  %v9002_v33 = vld [vmem:[#allocation43_spill] sm:$0xff]  ;;  %v9004_v18 = vld [vmem:[#allocation44_spill] sm:$0xff] }
 0x600   :  { %5804 = vmatprep.subr.bf16.mxu0 %v8888_v51  ;;  %5836 = vmatprep.subr.bf16.mxu1 %v8889_v7 }
 0x601   :  { %6705 = vtanh.f32 %v8028_v42 }
 0x603   :  { %5806 = vmatpush1.bf16.msra.mxu0 %v8890_v28  ;;  %5838 = vmatpush1.bf16.msra.mxu1 %v8891_v45 }
 0x604   :  { %5808 = vmatprep.subr.bf16.mxu0 %v8892_v60  ;;  %5840 = vmatprep.subr.bf16.mxu1 %v8837_v41 }
 0x607   :  { %5810 = vmatpush1.bf16.msra.mxu0 %v8838_v0  ;;  %5842 = vmatpush1.bf16.msra.mxu1 %v8839_v48 }
 0x608   :  { %5812 = vmatprep.subr.bf16.mxu0 %v8840_v35  ;;  %5844 = vmatprep.subr.bf16.mxu1 %v8841_v58 }
 0x60b   :  { %v6706_v32 = vpop.eup %6705  ;;  %5814 = vmatpush1.bf16.msra.mxu0 %v8842_v8  ;;  %5846 = vmatpush1.bf16.msra.mxu1 %v8843_v53 }
 0x60c   :  { %5848 = vmatprep.subr.bf16.mxu0 %v8844_v4  ;;  %5880 = vmatprep.subr.bf16.mxu1 %v8845_v37  ;;  %v2760_v43 = vmul.f32 %v6706_v32, %v6704_v39  ;;  %v9005_v39 = vld [vmem:[#allocation32_spill] sm:$0xff]  ;;  %v9006_v32 = vld [vmem:[#allocation45_spill] sm:$0xff] }
 0x60e   :  { %2968 = vmatmul.mubr.f32.vlgmr.msra.gmra.mrb[24].mxu0 %v2760_v43  ;;  %3039 = vmatmul.mubr.f32.vlgmr.msra.gmra.mrb[26].mxu1 %v2760_v43 }
 0x60f   :  { %5850 = vmatpush1.bf16.msra.mxu0 %v7148_v15  ;;  %5882 = vmatpush1.bf16.msra.mxu1 %v7253_v14 }
 0x610   :  { %5852 = vmatprep.subr.bf16.mxu0 %v7151_v16  ;;  %5884 = vmatprep.subr.bf16.mxu1 %v7256_v17 }
 0x611   :  { %3142 = vmatprep.mubr.f32.mxu0 %v8752_v61  ;;  %3213 = vmatprep.mubr.f32.mxu1 %v8752_v61 }
 0x613   :  { %5854 = vmatpush1.bf16.msra.mxu0 %v7159_v22  ;;  %5886 = vmatpush1.bf16.msra.mxu1 %v7262_v24 }
 0x614   :  { %5856 = vmatprep.subr.bf16.mxu0 %v7162_v23  ;;  %5888 = vmatprep.subr.bf16.mxu1 %v8994_v31 }
 0x617   :  { %5858 = vmatpush1.bf16.msra.mxu0 %v8995_v27  ;;  %5890 = vmatpush1.bf16.msra.mxu1 %v8996_v40 }
 0x618   :  { %5860 = vmatprep.subr.bf16.mxu0 %v8997_v55  ;;  %5892 = vmatprep.subr.bf16.mxu1 %v8998_v47  ;;  %v9008_v55 = vld [vmem:[#allocation46_spill] sm:$0xff] }
 0x619   :  { %v9009_v47 = vld [vmem:[#allocation34_spill] sm:$0xff] }
 0x61b   :  { %5862 = vmatpush1.bf16.msra.mxu0 %v8999_v30  ;;  %5894 = vmatpush1.bf16.msra.mxu1 %v9000_v29  ;;  %v9010_v30 = vld [vmem:[#allocation47_spill] sm:$0xff] }
 0x61c   :  { %5864 = vmatprep.subr.bf16.mxu0 %v9001_v25  ;;  %5896 = vmatprep.subr.bf16.mxu1 %v9002_v33  ;;  %v9011_v29 = vld [vmem:[#allocation35_spill] sm:$0xff]  ;;  %v9012_v25 = vld [vmem:[#allocation48_spill] sm:$0xff] }
 0x61d   :  { %v9013_v33 = vld [vmem:[#allocation36_spill] sm:$0xff] }
 0x61f   :  { %5866 = vmatpush1.bf16.msra.mxu0 %v9003_v26  ;;  %5898 = vmatpush1.bf16.msra.mxu1 %v9004_v18  ;;  %v9014_v26 = vld [vmem:[#allocation49_spill] sm:$0xff] }
 0x620   :  { %5868 = vmatprep.subr.bf16.mxu0 %v9005_v39  ;;  %5900 = vmatprep.subr.bf16.mxu1 %v9006_v32  ;;  %v9015_v18 = vld [vmem:[#allocation37_spill] sm:$0xff]  ;;  %v9016_v39 = vld [vmem:[#allocation50_spill] sm:$0xff]  ;;  %v9017_v32 = vld [vmem:[#allocation51_spill] sm:$0xff] }
 0x623   :  { %5870 = vmatpush1.bf16.msra.mxu0 %v9007_v50  ;;  %5902 = vmatpush1.bf16.msra.mxu1 %v9008_v55  ;;  %v9018_v50 = vld [vmem:[#allocation52_spill] sm:$0xff]  ;;  %v9051_v55 = vld [vmem:[#allocation117_spill] sm:$0xff] }
 0x624   :  { %5872 = vmatprep.subr.bf16.mxu0 %v9009_v47  ;;  %5904 = vmatprep.subr.bf16.mxu1 %v9010_v30  ;;  %v9019_v47 = vld [vmem:[#allocation53_spill] sm:$0xff]  ;;  %v9020_v30 = vld [vmem:[#allocation54_spill] sm:$0xff] }
 0x627   :  { %5874 = vmatpush1.bf16.msra.mxu0 %v9011_v29  ;;  %5906 = vmatpush1.bf16.msra.mxu1 %v9012_v25  ;;  %v9021_v29 = vld [vmem:[#allocation55_spill] sm:$0xff]  ;;  %v9022_v25 = vld [vmem:[#allocation56_spill] sm:$0xff] }
 0x628   :  { %5876 = vmatprep.subr.bf16.mxu0 %v9013_v33  ;;  %5908 = vmatprep.subr.bf16.mxu1 %v9014_v26  ;;  %v9032_v26 = vld [vmem:[#allocation66_spill] sm:$0xff]  ;;  %v9033_v33 = vld [vmem:[#allocation67_spill] sm:$0xff] }
 0x62b   :  { %5878 = vmatpush1.bf16.msra.mxu0 %v9015_v18  ;;  %5910 = vmatpush1.bf16.msra.mxu1 %v9016_v39  ;;  %v9023_v18 = vld [vmem:[#allocation57_spill] sm:$0xff]  ;;  %v9024_v39 = vld [vmem:[#allocation58_spill] sm:$0xff] }
 0x62c   :  { %5912 = vmatprep.subr.bf16.mxu0 %v9017_v32  ;;  %5944 = vmatprep.subr.bf16.mxu1 %v9018_v50  ;;  %v9025_v32 = vld [vmem:[#allocation59_spill] sm:$0xff]  ;;  %v9026_v50 = vld [vmem:[#allocation60_spill] sm:$0xff] }
 0x62e   :  { %3143 = vmatmul.mubr.f32.vlgmr.msra.gmra.mrb[10].mxu0 %v2760_v43  ;;  %3214 = vmatmul.mubr.f32.vlgmr.msra.gmra.mrb[10].mxu1 %v2760_v43  ;;  %v9027_v43 = vld [vmem:[#allocation61_spill] sm:$0xff] }
 0x62f   :  { %5914 = vmatpush1.bf16.msra.mxu0 %v9019_v47  ;;  %5946 = vmatpush1.bf16.msra.mxu1 %v9020_v30  ;;  %v9028_v47 = vld [vmem:[#allocation62_spill] sm:$0xff]  ;;  %v9029_v30 = vld [vmem:[#allocation63_spill] sm:$0xff] }
 0x630   :  { %5916 = vmatprep.subr.bf16.mxu0 %v9021_v29  ;;  %5948 = vmatprep.subr.bf16.mxu1 %v9022_v25  ;;  %v9030_v29 = vld [vmem:[#allocation64_spill] sm:$0xff]  ;;  %v9031_v25 = vld [vmem:[#allocation65_spill] sm:$0xff] }
 0x631   :  { %3312 = vmatprep.mubr.f32.mxu0 %v8752_v61  ;;  %3383 = vmatprep.mubr.f32.mxu1 %v8752_v61 }
 0x633   :  { %5918 = vmatpush1.bf16.msra.mxu0 %v9023_v18  ;;  %5950 = vmatpush1.bf16.msra.mxu1 %v9024_v39  ;;  %v9034_v18 = vld [vmem:[#allocation68_spill] sm:$0xff]  ;;  %v9035_v39 = vld [vmem:[#allocation69_spill] sm:$0xff] }
 0x634   :  { %5920 = vmatprep.subr.bf16.mxu0 %v9025_v32  ;;  %5952 = vmatprep.subr.bf16.mxu1 %v9026_v50  ;;  %v9036_v32 = vld [vmem:[#allocation70_spill] sm:$0xff]  ;;  %v9037_v50 = vld [vmem:[#allocation71_spill] sm:$0xff] }
 0x637   :  { %5922 = vmatpush1.bf16.msra.mxu0 %v9027_v43  ;;  %5954 = vmatpush1.bf16.msra.mxu1 %v9028_v47  ;;  %v9038_v43 = vld [vmem:[#allocation72_spill] sm:$0xff]  ;;  %v9039_v47 = vld [vmem:[#allocation73_spill] sm:$0xff] }
 0x638   :  { %5924 = vmatprep.subr.bf16.mxu0 %v9029_v30  ;;  %5956 = vmatprep.subr.bf16.mxu1 %v9030_v29  ;;  %v9040_v30 = vld [vmem:[#allocation74_spill] sm:$0xff]  ;;  %v9041_v29 = vld [vmem:[#allocation75_spill] sm:$0xff] }
 0x63b   :  { %5926 = vmatpush1.bf16.msra.mxu0 %v9031_v25  ;;  %5958 = vmatpush1.bf16.msra.mxu1 %v9032_v26  ;;  %v9042_v25 = vld [vmem:[#allocation76_spill] sm:$0xff]  ;;  %v9043_v26 = vld [vmem:[#allocation77_spill] sm:$0xff] }
 0x63c   :  { %5928 = vmatprep.subr.bf16.mxu0 %v9033_v33  ;;  %5960 = vmatprep.subr.bf16.mxu1 %v9034_v18  ;;  %v9044_v33 = vld [vmem:[#allocation78_spill] sm:$0xff]  ;;  %v9045_v18 = vld [vmem:[#allocation79_spill] sm:$0xff] }
 0x63f   :  { %5930 = vmatpush1.bf16.msra.mxu0 %v9035_v39  ;;  %5962 = vmatpush1.bf16.msra.mxu1 %v9036_v32  ;;  %v9046_v39 = vld [vmem:[#allocation80_spill] sm:$0xff]  ;;  %v9047_v32 = vld [vmem:[#allocation81_spill] sm:$0xff] }
 0x640   :  { %5932 = vmatprep.subr.bf16.mxu0 %v9037_v50  ;;  %5964 = vmatprep.subr.bf16.mxu1 %v9038_v43  ;;  %v9048_v50 = vld [vmem:[#allocation82_spill] sm:$0xff]  ;;  %v9049_v43 = vld [vmem:[#allocation83_spill] sm:$0xff] }
 0x643   :  { %5934 = vmatpush1.bf16.msra.mxu0 %v9039_v47  ;;  %5966 = vmatpush1.bf16.msra.mxu1 %v9040_v30  ;;  %v9050_v47 = vld [vmem:[#allocation84_spill] sm:$0xff] }
 0x644   :  { %5936 = vmatprep.subr.bf16.mxu0 %v9041_v29  ;;  %5968 = vmatprep.subr.bf16.mxu1 %v9042_v25 }
 0x647   :  { %5938 = vmatpush1.bf16.msra.mxu0 %v9043_v26  ;;  %5970 = vmatpush1.bf16.msra.mxu1 %v9044_v33 }
 0x648   :  { %5940 = vmatprep.subr.bf16.mxu0 %v9045_v18  ;;  %5972 = vmatprep.subr.bf16.mxu1 %v9046_v39 }
 0x64b   :  { %5942 = vmatpush1.bf16.msra.mxu0 %v9047_v32  ;;  %5974 = vmatpush1.bf16.msra.mxu1 %v9048_v50 }
 0x64c   :  { %5976 = vmatprep.subr.bf16.mxu0 %v9049_v43  ;;  %6008 = vmatprep.subr.bf16.mxu1 %v9050_v47 }
 0x6e1   :  { %v2969_v30 = vpop.f32.mrb[24].mxu0  ;;  %v3040_v29 = vpop.f32.mrb[26].mxu1 }
 0x6e2   :  { %v3045_v25 = vadd.f32 %v2969_v30, %v9051_v55  ;;  %v2971_v40 = vpop.f32.mrb[25].mxu0  ;;  %v3042_v26 = vpop.f32.mrb[27].mxu1  ;;  %v3047_v50 = vadd.f32 %v3040_v29, %v8871_v6 }
 0x6e3   :  { %v3046_v33 = vadd.f32 %v2971_v40, %v7618_v59  ;;  %v3048_v32 = vadd.f32 %v3042_v26, %v8870_v52 }
 0x6e4   :  { %v4789_v27 = vmul.f32 -1.442695, %v3045_v25 }
 0x6e5   :  { %v4790_v18 = vmul.f32 -1.442695, %v3046_v33  ;;  %v4791_v39 = vmul.f32 -1.442695, %v3048_v32 }
 0x6e6   :  { %6707 = vpow2.f32 %v4789_v27 }
 0x6e7   :  { %6709 = vpow2.f32 %v4790_v18 }
 0x6e8   :  { %6711 = vpow2.f32 %v4791_v39 }
 0x6e9   :  { %6713 = vtanh.f32 %v3047_v50 }
 0x6f0   :  { %v6708_v43 = vpop.eup %6707 }
 0x6f1   :  { %v6710_v31 = vpop.eup %6709  ;;  %v3052_v47 = vadd.f32 1.0, %v6708_v43 }
 0x6f2   :  { %v3058_v23 = vadd.f32 1.0, %v6710_v31  ;;  %v6712_v30 = vpop.eup %6711 }
 0x6f3   :  { %6715 = vrcp.f32 %v3052_v47  ;;  %v6714_v55 = vpop.eup %6713  ;;  %v3065_v27 = vadd.f32 1.0, %v6712_v30 }
 0x6f4   :  { %6717 = vrcp.f32 %v3058_v23 }
 0x6f5   :  { %6719 = vrcp.f32 %v3065_v27 }
 0x6fd   :  { %v6716_v40 = vpop.eup %6715 }
 0x6fe   :  { %v6718_v25 = vpop.eup %6717  ;;  %v3069_v33 = vmul.f32 %v6716_v40, %v6714_v55 }
 0x6ff   :  { %v3068_v18 = vmul.f32 %v6718_v25, %v7998_v62  ;;  %v6720_v62 = vpop.eup %6719 }
 0x701   :  { %v8120_v26 = vadd.f32 %v3069_v33, %v3068_v18  ;;  %v3144_v32 = vpop.f32.mrb[10].mxu0  ;;  %v3215_v29 = vpop.f32.mrb[10].mxu1 }
 0x702   :  { %v6467_v43 = vadd.f32 %v3144_v32, %v8811_v34  ;;  %v3146_v39 = vpop.f32.mrb[11].mxu0  ;;  %v3217_v50 = vpop.f32.mrb[11].mxu1  ;;  %v6483_v25 = vadd.f32 %v3215_v29, %v7530_v21 }
 0x703   :  { %v6468_v31 = vadd.f32 %v3146_v39, %v8812_v19  ;;  %6721 = vtanh.f32 %v8120_v26  ;;  %v6484_v55 = vadd.f32 %v3217_v50, %v7534_v11 }
 0x704   :  { %v4792_v23 = vmul.f32 -1.442695, %v6467_v43 }
 0x705   :  { %v4793_v47 = vmul.f32 -1.442695, %v6468_v31  ;;  %v4794_v40 = vmul.f32 -1.442695, %v6484_v55 }
 0x706   :  { %6723 = vpow2.f32 %v4792_v23 }
 0x707   :  { %6725 = vpow2.f32 %v4793_v47 }
 0x708   :  { %6727 = vpow2.f32 %v4794_v40 }
 0x709   :  { %6729 = vtanh.f32 %v6483_v25  ;;  %v9053_v25 = vld [vmem:[#allocation26_spill] sm:$0xff] }
 0x70d   :  { %v6722_v30 = vpop.eup %6721 }
 0x70e   :  { %v8127_v33 = vmul.f32 %v6722_v30, %v6720_v62 }
 0x710   :  { %9052 = vst [vmem:[#allocation100_spill] sm:$0xff] %v8127_v33  ;;  %v6724_v27 = vpop.eup %6723  ;;  %3313 = vmatmul.mubr.f32.vlgmr.msra.gmra.mrb[26].mxu0 %v8127_v33  ;;  %3384 = vmatmul.mubr.f32.vlgmr.msra.gmra.mrb[28].mxu1 %v8127_v33  ;;  %v9067_v33 = vld [vmem:[#allocation33_spill] sm:$0xff] }
 0x711   :  { %v6726_v18 = vpop.eup %6725  ;;  %v3227_v32 = vadd.f32 1.0, %v6724_v27  ;;  %5978 = vmatpush1.bf16.msra.mxu0 %v8873_v9  ;;  %6010 = vmatpush1.bf16.msra.mxu1 %v8874_v5  ;;  %v9054_v27 = vld [vmem:[#allocation39_spill] sm:$0xff] }
 0x712   :  { %v3233_v43 = vadd.f32 1.0, %v6726_v18  ;;  %5980 = vmatprep.subr.bf16.mxu0 %v8875_v2  ;;  %6012 = vmatprep.subr.bf16.mxu1 %v8876_v1  ;;  %v6728_v29 = vpop.eup %6727  ;;  %v9055_v18 = vld [vmem:[#allocation27_spill] sm:$0xff] }
 0x713   :  { %6731 = vrcp.f32 %v3227_v32  ;;  %3454 = vmatprep.mubr.f32.mxu0 %v8752_v61  ;;  %3525 = vmatprep.mubr.f32.mxu1 %v8752_v61  ;;  %v6730_v39 = vpop.eup %6729  ;;  %v3240_v47 = vadd.f32 1.0, %v6728_v29  ;;  %v9056_v32 = vld [vmem:[#allocation40_spill] sm:$0xff]  ;;  %v9058_v29 = vld [vmem:[#allocation41_spill] sm:$0xff] }
 0x714   :  { %6733 = vrcp.f32 %v3233_v43  ;;  %v9057_v43 = vld [vmem:[#allocation28_spill] sm:$0xff] }
 0x715   :  { %5982 = vmatpush1.bf16.msra.mxu0 %v8933_v63  ;;  %6014 = vmatpush1.bf16.msra.mxu1 %v8934_v20  ;;  %6735 = vrcp.f32 %v3240_v47  ;;  %v9063_v47 = vld [vmem:[#allocation31_spill] sm:$0xff] }
 0x716   :  { %5984 = vmatprep.subr.bf16.mxu0 %v8935_v56  ;;  %6016 = vmatprep.subr.bf16.mxu1 %v8936_v49 }
 0x719   :  { %5986 = vmatpush1.bf16.msra.mxu0 %v8937_v57  ;;  %6018 = vmatpush1.bf16.msra.mxu1 %v8993_v38 }
 0x71a   :  { %5988 = vmatprep.subr.bf16.mxu0 %v8939_v54  ;;  %6020 = vmatprep.subr.bf16.mxu1 %v8940_v36 }
 0x71d   :  { %v6732_v50 = vpop.eup %6731  ;;  %5990 = vmatpush1.bf16.msra.mxu0 %v8941_v46  ;;  %6022 = vmatpush1.bf16.msra.mxu1 %v8827_v13 }
 0x71e   :  { %v6734_v31 = vpop.eup %6733  ;;  %v3244_v23 = vmul.f32 %v6732_v50, %v6730_v39  ;;  %5992 = vmatprep.subr.bf16.mxu0 %v8828_v10  ;;  %6024 = vmatprep.subr.bf16.mxu1 %v8829_v3  ;;  %v9059_v39 = vld [vmem:[#allocation29_spill] sm:$0xff]  ;;  %v9060_v50 = vld [vmem:[#allocation42_spill] sm:$0xff] }
 0x71f   :  { %v3243_v55 = vmul.f32 %v6734_v31, %v8028_v42  ;;  %v6736_v42 = vpop.eup %6735  ;;  %v9061_v31 = vld [vmem:[#allocation30_spill] sm:$0xff] }
 0x721   :  { %v8150_v62 = vadd.f32 %v3244_v23, %v3243_v55  ;;  %5994 = vmatpush1.bf16.msra.mxu0 %v8886_v44  ;;  %6026 = vmatpush1.bf16.msra.mxu1 %v8887_v12  ;;  %v9062_v23 = vld [vmem:[#allocation43_spill] sm:$0xff]  ;;  %v9064_v55 = vld [vmem:[#allocation44_spill] sm:$0xff] }
 0x722   :  { %5996 = vmatprep.subr.bf16.mxu0 %v8888_v51  ;;  %6028 = vmatprep.subr.bf16.mxu1 %v8889_v7 }
 0x723   :  { %6737 = vtanh.f32 %v8150_v62 }
 0x725   :  { %5998 = vmatpush1.bf16.msra.mxu0 %v8890_v28  ;;  %6030 = vmatpush1.bf16.msra.mxu1 %v8891_v45 }
 0x726   :  { %6000 = vmatprep.subr.bf16.mxu0 %v8892_v60  ;;  %6032 = vmatprep.subr.bf16.mxu1 %v8837_v41 }
 0x729   :  { %6002 = vmatpush1.bf16.msra.mxu0 %v8838_v0  ;;  %6034 = vmatpush1.bf16.msra.mxu1 %v8839_v48 }
 0x72a   :  { %6004 = vmatprep.subr.bf16.mxu0 %v8840_v35  ;;  %6036 = vmatprep.subr.bf16.mxu1 %v8841_v58 }
 0x72d   :  { %v6738_v30 = vpop.eup %6737  ;;  %6006 = vmatpush1.bf16.msra.mxu0 %v8842_v8  ;;  %6038 = vmatpush1.bf16.msra.mxu1 %v8843_v53 }
 0x72e   :  { %v3247_v40 = vmul.f32 %v6738_v30, %v6736_v42  ;;  %6040 = vmatprep.subr.bf16.mxu0 %v8844_v4  ;;  %6072 = vmatprep.subr.bf16.mxu1 %v8845_v37  ;;  %v9065_v42 = vld [vmem:[#allocation32_spill] sm:$0xff]  ;;  %v9066_v30 = vld [vmem:[#allocation45_spill] sm:$0xff] }
 0x730   :  { %3455 = vmatmul.mubr.f32.vlgmr.msra.gmra.mrb[26].mxu0 %v3247_v40  ;;  %3526 = vmatmul.mubr.f32.vlgmr.msra.gmra.mrb[28].mxu1 %v3247_v40 }
 0x731   :  { %6042 = vmatpush1.bf16.msra.mxu0 %v7148_v15  ;;  %6074 = vmatpush1.bf16.msra.mxu1 %v7253_v14 }
 0x732   :  { %6044 = vmatprep.subr.bf16.mxu0 %v7151_v16  ;;  %6076 = vmatprep.subr.bf16.mxu1 %v7256_v17 }
 0x733   :  { %3629 = vmatprep.mubr.f32.mxu0 %v8752_v61  ;;  %3700 = vmatprep.mubr.f32.mxu1 %v8752_v61 }
 0x735   :  { %6046 = vmatpush1.bf16.msra.mxu0 %v7159_v22  ;;  %6078 = vmatpush1.bf16.msra.mxu1 %v7262_v24 }
 0x736   :  { %6048 = vmatprep.subr.bf16.mxu0 %v9053_v25  ;;  %6080 = vmatprep.subr.bf16.mxu1 %v9054_v27 }
 0x739   :  { %6050 = vmatpush1.bf16.msra.mxu0 %v9055_v18  ;;  %6082 = vmatpush1.bf16.msra.mxu1 %v9056_v32 }
 0x73a   :  { %6052 = vmatprep.subr.bf16.mxu0 %v9057_v43  ;;  %6084 = vmatprep.subr.bf16.mxu1 %v9058_v29  ;;  %v9068_v43 = vld [vmem:[#allocation46_spill] sm:$0xff] }
 0x73b   :  { %v9069_v29 = vld [vmem:[#allocation34_spill] sm:$0xff] }
 0x73d   :  { %6054 = vmatpush1.bf16.msra.mxu0 %v9059_v39  ;;  %6086 = vmatpush1.bf16.msra.mxu1 %v9060_v50  ;;  %v9070_v39 = vld [vmem:[#allocation47_spill] sm:$0xff] }
 0x73e   :  { %6056 = vmatprep.subr.bf16.mxu0 %v9061_v31  ;;  %6088 = vmatprep.subr.bf16.mxu1 %v9062_v23  ;;  %v9071_v50 = vld [vmem:[#allocation35_spill] sm:$0xff]  ;;  %v9072_v31 = vld [vmem:[#allocation48_spill] sm:$0xff] }
 0x73f   :  { %v9073_v23 = vld [vmem:[#allocation36_spill] sm:$0xff] }
 0x741   :  { %6058 = vmatpush1.bf16.msra.mxu0 %v9063_v47  ;;  %6090 = vmatpush1.bf16.msra.mxu1 %v9064_v55  ;;  %v9074_v47 = vld [vmem:[#allocation49_spill] sm:$0xff] }
 0x742   :  { %6060 = vmatprep.subr.bf16.mxu0 %v9065_v42  ;;  %6092 = vmatprep.subr.bf16.mxu1 %v9066_v30  ;;  %v9075_v55 = vld [vmem:[#allocation37_spill] sm:$0xff]  ;;  %v9076_v42 = vld [vmem:[#allocation50_spill] sm:$0xff]  ;;  %v9077_v30 = vld [vmem:[#allocation51_spill] sm:$0xff] }
 0x745   :  { %6062 = vmatpush1.bf16.msra.mxu0 %v9067_v33  ;;  %6094 = vmatpush1.bf16.msra.mxu1 %v9068_v43  ;;  %v9078_v33 = vld [vmem:[#allocation52_spill] sm:$0xff]  ;;  %v9111_v43 = vld [vmem:[#allocation117_spill] sm:$0xff] }
 0x746   :  { %6064 = vmatprep.subr.bf16.mxu0 %v9069_v29  ;;  %6096 = vmatprep.subr.bf16.mxu1 %v9070_v39  ;;  %v9079_v29 = vld [vmem:[#allocation53_spill] sm:$0xff]  ;;  %v9080_v39 = vld [vmem:[#allocation54_spill] sm:$0xff] }
 0x749   :  { %6066 = vmatpush1.bf16.msra.mxu0 %v9071_v50  ;;  %6098 = vmatpush1.bf16.msra.mxu1 %v9072_v31  ;;  %v9081_v50 = vld [vmem:[#allocation55_spill] sm:$0xff]  ;;  %v9082_v31 = vld [vmem:[#allocation56_spill] sm:$0xff] }
 0x74a   :  { %6068 = vmatprep.subr.bf16.mxu0 %v9073_v23  ;;  %6100 = vmatprep.subr.bf16.mxu1 %v9074_v47  ;;  %v9092_v47 = vld [vmem:[#allocation66_spill] sm:$0xff]  ;;  %v9093_v23 = vld [vmem:[#allocation67_spill] sm:$0xff] }
 0x74d   :  { %6070 = vmatpush1.bf16.msra.mxu0 %v9075_v55  ;;  %6102 = vmatpush1.bf16.msra.mxu1 %v9076_v42  ;;  %v9083_v55 = vld [vmem:[#allocation57_spill] sm:$0xff]  ;;  %v9084_v42 = vld [vmem:[#allocation58_spill] sm:$0xff] }
 0x74e   :  { %6104 = vmatprep.subr.bf16.mxu0 %v9077_v30  ;;  %6136 = vmatprep.subr.bf16.mxu1 %v9078_v33  ;;  %v9085_v30 = vld [vmem:[#allocation59_spill] sm:$0xff]  ;;  %v9086_v33 = vld [vmem:[#allocation60_spill] sm:$0xff] }
 0x750   :  { %3630 = vmatmul.mubr.f32.vlgmr.msra.gmra.mrb[12].mxu0 %v3247_v40  ;;  %3701 = vmatmul.mubr.f32.vlgmr.msra.gmra.mrb[12].mxu1 %v3247_v40  ;;  %v9087_v40 = vld [vmem:[#allocation61_spill] sm:$0xff] }
 0x751   :  { %6106 = vmatpush1.bf16.msra.mxu0 %v9079_v29  ;;  %6138 = vmatpush1.bf16.msra.mxu1 %v9080_v39  ;;  %v9088_v29 = vld [vmem:[#allocation62_spill] sm:$0xff]  ;;  %v9089_v39 = vld [vmem:[#allocation63_spill] sm:$0xff] }
 0x752   :  { %6108 = vmatprep.subr.bf16.mxu0 %v9081_v50  ;;  %6140 = vmatprep.subr.bf16.mxu1 %v9082_v31  ;;  %v9090_v50 = vld [vmem:[#allocation64_spill] sm:$0xff]  ;;  %v9091_v31 = vld [vmem:[#allocation65_spill] sm:$0xff] }
 0x753   :  { %3799 = vmatprep.mubr.f32.mxu0 %v8752_v61  ;;  %3870 = vmatprep.mubr.f32.mxu1 %v8752_v61 }
 0x755   :  { %6110 = vmatpush1.bf16.msra.mxu0 %v9083_v55  ;;  %6142 = vmatpush1.bf16.msra.mxu1 %v9084_v42  ;;  %v9094_v55 = vld [vmem:[#allocation68_spill] sm:$0xff]  ;;  %v9095_v42 = vld [vmem:[#allocation69_spill] sm:$0xff] }
 0x756   :  { %6112 = vmatprep.subr.bf16.mxu0 %v9085_v30  ;;  %6144 = vmatprep.subr.bf16.mxu1 %v9086_v33  ;;  %v9096_v30 = vld [vmem:[#allocation70_spill] sm:$0xff]  ;;  %v9097_v33 = vld [vmem:[#allocation71_spill] sm:$0xff] }
 0x759   :  { %6114 = vmatpush1.bf16.msra.mxu0 %v9087_v40  ;;  %6146 = vmatpush1.bf16.msra.mxu1 %v9088_v29  ;;  %v9098_v40 = vld [vmem:[#allocation72_spill] sm:$0xff]  ;;  %v9099_v29 = vld [vmem:[#allocation73_spill] sm:$0xff] }
 0x75a   :  { %6116 = vmatprep.subr.bf16.mxu0 %v9089_v39  ;;  %6148 = vmatprep.subr.bf16.mxu1 %v9090_v50  ;;  %v9100_v39 = vld [vmem:[#allocation74_spill] sm:$0xff]  ;;  %v9101_v50 = vld [vmem:[#allocation75_spill] sm:$0xff] }
 0x75d   :  { %6118 = vmatpush1.bf16.msra.mxu0 %v9091_v31  ;;  %6150 = vmatpush1.bf16.msra.mxu1 %v9092_v47  ;;  %v9102_v31 = vld [vmem:[#allocation76_spill] sm:$0xff]  ;;  %v9103_v47 = vld [vmem:[#allocation77_spill] sm:$0xff] }
 0x75e   :  { %6120 = vmatprep.subr.bf16.mxu0 %v9093_v23  ;;  %6152 = vmatprep.subr.bf16.mxu1 %v9094_v55  ;;  %v9104_v23 = vld [vmem:[#allocation78_spill] sm:$0xff]  ;;  %v9105_v55 = vld [vmem:[#allocation79_spill] sm:$0xff] }
 0x761   :  { %6122 = vmatpush1.bf16.msra.mxu0 %v9095_v42  ;;  %6154 = vmatpush1.bf16.msra.mxu1 %v9096_v30  ;;  %v9106_v42 = vld [vmem:[#allocation80_spill] sm:$0xff]  ;;  %v9107_v30 = vld [vmem:[#allocation81_spill] sm:$0xff] }
 0x762   :  { %6124 = vmatprep.subr.bf16.mxu0 %v9097_v33  ;;  %6156 = vmatprep.subr.bf16.mxu1 %v9098_v40  ;;  %v9108_v33 = vld [vmem:[#allocation82_spill] sm:$0xff]  ;;  %v9109_v40 = vld [vmem:[#allocation83_spill] sm:$0xff] }
 0x765   :  { %6126 = vmatpush1.bf16.msra.mxu0 %v9099_v29  ;;  %6158 = vmatpush1.bf16.msra.mxu1 %v9100_v39  ;;  %v9110_v29 = vld [vmem:[#allocation84_spill] sm:$0xff] }
 0x766   :  { %6128 = vmatprep.subr.bf16.mxu0 %v9101_v50  ;;  %6160 = vmatprep.subr.bf16.mxu1 %v9102_v31 }
 0x769   :  { %6130 = vmatpush1.bf16.msra.mxu0 %v9103_v47  ;;  %6162 = vmatpush1.bf16.msra.mxu1 %v9104_v23 }
 0x76a   :  { %6132 = vmatprep.subr.bf16.mxu0 %v9105_v55  ;;  %6164 = vmatprep.subr.bf16.mxu1 %v9106_v42 }
 0x76d   :  { %6134 = vmatpush1.bf16.msra.mxu0 %v9107_v30  ;;  %6166 = vmatpush1.bf16.msra.mxu1 %v9108_v33 }
 0x76e   :  { %6168 = vmatprep.subr.bf16.mxu0 %v9109_v40  ;;  %6200 = vmatprep.subr.bf16.mxu1 %v9110_v29 }
 0x803   :  { %v3456_v39 = vpop.f32.mrb[26].mxu0  ;;  %v3527_v50 = vpop.f32.mrb[28].mxu1 }
 0x804   :  { %v3532_v31 = vadd.f32 %v3456_v39, %v9111_v43  ;;  %v3458_v32 = vpop.f32.mrb[27].mxu0  ;;  %v3529_v47 = vpop.f32.mrb[29].mxu1  ;;  %v3534_v33 = vadd.f32 %v3527_v50, %v8871_v6 }
 0x805   :  { %v3533_v23 = vadd.f32 %v3458_v32, %v7618_v59  ;;  %v3535_v30 = vadd.f32 %v3529_v47, %v8870_v52 }
 0x806   :  { %v4795_v18 = vmul.f32 -1.442695, %v3532_v31 }
 0x807   :  { %v4796_v55 = vmul.f32 -1.442695, %v3533_v23  ;;  %v4797_v42 = vmul.f32 -1.442695, %v3535_v30 }
 0x808   :  { %6739 = vpow2.f32 %v4795_v18 }
 0x809   :  { %6741 = vpow2.f32 %v4796_v55 }
 0x80a   :  { %6743 = vpow2.f32 %v4797_v42 }
 0x80b   :  { %6745 = vtanh.f32 %v3534_v33 }
 0x812   :  { %v6740_v40 = vpop.eup %6739 }
 0x813   :  { %v6742_v27 = vpop.eup %6741  ;;  %v3539_v29 = vadd.f32 1.0, %v6740_v40 }
 0x814   :  { %v3545_v25 = vadd.f32 1.0, %v6742_v27  ;;  %v6744_v39 = vpop.eup %6743 }
 0x815   :  { %6747 = vrcp.f32 %v3539_v29  ;;  %v6746_v43 = vpop.eup %6745  ;;  %v3552_v18 = vadd.f32 1.0, %v6744_v39 }
 0x816   :  { %6749 = vrcp.f32 %v3545_v25 }
 0x817   :  { %6751 = vrcp.f32 %v3552_v18 }
 0x81f   :  { %v6748_v32 = vpop.eup %6747 }
 0x820   :  { %v6750_v31 = vpop.eup %6749  ;;  %v3556_v23 = vmul.f32 %v6748_v32, %v6746_v43 }
 0x821   :  { %v3555_v55 = vmul.f32 %v6750_v31, %v8120_v26  ;;  %v6752_v26 = vpop.eup %6751 }
 0x823   :  { %v8242_v47 = vadd.f32 %v3556_v23, %v3555_v55  ;;  %v3631_v30 = vpop.f32.mrb[12].mxu0  ;;  %v3702_v50 = vpop.f32.mrb[12].mxu1 }
 0x824   :  { %v6469_v40 = vadd.f32 %v3631_v30, %v8811_v34  ;;  %v3633_v42 = vpop.f32.mrb[13].mxu0  ;;  %v3704_v33 = vpop.f32.mrb[13].mxu1  ;;  %v6485_v31 = vadd.f32 %v3702_v50, %v7530_v21 }
 0x825   :  { %v6470_v27 = vadd.f32 %v3633_v42, %v8812_v19  ;;  %6753 = vtanh.f32 %v8242_v47  ;;  %v6486_v43 = vadd.f32 %v3704_v33, %v7534_v11 }
 0x826   :  { %v4798_v25 = vmul.f32 -1.442695, %v6469_v40 }
 0x827   :  { %v4799_v29 = vmul.f32 -1.442695, %v6470_v27  ;;  %v4800_v32 = vmul.f32 -1.442695, %v6486_v43 }
 0x828   :  { %6755 = vpow2.f32 %v4798_v25 }
 0x829   :  { %6757 = vpow2.f32 %v4799_v29 }
 0x82a   :  { %6759 = vpow2.f32 %v4800_v32 }
 0x82b   :  { %6761 = vtanh.f32 %v6485_v31  ;;  %v9114_v31 = vld [vmem:[#allocation27_spill] sm:$0xff] }
 0x82f   :  { %v6754_v39 = vpop.eup %6753 }
 0x830   :  { %v8249_v23 = vmul.f32 %v6754_v39, %v6752_v26 }
 0x832   :  { %v6756_v18 = vpop.eup %6755  ;;  %3800 = vmatmul.mubr.f32.vlgmr.msra.gmra.mrb[28].mxu0 %v8249_v23  ;;  %3871 = vmatmul.mubr.f32.vlgmr.msra.gmra.mrb[30].mxu1 %v8249_v23 }
 0x833   :  { %v6758_v55 = vpop.eup %6757  ;;  %v3714_v30 = vadd.f32 1.0, %v6756_v18  ;;  %6170 = vmatpush1.bf16.msra.mxu0 %v8873_v9  ;;  %6202 = vmatpush1.bf16.msra.mxu1 %v8874_v5  ;;  %v9119_v18 = vld [vmem:[#allocation42_spill] sm:$0xff] }
 0x834   :  { %v3720_v40 = vadd.f32 1.0, %v6758_v55  ;;  %6172 = vmatprep.subr.bf16.mxu0 %v8875_v2  ;;  %6204 = vmatprep.subr.bf16.mxu1 %v8876_v1  ;;  %v6760_v50 = vpop.eup %6759  ;;  %v9120_v55 = vld [vmem:[#allocation30_spill] sm:$0xff] }
 0x835   :  { %6763 = vrcp.f32 %v3714_v30  ;;  %3941 = vmatprep.mubr.f32.mxu0 %v8752_v61  ;;  %4012 = vmatprep.mubr.f32.mxu1 %v8752_v61  ;;  %v6762_v42 = vpop.eup %6761  ;;  %v3727_v29 = vadd.f32 1.0, %v6760_v50  ;;  %v9123_v30 = vld [vmem:[#allocation44_spill] sm:$0xff]  ;;  %v9125_v50 = vld [vmem:[#allocation45_spill] sm:$0xff] }
 0x836   :  { %6765 = vrcp.f32 %v3720_v40  ;;  %v9124_v40 = vld [vmem:[#allocation32_spill] sm:$0xff] }
 0x837   :  { %6174 = vmatpush1.bf16.msra.mxu0 %v8933_v63  ;;  %6206 = vmatpush1.bf16.msra.mxu1 %v8934_v20  ;;  %6767 = vrcp.f32 %v3727_v29  ;;  %v9130_v29 = vld [vmem:[#allocation35_spill] sm:$0xff] }
 0x838   :  { %6176 = vmatprep.subr.bf16.mxu0 %v8935_v56  ;;  %6208 = vmatprep.subr.bf16.mxu1 %v8936_v49 }
 0x83b   :  { %6178 = vmatpush1.bf16.msra.mxu0 %v8937_v57  ;;  %6210 = vmatpush1.bf16.msra.mxu1 %v8993_v38 }
 0x83c   :  { %6180 = vmatprep.subr.bf16.mxu0 %v8939_v54  ;;  %6212 = vmatprep.subr.bf16.mxu1 %v8940_v36 }
 0x83f   :  { %v6764_v33 = vpop.eup %6763  ;;  %6182 = vmatpush1.bf16.msra.mxu0 %v8941_v46  ;;  %6214 = vmatpush1.bf16.msra.mxu1 %v8827_v13 }
 0x840   :  { %v6766_v27 = vpop.eup %6765  ;;  %v3731_v25 = vmul.f32 %v6764_v33, %v6762_v42  ;;  %6184 = vmatprep.subr.bf16.mxu0 %v8828_v10  ;;  %6216 = vmatprep.subr.bf16.mxu1 %v8829_v3  ;;  %v9126_v42 = vld [vmem:[#allocation33_spill] sm:$0xff]  ;;  %v9127_v33 = vld [vmem:[#allocation46_spill] sm:$0xff] }
 0x841   :  { %v3730_v43 = vmul.f32 %v6766_v27, %v8150_v62  ;;  %v6768_v62 = vpop.eup %6767  ;;  %v9128_v27 = vld [vmem:[#allocation34_spill] sm:$0xff] }
 0x843   :  { %v8272_v26 = vadd.f32 %v3731_v25, %v3730_v43  ;;  %6186 = vmatpush1.bf16.msra.mxu0 %v8886_v44  ;;  %6218 = vmatpush1.bf16.msra.mxu1 %v8887_v12  ;;  %v9129_v25 = vld [vmem:[#allocation47_spill] sm:$0xff]  ;;  %v9131_v43 = vld [vmem:[#allocation48_spill] sm:$0xff] }
 0x844   :  { %6188 = vmatprep.subr.bf16.mxu0 %v8888_v51  ;;  %6220 = vmatprep.subr.bf16.mxu1 %v8889_v7 }
 0x845   :  { %6769 = vtanh.f32 %v8272_v26 }
 0x847   :  { %6190 = vmatpush1.bf16.msra.mxu0 %v8890_v28  ;;  %6222 = vmatpush1.bf16.msra.mxu1 %v8891_v45 }
 0x848   :  { %6192 = vmatprep.subr.bf16.mxu0 %v8892_v60  ;;  %6224 = vmatprep.subr.bf16.mxu1 %v8837_v41 }
 0x84b   :  { %6194 = vmatpush1.bf16.msra.mxu0 %v8838_v0  ;;  %6226 = vmatpush1.bf16.msra.mxu1 %v8839_v48 }
 0x84c   :  { %6196 = vmatprep.subr.bf16.mxu0 %v8840_v35  ;;  %6228 = vmatprep.subr.bf16.mxu1 %v8841_v58 }
 0x84f   :  { %v6770_v39 = vpop.eup %6769  ;;  %6198 = vmatpush1.bf16.msra.mxu0 %v8842_v8  ;;  %6230 = vmatpush1.bf16.msra.mxu1 %v8843_v53 }
 0x850   :  { %6232 = vmatprep.subr.bf16.mxu0 %v8844_v4  ;;  %6264 = vmatprep.subr.bf16.mxu1 %v8845_v37  ;;  %v3734_v32 = vmul.f32 %v6770_v39, %v6768_v62  ;;  %v9112_v4 = vld [vmem:[#allocation26_spill] sm:$0xff]  ;;  %v9113_v37 = vld [vmem:[#allocation39_spill] sm:$0xff]  ;;  %v9132_v62 = vld [vmem:[#allocation36_spill] sm:$0xff] }
 0x851   :  { %v9133_v39 = vld [vmem:[#allocation49_spill] sm:$0xff] }
 0x852   :  { %3942 = vmatmul.mubr.f32.vlgmr.msra.gmra.mrb[28].mxu0 %v3734_v32  ;;  %4013 = vmatmul.mubr.f32.vlgmr.msra.gmra.mrb[30].mxu1 %v3734_v32 }
 0x853   :  { %6234 = vmatpush1.bf16.msra.mxu0 %v7148_v15  ;;  %6266 = vmatpush1.bf16.msra.mxu1 %v7253_v14  ;;  %v9115_v15 = vld [vmem:[#allocation40_spill] sm:$0xff] }
 0x854   :  { %6236 = vmatprep.subr.bf16.mxu0 %v7151_v16  ;;  %6268 = vmatprep.subr.bf16.mxu1 %v7256_v17  ;;  %v9116_v14 = vld [vmem:[#allocation28_spill] sm:$0xff]  ;;  %v9117_v16 = vld [vmem:[#allocation41_spill] sm:$0xff] }
 0x855   :  { %4116 = vmatprep.mubr.f32.mxu0 %v8752_v61  ;;  %4187 = vmatprep.mubr.f32.mxu1 %v8752_v61  ;;  %v9118_v17 = vld [vmem:[#allocation29_spill] sm:$0xff] }
 0x857   :  { %6238 = vmatpush1.bf16.msra.mxu0 %v7159_v22  ;;  %6270 = vmatpush1.bf16.msra.mxu1 %v7262_v24  ;;  %v9121_v22 = vld [vmem:[#allocation43_spill] sm:$0xff] }
 0x858   :  { %6240 = vmatprep.subr.bf16.mxu0 %v9112_v4  ;;  %6272 = vmatprep.subr.bf16.mxu1 %v9113_v37  ;;  %v9122_v24 = vld [vmem:[#allocation31_spill] sm:$0xff]  ;;  %v9134_v4 = vld [vmem:[#allocation37_spill] sm:$0xff]  ;;  %v9135_v37 = vld [vmem:[#allocation50_spill] sm:$0xff] }
 0x85b   :  { %6242 = vmatpush1.bf16.msra.mxu0 %v9114_v31  ;;  %6274 = vmatpush1.bf16.msra.mxu1 %v9115_v15  ;;  %v9136_v31 = vld [vmem:[#allocation51_spill] sm:$0xff]  ;;  %v9137_v15 = vld [vmem:[#allocation52_spill] sm:$0xff] }
 0x85c   :  { %6244 = vmatprep.subr.bf16.mxu0 %v9116_v14  ;;  %6276 = vmatprep.subr.bf16.mxu1 %v9117_v16  ;;  %v9138_v14 = vld [vmem:[#allocation53_spill] sm:$0xff]  ;;  %v9139_v16 = vld [vmem:[#allocation54_spill] sm:$0xff] }
 0x85f   :  { %6246 = vmatpush1.bf16.msra.mxu0 %v9118_v17  ;;  %6278 = vmatpush1.bf16.msra.mxu1 %v9119_v18  ;;  %v9140_v17 = vld [vmem:[#allocation55_spill] sm:$0xff]  ;;  %v9141_v18 = vld [vmem:[#allocation56_spill] sm:$0xff] }
 0x860   :  { %6248 = vmatprep.subr.bf16.mxu0 %v9120_v55  ;;  %6280 = vmatprep.subr.bf16.mxu1 %v9121_v22  ;;  %v9142_v55 = vld [vmem:[#allocation57_spill] sm:$0xff]  ;;  %v9143_v22 = vld [vmem:[#allocation58_spill] sm:$0xff] }
 0x863   :  { %6250 = vmatpush1.bf16.msra.mxu0 %v9122_v24  ;;  %6282 = vmatpush1.bf16.msra.mxu1 %v9123_v30  ;;  %v9144_v24 = vld [vmem:[#allocation59_spill] sm:$0xff]  ;;  %v9145_v30 = vld [vmem:[#allocation60_spill] sm:$0xff] }
 0x864   :  { %6252 = vmatprep.subr.bf16.mxu0 %v9124_v40  ;;  %6284 = vmatprep.subr.bf16.mxu1 %v9125_v50  ;;  %v9147_v40 = vld [vmem:[#allocation62_spill] sm:$0xff]  ;;  %v9148_v50 = vld [vmem:[#allocation63_spill] sm:$0xff] }
 0x867   :  { %6254 = vmatpush1.bf16.msra.mxu0 %v9126_v42  ;;  %6286 = vmatpush1.bf16.msra.mxu1 %v9127_v33  ;;  %v9149_v42 = vld [vmem:[#allocation64_spill] sm:$0xff]  ;;  %v9150_v33 = vld [vmem:[#allocation65_spill] sm:$0xff] }
 0x868   :  { %6256 = vmatprep.subr.bf16.mxu0 %v9128_v27  ;;  %6288 = vmatprep.subr.bf16.mxu1 %v9129_v25  ;;  %v9151_v27 = vld [vmem:[#allocation66_spill] sm:$0xff]  ;;  %v9152_v25 = vld [vmem:[#allocation67_spill] sm:$0xff] }
 0x86b   :  { %6258 = vmatpush1.bf16.msra.mxu0 %v9130_v29  ;;  %6290 = vmatpush1.bf16.msra.mxu1 %v9131_v43  ;;  %v9153_v29 = vld [vmem:[#allocation68_spill] sm:$0xff]  ;;  %v9154_v43 = vld [vmem:[#allocation69_spill] sm:$0xff] }
 0x86c   :  { %6260 = vmatprep.subr.bf16.mxu0 %v9132_v62  ;;  %6292 = vmatprep.subr.bf16.mxu1 %v9133_v39  ;;  %v9155_v62 = vld [vmem:[#allocation70_spill] sm:$0xff]  ;;  %v9156_v39 = vld [vmem:[#allocation71_spill] sm:$0xff] }
 0x86f   :  { %6262 = vmatpush1.bf16.msra.mxu0 %v9134_v4  ;;  %6294 = vmatpush1.bf16.msra.mxu1 %v9135_v37  ;;  %v9157_v4 = vld [vmem:[#allocation72_spill] sm:$0xff]  ;;  %v9158_v37 = vld [vmem:[#allocation73_spill] sm:$0xff] }
 0x870   :  { %6296 = vmatprep.subr.bf16.mxu0 %v9136_v31  ;;  %6328 = vmatprep.subr.bf16.mxu1 %v9137_v15  ;;  %v9159_v31 = vld [vmem:[#allocation74_spill] sm:$0xff]  ;;  %v9160_v15 = vld [vmem:[#allocation75_spill] sm:$0xff] }
 0x872   :  { %4117 = vmatmul.mubr.f32.vlgmr.msra.gmra.mrb[14].mxu0 %v3734_v32  ;;  %4188 = vmatmul.mubr.f32.vlgmr.msra.gmra.mrb[14].mxu1 %v3734_v32  ;;  %v9146_v32 = vld [vmem:[#allocation61_spill] sm:$0xff] }
 0x873   :  { %6298 = vmatpush1.bf16.msra.mxu0 %v9138_v14  ;;  %6330 = vmatpush1.bf16.msra.mxu1 %v9139_v16  ;;  %v9161_v14 = vld [vmem:[#allocation76_spill] sm:$0xff]  ;;  %v9162_v16 = vld [vmem:[#allocation77_spill] sm:$0xff] }
 0x874   :  { %6300 = vmatprep.subr.bf16.mxu0 %v9140_v17  ;;  %6332 = vmatprep.subr.bf16.mxu1 %v9141_v18  ;;  %v9163_v17 = vld [vmem:[#allocation78_spill] sm:$0xff]  ;;  %v9164_v18 = vld [vmem:[#allocation79_spill] sm:$0xff] }
 0x875   :  { %4286 = vmatprep.mubr.f32.mxu0 %v8752_v61  ;;  %4357 = vmatprep.mubr.f32.mxu1 %v8752_v61 }
 0x877   :  { %6302 = vmatpush1.bf16.msra.mxu0 %v9142_v55  ;;  %6334 = vmatpush1.bf16.msra.mxu1 %v9143_v22  ;;  %v9165_v55 = vld [vmem:[#allocation80_spill] sm:$0xff]  ;;  %v9166_v22 = vld [vmem:[#allocation81_spill] sm:$0xff] }
 0x878   :  { %6304 = vmatprep.subr.bf16.mxu0 %v9144_v24  ;;  %6336 = vmatprep.subr.bf16.mxu1 %v9145_v30  ;;  %v9167_v24 = vld [vmem:[#allocation82_spill] sm:$0xff]  ;;  %v9168_v30 = vld [vmem:[#allocation83_spill] sm:$0xff] }
 0x87b   :  { %6306 = vmatpush1.bf16.msra.mxu0 %v9146_v32  ;;  %6338 = vmatpush1.bf16.msra.mxu1 %v9147_v40  ;;  %v9169_v32 = vld [vmem:[#allocation84_spill] sm:$0xff] }
 0x87c   :  { %6308 = vmatprep.subr.bf16.mxu0 %v9148_v50  ;;  %6340 = vmatprep.subr.bf16.mxu1 %v9149_v42  ;;  %v9170_v42 = vld [vmem:[#allocation117_spill] sm:$0xff] }
 0x87f   :  { %6310 = vmatpush1.bf16.msra.mxu0 %v9150_v33  ;;  %6342 = vmatpush1.bf16.msra.mxu1 %v9151_v27 }
 0x880   :  { %6312 = vmatprep.subr.bf16.mxu0 %v9152_v25  ;;  %6344 = vmatprep.subr.bf16.mxu1 %v9153_v29 }
 0x883   :  { %6314 = vmatpush1.bf16.msra.mxu0 %v9154_v43  ;;  %6346 = vmatpush1.bf16.msra.mxu1 %v9155_v62 }
 0x884   :  { %6316 = vmatprep.subr.bf16.mxu0 %v9156_v39  ;;  %6348 = vmatprep.subr.bf16.mxu1 %v9157_v4 }
 0x887   :  { %6318 = vmatpush1.bf16.msra.mxu0 %v9158_v37  ;;  %6350 = vmatpush1.bf16.msra.mxu1 %v9159_v31 }
 0x888   :  { %6320 = vmatprep.subr.bf16.mxu0 %v9160_v15  ;;  %6352 = vmatprep.subr.bf16.mxu1 %v9161_v14 }
 0x88b   :  { %6322 = vmatpush1.bf16.msra.mxu0 %v9162_v16  ;;  %6354 = vmatpush1.bf16.msra.mxu1 %v9163_v17 }
 0x88c   :  { %6324 = vmatprep.subr.bf16.mxu0 %v9164_v18  ;;  %6356 = vmatprep.subr.bf16.mxu1 %v9165_v55 }
 0x88f   :  { %6326 = vmatpush1.bf16.msra.mxu0 %v9166_v22  ;;  %6358 = vmatpush1.bf16.msra.mxu1 %v9167_v24 }
 0x890   :  { %6360 = vmatprep.subr.bf16.mxu0 %v9168_v30  ;;  %6392 = vmatprep.subr.bf16.mxu1 %v9169_v32 }
 0x925   :  { %v3943_v40 = vpop.f32.mrb[28].mxu0  ;;  %v4014_v50 = vpop.f32.mrb[30].mxu1 }
 0x926   :  { %v4019_v33 = vadd.f32 %v3943_v40, %v9170_v42  ;;  %v3945_v27 = vpop.f32.mrb[29].mxu0  ;;  %v4016_v25 = vpop.f32.mrb[31].mxu1  ;;  %v4021_v37 = vadd.f32 %v4014_v50, %v8871_v6 }
 0x927   :  { %v4020_v29 = vadd.f32 %v3945_v27, %v7618_v59  ;;  %v4022_v39 = vadd.f32 %v4016_v25, %v8870_v52 }
 0x928   :  { %v4801_v43 = vmul.f32 -1.442695, %v4019_v33 }
 0x929   :  { %v4802_v62 = vmul.f32 -1.442695, %v4020_v29  ;;  %v4803_v4 = vmul.f32 -1.442695, %v4022_v39 }
 0x92a   :  { %6771 = vpow2.f32 %v4801_v43 }
 0x92b   :  { %6773 = vpow2.f32 %v4802_v62 }
 0x92c   :  { %6775 = vpow2.f32 %v4803_v4 }
 0x92d   :  { %6777 = vtanh.f32 %v4021_v37 }
 0x934   :  { %v6772_v31 = vpop.eup %6771 }
 0x935   :  { %v6774_v15 = vpop.eup %6773  ;;  %v4026_v14 = vadd.f32 1.0, %v6772_v31 }
 0x936   :  { %v4032_v16 = vadd.f32 1.0, %v6774_v15  ;;  %v6776_v17 = vpop.eup %6775 }
 0x937   :  { %6779 = vrcp.f32 %v4026_v14  ;;  %v6778_v18 = vpop.eup %6777  ;;  %v4039_v30 = vadd.f32 1.0, %v6776_v17  ;;  %v4561_v17 = vld [vmem:[#allocation14 + $0x70] sm:$0xff] }
 0x938   :  { %6781 = vrcp.f32 %v4032_v16 }
 0x939   :  { %6783 = vrcp.f32 %v4039_v30  ;;  %v9174_v30 = vld [vmem:[#allocation99_spill] sm:$0xff] }
 0x941   :  { %v6780_v55 = vpop.eup %6779 }
 0x942   :  { %v6782_v22 = vpop.eup %6781  ;;  %v4043_v24 = vmul.f32 %v6780_v55, %v6778_v18  ;;  %v4562_v18 = vld [vmem:[#allocation14 + $0x78] sm:$0xff] }
 0x943   :  { %v4042_v32 = vmul.f32 %v6782_v22, %v8242_v47  ;;  %v6784_v47 = vpop.eup %6783  ;;  %v6451_v55 = vpack.c.bf16 %v4562_v18, %v4561_v17  ;;  %v9172_v22 = vld [vmem:[#allocation116_spill] sm:$0xff] }
 0x945   :  { %v8364_v40 = vadd.f32 %v4043_v24, %v4042_v32  ;;  %v4118_v33 = vpop.f32.mrb[14].mxu0  ;;  %v4189_v50 = vpop.f32.mrb[14].mxu1  ;;  %v9173_v24 = vld [vmem:[#allocation98_spill] sm:$0xff]  ;;  %v9175_v32 = vld [vmem:[#allocation100_spill] sm:$0xff] }
 0x946   :  { %v6471_v27 = vadd.f32 %v4118_v33, %v8811_v34  ;;  %v4120_v25 = vpop.f32.mrb[15].mxu0  ;;  %v4191_v29 = vpop.f32.mrb[15].mxu1  ;;  %v6487_v15 = vadd.f32 %v4189_v50, %v7530_v21 }
 0x947   :  { %v6472_v43 = vadd.f32 %v4120_v25, %v8812_v19  ;;  %6785 = vtanh.f32 %v8364_v40  ;;  %v6488_v4 = vadd.f32 %v4191_v29, %v7534_v11 }
 0x948   :  { %v4804_v62 = vmul.f32 -1.442695, %v6471_v27 }
 0x949   :  { %v4805_v39 = vmul.f32 -1.442695, %v6472_v43  ;;  %v4806_v31 = vmul.f32 -1.442695, %v6488_v4 }
 0x94a   :  { %6787 = vpow2.f32 %v4804_v62 }
 0x94b   :  { %6789 = vpow2.f32 %v4805_v39 }
 0x94c   :  { %6791 = vpow2.f32 %v4806_v31 }
 0x94d   :  { %6793 = vtanh.f32 %v6487_v15 }
 0x951   :  { %v6786_v37 = vpop.eup %6785 }
 0x952   :  { %v8371_v14 = vmul.f32 %v6786_v37, %v6784_v47 }
 0x954   :  { %v6788_v34 = vpop.eup %6787  ;;  %4287 = vmatmul.mubr.f32.vlgmr.msra.gmra.mrb[30].mxu0 %v8371_v14  ;;  %4358 = vmatmul.mubr.f32.vlgmr.msra.gmra.mrb[32].mxu1 %v8371_v14 }
 0x955   :  { %v6790_v19 = vpop.eup %6789  ;;  %v4201_v16 = vadd.f32 1.0, %v6788_v34  ;;  %6362 = vmatpush1.bf16.msra.mxu0 %v8873_v9  ;;  %6394 = vmatpush1.bf16.msra.mxu1 %v8874_v5 }
 0x956   :  { %v4207_v11 = vadd.f32 1.0, %v6790_v19  ;;  %6364 = vmatprep.subr.bf16.mxu0 %v8875_v2  ;;  %6396 = vmatprep.subr.bf16.mxu1 %v8876_v1  ;;  %v6792_v21 = vpop.eup %6791 }
 0x957   :  { %6795 = vrcp.f32 %v4201_v16  ;;  %4428 = vmatprep.mubr.f32.mxu0 %v8752_v61  ;;  %4499 = vmatprep.mubr.f32.mxu1 %v8752_v61  ;;  %v6794_v9 = vpop.eup %6793  ;;  %v4214_v1 = vadd.f32 1.0, %v6792_v21 }
 0x958   :  { %6797 = vrcp.f32 %v4207_v11 }
 0x959   :  { %6366 = vmatpush1.bf16.msra.mxu0 %v8933_v63  ;;  %6398 = vmatpush1.bf16.msra.mxu1 %v8934_v20  ;;  %6799 = vrcp.f32 %v4214_v1 }
 0x95a   :  { %6368 = vmatprep.subr.bf16.mxu0 %v8935_v56  ;;  %6400 = vmatprep.subr.bf16.mxu1 %v8936_v49  ;;  %v4555_v56 = vld [vmem:[#allocation14 + $0x40] sm:$0xff] }
 0x95d   :  { %6370 = vmatpush1.bf16.msra.mxu0 %v8937_v57  ;;  %6402 = vmatpush1.bf16.msra.mxu1 %v8993_v38  ;;  %v4557_v57 = vld [vmem:[#allocation14 + $0x50] sm:$0xff]  ;;  %v4560_v38 = vld [vmem:[#allocation14 + $0x68] sm:$0xff] }
 0x95e   :  { %6372 = vmatprep.subr.bf16.mxu0 %v8939_v54  ;;  %6404 = vmatprep.subr.bf16.mxu1 %v8940_v36  ;;  %v4558_v54 = vld [vmem:[#allocation14 + $0x58] sm:$0xff] }
 0x95f   :  { %v6443_v36 = vpack.c.bf16 %v4558_v54, %v4557_v57 }
 0x961   :  { %v6796_v61 = vpop.eup %6795  ;;  %6374 = vmatpush1.bf16.msra.mxu0 %v8941_v46  ;;  %6406 = vmatpush1.bf16.msra.mxu1 %v8827_v13  ;;  %v4548_v13 = vld [vmem:[#allocation14 + $0x8] sm:$0xff]  ;;  %v4559_v46 = vld [vmem:[#allocation14 + $0x60] sm:$0xff] }
 0x962   :  { %v6798_v5 = vpop.eup %6797  ;;  %v4218_v2 = vmul.f32 %v6796_v61, %v6794_v9  ;;  %6376 = vmatprep.subr.bf16.mxu0 %v8828_v10  ;;  %6408 = vmatprep.subr.bf16.mxu1 %v8829_v3  ;;  %v4547_v10 = vld [vmem:[#allocation14] sm:$0xff] }
 0x963   :  { %v4217_v63 = vmul.f32 %v6798_v5, %v8272_v26  ;;  %v6423_v3 = vpack.c.bf16 %v4548_v13, %v4547_v10  ;;  %v6447_v26 = vpack.c.bf16 %v4560_v38, %v4559_v46 }
 0x965   :  { %v4219_v20 = vadd.f32 %v4218_v2, %v4217_v63  ;;  %6378 = vmatpush1.bf16.msra.mxu0 %v8886_v44  ;;  %6410 = vmatpush1.bf16.msra.mxu1 %v8887_v12  ;;  %v4550_v44 = vld [vmem:[#allocation14 + $0x18] sm:$0xff]  ;;  %v6800_v12 = vpop.eup %6799 }
 0x966   :  { %6380 = vmatprep.subr.bf16.mxu0 %v8888_v51  ;;  %6412 = vmatprep.subr.bf16.mxu1 %v8889_v7  ;;  %v4549_v51 = vld [vmem:[#allocation14 + $0x10] sm:$0xff] }
 0x967   :  { %4692 = vst [vmem:[#allocation19] sm:$0xff] %v4219_v20  ;;  %6801 = vtanh.f32 %v4219_v20 }
 0x969   :  { %6382 = vmatpush1.bf16.msra.mxu0 %v8890_v28  ;;  %6414 = vmatpush1.bf16.msra.mxu1 %v8891_v45  ;;  %v6427_v28 = vpack.c.bf16 %v4550_v44, %v4549_v51  ;;  %v4551_v45 = vld [vmem:[#allocation14 + $0x20] sm:$0xff] }
 0x96a   :  { %6384 = vmatprep.subr.bf16.mxu0 %v8892_v60  ;;  %6416 = vmatprep.subr.bf16.mxu1 %v8837_v41  ;;  %v4554_v60 = vld [vmem:[#allocation14 + $0x38] sm:$0xff] }
 0x96d   :  { %6386 = vmatpush1.bf16.msra.mxu0 %v8838_v0  ;;  %6418 = vmatpush1.bf16.msra.mxu1 %v8839_v48  ;;  %v4552_v0 = vld [vmem:[#allocation14 + $0x28] sm:$0xff]  ;;  %v9171_v48 = vld [vmem:[#allocation115_spill] sm:$0xff] }
 0x96e   :  { %6388 = vmatprep.subr.bf16.mxu0 %v8840_v35  ;;  %6420 = vmatprep.subr.bf16.mxu1 %v8841_v58  ;;  %v6431_v35 = vpack.c.bf16 %v4552_v0, %v4551_v45  ;;  %v4553_v58 = vld [vmem:[#allocation14 + $0x30] sm:$0xff] }
 0x971   :  { %v6802_v7 = vpop.eup %6801  ;;  %6390 = vmatpush1.bf16.msra.mxu0 %v8842_v8  ;;  %6422 = vmatpush1.bf16.msra.mxu1 %v8843_v53  ;;  %v6435_v8 = vpack.c.bf16 %v4554_v60, %v4553_v58  ;;  %v4556_v53 = vld [vmem:[#allocation14 + $0x48] sm:$0xff] }
 0x972   :  { %v4221_v41 = vmul.f32 %v6802_v7, %v6800_v12  ;;  %6424 = vmatprep.subr.bf16.mxu0 %v6423_v3  ;;  %v6439_v49 = vpack.c.bf16 %v4556_v53, %v4555_v56 }
 0x974   :  { %4429 = vmatmul.mubr.f32.vlgmr.msra.gmra.mrb[30].mxu0 %v4221_v41  ;;  %4687 = vst [vmem:[#allocation17] sm:$0xff] %v4221_v41  ;;  %4500 = vmatmul.mubr.f32.vlgmr.msra.gmra.mrb[32].mxu1 %v4221_v41 }
 0x975   :  { %6426 = vmatpush3.bf16.msra.mxu0 %v6423_v3  ;;  %4867 = vmatprep.mubr.f32.mxu0 %v9171_v48 }
 0x976   :  { %6428 = vmatprep.subr.bf16.mxu0 %v6427_v28 }
 0x979   :  { %6430 = vmatpush3.bf16.msra.mxu0 %v6427_v28 }
 0x97a   :  { %6432 = vmatprep.subr.bf16.mxu0 %v6431_v35 }
 0x97d   :  { %6434 = vmatpush3.bf16.msra.mxu0 %v6431_v35 }
 0x97e   :  { %6436 = vmatprep.subr.bf16.mxu0 %v6435_v8 }
 0x981   :  { %6438 = vmatpush3.bf16.msra.mxu0 %v6435_v8 }
 0x982   :  { %6440 = vmatprep.subr.bf16.mxu0 %v6439_v49 }
 0x985   :  { %6442 = vmatpush3.bf16.msra.mxu0 %v6439_v49 }
 0x986   :  { %6444 = vmatprep.subr.bf16.mxu0 %v6443_v36 }
 0x989   :  { %6446 = vmatpush3.bf16.msra.mxu0 %v6443_v36 }
 0x98a   :  { %6448 = vmatprep.subr.bf16.mxu0 %v6447_v26 }
 0x98d   :  { %6450 = vmatpush3.bf16.msra.mxu0 %v6447_v26 }
 0x98e   :  { %6452 = vmatprep.subr.bf16.mxu0 %v6451_v55 }
 0x991   :  { %6454 = vmatpush3.bf16.msra.mxu0 %v6451_v55 }
 0x994   :  { %4868 = vmatmul.mubr.f32.vlgmr.msra.gmra.mrb[32].mxu0 %v9172_v22 }
 0x995   :  { %4870 = vmatprep.mubr.f32.mxu0 %v9173_v24 }
 0x998   :  { %4871 = vmatmul.mubr.f32.gmra.mrb[34].mxu0 %v9174_v30 }
 0x999   :  { %4873 = vmatprep.mubr.f32.mxu0 %v9175_v32 }
 0x99c   :  { %4874 = vmatmul.mubr.f32.gmra.mrb[36].mxu0 %v8249_v23 }
 0x99d   :  { %4876 = vmatprep.mubr.f32.mxu0 %v8371_v14 }
 0xa47   :  { %v4430_v33 = vpop.f32.mrb[30].mxu0  ;;  %v4501_v50 = vpop.f32.mrb[32].mxu1 }
 0xa48   :  { %v4506_v27 = vadd.f32 %v4430_v33, %v9170_v42  ;;  %v4432_v25 = vpop.f32.mrb[31].mxu0  ;;  %v4503_v29 = vpop.f32.mrb[33].mxu1  ;;  %v4508_v37 = vadd.f32 %v4501_v50, %v8871_v6 }
 0xa49   :  { %v4507_v43 = vadd.f32 %v4432_v25, %v7618_v59  ;;  %v4509_v4 = vadd.f32 %v4503_v29, %v8870_v52  ;;  %v8423_v52 = vld [vmem:[%s8486_s8] ss:$0 sm:$0xff]  ;;  %s6992_s8 = smov [#allocation17]  }
 0xa4a   :  { %v4807_v62 = vmul.f32 -1.442695, %v4506_v27  ;;  %s4713_s23 = sshll.u32 %s6992_s8, 4  ;;  %s4714_s23 = int_to_ptr.vmem [resolvable:$true] %s4713_s23 }
 0xa4b   :  { %v4808_v39 = vmul.f32 -1.442695, %v4507_v43  ;;  %v4809_v47 = vmul.f32 -1.442695, %v4509_v4  ;;  %s6907_s4 = scalar_lea.vmem %s4714_s23, 256  ;;  %p6912_p5 = scmp.lt.s32.totalorder %s4714_s23, %s4714_s23 }
 0xa4c   :  { %6803 = vpow2.f32 %v4807_v62  ;;  %p6908_p4 = scmp.ne.s32.totalorder %s4714_s23, %s6907_s4  ;;  %p6913_p6 = scmp.lt.s32.totalorder %s6907_s4, %s6907_s4 }
 0xa4d   :  { %6805 = vpow2.f32 %v4808_v39 }
 0xa4e   :  { %6807 = vpow2.f32 %v4809_v47  ;;  %p6914_p7 = por %p6913_p6, %p6912_p5 }
 0xa4f   :  { %6809 = vtanh.f32 %v4508_v37 }
 0xa50   :  { %p6915_p8 = pnand %p6914_p7, %p6908_p4 }
 0xa56   :  { %v6804_v23 = vpop.eup %6803 }
 0xa57   :  { %v6806_v31 = vpop.eup %6805  ;;  %v4513_v15 = vadd.f32 1.0, %v6804_v23 }
 0xa58   :  { %v4519_v14 = vadd.f32 1.0, %v6806_v31  ;;  %v6808_v42 = vpop.eup %6807 }
 0xa59   :  { %6811 = vrcp.f32 %v4513_v15  ;;  %v6810_v34 = vpop.eup %6809  ;;  %v4526_v11 = vadd.f32 1.0, %v6808_v42 }
 0xa5a   :  { %6813 = vrcp.f32 %v4519_v14 }
 0xa5b   :  { %6815 = vrcp.f32 %v4526_v11 }
 0xa63   :  { %v6812_v59 = vpop.eup %6811 }
 0xa64   :  { %v6814_v19 = vpop.eup %6813  ;;  %v4530_v16 = vmul.f32 %v6812_v59, %v6810_v34 }
 0xa65   :  { %v4529_v21 = vmul.f32 %v6814_v19, %v8364_v40  ;;  %v6816_v44 = vpop.eup %6815 }
 0xa67   :  { %v4869_v6 = vpop.f32.mrb[32].mxu0  ;;  %v4531_v9 = vadd.f32 %v4530_v16, %v4529_v21 }
 0xa68   :  { %v4642_v61 = vadd.f32 %v4869_v6, %v8423_v52  ;;  %v4636_v5 = vpop.f32.mrb[33].mxu0 }
 0xa69   :  { %v4637_v2 = vadd.f32 %v8423_v52, %v4636_v5  ;;  %6817 = vtanh.f32 %v4531_v9  ;;  %4695 = vst [vmem:[#allocation19 + $0x8] sm:$0xff] %v4531_v9 }
 0xa6a   :  { %4676 = vst [vmem:[#allocation16 + $0x8] sm:$0xff] %v4642_v61 }
 0xa6b   :  { %4675 = vst [vmem:[#allocation16] sm:$0xff] %v4637_v2  ;;  %v4872_v1 = vpop.f32.mrb[34].mxu0 }
 0xa6c   :  { %v4652_v40 = vadd.f32 %v4872_v1, %v8423_v52  ;;  %v4646_v63 = vpop.f32.mrb[35].mxu0 }
 0xa6d   :  { %v4647_v20 = vadd.f32 %v8423_v52, %v4646_v63 }
 0xa6e   :  { %4678 = vst [vmem:[#allocation16 + $0x18] sm:$0xff] %v4652_v40 }
 0xa6f   :  { %4677 = vst [vmem:[#allocation16 + $0x10] sm:$0xff] %v4647_v20  ;;  %v4875_v10 = vpop.f32.mrb[36].mxu0 }
 0xa70   :  { %v4662_v13 = vadd.f32 %v4875_v10, %v8423_v52  ;;  %v4656_v3 = vpop.f32.mrb[37].mxu0 }
 0xa71   :  { %v4657_v51 = vadd.f32 %v8423_v52, %v4656_v3 }
 0xa72   :  { %4680 = vst [vmem:[#allocation16 + $0x28] sm:$0xff] %v4662_v13 }
 0xa73   :  { %v6818_v12 = vpop.eup %6817  ;;  %4679 = vst [vmem:[#allocation16 + $0x20] sm:$0xff] %v4657_v51 }
 0xa74   :  { %v4533_v7 = vmul.f32 %v6818_v12, %v6816_v44 }
 0xa76   :  { %4877 = vmatmul.mubr.f32.gmra.mrb[38].mxu0 %v4533_v7  ;;  %4690 = vst [vmem:[#allocation17 + $0x8] sm:$0xff] %v4533_v7 }
 0xa77   :  { %6918 = shalt.err (!%p6915_p8)
}
 0xa78   :  { %s6919_s26 = scalar_lea.hbm %s8488_s10, 256 }
 0xa79   :  { %p6920_p9 = scmp.ne.s32.totalorder %s8488_s10, %s6919_s26  ;;  %p6923_p10 = scmp.lt.u32.totalorder %s6919_s26, %s8488_s10 }
 0xa7b   :  { %p6925_p11 = pnand %p6923_p10, %p6920_p9 }
 0xa7d   :  { %6928 = shalt.err (!%p6925_p11)
}
 0xa7e   :  { %4719 = dma.vmem_to_hbm [thread:$0]  %s4714_s23, 256, %s8488_s10, [#allocation18], %s6989_s5, %s6989_s5, %s6990_s29  }
 0xa7f   :  { %s6993_s1 = smov [#allocation19]  }
 0xa80   :  { %s4725_s15 = sshll.u32 %s6993_s1, 4  ;;  %s4726_s15 = int_to_ptr.vmem [resolvable:$true] %s4725_s15 }
 0xa81   :  { %s6929_s7 = scalar_lea.vmem %s4726_s15, 256  ;;  %p6934_p13 = scmp.lt.s32.totalorder %s4726_s15, %s4726_s15 }
 0xa82   :  { %p6930_p12 = scmp.ne.s32.totalorder %s4726_s15, %s6929_s7  ;;  %p6935_p0 = scmp.lt.s32.totalorder %s6929_s7, %s6929_s7 }
 0xa84   :  { %p6936_p1 = por %p6935_p0, %p6934_p13 }
 0xa86   :  { %p6937_p2 = pnand %p6936_p1, %p6930_p12 }
 0xa88   :  { %6940 = shalt.err (!%p6937_p2)
}
 0xa89   :  { %s6941_s17 = scalar_lea.hbm %s8489_s11, 256 }
 0xa8a   :  { %p6942_p3 = scmp.ne.s32.totalorder %s8489_s11, %s6941_s17  ;;  %p6945_p4 = scmp.lt.u32.totalorder %s6941_s17, %s8489_s11 }
 0xa8c   :  { %p6947_p5 = pnand %p6945_p4, %p6942_p3 }
 0xa8e   :  { %6950 = shalt.err (!%p6947_p5)
}
 0xa8f   :  { %4731 = dma.vmem_to_hbm [thread:$0]  %s4726_s15, 256, %s8489_s11, [#allocation18], %s6989_s5, %s6989_s5, %s6990_s29  }
 0xa90   :  { %s6994_s21 = smov [#allocation16]  }
 0xa91   :  { %s4701_s6 = sshll.u32 %s6994_s21, 4  ;;  %s4702_s6 = int_to_ptr.vmem [resolvable:$true] %s4701_s6 }
 0xa92   :  { %s6951_s22 = scalar_lea.vmem %s4702_s6, 1024  ;;  %p6956_p7 = scmp.lt.s32.totalorder %s4702_s6, %s4702_s6 }
 0xa93   :  { %p6952_p6 = scmp.ne.s32.totalorder %s4702_s6, %s6951_s22  ;;  %p6957_p8 = scmp.lt.s32.totalorder %s6951_s22, %s6951_s22 }
 0xa95   :  { %p6958_p9 = por %p6957_p8, %p6956_p7 }
 0xa97   :  { %p6959_p10 = pnand %p6958_p9, %p6952_p6 }
 0xb49   :  { %v4878_v41 = vpop.f32.mrb[38].mxu0 }
 0xb4a   :  { %v4672_v28 = vadd.f32 %v4878_v41, %v8423_v52  ;;  %v4666_v45 = vpop.f32.mrb[39].mxu0 }
 0xb4b   :  { %v4667_v0 = vadd.f32 %v8423_v52, %v4666_v45 }
 0xb4c   :  { %4682 = vst [vmem:[#allocation16 + $0x38] sm:$0xff] %v4672_v28 }
 0xb4d   :  { %4681 = vst [vmem:[#allocation16 + $0x30] sm:$0xff] %v4667_v0 }
 0xb4e   :  { %6962 = shalt.err (!%p6959_p10)
}
 0xb4f   :  { %s6963_s23 = scalar_lea.hbm %s8487_s9, 1024 }
 0xb50   :  { %p6964_p11 = scmp.ne.s32.totalorder %s8487_s9, %s6963_s23  ;;  %p6967_p12 = scmp.lt.u32.totalorder %s6963_s23, %s8487_s9 }
 0xb52   :  { %p6969_p13 = pnand %p6967_p12, %p6964_p11 }
 0xb54   :  { %6972 = shalt.err (!%p6969_p13)
}
 0xb55   :  { %4707 = dma.vmem_to_hbm [thread:$0]  %s4702_s6, 1024, %s8487_s9, [#allocation10], %s6989_s5, %s6989_s5, %s6990_s29  }
 0xb56   :  { %6979 = dma.done.wait [#allocation10], 1024  }
 0xb57   :  { %6980 = vsyncadd [#allocation10], 4294966272 }
 0xb58   :  { %6981 = dma.done.wait [#allocation18], 512  }
 0xb59   :  { %6982 = vsyncadd [#allocation18], 4294966784 }
 0xb5a   :  { %4741 = vsyncpa [#allocation9], 1 }
 0xb5b   :  { %4742 = vsyncpa [#allocation12], 1 }
 0xb5c   :  { %4743 = vsyncpa [#allocation15], 1 }
 0xb5d   :  { %4744 = vsyncpa [#allocation10], 1 }
 0xb5e   :  { %4745 = vsyncpa [#allocation18], 1 }

// kernel: tpu_custom_call.1
= control target key start
LH: loop header
LB: loop body
LE: loop exit
PB: predicated region body
PF: predicated region fallthrough
CT: control target
= control target key end

     0   :  { %17 = vsyncpa [#allocation9], 0  ;;  %s8478_s0 = inlined_call_operand.vmem [shape: f32[1,64,16], index: 0, kind: input, shape index: {}]   ;;  %s8479_s1 = inlined_call_operand.vmem [shape: f32[16,512], index: 1, kind: input, shape index: {}]   ;;  %s8480_s2 = inlined_call_operand.hbm [shape: f32[128,512], index: 2, kind: input, shape index: {}]   ;;  %s8481_s3 = inlined_call_operand.vmem [shape: f32[1,512], index: 3, kind: input, shape index: {}]   ;;  %s8482_s4 = inlined_call_operand.hbm [shape: f32[128,512], index: 4, kind: input, shape index: {}]   ;;  %s8483_s5 = inlined_call_operand.hbm [shape: f32[128,512], index: 5, kind: input, shape index: {}]   ;;  %s8484_s6 = inlined_call_operand.vmem [shape: f32[1,512], index: 6, kind: input, shape index: {}]   ;;  %s8485_s7 = inlined_call_operand.hbm [shape: f32[128,128], index: 7, kind: input, shape index: {}]   ;;  %s8486_s8 = inlined_call_operand.vmem [shape: f32[1,128], index: 8, kind: input, shape index: {}]   ;;  %s8487_s9 = inlined_call_operand.hbm [shape: f32[1,64,128], index: 9, kind: output, shape index: {0}]   ;;  %s8488_s10 = inlined_call_operand.hbm [shape: f32[2,8,128], index: 10, kind: output, shape index: {1}]   ;;  %s8489_s11 = inlined_call_operand.hbm [shape: f32[2,8,128], index: 11, kind: output, shape index: {2}]  }
   0x1   :  { %18 = vsyncpa [#allocation12], 0 }
   0x2   :  { %19 = vsyncpa [#allocation15], 0 }
   0x3   :  { %20 = vsyncpa [#allocation10], 0 }
   0x4   :  { %21 = vsyncpa [#allocation18], 0  ;;  %s6983_s17 = smov [#allocation11]   ;;  %s6984_s19 = smov [#allocation8]  }
   0x5   :  { %s45_s18 = sshll.u32 %s6983_s17, 4  ;;  %s31_s20 = sshll.u32 %s6984_s19, 4  ;;  %s46_s18 = int_to_ptr.vmem [resolvable:$true] %s45_s18  ;;  %s7055_s20 = int_to_ptr.vmem [resolvable:$true] %s31_s20 }
   0x6   :  { %s6819_s23 = scalar_lea.hbm %s8482_s4, 8192 }
   0x7   :  { %p6820_p0 = scmp.ne.s32.totalorder %s8482_s4, %s6819_s23  ;;  %p6823_p1 = scmp.lt.u32.totalorder %s6819_s23, %s8482_s4 }
   0x9   :  { %p6825_p2 = pnand %p6823_p1, %p6820_p0 }
   0xb   :  { %6828 = shalt.err (!%p6825_p2)
}
   0xc   :  { %s6829_s28 = scalar_lea.vmem %s46_s18, 8192  ;;  %p6834_p4 = scmp.lt.s32.totalorder %s46_s18, %s46_s18 }
   0xd   :  { %p6830_p3 = scmp.ne.s32.totalorder %s46_s18, %s6829_s28  ;;  %p6835_p5 = scmp.lt.s32.totalorder %s6829_s28, %s6829_s28 }
   0xf   :  { %p6836_p6 = por %p6835_p5, %p6834_p4 }
  0x11   :  { %p6837_p7 = pnand %p6836_p6, %p6830_p3 }
  0x13   :  { %6840 = shalt.err (!%p6837_p7)
}
  0x14   :  { %s6985_s29 = smov 512   ;;  %s6986_s30 = smov 32  }
  0x15   :  { %51 = dma.hbm_to_vmem [thread:$0]  %s8482_s4, 8192, %s46_s18, [#allocation12], %s6985_s29, %s6985_s29, %s6986_s30  }
  0x16   :  { %s6841_s16 = scalar_lea.hbm %s8480_s2, 8192 }
  0x17   :  { %p6842_p8 = scmp.ne.s32.totalorder %s8480_s2, %s6841_s16  ;;  %p6845_p9 = scmp.lt.u32.totalorder %s6841_s16, %s8480_s2 }
  0x19   :  { %p6847_p10 = pnand %p6845_p9, %p6842_p8 }
  0x1b   :  { %6850 = shalt.err (!%p6847_p10)
}
  0x1c   :  { %s6851_s23 = scalar_lea.vmem %s7055_s20, 8192  ;;  %p6856_p12 = scmp.lt.s32.totalorder %s7055_s20, %s7055_s20 }
  0x1d   :  { %p6852_p11 = scmp.ne.s32.totalorder %s7055_s20, %s6851_s23  ;;  %p6857_p13 = scmp.lt.s32.totalorder %s6851_s23, %s6851_s23 }
  0x1f   :  { %p6858_p0 = por %p6857_p13, %p6856_p12 }
  0x21   :  { %p6859_p1 = pnand %p6858_p0, %p6852_p11 }
  0x23   :  { %6862 = shalt.err (!%p6859_p1)
}
  0x24   :  { %37 = dma.hbm_to_vmem [thread:$0]  %s8480_s2, 8192, %s7055_s20, [#allocation9], %s6985_s29, %s6985_s29, %s6986_s30  }
  0x25   :  { %s6987_s24 = smov [#allocation13]   ;;  %s6988_s26 = smov [#allocation14]  }
  0x26   :  { %s57_s25 = sshll.u32 %s6987_s24, 4  ;;  %s71_s27 = sshll.u32 %s6988_s26, 4  ;;  %s58_s25 = int_to_ptr.vmem [resolvable:$true] %s57_s25  ;;  %s7092_s27 = int_to_ptr.vmem [resolvable:$true] %s71_s27 }
  0x27   :  { %s6863_s13 = scalar_lea.hbm %s8483_s5, 8192 }
  0x28   :  { %p6864_p2 = scmp.ne.s32.totalorder %s8483_s5, %s6863_s13  ;;  %p6867_p3 = scmp.lt.u32.totalorder %s6863_s13, %s8483_s5 }
  0x2a   :  { %p6869_p4 = pnand %p6867_p3, %p6864_p2 }
  0x2c   :  { %6872 = shalt.err (!%p6869_p4)
}
  0x2d   :  { %s6873_s2 = scalar_lea.vmem %s58_s25, 8192  ;;  %p6878_p6 = scmp.lt.s32.totalorder %s58_s25, %s58_s25 }
  0x2e   :  { %p6874_p5 = scmp.ne.s32.totalorder %s58_s25, %s6873_s2  ;;  %p6879_p7 = scmp.lt.s32.totalorder %s6873_s2, %s6873_s2 }
  0x30   :  { %p6880_p8 = por %p6879_p7, %p6878_p6 }
  0x32   :  { %p6881_p9 = pnand %p6880_p8, %p6874_p5 }
  0x34   :  { %6884 = shalt.err (!%p6881_p9)
}
  0x35   :  { %63 = dma.hbm_to_vmem [thread:$0]  %s8483_s5, 8192, %s58_s25, [#allocation12], %s6985_s29, %s6985_s29, %s6986_s30  }
  0x36   :  { %s6885_s23 = scalar_lea.hbm %s8485_s7, 2048 }
  0x37   :  { %p6886_p10 = scmp.ne.s32.totalorder %s8485_s7, %s6885_s23  ;;  %p6889_p11 = scmp.lt.u32.totalorder %s6885_s23, %s8485_s7 }
  0x39   :  { %p6891_p12 = pnand %p6889_p11, %p6886_p10 }
  0x3b   :  { %6894 = shalt.err (!%p6891_p12)
}
  0x3c   :  { %s6895_s28 = scalar_lea.vmem %s7092_s27, 2048  ;;  %p6900_p0 = scmp.lt.s32.totalorder %s7092_s27, %s7092_s27 }
  0x3d   :  { %p6896_p13 = scmp.ne.s32.totalorder %s7092_s27, %s6895_s28  ;;  %p6901_p1 = scmp.lt.s32.totalorder %s6895_s28, %s6895_s28 }
  0x3f   :  { %p6902_p2 = por %p6901_p1, %p6900_p0 }
  0x41   :  { %p6903_p3 = pnand %p6902_p2, %p6896_p13 }
  0x43   :  { %6906 = shalt.err (!%p6903_p3)
}
  0x44   :  { %s6989_s5 = smov 128   ;;  %s6990_s29 = smov 8  }
  0x45   :  { %77 = dma.hbm_to_vmem [thread:$0]  %s8485_s7, 2048, %s7092_s27, [#allocation15], %s6989_s5, %s6989_s5, %s6990_s29  }
  0x46   :  { %6973 = dma.done.wait [#allocation9], 8192  }
  0x47   :  { %6974 = vsyncadd [#allocation9], 4294959104 }
  0x48   :  { %6975 = dma.done.wait [#allocation12], 16384  }
  0x49   :  { %6976 = vsyncadd [#allocation12], 4294950912 }
  0x4a   :  { %6977 = dma.done.wait [#allocation15], 2048  }
  0x4b   :  { %6978 = vsyncadd [#allocation15], 4294965248  ;;  %v8490_v0 = vmov 0.0   ;;  %v111_v1 = vld [vmem:[%s8479_s1 + $0x18] sm:$0xff]  ;;  %v110_v3 = vld [vmem:[%s8479_s1 + $0x10] sm:$0xff]  ;;  %vm138_vm0 = vcmask 130048  }
  0x4c   :  { %340 = vmatprep.mubr.f32.mxu1 %v8490_v0  ;;  %227 = vmatprep.mubr.f32.mxu0 %v8490_v0  ;;  %v115_v2 = vld [vmem:[%s8479_s1 + $0x38] sm:$0xff]  ;;  %v114_v5 = vld [vmem:[%s8479_s1 + $0x30] sm:$0xff]  ;;  %v422_v6 = vld [vmem:[#allocation8 + $0x8] sm:$0xff] }
  0x4d   :  { %v4883_v4 = vpack.c.bf16 %v115_v2, %v111_v1  ;;  %v4885_v7 = vpack.c.bf16 %v114_v5, %v110_v3  ;;  %v426_v8 = vld [vmem:[#allocation8 + $0x28] sm:$0xff]  ;;  %v421_v9 = vld [vmem:[#allocation8] sm:$0xff]  ;;  %v102_v28 = vld [vmem:[%s8478_s0 + $0x10] sm:$0xff] }
  0x4e   :  { %v425_v10 = vld [vmem:[#allocation8 + $0x20] sm:$0xff]  ;;  %v7143_v11 = vpack.c.bf16 %v426_v8, %v422_v6  ;;  %v430_v12 = vld [vmem:[#allocation8 + $0x48] sm:$0xff]  ;;  %v103_v41 = vld [vmem:[%s8478_s0 + $0x18] sm:$0xff] }
  0x4f   :  { %4884 = vmatprep.subr.bf16.mxu1 %v4883_v4  ;;  %v434_v13 = vld [vmem:[#allocation8 + $0x68] sm:$0xff]  ;;  %v100_v14 = vld [vmem:[%s8478_s0] sm:$0xff]  ;;  %v7148_v15 = vpack.c.bf16 %v425_v10, %v421_v9  ;;  %v106_v62 = vld [vmem:[%s8478_s0 + $0x30] sm:$0xff] }
  0x50   :  { %8691 = vst [vmem:[#allocation25_spill] sm:$0xff] %v7143_v11  ;;  %4886 = vmatpush1.bf16.msra.mxu1 %v4885_v7  ;;  %v7151_v16 = vpack.c.bf16 %v434_v13, %v430_v12  ;;  %v429_v17 = vld [vmem:[#allocation8 + $0x40] sm:$0xff]  ;;  %v438_v19 = vld [vmem:[#allocation8 + $0x88] sm:$0xff]  ;;  %v424_v4 = vld [vmem:[#allocation8 + $0x18] sm:$0xff] }
  0x51   :  { %4888 = vmatprep.subr.bf16.mxu1 %v7143_v11  ;;  %v433_v18 = vld [vmem:[#allocation8 + $0x60] sm:$0xff]  ;;  %v442_v20 = vld [vmem:[#allocation8 + $0xa8] sm:$0xff]  ;;  %v428_v5 = vld [vmem:[#allocation8 + $0x38] sm:$0xff] }
  0x52   :  { %v101_v21 = vld [vmem:[%s8478_s0 + $0x8] sm:$0xff]  ;;  %v7159_v22 = vpack.c.bf16 %v433_v18, %v429_v17  ;;  %v7162_v23 = vpack.c.bf16 %v442_v20, %v438_v19  ;;  %v437_v24 = vld [vmem:[#allocation8 + $0x80] sm:$0xff]  ;;  %v107_v6 = vld [vmem:[%s8478_s0 + $0x38] sm:$0xff]  ;;  %v7246_v8 = vpack.c.bf16 %v428_v5, %v424_v4 }
  0x53   :  { %4754 = vmatmul.mubr.msk.f32.vlgmr.msra.gmra.mrb[0].mxu1 %vm138_vm0, %v100_v14  ;;  %v441_v25 = vld [vmem:[#allocation8 + $0xa0] sm:$0xff]  ;;  %v446_v26 = vld [vmem:[#allocation8 + $0xc8] sm:$0xff]  ;;  %v423_v9 = vld [vmem:[#allocation8 + $0x10] sm:$0xff] }
  0x54   :  { %4890 = vmatpush1.bf16.msra.mxu1 %v7148_v15  ;;  %346 = vmatprep.mubr.f32.mxu1 %v8490_v0  ;;  %8692 = vst [vmem:[#allocation26_spill] sm:$0xff] %v7162_v23  ;;  %v450_v27 = vld [vmem:[#allocation8 + $0xe8] sm:$0xff]  ;;  %v7170_v29 = vpack.c.bf16 %v441_v25, %v437_v24  ;;  %v445_v30 = vld [vmem:[#allocation8 + $0xc0] sm:$0xff]  ;;  %8704 = vst [vmem:[#allocation38_spill] sm:$0xff] %v7246_v8 }
  0x55   :  { %4892 = vmatprep.subr.bf16.mxu1 %v7151_v16  ;;  %v449_v31 = vld [vmem:[#allocation8 + $0xe0] sm:$0xff]  ;;  %v7173_v32 = vpack.c.bf16 %v450_v27, %v446_v26  ;;  %v109_v33 = vld [vmem:[%s8479_s1 + $0x8] sm:$0xff]  ;;  %v427_v10 = vld [vmem:[#allocation8 + $0x30] sm:$0xff] }
  0x56   :  { %8693 = vst [vmem:[#allocation27_spill] sm:$0xff] %v7170_v29  ;;  %v113_v34 = vld [vmem:[%s8479_s1 + $0x28] sm:$0xff]  ;;  %v108_v35 = vld [vmem:[%s8479_s1] sm:$0xff]  ;;  %v7193_v42 = vpack.c.bf16 %v449_v31, %v445_v30  ;;  %v432_v12 = vld [vmem:[#allocation8 + $0x58] sm:$0xff] }
  0x57   :  { %4755 = vmatmul.mubr.msk.f32.gmra.mrb[2].mxu1 %vm138_vm0, %v101_v21  ;;  %8694 = vst [vmem:[#allocation28_spill] sm:$0xff] %v7173_v32  ;;  %v454_v36 = vld [vmem:[#allocation8 + $0x108] sm:$0xff]  ;;  %v4879_v38 = vpack.c.bf16 %v113_v34, %v109_v33  ;;  %v112_v39 = vld [vmem:[%s8479_s1 + $0x20] sm:$0xff]  ;;  %v436_v13 = vld [vmem:[#allocation8 + $0x78] sm:$0xff] }
  0x58   :  { %4894 = vmatpush1.bf16.msra.mxu1 %v7159_v22  ;;  %352 = vmatprep.mubr.f32.mxu1 %v8490_v0  ;;  %v458_v37 = vld [vmem:[#allocation8 + $0x128] sm:$0xff]  ;;  %v4881_v40 = vpack.c.bf16 %v112_v39, %v108_v35  ;;  %8695 = vst [vmem:[#allocation29_spill] sm:$0xff] %v7193_v42  ;;  %v453_v44 = vld [vmem:[#allocation8 + $0x100] sm:$0xff]  ;;  %v7256_v17 = vpack.c.bf16 %v436_v13, %v432_v12  ;;  %v431_v18 = vld [vmem:[#allocation8 + $0x50] sm:$0xff] }
  0x59   :  { %4896 = vmatprep.subr.bf16.mxu1 %v7162_v23  ;;  %v7196_v43 = vpack.c.bf16 %v458_v37, %v454_v36  ;;  %v457_v45 = vld [vmem:[#allocation8 + $0x120] sm:$0xff]  ;;  %4880 = vmatprep.subr.bf16.mxu0 %v4879_v38  ;;  %v462_v46 = vld [vmem:[#allocation8 + $0x148] sm:$0xff]  ;;  %v435_v19 = vld [vmem:[#allocation8 + $0x70] sm:$0xff] }
  0x5a   :  { %v466_v47 = vld [vmem:[#allocation8 + $0x168] sm:$0xff]  ;;  %4882 = vmatpush1.bf16.msra.mxu0 %v4881_v40  ;;  %v104_v48 = vld [vmem:[%s8478_s0 + $0x20] sm:$0xff]  ;;  %v7204_v49 = vpack.c.bf16 %v457_v45, %v453_v44  ;;  %v440_v20 = vld [vmem:[#allocation8 + $0x98] sm:$0xff]  ;;  %v7262_v24 = vpack.c.bf16 %v435_v19, %v431_v18 }
  0x5b   :  { %4756 = vmatmul.mubr.msk.f32.gmra.mrb[4].mxu1 %vm138_vm0, %v102_v28  ;;  %8696 = vst [vmem:[#allocation30_spill] sm:$0xff] %v7196_v43  ;;  %v7207_v50 = vpack.c.bf16 %v466_v47, %v462_v46  ;;  %v461_v51 = vld [vmem:[#allocation8 + $0x140] sm:$0xff]  ;;  %v470_v53 = vld [vmem:[#allocation8 + $0x188] sm:$0xff]  ;;  %v439_v26 = vld [vmem:[#allocation8 + $0x90] sm:$0xff] }
  0x5c   :  { %4898 = vmatpush1.bf16.msra.mxu1 %v7170_v29  ;;  %358 = vmatprep.mubr.f32.mxu1 %v8490_v0  ;;  %8697 = vst [vmem:[#allocation31_spill] sm:$0xff] %v7204_v49  ;;  %v465_v52 = vld [vmem:[#allocation8 + $0x160] sm:$0xff]  ;;  %v474_v54 = vld [vmem:[#allocation8 + $0x1a8] sm:$0xff]  ;;  %v443_v27 = vld [vmem:[#allocation8 + $0xb0] sm:$0xff] }
  0x5d   :  { %4900 = vmatprep.subr.bf16.mxu1 %v7173_v32  ;;  %8698 = vst [vmem:[#allocation32_spill] sm:$0xff] %v7207_v50  ;;  %4746 = vmatmul.mubr.msk.f32.vlgmr.msra.gmra.mrb[0].mxu0 %vm138_vm0, %v100_v14  ;;  %v105_v55 = vld [vmem:[%s8478_s0 + $0x28] sm:$0xff]  ;;  %v7217_v56 = vpack.c.bf16 %v465_v52, %v461_v51  ;;  %v7220_v57 = vpack.c.bf16 %v474_v54, %v470_v53  ;;  %v469_v58 = vld [vmem:[#allocation8 + $0x180] sm:$0xff]  ;;  %v452_v30 = vld [vmem:[#allocation8 + $0xf8] sm:$0xff] }
  0x5e   :  { %233 = vmatprep.mubr.f32.mxu0 %v8490_v0  ;;  %v473_v59 = vld [vmem:[#allocation8 + $0x1a0] sm:$0xff]  ;;  %v478_v60 = vld [vmem:[#allocation8 + $0x1c8] sm:$0xff]  ;;  %v7253_v14 = vpack.c.bf16 %v427_v10, %v423_v9  ;;  %v7271_v31 = vpack.c.bf16 %v443_v27, %v439_v26  ;;  %v447_v34 = vld [vmem:[#allocation8 + $0xd0] sm:$0xff] }
  0x5f   :  { %4757 = vmatmul.mubr.msk.f32.gmra.mrb[6].mxu1 %vm138_vm0, %v103_v41  ;;  %8699 = vst [vmem:[#allocation33_spill] sm:$0xff] %v7217_v56  ;;  %8700 = vst [vmem:[#allocation34_spill] sm:$0xff] %v7220_v57  ;;  %v482_v61 = vld [vmem:[#allocation8 + $0x1e8] sm:$0xff]  ;;  %v7230_v63 = vpack.c.bf16 %v473_v59, %v469_v58  ;;  %v477_v2 = vld [vmem:[#allocation8 + $0x1c0] sm:$0xff] }
  0x60   :  { %4902 = vmatpush1.bf16.msra.mxu1 %v7193_v42  ;;  %364 = vmatprep.mubr.f32.mxu1 %v8490_v0  ;;  %v7233_v1 = vpack.c.bf16 %v482_v61, %v478_v60  ;;  %v481_v3 = vld [vmem:[#allocation8 + $0x1e0] sm:$0xff]  ;;  %8706 = vst [vmem:[#allocation40_spill] sm:$0xff] %v7271_v31  ;;  %v451_v35 = vld [vmem:[#allocation8 + $0xf0] sm:$0xff]  ;;  %v456_v36 = vld [vmem:[#allocation8 + $0x118] sm:$0xff] }
  0x61   :  { %4904 = vmatprep.subr.bf16.mxu1 %v7196_v43  ;;  %4747 = vmatmul.mubr.msk.f32.gmra.mrb[2].mxu0 %vm138_vm0, %v101_v21  ;;  %8701 = vst [vmem:[#allocation35_spill] sm:$0xff] %v7230_v63  ;;  %v7243_v7 = vpack.c.bf16 %v481_v3, %v477_v2  ;;  %v444_v21 = vld [vmem:[#allocation8 + $0xb8] sm:$0xff]  ;;  %v7279_v38 = vpack.c.bf16 %v451_v35, %v447_v34  ;;  %v455_v40 = vld [vmem:[#allocation8 + $0x110] sm:$0xff]  ;;  %v554_v9 = vld [vmem:[#allocation13 + $0x28] sm:$0xff] }
  0x62   :  { %239 = vmatprep.mubr.f32.mxu0 %v8490_v0  ;;  %8702 = vst [vmem:[#allocation36_spill] sm:$0xff] %v7233_v1  ;;  %v7266_v25 = vpack.c.bf16 %v444_v21, %v440_v20  ;;  %v460_v37 = vld [vmem:[#allocation8 + $0x138] sm:$0xff]  ;;  %v467_v51 = vld [vmem:[#allocation8 + $0x170] sm:$0xff]  ;;  %v549_v19 = vld [vmem:[#allocation13] sm:$0xff] }
  0x63   :  { %4758 = vmatmul.mubr.msk.f32.gmra.mrb[8].mxu1 %vm138_vm0, %v104_v48  ;;  %8703 = vst [vmem:[#allocation37_spill] sm:$0xff] %v7243_v7  ;;  %8708 = vst [vmem:[#allocation42_spill] sm:$0xff] %v7279_v38  ;;  %v7282_v39 = vpack.c.bf16 %v460_v37, %v456_v36  ;;  %v464_v44 = vld [vmem:[#allocation8 + $0x158] sm:$0xff]  ;;  %v471_v58 = vld [vmem:[#allocation8 + $0x190] sm:$0xff] }
  0x64   :  { %4906 = vmatpush1.bf16.msra.mxu1 %v7204_v49  ;;  %370 = vmatprep.mubr.f32.mxu1 %v8490_v0  ;;  %8705 = vst [vmem:[#allocation39_spill] sm:$0xff] %v7266_v25  ;;  %v468_v45 = vld [vmem:[#allocation8 + $0x178] sm:$0xff]  ;;  %v475_v59 = vld [vmem:[#allocation8 + $0x1b0] sm:$0xff]  ;;  %v553_v20 = vld [vmem:[#allocation13 + $0x20] sm:$0xff] }
  0x65   :  { %4908 = vmatprep.subr.bf16.mxu1 %v7207_v50  ;;  %4748 = vmatmul.mubr.msk.f32.gmra.mrb[4].mxu0 %vm138_vm0, %v102_v28  ;;  %v448_v28 = vld [vmem:[#allocation8 + $0xd8] sm:$0xff]  ;;  %8709 = vst [vmem:[#allocation43_spill] sm:$0xff] %v7282_v39  ;;  %v7290_v47 = vpack.c.bf16 %v468_v45, %v464_v44  ;;  %v479_v3 = vld [vmem:[#allocation8 + $0x1d0] sm:$0xff]  ;;  %v7317_v26 = vpack.c.bf16 %v553_v20, %v549_v19  ;;  %v562_v34 = vld [vmem:[#allocation13 + $0x68] sm:$0xff] }
  0x66   :  { %245 = vmatprep.mubr.f32.mxu0 %v8490_v0  ;;  %v7274_v33 = vpack.c.bf16 %v452_v30, %v448_v28  ;;  %v472_v52 = vld [vmem:[#allocation8 + $0x198] sm:$0xff]  ;;  %v483_v4 = vld [vmem:[#allocation8 + $0x1f0] sm:$0xff]  ;;  %v558_v30 = vld [vmem:[#allocation13 + $0x48] sm:$0xff] }
  0x67   :  { %4759 = vmatmul.mubr.msk.f32.gmra.mrb[10].mxu1 %vm138_vm0, %v105_v55  ;;  %8711 = vst [vmem:[#allocation45_spill] sm:$0xff] %v7290_v47  ;;  %v476_v53 = vld [vmem:[#allocation8 + $0x1b8] sm:$0xff]  ;;  %v7305_v5 = vpack.c.bf16 %v483_v4, %v479_v3  ;;  %v551_v21 = vld [vmem:[#allocation13 + $0x10] sm:$0xff]  ;;  %8719 = vst [vmem:[#allocation53_spill] sm:$0xff] %v7317_v26  ;;  %v7323_v36 = vpack.c.bf16 %v562_v34, %v558_v30 }
  0x68   :  { %4910 = vmatpush1.bf16.msra.mxu1 %v7217_v56  ;;  %376 = vmatprep.mubr.f32.mxu1 %v8490_v0  ;;  %8707 = vst [vmem:[#allocation41_spill] sm:$0xff] %v7274_v33  ;;  %v480_v60 = vld [vmem:[#allocation8 + $0x1d8] sm:$0xff]  ;;  %v555_v27 = vld [vmem:[#allocation13 + $0x30] sm:$0xff]  ;;  %v565_v3 = vld [vmem:[#allocation13 + $0x80] sm:$0xff] }
  0x69   :  { %4912 = vmatprep.subr.bf16.mxu1 %v7220_v57  ;;  %4749 = vmatmul.mubr.msk.f32.gmra.mrb[6].mxu0 %vm138_vm0, %v103_v41  ;;  %v459_v41 = vld [vmem:[#allocation8 + $0x130] sm:$0xff]  ;;  %v484_v61 = vld [vmem:[#allocation8 + $0x1f8] sm:$0xff]  ;;  %8716 = vst [vmem:[#allocation50_spill] sm:$0xff] %v7305_v5  ;;  %v7319_v28 = vpack.c.bf16 %v555_v27, %v551_v21  ;;  %8721 = vst [vmem:[#allocation55_spill] sm:$0xff] %v7323_v36 }
  0x6a   :  { %251 = vmatprep.mubr.f32.mxu0 %v8490_v0  ;;  %v7287_v46 = vpack.c.bf16 %v459_v41, %v455_v40  ;;  %v7302_v2 = vpack.c.bf16 %v484_v61, %v480_v60  ;;  %v552_v10 = vld [vmem:[#allocation13 + $0x18] sm:$0xff]  ;;  %v557_v40 = vld [vmem:[#allocation13 + $0x40] sm:$0xff]  ;;  %v574_v20 = vld [vmem:[#allocation13 + $0xc8] sm:$0xff] }
  0x6b   :  { %4760 = vmatmul.mubr.msk.f32.gmra.mrb[12].mxu1 %vm138_vm0, %v106_v62  ;;  %v556_v13 = vld [vmem:[#allocation13 + $0x38] sm:$0xff]  ;;  %8720 = vst [vmem:[#allocation54_spill] sm:$0xff] %v7319_v28  ;;  %v561_v41 = vld [vmem:[#allocation13 + $0x60] sm:$0xff]  ;;  %v578_v21 = vld [vmem:[#allocation13 + $0xe8] sm:$0xff] }
  0x6c   :  { %4914 = vmatpush1.bf16.msra.mxu1 %v7230_v63  ;;  %382 = vmatprep.mubr.f32.mxu1 %v8490_v0  ;;  %8710 = vst [vmem:[#allocation44_spill] sm:$0xff] %v7287_v46  ;;  %8715 = vst [vmem:[#allocation49_spill] sm:$0xff] %v7302_v2  ;;  %v7313_v18 = vpack.c.bf16 %v556_v13, %v552_v10  ;;  %v560_v35 = vld [vmem:[#allocation13 + $0x58] sm:$0xff]  ;;  %v7327_v45 = vpack.c.bf16 %v561_v41, %v557_v40  ;;  %v569_v4 = vld [vmem:[#allocation13 + $0xa0] sm:$0xff] }
  0x6d   :  { %4916 = vmatprep.subr.bf16.mxu1 %v7233_v1  ;;  %4750 = vmatmul.mubr.msk.f32.gmra.mrb[8].mxu0 %vm138_vm0, %v104_v48  ;;  %v463_v48 = vld [vmem:[#allocation8 + $0x150] sm:$0xff]  ;;  %v564_v37 = vld [vmem:[#allocation13 + $0x78] sm:$0xff]  ;;  %v7347_v30 = vpack.c.bf16 %v578_v21, %v574_v20 }
  0x6e   :  { %257 = vmatprep.mubr.f32.mxu0 %v8490_v0  ;;  %v7293_v54 = vpack.c.bf16 %v467_v51, %v463_v48  ;;  %8718 = vst [vmem:[#allocation52_spill] sm:$0xff] %v7313_v18  ;;  %v7325_v44 = vpack.c.bf16 %v564_v37, %v560_v35  ;;  %8723 = vst [vmem:[#allocation57_spill] sm:$0xff] %v7327_v45  ;;  %v559_v48 = vld [vmem:[#allocation13 + $0x50] sm:$0xff]  ;;  %v572_v61 = vld [vmem:[#allocation13 + $0xb8] sm:$0xff] }
  0x6f   :  { %4761 = vmatmul.mubr.msk.f32.gmra.mrb[14].mxu1 %vm138_vm0, %v107_v6  ;;  %v563_v51 = vld [vmem:[#allocation13 + $0x70] sm:$0xff]  ;;  %v576_v27 = vld [vmem:[#allocation13 + $0xd8] sm:$0xff]  ;;  %8729 = vst [vmem:[#allocation63_spill] sm:$0xff] %v7347_v30  ;;  %v573_v35 = vld [vmem:[#allocation13 + $0xc0] sm:$0xff] }
  0x70   :  { %4918 = vmatpush1.bf16.msra.mxu1 %v7243_v7  ;;  %707 = vmatprep.mubr.f32.mxu1 %v8490_v0  ;;  %8712 = vst [vmem:[#allocation46_spill] sm:$0xff] %v7293_v54  ;;  %8722 = vst [vmem:[#allocation56_spill] sm:$0xff] %v7325_v44  ;;  %v567_v10 = vld [vmem:[#allocation13 + $0x90] sm:$0xff]  ;;  %v580_v34 = vld [vmem:[#allocation13 + $0xf8] sm:$0xff] }
  0x71   :  { %4920 = vmatprep.subr.bf16.mxu1 %v7246_v8  ;;  %4751 = vmatmul.mubr.msk.f32.gmra.mrb[10].mxu0 %vm138_vm0, %v105_v55  ;;  %v7296_v55 = vpack.c.bf16 %v476_v53, %v472_v52  ;;  %v7330_v52 = vpack.c.bf16 %v563_v51, %v559_v48  ;;  %v566_v53 = vld [vmem:[#allocation13 + $0x88] sm:$0xff]  ;;  %v571_v13 = vld [vmem:[#allocation13 + $0xb0] sm:$0xff]  ;;  %v577_v37 = vld [vmem:[#allocation13 + $0xe0] sm:$0xff]  ;;  %v7349_v40 = vpack.c.bf16 %v580_v34, %v576_v27 }
  0x72   :  { %263 = vmatprep.mubr.f32.mxu0 %v8490_v0  ;;  %v7342_v19 = vpack.c.bf16 %v571_v13, %v567_v10  ;;  %v7351_v41 = vpack.c.bf16 %v577_v37, %v573_v35  ;;  %v575_v48 = vld [vmem:[#allocation13 + $0xd0] sm:$0xff]  ;;  %v581_v10 = vld [vmem:[#allocation13 + $0x100] sm:$0xff]  ;;  %v590_v37 = vld [vmem:[#allocation13 + $0x148] sm:$0xff] }
  0x73   :  { %708 = vmatmul.mubr.f32.vlgmr.msra.gmra.mrb[16].mxu1 %v8490_v0  ;;  %8713 = vst [vmem:[#allocation47_spill] sm:$0xff] %v7296_v55  ;;  %8724 = vst [vmem:[#allocation58_spill] sm:$0xff] %v7330_v52  ;;  %v579_v51 = vld [vmem:[#allocation13 + $0xf0] sm:$0xff]  ;;  %v585_v13 = vld [vmem:[#allocation13 + $0x120] sm:$0xff] }
  0x74   :  { %4922 = vmatpush1.bf16.msra.mxu1 %v7253_v14  ;;  %778 = vmatprep.mubr.f32.mxu1 %v8490_v0  ;;  %8728 = vst [vmem:[#allocation62_spill] sm:$0xff] %v7342_v19  ;;  %8730 = vst [vmem:[#allocation64_spill] sm:$0xff] %v7349_v40  ;;  %v7363_v21 = vpack.c.bf16 %v585_v13, %v581_v10  ;;  %v583_v27 = vld [vmem:[#allocation13 + $0x110] sm:$0xff] }
  0x75   :  { %4924 = vmatprep.subr.bf16.mxu1 %v7256_v17  ;;  %4752 = vmatmul.mubr.msk.f32.gmra.mrb[12].mxu0 %vm138_vm0, %v106_v62  ;;  %v7299_v62 = vpack.c.bf16 %v475_v59, %v471_v58  ;;  %v570_v58 = vld [vmem:[#allocation13 + $0xa8] sm:$0xff]  ;;  %v568_v59 = vld [vmem:[#allocation13 + $0x98] sm:$0xff]  ;;  %8731 = vst [vmem:[#allocation65_spill] sm:$0xff] %v7351_v41  ;;  %v587_v34 = vld [vmem:[#allocation13 + $0x130] sm:$0xff] }
  0x76   :  { %269 = vmatprep.mubr.f32.mxu0 %v8490_v0  ;;  %v7335_v60 = vpack.c.bf16 %v570_v58, %v566_v53  ;;  %v7354_v53 = vpack.c.bf16 %v579_v51, %v575_v48  ;;  %v582_v58 = vld [vmem:[#allocation13 + $0x108] sm:$0xff]  ;;  %8735 = vst [vmem:[#allocation69_spill] sm:$0xff] %v7363_v21  ;;  %v7366_v35 = vpack.c.bf16 %v587_v34, %v583_v27  ;;  %v592_v51 = vld [vmem:[#allocation13 + $0x158] sm:$0xff]  ;;  %v591_v27 = vld [vmem:[#allocation13 + $0x150] sm:$0xff] }
  0x77   :  { %8714 = vst [vmem:[#allocation48_spill] sm:$0xff] %v7299_v62  ;;  %v594_v48 = vld [vmem:[#allocation13 + $0x168] sm:$0xff]  ;;  %v595_v34 = vld [vmem:[#allocation13 + $0x170] sm:$0xff] }
  0x78   :  { %4926 = vmatpush1.bf16.msra.mxu1 %v7262_v24  ;;  %8725 = vst [vmem:[#allocation59_spill] sm:$0xff] %v7335_v60  ;;  %8732 = vst [vmem:[#allocation66_spill] sm:$0xff] %v7354_v53 }
  0x79   :  { %4928 = vmatprep.subr.bf16.mxu1 %v7266_v25  ;;  %4753 = vmatmul.mubr.msk.f32.gmra.mrb[14].mxu0 %vm138_vm0, %v107_v6  ;;  %v550_v6 = vld [vmem:[#allocation13 + $0x8] sm:$0xff]  ;;  %8736 = vst [vmem:[#allocation70_spill] sm:$0xff] %v7366_v35 }
  0x7a   :  { %877 = vmatprep.mubr.f32.mxu0 %v8490_v0  ;;  %v7311_v12 = vpack.c.bf16 %v554_v9, %v550_v6  ;;  %v7337_v6 = vpack.c.bf16 %v572_v61, %v568_v59  ;;  %v7339_v9 = vpack.c.bf16 %v569_v4, %v565_v3  ;;  %v586_v59 = vld [vmem:[#allocation13 + $0x128] sm:$0xff]  ;;  %v584_v61 = vld [vmem:[#allocation13 + $0x118] sm:$0xff] }
  0x7b   :  { %v7359_v3 = vpack.c.bf16 %v586_v59, %v582_v58  ;;  %v588_v4 = vld [vmem:[#allocation13 + $0x138] sm:$0xff]  ;;  %v7371_v58 = vpack.c.bf16 %v594_v48, %v590_v37  ;;  %v602_v37 = vld [vmem:[#allocation13 + $0x1a8] sm:$0xff] }
  0x7c   :  { %4930 = vmatpush1.bf16.msra.mxu1 %v7271_v31  ;;  %8717 = vst [vmem:[#allocation51_spill] sm:$0xff] %v7311_v12  ;;  %4952 = vmatprep.subr.bf16.mxu0 %v7311_v12  ;;  %8726 = vst [vmem:[#allocation60_spill] sm:$0xff] %v7337_v6  ;;  %v7361_v20 = vpack.c.bf16 %v588_v4, %v584_v61  ;;  %v596_v59 = vld [vmem:[#allocation13 + $0x178] sm:$0xff]  ;;  %v589_v61 = vld [vmem:[#allocation13 + $0x140] sm:$0xff] }
  0x7d   :  { %4932 = vmatprep.subr.bf16.mxu1 %v7274_v33  ;;  %4954 = vmatpush1.bf16.msra.mxu0 %v7317_v26  ;;  %8727 = vst [vmem:[#allocation61_spill] sm:$0xff] %v7339_v9  ;;  %8733 = vst [vmem:[#allocation67_spill] sm:$0xff] %v7359_v3  ;;  %v593_v4 = vld [vmem:[#allocation13 + $0x160] sm:$0xff]  ;;  %v7373_v10 = vpack.c.bf16 %v596_v59, %v592_v51  ;;  %v600_v48 = vld [vmem:[#allocation13 + $0x198] sm:$0xff] }
  0x7e   :  { %4956 = vmatprep.subr.bf16.mxu0 %v7323_v36  ;;  %8734 = vst [vmem:[#allocation68_spill] sm:$0xff] %v7361_v20  ;;  %8737 = vst [vmem:[#allocation71_spill] sm:$0xff] %v7371_v58  ;;  %v7375_v13 = vpack.c.bf16 %v593_v4, %v589_v61  ;;  %v604_v51 = vld [vmem:[#allocation13 + $0x1b8] sm:$0xff]  ;;  %v597_v59 = vld [vmem:[#allocation13 + $0x180] sm:$0xff] }
  0x7f   :  { %8738 = vst [vmem:[#allocation72_spill] sm:$0xff] %v7373_v10  ;;  %v601_v61 = vld [vmem:[#allocation13 + $0x1a0] sm:$0xff]  ;;  %v7385_v4 = vpack.c.bf16 %v604_v51, %v600_v48  ;;  %v612_v48 = vld [vmem:[#allocation13 + $0x1f8] sm:$0xff] }
  0x80   :  { %4934 = vmatpush1.bf16.msra.mxu1 %v7279_v38  ;;  %8739 = vst [vmem:[#allocation73_spill] sm:$0xff] %v7375_v13  ;;  %v605_v51 = vld [vmem:[#allocation13 + $0x1c0] sm:$0xff] }
  0x81   :  { %4936 = vmatprep.subr.bf16.mxu1 %v7282_v39  ;;  %4958 = vmatpush1.bf16.msra.mxu0 %v7327_v45  ;;  %8742 = vst [vmem:[#allocation76_spill] sm:$0xff] %v7385_v4 }
  0x82   :  { %4960 = vmatprep.subr.bf16.mxu0 %v7335_v60 }
  0x84   :  { %4938 = vmatpush1.bf16.msra.mxu1 %v7287_v46 }
  0x85   :  { %4940 = vmatprep.subr.bf16.mxu1 %v7290_v47  ;;  %4962 = vmatpush1.bf16.msra.mxu0 %v7339_v9 }
  0x86   :  { %4964 = vmatprep.subr.bf16.mxu0 %v7347_v30 }
  0x88   :  { %4942 = vmatpush1.bf16.msra.mxu1 %v7293_v54 }
  0x89   :  { %4944 = vmatprep.subr.bf16.mxu1 %v7296_v55  ;;  %4966 = vmatpush1.bf16.msra.mxu0 %v7351_v41  ;;  %v537_v41 = vld [vmem:[#allocation11 + $0x1a0] sm:$0xff] }
  0x8a   :  { %4968 = vmatprep.subr.bf16.mxu0 %v7359_v3 }
  0x8c   :  { %4946 = vmatpush1.bf16.msra.mxu1 %v7299_v62 }
  0x8d   :  { %4948 = vmatprep.subr.bf16.mxu1 %v7302_v2  ;;  %4970 = vmatpush1.bf16.msra.mxu0 %v7363_v21 }
  0x8e   :  { %4972 = vmatprep.subr.bf16.mxu0 %v7371_v58 }
  0x90   :  { %4950 = vmatpush1.bf16.msra.mxu1 %v7305_v5 }
  0x91   :  { %4984 = vmatprep.subr.bf16.mxu1 %v7313_v18  ;;  %4974 = vmatpush1.bf16.msra.mxu0 %v7375_v13 }
  0x93   :  { %779 = vmatmul.mubr.f32.vlgmr.msra.gmra.mrb[0].mxu1 %v8490_v0 }
  0x94   :  { %948 = vmatprep.mubr.f32.mxu1 %v8490_v0  ;;  %4986 = vmatpush1.bf16.msra.mxu1 %v7319_v28  ;;  %v7378_v0 = vpack.c.bf16 %v595_v34, %v591_v27  ;;  %v599_v27 = vld [vmem:[#allocation13 + $0x190] sm:$0xff] }
  0x95   :  { %4988 = vmatprep.subr.bf16.mxu1 %v7325_v44  ;;  %v603_v34 = vld [vmem:[#allocation13 + $0x1b0] sm:$0xff] }
  0x96   :  { %8740 = vst [vmem:[#allocation74_spill] sm:$0xff] %v7378_v0 }
  0x98   :  { %4990 = vmatpush1.bf16.msra.mxu1 %v7330_v52 }
  0x99   :  { %4992 = vmatprep.subr.bf16.mxu1 %v7337_v6 }
  0x9c   :  { %4994 = vmatpush1.bf16.msra.mxu1 %v7342_v19 }
  0x9d   :  { %4996 = vmatprep.subr.bf16.mxu1 %v7349_v40 }
  0xa0   :  { %4998 = vmatpush1.bf16.msra.mxu1 %v7354_v53  ;;  %v538_v53 = vld [vmem:[#allocation11 + $0x1a8] sm:$0xff] }
  0xa1   :  { %5000 = vmatprep.subr.bf16.mxu1 %v7361_v20  ;;  %v7387_v20 = vpack.c.bf16 %v601_v61, %v597_v59  ;;  %v609_v59 = vld [vmem:[#allocation13 + $0x1e0] sm:$0xff] }
  0xa2   :  { %v7399_v58 = vpack.c.bf16 %v609_v59, %v605_v51  ;;  %v489_v51 = vld [vmem:[#allocation11 + $0x20] sm:$0xff] }
  0xa3   :  { %8743 = vst [vmem:[#allocation77_spill] sm:$0xff] %v7387_v20 }
  0xa4   :  { %5002 = vmatpush1.bf16.msra.mxu1 %v7366_v35  ;;  %v598_v35 = vld [vmem:[#allocation13 + $0x188] sm:$0xff]  ;;  %8747 = vst [vmem:[#allocation81_spill] sm:$0xff] %v7399_v58 }
  0xa5   :  { %5004 = vmatprep.subr.bf16.mxu1 %v7373_v10  ;;  %v7383_v21 = vpack.c.bf16 %v602_v37, %v598_v35  ;;  %v7390_v10 = vpack.c.bf16 %v603_v34, %v599_v27  ;;  %v610_v35 = vld [vmem:[#allocation13 + $0x1e8] sm:$0xff]  ;;  %v608_v37 = vld [vmem:[#allocation13 + $0x1d8] sm:$0xff]  ;;  %v607_v27 = vld [vmem:[#allocation13 + $0x1d0] sm:$0xff] }
  0xa6   :  { %v7397_v61 = vpack.c.bf16 %v612_v48, %v608_v37  ;;  %v611_v34 = vld [vmem:[#allocation13 + $0x1f0] sm:$0xff]  ;;  %v492_v37 = vld [vmem:[#allocation11 + $0x38] sm:$0xff]  ;;  %v485_v48 = vld [vmem:[#allocation11] sm:$0xff] }
  0xa7   :  { %8741 = vst [vmem:[#allocation75_spill] sm:$0xff] %v7383_v21  ;;  %4976 = vmatprep.subr.bf16.mxu0 %v7383_v21  ;;  %8744 = vst [vmem:[#allocation78_spill] sm:$0xff] %v7390_v10  ;;  %v7411_v21 = vpack.c.bf16 %v489_v51, %v485_v48  ;;  %v493_v48 = vld [vmem:[#allocation11 + $0x40] sm:$0xff] }
  0xa8   :  { %5006 = vmatpush1.bf16.msra.mxu1 %v7378_v0  ;;  %4978 = vmatpush1.bf16.msra.mxu0 %v7387_v20  ;;  %v606_v0 = vld [vmem:[#allocation13 + $0x1c8] sm:$0xff]  ;;  %8746 = vst [vmem:[#allocation80_spill] sm:$0xff] %v7397_v61  ;;  %v497_v51 = vld [vmem:[#allocation11 + $0x60] sm:$0xff] }
  0xa9   :  { %5008 = vmatprep.subr.bf16.mxu1 %v7385_v4  ;;  %v7395_v13 = vpack.c.bf16 %v610_v35, %v606_v0  ;;  %v7402_v4 = vpack.c.bf16 %v611_v34, %v607_v27  ;;  %v490_v0 = vld [vmem:[#allocation11 + $0x28] sm:$0xff]  ;;  %v488_v35 = vld [vmem:[#allocation11 + $0x18] sm:$0xff]  ;;  %8751 = vst [vmem:[#allocation85_spill] sm:$0xff] %v7411_v21  ;;  %v487_v27 = vld [vmem:[#allocation11 + $0x10] sm:$0xff] }
  0xaa   :  { %v7409_v59 = vpack.c.bf16 %v492_v37, %v488_v35  ;;  %v491_v34 = vld [vmem:[#allocation11 + $0x30] sm:$0xff]  ;;  %v500_v37 = vld [vmem:[#allocation11 + $0x78] sm:$0xff] }
  0xab   :  { %8745 = vst [vmem:[#allocation79_spill] sm:$0xff] %v7395_v13  ;;  %4980 = vmatprep.subr.bf16.mxu0 %v7395_v13  ;;  %8748 = vst [vmem:[#allocation82_spill] sm:$0xff] %v7402_v4 }
  0xac   :  { %5010 = vmatpush1.bf16.msra.mxu1 %v7390_v10  ;;  %4982 = vmatpush1.bf16.msra.mxu0 %v7399_v58  ;;  %v486_v10 = vld [vmem:[#allocation11 + $0x8] sm:$0xff]  ;;  %8750 = vst [vmem:[#allocation84_spill] sm:$0xff] %v7409_v59  ;;  %v7415_v58 = vpack.c.bf16 %v491_v34, %v487_v27  ;;  %v7425_v27 = vpack.c.bf16 %v497_v51, %v493_v48  ;;  %v495_v34 = vld [vmem:[#allocation11 + $0x50] sm:$0xff]  ;;  %v501_v48 = vld [vmem:[#allocation11 + $0x80] sm:$0xff] }
  0xad   :  { %5012 = vmatprep.subr.bf16.mxu1 %v7397_v61  ;;  %v7407_v20 = vpack.c.bf16 %v490_v0, %v486_v10  ;;  %v8752_v61 = vmov 0.0   ;;  %v494_v10 = vld [vmem:[#allocation11 + $0x48] sm:$0xff]  ;;  %v505_v51 = vld [vmem:[#allocation11 + $0xa0] sm:$0xff] }
  0xae   :  { %8753 = vst [vmem:[#allocation86_spill] sm:$0xff] %v7415_v58  ;;  %v498_v0 = vld [vmem:[#allocation11 + $0x68] sm:$0xff]  ;;  %8756 = vst [vmem:[#allocation89_spill] sm:$0xff] %v7425_v27  ;;  %v7439_v3 = vpack.c.bf16 %v505_v51, %v501_v48 }
  0xaf   :  { %8749 = vst [vmem:[#allocation83_spill] sm:$0xff] %v7407_v20  ;;  %5016 = vmatprep.subr.bf16.mxu0 %v7407_v20  ;;  %878 = vmatmul.mubr.f32.vlgmr.msra.gmra.mrb[16].mxu0 %v8752_v61  ;;  %v7421_v35 = vpack.c.bf16 %v498_v0, %v494_v10  ;;  %v502_v10 = vld [vmem:[#allocation11 + $0x88] sm:$0xff] }
  0xb0   :  { %5014 = vmatpush1.bf16.msra.mxu1 %v7402_v4  ;;  %v496_v4 = vld [vmem:[#allocation11 + $0x58] sm:$0xff]  ;;  %5018 = vmatpush1.bf16.msra.mxu0 %v7411_v21  ;;  %v506_v0 = vld [vmem:[#allocation11 + $0xa8] sm:$0xff]  ;;  %8760 = vst [vmem:[#allocation93_spill] sm:$0xff] %v7439_v3 }
  0xb1   :  { %5048 = vmatprep.subr.bf16.mxu1 %v7409_v59  ;;  %8754 = vst [vmem:[#allocation87_spill] sm:$0xff] %v7421_v35  ;;  %v7423_v20 = vpack.c.bf16 %v500_v37, %v496_v4  ;;  %v499_v59 = vld [vmem:[#allocation11 + $0x70] sm:$0xff]  ;;  %1019 = vmatprep.mubr.f32.mxu0 %v8752_v61  ;;  %v7435_v4 = vpack.c.bf16 %v506_v0, %v502_v10  ;;  %v508_v37 = vld [vmem:[#allocation11 + $0xb8] sm:$0xff]  ;;  %v509_v0 = vld [vmem:[#allocation11 + $0xc0] sm:$0xff] }
  0xb2   :  { %5020 = vmatprep.subr.bf16.mxu0 %v7421_v35  ;;  %v7430_v21 = vpack.c.bf16 %v499_v59, %v495_v34  ;;  %v503_v59 = vld [vmem:[#allocation11 + $0x90] sm:$0xff]  ;;  %v514_v35 = vld [vmem:[#allocation11 + $0xe8] sm:$0xff] }
  0xb3   :  { %949 = vmatmul.mubr.f32.vlgmr.msra.gmra.mrb[18].mxu1 %v8752_v61  ;;  %8755 = vst [vmem:[#allocation88_spill] sm:$0xff] %v7423_v20  ;;  %8758 = vst [vmem:[#allocation91_spill] sm:$0xff] %v7435_v4  ;;  %v507_v34 = vld [vmem:[#allocation11 + $0xb0] sm:$0xff] }
  0xb4   :  { %5050 = vmatpush1.bf16.msra.mxu1 %v7415_v58  ;;  %1090 = vmatprep.mubr.f32.mxu1 %v8752_v61  ;;  %8757 = vst [vmem:[#allocation90_spill] sm:$0xff] %v7430_v21  ;;  %v504_v58 = vld [vmem:[#allocation11 + $0x98] sm:$0xff] }
  0xb5   :  { %5052 = vmatprep.subr.bf16.mxu1 %v7423_v20  ;;  %5022 = vmatpush1.bf16.msra.mxu0 %v7425_v27  ;;  %v7437_v13 = vpack.c.bf16 %v508_v37, %v504_v58  ;;  %v7442_v20 = vpack.c.bf16 %v507_v34, %v503_v59  ;;  %v510_v27 = vld [vmem:[#allocation11 + $0xc8] sm:$0xff]  ;;  %v516_v58 = vld [vmem:[#allocation11 + $0xf8] sm:$0xff]  ;;  %v513_v37 = vld [vmem:[#allocation11 + $0xe0] sm:$0xff] }
  0xb6   :  { %5024 = vmatprep.subr.bf16.mxu0 %v7435_v4  ;;  %v7447_v10 = vpack.c.bf16 %v514_v35, %v510_v27  ;;  %v7451_v51 = vpack.c.bf16 %v513_v37, %v509_v0  ;;  %v511_v59 = vld [vmem:[#allocation11 + $0xd0] sm:$0xff]  ;;  %v522_v4 = vld [vmem:[#allocation11 + $0x128] sm:$0xff]  ;;  %v517_v27 = vld [vmem:[#allocation11 + $0x100] sm:$0xff] }
  0xb7   :  { %8759 = vst [vmem:[#allocation92_spill] sm:$0xff] %v7437_v13  ;;  %8761 = vst [vmem:[#allocation94_spill] sm:$0xff] %v7442_v20  ;;  %v515_v34 = vld [vmem:[#allocation11 + $0xf0] sm:$0xff] }
  0xb8   :  { %5054 = vmatpush1.bf16.msra.mxu1 %v7430_v21  ;;  %v512_v21 = vld [vmem:[#allocation11 + $0xd8] sm:$0xff]  ;;  %8762 = vst [vmem:[#allocation95_spill] sm:$0xff] %v7447_v10  ;;  %8764 = vst [vmem:[#allocation97_spill] sm:$0xff] %v7451_v51 }
  0xb9   :  { %5056 = vmatprep.subr.bf16.mxu1 %v7437_v13  ;;  %5026 = vmatpush1.bf16.msra.mxu0 %v7439_v3  ;;  %v7449_v48 = vpack.c.bf16 %v516_v58, %v512_v21  ;;  %v7454_v13 = vpack.c.bf16 %v515_v34, %v511_v59  ;;  %v518_v3 = vld [vmem:[#allocation11 + $0x108] sm:$0xff]  ;;  %v524_v21 = vld [vmem:[#allocation11 + $0x138] sm:$0xff]  ;;  %v521_v58 = vld [vmem:[#allocation11 + $0x120] sm:$0xff] }
  0xba   :  { %5028 = vmatprep.subr.bf16.mxu0 %v7447_v10  ;;  %v7459_v35 = vpack.c.bf16 %v522_v4, %v518_v3  ;;  %v7463_v37 = vpack.c.bf16 %v521_v58, %v517_v27  ;;  %v519_v59 = vld [vmem:[#allocation11 + $0x110] sm:$0xff]  ;;  %v530_v10 = vld [vmem:[#allocation11 + $0x168] sm:$0xff]  ;;  %v525_v4 = vld [vmem:[#allocation11 + $0x140] sm:$0xff] }
  0xbb   :  { %8763 = vst [vmem:[#allocation96_spill] sm:$0xff] %v7449_v48  ;;  %8765 = vst [vmem:[#allocation98_spill] sm:$0xff] %v7454_v13  ;;  %v523_v34 = vld [vmem:[#allocation11 + $0x130] sm:$0xff] }
  0xbc   :  { %5058 = vmatpush1.bf16.msra.mxu1 %v7442_v20  ;;  %v520_v20 = vld [vmem:[#allocation11 + $0x118] sm:$0xff]  ;;  %8766 = vst [vmem:[#allocation99_spill] sm:$0xff] %v7459_v35  ;;  %8768 = vst [vmem:[#allocation101_spill] sm:$0xff] %v7463_v37 }
  0xbd   :  { %5060 = vmatprep.subr.bf16.mxu1 %v7449_v48  ;;  %5030 = vmatpush1.bf16.msra.mxu0 %v7451_v51  ;;  %v7461_v0 = vpack.c.bf16 %v524_v21, %v520_v20  ;;  %v7466_v48 = vpack.c.bf16 %v523_v34, %v519_v59  ;;  %v526_v51 = vld [vmem:[#allocation11 + $0x148] sm:$0xff]  ;;  %v532_v20 = vld [vmem:[#allocation11 + $0x178] sm:$0xff]  ;;  %v529_v21 = vld [vmem:[#allocation11 + $0x160] sm:$0xff] }
  0xbe   :  { %5032 = vmatprep.subr.bf16.mxu0 %v7459_v35  ;;  %v7471_v3 = vpack.c.bf16 %v530_v10, %v526_v51  ;;  %v7475_v58 = vpack.c.bf16 %v529_v21, %v525_v4  ;;  %v527_v59 = vld [vmem:[#allocation11 + $0x150] sm:$0xff]  ;;  %v534_v35 = vld [vmem:[#allocation11 + $0x188] sm:$0xff]  ;;  %v540_v51 = vld [vmem:[#allocation11 + $0x1b8] sm:$0xff] }
  0xbf   :  { %8767 = vst [vmem:[#allocation100_spill] sm:$0xff] %v7461_v0  ;;  %8769 = vst [vmem:[#allocation102_spill] sm:$0xff] %v7466_v48  ;;  %v531_v34 = vld [vmem:[#allocation11 + $0x170] sm:$0xff]  ;;  %v7481_v10 = vpack.c.bf16 %v538_v53, %v534_v35  ;;  %v546_v53 = vld [vmem:[#allocation11 + $0x1e8] sm:$0xff] }
  0xc0   :  { %5062 = vmatpush1.bf16.msra.mxu1 %v7454_v13  ;;  %v528_v13 = vld [vmem:[#allocation11 + $0x158] sm:$0xff]  ;;  %8770 = vst [vmem:[#allocation103_spill] sm:$0xff] %v7471_v3  ;;  %8772 = vst [vmem:[#allocation105_spill] sm:$0xff] %v7475_v58  ;;  %v535_v4 = vld [vmem:[#allocation11 + $0x190] sm:$0xff] }
  0xc1   :  { %5064 = vmatprep.subr.bf16.mxu1 %v7461_v0  ;;  %5034 = vmatpush1.bf16.msra.mxu0 %v7463_v37  ;;  %v7473_v27 = vpack.c.bf16 %v532_v20, %v528_v13  ;;  %v7478_v0 = vpack.c.bf16 %v531_v34, %v527_v59  ;;  %v536_v37 = vld [vmem:[#allocation11 + $0x198] sm:$0xff]  ;;  %8774 = vst [vmem:[#allocation107_spill] sm:$0xff] %v7481_v10  ;;  %v539_v21 = vld [vmem:[#allocation11 + $0x1b0] sm:$0xff]  ;;  %v542_v59 = vld [vmem:[#allocation11 + $0x1c8] sm:$0xff] }
  0xc2   :  { %5036 = vmatprep.subr.bf16.mxu0 %v7471_v3  ;;  %v7485_v13 = vpack.c.bf16 %v540_v51, %v536_v37  ;;  %v7490_v34 = vpack.c.bf16 %v539_v21, %v535_v4  ;;  %v544_v35 = vld [vmem:[#allocation11 + $0x1d8] sm:$0xff]  ;;  %v7493_v3 = vpack.c.bf16 %v546_v53, %v542_v59  ;;  %v541_v37 = vld [vmem:[#allocation11 + $0x1c0] sm:$0xff] }
  0xc3   :  { %8771 = vst [vmem:[#allocation104_spill] sm:$0xff] %v7473_v27  ;;  %8773 = vst [vmem:[#allocation106_spill] sm:$0xff] %v7478_v0  ;;  %v545_v51 = vld [vmem:[#allocation11 + $0x1e0] sm:$0xff] }
  0xc4   :  { %5066 = vmatpush1.bf16.msra.mxu1 %v7466_v48  ;;  %v533_v48 = vld [vmem:[#allocation11 + $0x180] sm:$0xff]  ;;  %8775 = vst [vmem:[#allocation108_spill] sm:$0xff] %v7485_v13  ;;  %8777 = vst [vmem:[#allocation110_spill] sm:$0xff] %v7490_v34 }
  0xc5   :  { %5068 = vmatprep.subr.bf16.mxu1 %v7473_v27  ;;  %5038 = vmatpush1.bf16.msra.mxu0 %v7475_v58  ;;  %v7487_v20 = vpack.c.bf16 %v537_v41, %v533_v48  ;;  %v548_v27 = vld [vmem:[#allocation11 + $0x1f8] sm:$0xff]  ;;  %8778 = vst [vmem:[#allocation111_spill] sm:$0xff] %v7493_v3  ;;  %v543_v41 = vld [vmem:[#allocation11 + $0x1d0] sm:$0xff] }
  0xc6   :  { %5040 = vmatprep.subr.bf16.mxu0 %v7481_v10  ;;  %v7495_v58 = vpack.c.bf16 %v548_v27, %v544_v35  ;;  %v547_v48 = vld [vmem:[#allocation11 + $0x1f0] sm:$0xff]  ;;  %v7499_v10 = vpack.c.bf16 %v545_v51, %v541_v37  ;;  %v118_v27 = vlaneseq  ;;  %v116_v37 = vld [vmem:[%s8481_s3] sm:$0xf] }
  0xc7   :  { %8776 = vst [vmem:[#allocation109_spill] sm:$0xff] %v7487_v20  ;;  %v7501_v4 = vpack.c.bf16 %v547_v48, %v543_v41 }
  0xc8   :  { %5070 = vmatpush1.bf16.msra.mxu1 %v7478_v0  ;;  %8779 = vst [vmem:[#allocation112_spill] sm:$0xff] %v7495_v58  ;;  %8780 = vst [vmem:[#allocation113_spill] sm:$0xff] %v7499_v10  ;;  %v7509_v53 = vshrl.u32 %v118_v27, 7 }
  0xc9   :  { %5072 = vmatprep.subr.bf16.mxu1 %v7485_v13  ;;  %5042 = vmatpush1.bf16.msra.mxu0 %v7487_v20  ;;  %8781 = vst [vmem:[#allocation114_spill] sm:$0xff] %v7501_v4 }
  0xca   :  { %5044 = vmatprep.subr.bf16.mxu0 %v7493_v3  ;;  %v8592_v35 = vsub.s32 0, %v7509_v53  ;;  %v8597_v51 = vsub.s32 1, %v7509_v53  ;;  %v8598_v20 = vsub.s32 2, %v7509_v53  ;;  %v8603_v13 = vsub.s32 3, %v7509_v53 }
  0xcc   :  { %5074 = vmatpush1.bf16.msra.mxu1 %v7490_v34  ;;  %v7518_v41 = vrot.slane %v116_v37, %v8592_v35  ;;  %v7522_v48 = vrot.slane %v116_v37, %v8597_v51 }
  0xcd   :  { %5076 = vmatprep.subr.bf16.mxu1 %v7495_v58  ;;  %5046 = vmatpush1.bf16.msra.mxu0 %v7499_v10 }
  0xce   :  { %5080 = vmatprep.subr.bf16.mxu0 %v7143_v11  ;;  %8782 = vst [vmem:[#allocation115_spill] sm:$0xff] %v7518_v41  ;;  %8783 = vst [vmem:[#allocation116_spill] sm:$0xff] %v7522_v48 }
  0xd0   :  { %5078 = vmatpush1.bf16.msra.mxu1 %v7501_v4 }
  0xd1   :  { %5112 = vmatprep.subr.bf16.mxu1 %v7246_v8 }
 0x130   :  { %v229_v21 = vpop.f32.mrb[0].mxu0 }
 0x131   :  { %v231_v59 = vpop.f32.mrb[1].mxu0  ;;  %v230_v8 = vadd.f32 %v229_v21, %v7518_v41  ;;  %v7530_v21 = vrot.slane %v116_v37, %v8598_v20 }
 0x132   :  { %v232_v27 = vadd.f32 %v231_v59, %v7522_v48 }
 0x146   :  { %v709_v11 = vpop.f32.mrb[16].mxu1 }
 0x147   :  { %v785_v4 = vadd.f32 %v709_v11, %v230_v8  ;;  %v711_v10 = vpop.f32.mrb[17].mxu1  ;;  %v7534_v11 = vrot.slane %v116_v37, %v8603_v13  ;;  %v8798_v13 = vld [vmem:[#allocation79_spill] sm:$0xff] }
 0x148   :  { %v786_v58 = vadd.f32 %v711_v10, %v232_v27 }
 0x149   :  { %v4762_v34 = vmul.f32 -1.442695, %v785_v4 }
 0x14a   :  { %v4763_v3 = vmul.f32 -1.442695, %v786_v58 }
 0x14c   :  { %6563 = vpow2.f32 %v4763_v3 }
 0x14d   :  { %6565 = vpow2.f32 %v4762_v34 }
 0x156   :  { %v6564_v35 = vpop.eup %6563 }
 0x157   :  { %v6566_v0 = vpop.eup %6565  ;;  %v798_v51 = vadd.f32 1.0, %v6564_v35 }
 0x158   :  { %v792_v59 = vadd.f32 1.0, %v6566_v0 }
 0x159   :  { %6567 = vrcp.f32 %v798_v51 }
 0x15a   :  { %6569 = vrcp.f32 %v792_v59 }
 0x163   :  { %v6568_v4 = vpop.eup %6567 }
 0x164   :  { %v6570_v35 = vpop.eup %6569  ;;  %v808_v20 = vmul.f32 0.0, %v6568_v4  ;;  %v8790_v4 = vld [vmem:[#allocation71_spill] sm:$0xff] }
 0x166   :  { %v780_v8 = vpop.f32.mrb[0].mxu1 }
 0x167   :  { %v6473_v3 = vadd.f32 %v780_v8, %v7530_v21  ;;  %v782_v58 = vpop.f32.mrb[1].mxu1 }
 0x168   :  { %v6474_v10 = vadd.f32 %v782_v58, %v7534_v11  ;;  %v8787_v58 = vld [vmem:[#allocation68_spill] sm:$0xff] }
 0x169   :  { %6571 = vtanh.f32 %v6473_v3  ;;  %v8786_v3 = vld [vmem:[#allocation67_spill] sm:$0xff] }
 0x16a   :  { %v4764_v34 = vmul.f32 -1.442695, %v6474_v10  ;;  %v8788_v10 = vld [vmem:[#allocation69_spill] sm:$0xff] }
 0x16c   :  { %6573 = vpow2.f32 %v4764_v34  ;;  %v8789_v34 = vld [vmem:[#allocation70_spill] sm:$0xff] }
 0x173   :  { %v6572_v27 = vpop.eup %6571 }
 0x174   :  { %v809_v0 = vmul.f32 %v6572_v27, %v6570_v35  ;;  %v8791_v35 = vld [vmem:[#allocation72_spill] sm:$0xff]  ;;  %v8792_v27 = vld [vmem:[#allocation73_spill] sm:$0xff] }
 0x176   :  { %v6574_v48 = vpop.eup %6573  ;;  %v7538_v41 = vadd.f32 %v809_v0, %v808_v20  ;;  %v8784_v20 = vld [vmem:[#allocation65_spill] sm:$0xff]  ;;  %v8793_v0 = vld [vmem:[#allocation74_spill] sm:$0xff] }
 0x177   :  { %v805_v37 = vadd.f32 1.0, %v6574_v48  ;;  %v8785_v48 = vld [vmem:[#allocation66_spill] sm:$0xff] }
 0x178   :  { %6575 = vtanh.f32 %v7538_v41 }
 0x179   :  { %6577 = vrcp.f32 %v805_v37  ;;  %v8794_v37 = vld [vmem:[#allocation75_spill] sm:$0xff] }
 0x182   :  { %v6576_v51 = vpop.eup %6575 }
 0x183   :  { %v6578_v8 = vpop.eup %6577 }
 0x184   :  { %v812_v59 = vmul.f32 %v6578_v8, %v6576_v51  ;;  %v8795_v51 = vld [vmem:[#allocation76_spill] sm:$0xff]  ;;  %v8796_v8 = vld [vmem:[#allocation77_spill] sm:$0xff] }
 0x186   :  { %1020 = vmatmul.mubr.f32.vlgmr.msra.gmra.mrb[16].mxu0 %v812_v59  ;;  %1091 = vmatmul.mubr.f32.vlgmr.msra.gmra.mrb[18].mxu1 %v812_v59 }
 0x187   :  { %5082 = vmatpush1.bf16.msra.mxu0 %v7148_v15  ;;  %5114 = vmatpush1.bf16.msra.mxu1 %v7253_v14 }
 0x188   :  { %5084 = vmatprep.subr.bf16.mxu0 %v7151_v16  ;;  %5116 = vmatprep.subr.bf16.mxu1 %v7256_v17 }
 0x189   :  { %1194 = vmatprep.mubr.f32.mxu0 %v8752_v61  ;;  %1265 = vmatprep.mubr.f32.mxu1 %v8752_v61 }
 0x18b   :  { %5086 = vmatpush1.bf16.msra.mxu0 %v7159_v22  ;;  %5118 = vmatpush1.bf16.msra.mxu1 %v7262_v24 }
 0x18c   :  { %5088 = vmatprep.subr.bf16.mxu0 %v7162_v23  ;;  %5120 = vmatprep.subr.bf16.mxu1 %v7266_v25 }
 0x18f   :  { %5090 = vmatpush1.bf16.msra.mxu0 %v7170_v29  ;;  %5122 = vmatpush1.bf16.msra.mxu1 %v7271_v31 }
 0x190   :  { %5092 = vmatprep.subr.bf16.mxu0 %v7173_v32  ;;  %5124 = vmatprep.subr.bf16.mxu1 %v7274_v33 }
 0x193   :  { %5094 = vmatpush1.bf16.msra.mxu0 %v7193_v42  ;;  %5126 = vmatpush1.bf16.msra.mxu1 %v7279_v38 }
 0x194   :  { %5096 = vmatprep.subr.bf16.mxu0 %v7196_v43  ;;  %5128 = vmatprep.subr.bf16.mxu1 %v7282_v39 }
 0x197   :  { %5098 = vmatpush1.bf16.msra.mxu0 %v7204_v49  ;;  %5130 = vmatpush1.bf16.msra.mxu1 %v7287_v46 }
 0x198   :  { %5100 = vmatprep.subr.bf16.mxu0 %v7207_v50  ;;  %5132 = vmatprep.subr.bf16.mxu1 %v7290_v47 }
 0x19b   :  { %5102 = vmatpush1.bf16.msra.mxu0 %v7217_v56  ;;  %5134 = vmatpush1.bf16.msra.mxu1 %v7293_v54 }
 0x19c   :  { %5104 = vmatprep.subr.bf16.mxu0 %v7220_v57  ;;  %5136 = vmatprep.subr.bf16.mxu1 %v7296_v55 }
 0x19f   :  { %5106 = vmatpush1.bf16.msra.mxu0 %v7230_v63  ;;  %5138 = vmatpush1.bf16.msra.mxu1 %v7299_v62 }
 0x1a0   :  { %5108 = vmatprep.subr.bf16.mxu0 %v7233_v1  ;;  %5140 = vmatprep.subr.bf16.mxu1 %v7302_v2 }
 0x1a3   :  { %5110 = vmatpush1.bf16.msra.mxu0 %v7243_v7  ;;  %5142 = vmatpush1.bf16.msra.mxu1 %v7305_v5 }
 0x1a4   :  { %5144 = vmatprep.subr.bf16.mxu0 %v7311_v12  ;;  %5176 = vmatprep.subr.bf16.mxu1 %v7313_v18 }
 0x1a6   :  { %1195 = vmatmul.mubr.f32.vlgmr.msra.gmra.mrb[2].mxu0 %v812_v59  ;;  %1266 = vmatmul.mubr.f32.vlgmr.msra.gmra.mrb[2].mxu1 %v812_v59  ;;  %v8797_v59 = vld [vmem:[#allocation78_spill] sm:$0xff] }
 0x1a7   :  { %5146 = vmatpush1.bf16.msra.mxu0 %v7317_v26  ;;  %5178 = vmatpush1.bf16.msra.mxu1 %v7319_v28 }
 0x1a8   :  { %5148 = vmatprep.subr.bf16.mxu0 %v7323_v36  ;;  %5180 = vmatprep.subr.bf16.mxu1 %v7325_v44 }
 0x1a9   :  { %1364 = vmatprep.mubr.f32.mxu0 %v8752_v61  ;;  %1435 = vmatprep.mubr.f32.mxu1 %v8752_v61 }
 0x1ab   :  { %5150 = vmatpush1.bf16.msra.mxu0 %v7327_v45  ;;  %5182 = vmatpush1.bf16.msra.mxu1 %v7330_v52 }
 0x1ac   :  { %5152 = vmatprep.subr.bf16.mxu0 %v7335_v60  ;;  %5184 = vmatprep.subr.bf16.mxu1 %v7337_v6 }
 0x1af   :  { %5154 = vmatpush1.bf16.msra.mxu0 %v7339_v9  ;;  %5186 = vmatpush1.bf16.msra.mxu1 %v7342_v19 }
 0x1b0   :  { %5156 = vmatprep.subr.bf16.mxu0 %v7347_v30  ;;  %5188 = vmatprep.subr.bf16.mxu1 %v7349_v40 }
 0x1b3   :  { %5158 = vmatpush1.bf16.msra.mxu0 %v8784_v20  ;;  %5190 = vmatpush1.bf16.msra.mxu1 %v8785_v48  ;;  %v8807_v48 = vsub.s32 3, %v7509_v53 }
 0x1b4   :  { %5160 = vmatprep.subr.bf16.mxu0 %v8786_v3  ;;  %5192 = vmatprep.subr.bf16.mxu1 %v8787_v58 }
 0x1b7   :  { %5162 = vmatpush1.bf16.msra.mxu0 %v8788_v10  ;;  %5194 = vmatpush1.bf16.msra.mxu1 %v8789_v34  ;;  %v8799_v10 = vld [vmem:[#allocation80_spill] sm:$0xff]  ;;  %v8800_v34 = vld [vmem:[#allocation81_spill] sm:$0xff] }
 0x1b8   :  { %5164 = vmatprep.subr.bf16.mxu0 %v8790_v4  ;;  %5196 = vmatprep.subr.bf16.mxu1 %v8791_v35  ;;  %v8801_v4 = vld [vmem:[#allocation82_spill] sm:$0xff]  ;;  %v8802_v35 = vld [vmem:[#allocation83_spill] sm:$0xff] }
 0x1bb   :  { %5166 = vmatpush1.bf16.msra.mxu0 %v8792_v27  ;;  %5198 = vmatpush1.bf16.msra.mxu1 %v8793_v0  ;;  %v8803_v27 = vld [vmem:[#allocation84_spill] sm:$0xff] }
 0x1bc   :  { %5168 = vmatprep.subr.bf16.mxu0 %v8794_v37  ;;  %5200 = vmatprep.subr.bf16.mxu1 %v8795_v51  ;;  %v613_v51 = vld [vmem:[%s8484_s6] sm:$0xf] }
 0x1bd   :  { %v7624_v20 = vrot.slane %v613_v51, %v8807_v48 }
 0x1bf   :  { %5170 = vmatpush1.bf16.msra.mxu0 %v8796_v8  ;;  %5202 = vmatpush1.bf16.msra.mxu1 %v8797_v59  ;;  %v8804_v8 = vsub.s32 0, %v7509_v53  ;;  %8808 = vst [vmem:[#allocation118_spill] sm:$0xff] %v7624_v20 }
 0x1c0   :  { %5172 = vmatprep.subr.bf16.mxu0 %v8798_v13  ;;  %5204 = vmatprep.subr.bf16.mxu1 %v8799_v10  ;;  %v8806_v13 = vsub.s32 1, %v7509_v53 }
 0x1c1   :  { %v7614_v37 = vrot.slane %v613_v51, %v8804_v8 }
 0x1c2   :  { %v7618_v59 = vrot.slane %v613_v51, %v8806_v13  ;;  %v8809_v13 = vsub.s32 2, %v7509_v53 }
 0x1c3   :  { %5174 = vmatpush1.bf16.msra.mxu0 %v8800_v34  ;;  %5206 = vmatpush1.bf16.msra.mxu1 %v8801_v4  ;;  %8805 = vst [vmem:[#allocation117_spill] sm:$0xff] %v7614_v37 }
 0x1c4   :  { %5208 = vmatprep.subr.bf16.mxu0 %v8802_v35  ;;  %5240 = vmatprep.subr.bf16.mxu1 %v8803_v27  ;;  %v7629_v40 = vrot.slane %v613_v51, %v8809_v13 }
 0x1c6   :  { %8810 = vst [vmem:[#allocation119_spill] sm:$0xff] %v7629_v40 }
 0x259   :  { %v1021_v10 = vpop.f32.mrb[16].mxu0  ;;  %v1092_v34 = vpop.f32.mrb[18].mxu1 }
 0x25a   :  { %v1097_v4 = vadd.f32 %v1021_v10, %v7614_v37  ;;  %v1023_v0 = vpop.f32.mrb[17].mxu0  ;;  %v1094_v35 = vpop.f32.mrb[19].mxu1  ;;  %v1099_v10 = vadd.f32 %v1092_v34, %v7629_v40  ;;  %v8811_v34 = vld [vmem:[#allocation115_spill] sm:$0xff] }
 0x25b   :  { %v1098_v27 = vadd.f32 %v1023_v0, %v7618_v59  ;;  %v1100_v8 = vadd.f32 %v1094_v35, %v7624_v20 }
 0x25c   :  { %v4765_v58 = vmul.f32 -1.442695, %v1097_v4 }
 0x25d   :  { %v4766_v3 = vmul.f32 -1.442695, %v1098_v27  ;;  %v4767_v30 = vmul.f32 -1.442695, %v1100_v8 }
 0x25e   :  { %6579 = vpow2.f32 %v4765_v58 }
 0x25f   :  { %6581 = vpow2.f32 %v4766_v3 }
 0x260   :  { %6583 = vpow2.f32 %v4767_v30 }
 0x261   :  { %6585 = vtanh.f32 %v1099_v10 }
 0x268   :  { %v6580_v37 = vpop.eup %6579 }
 0x269   :  { %v6582_v19 = vpop.eup %6581  ;;  %v1104_v0 = vadd.f32 1.0, %v6580_v37 }
 0x26a   :  { %v1110_v4 = vadd.f32 1.0, %v6582_v19  ;;  %v6584_v48 = vpop.eup %6583  ;;  %v8812_v19 = vld [vmem:[#allocation116_spill] sm:$0xff] }
 0x26b   :  { %6587 = vrcp.f32 %v1104_v0  ;;  %v6586_v58 = vpop.eup %6585  ;;  %v1117_v20 = vadd.f32 1.0, %v6584_v48 }
 0x26c   :  { %6589 = vrcp.f32 %v1110_v4 }
 0x26d   :  { %6591 = vrcp.f32 %v1117_v20 }
 0x275   :  { %v6588_v3 = vpop.eup %6587 }
 0x276   :  { %v6590_v27 = vpop.eup %6589  ;;  %v1121_v35 = vmul.f32 %v6588_v3, %v6586_v58 }
 0x277   :  { %v1120_v53 = vmul.f32 0.0, %v6590_v27  ;;  %v6592_v58 = vpop.eup %6591 }
 0x279   :  { %v7632_v51 = vadd.f32 %v1121_v35, %v1120_v53  ;;  %v1196_v8 = vpop.f32.mrb[2].mxu0  ;;  %v1267_v13 = vpop.f32.mrb[2].mxu1 }
 0x27a   :  { %v6459_v40 = vadd.f32 %v1196_v8, %v8811_v34  ;;  %v1198_v37 = vpop.f32.mrb[3].mxu0  ;;  %v1269_v30 = vpop.f32.mrb[3].mxu1  ;;  %v6475_v35 = vadd.f32 %v1267_v13, %v7530_v21  ;;  %v8818_v13 = vld [vmem:[#allocation89_spill] sm:$0xff] }
 0x27b   :  { %6593 = vtanh.f32 %v7632_v51  ;;  %v6460_v10 = vadd.f32 %v1198_v37, %v8812_v19  ;;  %v6476_v48 = vadd.f32 %v1269_v30, %v7534_v11 }
 0x27c   :  { %v4768_v0 = vmul.f32 -1.442695, %v6459_v40  ;;  %v8814_v40 = vld [vmem:[#allocation85_spill] sm:$0xff] }
 0x27d   :  { %v4769_v4 = vmul.f32 -1.442695, %v6460_v10  ;;  %v4770_v27 = vmul.f32 -1.442695, %v6476_v48  ;;  %v8815_v10 = vld [vmem:[#allocation86_spill] sm:$0xff] }
 0x27e   :  { %6595 = vpow2.f32 %v4768_v0  ;;  %v8816_v0 = vld [vmem:[#allocation87_spill] sm:$0xff]  ;;  %v8819_v48 = vld [vmem:[#allocation90_spill] sm:$0xff] }
 0x27f   :  { %6597 = vpow2.f32 %v4769_v4  ;;  %v8817_v4 = vld [vmem:[#allocation88_spill] sm:$0xff] }
 0x280   :  { %6599 = vpow2.f32 %v4770_v27  ;;  %v8822_v27 = vld [vmem:[#allocation93_spill] sm:$0xff] }
 0x281   :  { %6601 = vtanh.f32 %v6475_v35  ;;  %v8823_v35 = vld [vmem:[#allocation94_spill] sm:$0xff] }
 0x285   :  { %v6594_v3 = vpop.eup %6593 }
 0x286   :  { %v7639_v20 = vmul.f32 %v6594_v3, %v6592_v58  ;;  %v8820_v58 = vld [vmem:[#allocation91_spill] sm:$0xff]  ;;  %v8821_v3 = vld [vmem:[#allocation92_spill] sm:$0xff] }
 0x288   :  { %8813 = vst [vmem:[#allocation115_spill] sm:$0xff] %v7639_v20  ;;  %v6596_v53 = vpop.eup %6595  ;;  %1365 = vmatmul.mubr.f32.vlgmr.msra.gmra.mrb[18].mxu0 %v7639_v20  ;;  %1436 = vmatmul.mubr.f32.vlgmr.msra.gmra.mrb[20].mxu1 %v7639_v20 }
 0x289   :  { %v6598_v8 = vpop.eup %6597  ;;  %v1279_v37 = vadd.f32 1.0, %v6596_v53  ;;  %5210 = vmatpush1.bf16.msra.mxu0 %v8814_v40  ;;  %5242 = vmatpush1.bf16.msra.mxu1 %v8815_v10  ;;  %v8824_v53 = vld [vmem:[#allocation95_spill] sm:$0xff] }
 0x28a   :  { %v1285_v30 = vadd.f32 1.0, %v6598_v8  ;;  %5212 = vmatprep.subr.bf16.mxu0 %v8816_v0  ;;  %5244 = vmatprep.subr.bf16.mxu1 %v8817_v4  ;;  %v8825_v8 = vld [vmem:[#allocation96_spill] sm:$0xff]  ;;  %v8828_v10 = vld [vmem:[#allocation99_spill] sm:$0xff] }
 0x28b   :  { %6603 = vrcp.f32 %v1279_v37  ;;  %1506 = vmatprep.mubr.f32.mxu0 %v8752_v61  ;;  %1577 = vmatprep.mubr.f32.mxu1 %v8752_v61  ;;  %v6600_v37 = vpop.eup %6599  ;;  %v8832_v40 = vld [vmem:[#allocation103_spill] sm:$0xff] }
 0x28c   :  { %6605 = vrcp.f32 %v1285_v30  ;;  %v6602_v20 = vpop.eup %6601  ;;  %v8826_v30 = vld [vmem:[#allocation97_spill] sm:$0xff] }
 0x28d   :  { %5214 = vmatpush1.bf16.msra.mxu0 %v8818_v13  ;;  %5246 = vmatpush1.bf16.msra.mxu1 %v8819_v48  ;;  %v8827_v13 = vld [vmem:[#allocation98_spill] sm:$0xff] }
 0x28e   :  { %5216 = vmatprep.subr.bf16.mxu0 %v8820_v58  ;;  %5248 = vmatprep.subr.bf16.mxu1 %v8821_v3  ;;  %v1292_v58 = vadd.f32 1.0, %v6600_v37  ;;  %v8829_v3 = vld [vmem:[#allocation100_spill] sm:$0xff]  ;;  %v8836_v37 = vld [vmem:[#allocation107_spill] sm:$0xff] }
 0x290   :  { %6607 = vrcp.f32 %v1292_v58  ;;  %v8841_v58 = vld [vmem:[#allocation112_spill] sm:$0xff] }
 0x291   :  { %5218 = vmatpush1.bf16.msra.mxu0 %v8822_v27  ;;  %5250 = vmatpush1.bf16.msra.mxu1 %v8823_v35 }
 0x292   :  { %5220 = vmatprep.subr.bf16.mxu0 %v8824_v53  ;;  %5252 = vmatprep.subr.bf16.mxu1 %v8825_v8  ;;  %v8830_v53 = vld [vmem:[#allocation101_spill] sm:$0xff]  ;;  %v8831_v8 = vld [vmem:[#allocation102_spill] sm:$0xff] }
 0x295   :  { %v6604_v4 = vpop.eup %6603  ;;  %5222 = vmatpush1.bf16.msra.mxu0 %v8826_v30  ;;  %5254 = vmatpush1.bf16.msra.mxu1 %v8827_v13  ;;  %v8833_v30 = vld [vmem:[#allocation104_spill] sm:$0xff] }
 0x296   :  { %v6606_v48 = vpop.eup %6605  ;;  %v1296_v0 = vmul.f32 %v6604_v4, %v6602_v20  ;;  %5224 = vmatprep.subr.bf16.mxu0 %v8828_v10  ;;  %5256 = vmatprep.subr.bf16.mxu1 %v8829_v3  ;;  %v8834_v20 = vld [vmem:[#allocation105_spill] sm:$0xff]  ;;  %v8835_v4 = vld [vmem:[#allocation106_spill] sm:$0xff] }
 0x297   :  { %v1295_v35 = vmul.f32 %v6606_v48, %v7538_v41  ;;  %v8837_v41 = vld [vmem:[#allocation108_spill] sm:$0xff]  ;;  %v8839_v48 = vld [vmem:[#allocation110_spill] sm:$0xff] }
 0x299   :  { %v7662_v27 = vadd.f32 %v1296_v0, %v1295_v35  ;;  %5226 = vmatpush1.bf16.msra.mxu0 %v8830_v53  ;;  %5258 = vmatpush1.bf16.msra.mxu1 %v8831_v8  ;;  %v8838_v0 = vld [vmem:[#allocation109_spill] sm:$0xff]  ;;  %v8840_v35 = vld [vmem:[#allocation111_spill] sm:$0xff]  ;;  %v8843_v53 = vld [vmem:[#allocation114_spill] sm:$0xff] }
 0x29a   :  { %5228 = vmatprep.subr.bf16.mxu0 %v8832_v40  ;;  %5260 = vmatprep.subr.bf16.mxu1 %v8833_v30  ;;  %v6608_v40 = vpop.eup %6607  ;;  %v8842_v8 = vld [vmem:[#allocation113_spill] sm:$0xff] }
 0x29b   :  { %6609 = vtanh.f32 %v7662_v27 }
 0x29d   :  { %5230 = vmatpush1.bf16.msra.mxu0 %v8834_v20  ;;  %5262 = vmatpush1.bf16.msra.mxu1 %v8835_v4  ;;  %v8844_v4 = vld [vmem:[#allocation25_spill] sm:$0xff] }
 0x29e   :  { %5232 = vmatprep.subr.bf16.mxu0 %v8836_v37  ;;  %5264 = vmatprep.subr.bf16.mxu1 %v8837_v41  ;;  %v8845_v37 = vld [vmem:[#allocation38_spill] sm:$0xff] }
 0x2a1   :  { %5234 = vmatpush1.bf16.msra.mxu0 %v8838_v0  ;;  %5266 = vmatpush1.bf16.msra.mxu1 %v8839_v48 }
 0x2a2   :  { %5236 = vmatprep.subr.bf16.mxu0 %v8840_v35  ;;  %5268 = vmatprep.subr.bf16.mxu1 %v8841_v58 }
 0x2a5   :  { %v6610_v30 = vpop.eup %6609  ;;  %5238 = vmatpush1.bf16.msra.mxu0 %v8842_v8  ;;  %5270 = vmatpush1.bf16.msra.mxu1 %v8843_v53 }
 0x2a6   :  { %v1299_v20 = vmul.f32 %v6610_v30, %v6608_v40  ;;  %5272 = vmatprep.subr.bf16.mxu0 %v8844_v4  ;;  %5304 = vmatprep.subr.bf16.mxu1 %v8845_v37  ;;  %v8846_v40 = vld [vmem:[#allocation62_spill] sm:$0xff]  ;;  %v8847_v30 = vld [vmem:[#allocation63_spill] sm:$0xff] }
 0x2a8   :  { %1507 = vmatmul.mubr.f32.vlgmr.msra.gmra.mrb[18].mxu0 %v1299_v20  ;;  %1578 = vmatmul.mubr.f32.vlgmr.msra.gmra.mrb[20].mxu1 %v1299_v20 }
 0x2a9   :  { %5274 = vmatpush1.bf16.msra.mxu0 %v7148_v15  ;;  %5306 = vmatpush1.bf16.msra.mxu1 %v7253_v14 }
 0x2aa   :  { %5276 = vmatprep.subr.bf16.mxu0 %v7151_v16  ;;  %5308 = vmatprep.subr.bf16.mxu1 %v7256_v17 }
 0x2ab   :  { %1681 = vmatprep.mubr.f32.mxu0 %v8752_v61  ;;  %1752 = vmatprep.mubr.f32.mxu1 %v8752_v61 }
 0x2ad   :  { %5278 = vmatpush1.bf16.msra.mxu0 %v7159_v22  ;;  %5310 = vmatpush1.bf16.msra.mxu1 %v7262_v24 }
 0x2ae   :  { %5280 = vmatprep.subr.bf16.mxu0 %v7162_v23  ;;  %5312 = vmatprep.subr.bf16.mxu1 %v7266_v25 }
 0x2b1   :  { %5282 = vmatpush1.bf16.msra.mxu0 %v7170_v29  ;;  %5314 = vmatpush1.bf16.msra.mxu1 %v7271_v31 }
 0x2b2   :  { %5284 = vmatprep.subr.bf16.mxu0 %v7173_v32  ;;  %5316 = vmatprep.subr.bf16.mxu1 %v7274_v33 }
 0x2b5   :  { %5286 = vmatpush1.bf16.msra.mxu0 %v7193_v42  ;;  %5318 = vmatpush1.bf16.msra.mxu1 %v7279_v38 }
 0x2b6   :  { %5288 = vmatprep.subr.bf16.mxu0 %v7196_v43  ;;  %5320 = vmatprep.subr.bf16.mxu1 %v7282_v39 }
 0x2b9   :  { %5290 = vmatpush1.bf16.msra.mxu0 %v7204_v49  ;;  %5322 = vmatpush1.bf16.msra.mxu1 %v7287_v46 }
 0x2ba   :  { %5292 = vmatprep.subr.bf16.mxu0 %v7207_v50  ;;  %5324 = vmatprep.subr.bf16.mxu1 %v7290_v47 }
 0x2bd   :  { %5294 = vmatpush1.bf16.msra.mxu0 %v7217_v56  ;;  %5326 = vmatpush1.bf16.msra.mxu1 %v7293_v54 }
 0x2be   :  { %5296 = vmatprep.subr.bf16.mxu0 %v7220_v57  ;;  %5328 = vmatprep.subr.bf16.mxu1 %v7296_v55 }
 0x2c1   :  { %5298 = vmatpush1.bf16.msra.mxu0 %v7230_v63  ;;  %5330 = vmatpush1.bf16.msra.mxu1 %v7299_v62 }
 0x2c2   :  { %5300 = vmatprep.subr.bf16.mxu0 %v7233_v1  ;;  %5332 = vmatprep.subr.bf16.mxu1 %v7302_v2 }
 0x2c5   :  { %5302 = vmatpush1.bf16.msra.mxu0 %v7243_v7  ;;  %5334 = vmatpush1.bf16.msra.mxu1 %v7305_v5 }
 0x2c6   :  { %5336 = vmatprep.subr.bf16.mxu0 %v7311_v12  ;;  %5368 = vmatprep.subr.bf16.mxu1 %v7313_v18 }
 0x2c8   :  { %1682 = vmatmul.mubr.f32.vlgmr.msra.gmra.mrb[4].mxu0 %v1299_v20  ;;  %1753 = vmatmul.mubr.f32.vlgmr.msra.gmra.mrb[4].mxu1 %v1299_v20  ;;  %v8848_v20 = vld [vmem:[#allocation64_spill] sm:$0xff] }
 0x2c9   :  { %5338 = vmatpush1.bf16.msra.mxu0 %v7317_v26  ;;  %5370 = vmatpush1.bf16.msra.mxu1 %v7319_v28  ;;  %v8851_v28 = vld [vmem:[#allocation67_spill] sm:$0xff]  ;;  %v8869_v26 = vld [vmem:[#allocation117_spill] sm:$0xff] }
 0x2ca   :  { %5340 = vmatprep.subr.bf16.mxu0 %v7323_v36  ;;  %5372 = vmatprep.subr.bf16.mxu1 %v7325_v44  ;;  %v8849_v44 = vld [vmem:[#allocation65_spill] sm:$0xff]  ;;  %v8850_v36 = vld [vmem:[#allocation66_spill] sm:$0xff] }
 0x2cb   :  { %1851 = vmatprep.mubr.f32.mxu0 %v8752_v61  ;;  %1922 = vmatprep.mubr.f32.mxu1 %v8752_v61 }
 0x2cd   :  { %5342 = vmatpush1.bf16.msra.mxu0 %v7327_v45  ;;  %5374 = vmatpush1.bf16.msra.mxu1 %v7330_v52  ;;  %v8852_v45 = vld [vmem:[#allocation68_spill] sm:$0xff]  ;;  %v8853_v52 = vld [vmem:[#allocation69_spill] sm:$0xff] }
 0x2ce   :  { %5344 = vmatprep.subr.bf16.mxu0 %v7335_v60  ;;  %5376 = vmatprep.subr.bf16.mxu1 %v7337_v6  ;;  %v8854_v60 = vld [vmem:[#allocation70_spill] sm:$0xff]  ;;  %v8855_v6 = vld [vmem:[#allocation71_spill] sm:$0xff] }
 0x2d1   :  { %5346 = vmatpush1.bf16.msra.mxu0 %v7339_v9  ;;  %5378 = vmatpush1.bf16.msra.mxu1 %v8846_v40  ;;  %v8856_v9 = vld [vmem:[#allocation72_spill] sm:$0xff]  ;;  %v8857_v40 = vld [vmem:[#allocation73_spill] sm:$0xff] }
 0x2d2   :  { %5348 = vmatprep.subr.bf16.mxu0 %v8847_v30  ;;  %5380 = vmatprep.subr.bf16.mxu1 %v8848_v20  ;;  %v8858_v30 = vld [vmem:[#allocation74_spill] sm:$0xff]  ;;  %v8859_v20 = vld [vmem:[#allocation75_spill] sm:$0xff] }
 0x2d5   :  { %5350 = vmatpush1.bf16.msra.mxu0 %v8849_v44  ;;  %5382 = vmatpush1.bf16.msra.mxu1 %v8850_v36  ;;  %v8860_v44 = vld [vmem:[#allocation76_spill] sm:$0xff]  ;;  %v8861_v36 = vld [vmem:[#allocation77_spill] sm:$0xff] }
 0x2d6   :  { %5352 = vmatprep.subr.bf16.mxu0 %v8851_v28  ;;  %5384 = vmatprep.subr.bf16.mxu1 %v8852_v45  ;;  %v8862_v28 = vld [vmem:[#allocation78_spill] sm:$0xff]  ;;  %v8863_v45 = vld [vmem:[#allocation79_spill] sm:$0xff] }
 0x2d9   :  { %5354 = vmatpush1.bf16.msra.mxu0 %v8853_v52  ;;  %5386 = vmatpush1.bf16.msra.mxu1 %v8854_v60  ;;  %v8864_v52 = vld [vmem:[#allocation80_spill] sm:$0xff]  ;;  %v8865_v60 = vld [vmem:[#allocation81_spill] sm:$0xff] }
 0x2da   :  { %5356 = vmatprep.subr.bf16.mxu0 %v8855_v6  ;;  %5388 = vmatprep.subr.bf16.mxu1 %v8856_v9  ;;  %v8866_v6 = vld [vmem:[#allocation82_spill] sm:$0xff]  ;;  %v8867_v9 = vld [vmem:[#allocation83_spill] sm:$0xff] }
 0x2dd   :  { %5358 = vmatpush1.bf16.msra.mxu0 %v8857_v40  ;;  %5390 = vmatpush1.bf16.msra.mxu1 %v8858_v30  ;;  %v8868_v40 = vld [vmem:[#allocation84_spill] sm:$0xff] }
 0x2de   :  { %5360 = vmatprep.subr.bf16.mxu0 %v8859_v20  ;;  %5392 = vmatprep.subr.bf16.mxu1 %v8860_v44 }
 0x2e1   :  { %5362 = vmatpush1.bf16.msra.mxu0 %v8861_v36  ;;  %5394 = vmatpush1.bf16.msra.mxu1 %v8862_v28 }
 0x2e2   :  { %5364 = vmatprep.subr.bf16.mxu0 %v8863_v45  ;;  %5396 = vmatprep.subr.bf16.mxu1 %v8864_v52  ;;  %v8870_v52 = vld [vmem:[#allocation118_spill] sm:$0xff] }
 0x2e5   :  { %5366 = vmatpush1.bf16.msra.mxu0 %v8865_v60  ;;  %5398 = vmatpush1.bf16.msra.mxu1 %v8866_v6  ;;  %v8871_v6 = vld [vmem:[#allocation119_spill] sm:$0xff] }
 0x2e6   :  { %5400 = vmatprep.subr.bf16.mxu0 %v8867_v9  ;;  %5432 = vmatprep.subr.bf16.mxu1 %v8868_v40 }
 0x37b   :  { %v1508_v30 = vpop.f32.mrb[18].mxu0  ;;  %v1579_v20 = vpop.f32.mrb[20].mxu1 }
 0x37c   :  { %v1584_v44 = vadd.f32 %v1508_v30, %v8869_v26  ;;  %v1510_v18 = vpop.f32.mrb[19].mxu0  ;;  %v1581_v36 = vpop.f32.mrb[21].mxu1  ;;  %v1586_v7 = vadd.f32 %v1579_v20, %v8871_v6 }
 0x37d   :  { %v1585_v28 = vadd.f32 %v1510_v18, %v7618_v59  ;;  %v1587_v60 = vadd.f32 %v1581_v36, %v8870_v52 }
 0x37e   :  { %v4771_v12 = vmul.f32 -1.442695, %v1584_v44 }
 0x37f   :  { %v4772_v45 = vmul.f32 -1.442695, %v1585_v28  ;;  %v4773_v5 = vmul.f32 -1.442695, %v1587_v60 }
 0x380   :  { %6611 = vpow2.f32 %v4771_v12 }
 0x381   :  { %6613 = vpow2.f32 %v4772_v45 }
 0x382   :  { %6615 = vpow2.f32 %v4773_v5 }
 0x383   :  { %6617 = vtanh.f32 %v1586_v7 }
 0x38a   :  { %v6612_v9 = vpop.eup %6611 }
 0x38b   :  { %v6614_v2 = vpop.eup %6613  ;;  %v1591_v40 = vadd.f32 1.0, %v6612_v9 }
 0x38c   :  { %v1597_v1 = vadd.f32 1.0, %v6614_v2  ;;  %v6616_v30 = vpop.eup %6615 }
 0x38d   :  { %6619 = vrcp.f32 %v1591_v40  ;;  %v6618_v26 = vpop.eup %6617  ;;  %v1604_v12 = vadd.f32 1.0, %v6616_v30 }
 0x38e   :  { %6621 = vrcp.f32 %v1597_v1 }
 0x38f   :  { %6623 = vrcp.f32 %v1604_v12 }
 0x397   :  { %v6620_v18 = vpop.eup %6619 }
 0x398   :  { %v6622_v44 = vpop.eup %6621  ;;  %v1608_v28 = vmul.f32 %v6620_v18, %v6618_v26 }
 0x399   :  { %v1607_v45 = vmul.f32 %v6622_v44, %v7632_v51  ;;  %v6624_v51 = vpop.eup %6623 }
 0x39b   :  { %v7754_v36 = vadd.f32 %v1608_v28, %v1607_v45  ;;  %v1683_v60 = vpop.f32.mrb[4].mxu0  ;;  %v1754_v20 = vpop.f32.mrb[4].mxu1 }
 0x39c   :  { %v6461_v9 = vadd.f32 %v1683_v60, %v8811_v34  ;;  %v1685_v5 = vpop.f32.mrb[5].mxu0  ;;  %v1756_v7 = vpop.f32.mrb[5].mxu1  ;;  %v6477_v44 = vadd.f32 %v1754_v20, %v7530_v21  ;;  %v8877_v20 = vld [vmem:[#allocation89_spill] sm:$0xff] }
 0x39d   :  { %v6462_v2 = vadd.f32 %v1685_v5, %v8812_v19  ;;  %6625 = vtanh.f32 %v7754_v36  ;;  %v6478_v26 = vadd.f32 %v1756_v7, %v7534_v11  ;;  %v8874_v5 = vld [vmem:[#allocation86_spill] sm:$0xff] }
 0x39e   :  { %v4774_v1 = vmul.f32 -1.442695, %v6461_v9  ;;  %v8873_v9 = vld [vmem:[#allocation85_spill] sm:$0xff] }
 0x39f   :  { %v4775_v40 = vmul.f32 -1.442695, %v6462_v2  ;;  %v4776_v18 = vmul.f32 -1.442695, %v6478_v26  ;;  %v8875_v2 = vld [vmem:[#allocation87_spill] sm:$0xff] }
 0x3a0   :  { %6627 = vpow2.f32 %v4774_v1  ;;  %v8876_v1 = vld [vmem:[#allocation88_spill] sm:$0xff]  ;;  %v8879_v26 = vld [vmem:[#allocation91_spill] sm:$0xff] }
 0x3a1   :  { %6629 = vpow2.f32 %v4775_v40  ;;  %v8878_v40 = vld [vmem:[#allocation90_spill] sm:$0xff] }
 0x3a2   :  { %6631 = vpow2.f32 %v4776_v18  ;;  %v8882_v18 = vld [vmem:[#allocation94_spill] sm:$0xff] }
 0x3a3   :  { %6633 = vtanh.f32 %v6477_v44  ;;  %v8883_v44 = vld [vmem:[#allocation95_spill] sm:$0xff] }
 0x3a7   :  { %v6626_v30 = vpop.eup %6625 }
 0x3a8   :  { %v7761_v28 = vmul.f32 %v6626_v30, %v6624_v51  ;;  %v8880_v51 = vld [vmem:[#allocation92_spill] sm:$0xff]  ;;  %v8881_v30 = vld [vmem:[#allocation93_spill] sm:$0xff] }
 0x3aa   :  { %8872 = vst [vmem:[#allocation116_spill] sm:$0xff] %v7761_v28  ;;  %v6628_v12 = vpop.eup %6627  ;;  %1852 = vmatmul.mubr.f32.vlgmr.msra.gmra.mrb[20].mxu0 %v7761_v28  ;;  %1923 = vmatmul.mubr.f32.vlgmr.msra.gmra.mrb[22].mxu1 %v7761_v28 }
 0x3ab   :  { %v6630_v45 = vpop.eup %6629  ;;  %v1766_v60 = vadd.f32 1.0, %v6628_v12  ;;  %5402 = vmatpush1.bf16.msra.mxu0 %v8873_v9  ;;  %5434 = vmatpush1.bf16.msra.mxu1 %v8874_v5  ;;  %v8884_v12 = vld [vmem:[#allocation96_spill] sm:$0xff] }
 0x3ac   :  { %v1772_v7 = vadd.f32 1.0, %v6630_v45  ;;  %5404 = vmatprep.subr.bf16.mxu0 %v8875_v2  ;;  %5436 = vmatprep.subr.bf16.mxu1 %v8876_v1  ;;  %v6632_v45 = vpop.eup %6631 }
 0x3ad   :  { %6635 = vrcp.f32 %v1766_v60  ;;  %1993 = vmatprep.mubr.f32.mxu0 %v8752_v61  ;;  %2064 = vmatprep.mubr.f32.mxu1 %v8752_v61  ;;  %v6634_v60 = vpop.eup %6633 }
 0x3ae   :  { %6637 = vrcp.f32 %v1772_v7  ;;  %v8885_v7 = vld [vmem:[#allocation97_spill] sm:$0xff] }
 0x3af   :  { %5406 = vmatpush1.bf16.msra.mxu0 %v8877_v20  ;;  %5438 = vmatpush1.bf16.msra.mxu1 %v8878_v40 }
 0x3b0   :  { %5408 = vmatprep.subr.bf16.mxu0 %v8879_v26  ;;  %5440 = vmatprep.subr.bf16.mxu1 %v8880_v51  ;;  %v1779_v26 = vadd.f32 1.0, %v6632_v45  ;;  %v8888_v51 = vld [vmem:[#allocation103_spill] sm:$0xff]  ;;  %v8891_v45 = vld [vmem:[#allocation106_spill] sm:$0xff] }
 0x3b2   :  { %6639 = vrcp.f32 %v1779_v26  ;;  %v8893_v26 = vld [vmem:[#allocation36_spill] sm:$0xff] }
 0x3b3   :  { %5410 = vmatpush1.bf16.msra.mxu0 %v8881_v30  ;;  %5442 = vmatpush1.bf16.msra.mxu1 %v8882_v18 }
 0x3b4   :  { %5412 = vmatprep.subr.bf16.mxu0 %v8883_v44  ;;  %5444 = vmatprep.subr.bf16.mxu1 %v8884_v12  ;;  %v8886_v44 = vld [vmem:[#allocation101_spill] sm:$0xff]  ;;  %v8887_v12 = vld [vmem:[#allocation102_spill] sm:$0xff] }
 0x3b7   :  { %v6636_v28 = vpop.eup %6635  ;;  %5414 = vmatpush1.bf16.msra.mxu0 %v8885_v7  ;;  %5446 = vmatpush1.bf16.msra.mxu1 %v8827_v13  ;;  %v8889_v7 = vld [vmem:[#allocation104_spill] sm:$0xff] }
 0x3b8   :  { %v6638_v40 = vpop.eup %6637  ;;  %v1783_v20 = vmul.f32 %v6636_v28, %v6634_v60  ;;  %5416 = vmatprep.subr.bf16.mxu0 %v8828_v10  ;;  %5448 = vmatprep.subr.bf16.mxu1 %v8829_v3  ;;  %v8890_v28 = vld [vmem:[#allocation105_spill] sm:$0xff]  ;;  %v8892_v60 = vld [vmem:[#allocation107_spill] sm:$0xff] }
 0x3b9   :  { %v1782_v18 = vmul.f32 %v6638_v40, %v7662_v27 }
 0x3bb   :  { %v7784_v30 = vadd.f32 %v1783_v20, %v1782_v18  ;;  %5418 = vmatpush1.bf16.msra.mxu0 %v8886_v44  ;;  %5450 = vmatpush1.bf16.msra.mxu1 %v8887_v12  ;;  %v8894_v18 = vld [vmem:[#allocation49_spill] sm:$0xff] }
 0x3bc   :  { %5420 = vmatprep.subr.bf16.mxu0 %v8888_v51  ;;  %5452 = vmatprep.subr.bf16.mxu1 %v8889_v7  ;;  %v6640_v27 = vpop.eup %6639 }
 0x3bd   :  { %6641 = vtanh.f32 %v7784_v30 }
 0x3bf   :  { %5422 = vmatpush1.bf16.msra.mxu0 %v8890_v28  ;;  %5454 = vmatpush1.bf16.msra.mxu1 %v8891_v45 }
 0x3c0   :  { %5424 = vmatprep.subr.bf16.mxu0 %v8892_v60  ;;  %5456 = vmatprep.subr.bf16.mxu1 %v8837_v41 }
 0x3c3   :  { %5426 = vmatpush1.bf16.msra.mxu0 %v8838_v0  ;;  %5458 = vmatpush1.bf16.msra.mxu1 %v8839_v48 }
 0x3c4   :  { %5428 = vmatprep.subr.bf16.mxu0 %v8840_v35  ;;  %5460 = vmatprep.subr.bf16.mxu1 %v8841_v58 }
 0x3c7   :  { %v6642_v20 = vpop.eup %6641  ;;  %5430 = vmatpush1.bf16.msra.mxu0 %v8842_v8  ;;  %5462 = vmatpush1.bf16.msra.mxu1 %v8843_v53 }
 0x3c8   :  { %5464 = vmatprep.subr.bf16.mxu0 %v8844_v4  ;;  %5496 = vmatprep.subr.bf16.mxu1 %v8845_v37  ;;  %v1786_v40 = vmul.f32 %v6642_v20, %v6640_v27  ;;  %v8895_v27 = vld [vmem:[#allocation37_spill] sm:$0xff]  ;;  %v8896_v20 = vld [vmem:[#allocation50_spill] sm:$0xff] }
 0x3ca   :  { %1994 = vmatmul.mubr.f32.vlgmr.msra.gmra.mrb[20].mxu0 %v1786_v40  ;;  %2065 = vmatmul.mubr.f32.vlgmr.msra.gmra.mrb[22].mxu1 %v1786_v40 }
 0x3cb   :  { %5466 = vmatpush1.bf16.msra.mxu0 %v7148_v15  ;;  %5498 = vmatpush1.bf16.msra.mxu1 %v7253_v14 }
 0x3cc   :  { %5468 = vmatprep.subr.bf16.mxu0 %v7151_v16  ;;  %5500 = vmatprep.subr.bf16.mxu1 %v7256_v17 }
 0x3cd   :  { %2168 = vmatprep.mubr.f32.mxu0 %v8752_v61  ;;  %2239 = vmatprep.mubr.f32.mxu1 %v8752_v61 }
 0x3cf   :  { %5470 = vmatpush1.bf16.msra.mxu0 %v7159_v22  ;;  %5502 = vmatpush1.bf16.msra.mxu1 %v7262_v24 }
 0x3d0   :  { %5472 = vmatprep.subr.bf16.mxu0 %v7162_v23  ;;  %5504 = vmatprep.subr.bf16.mxu1 %v7266_v25 }
 0x3d3   :  { %5474 = vmatpush1.bf16.msra.mxu0 %v7170_v29  ;;  %5506 = vmatpush1.bf16.msra.mxu1 %v7271_v31 }
 0x3d4   :  { %5476 = vmatprep.subr.bf16.mxu0 %v7173_v32  ;;  %5508 = vmatprep.subr.bf16.mxu1 %v7274_v33 }
 0x3d7   :  { %5478 = vmatpush1.bf16.msra.mxu0 %v7193_v42  ;;  %5510 = vmatpush1.bf16.msra.mxu1 %v7279_v38 }
 0x3d8   :  { %5480 = vmatprep.subr.bf16.mxu0 %v7196_v43  ;;  %5512 = vmatprep.subr.bf16.mxu1 %v7282_v39 }
 0x3db   :  { %5482 = vmatpush1.bf16.msra.mxu0 %v7204_v49  ;;  %5514 = vmatpush1.bf16.msra.mxu1 %v7287_v46 }
 0x3dc   :  { %5484 = vmatprep.subr.bf16.mxu0 %v7207_v50  ;;  %5516 = vmatprep.subr.bf16.mxu1 %v7290_v47  ;;  %v8897_v47 = vld [vmem:[#allocation51_spill] sm:$0xff] }
 0x3df   :  { %5486 = vmatpush1.bf16.msra.mxu0 %v7217_v56  ;;  %5518 = vmatpush1.bf16.msra.mxu1 %v7293_v54  ;;  %v8898_v56 = vld [vmem:[#allocation52_spill] sm:$0xff]  ;;  %v8931_v54 = vld [vmem:[#allocation117_spill] sm:$0xff] }
 0x3e0   :  { %5488 = vmatprep.subr.bf16.mxu0 %v7220_v57  ;;  %5520 = vmatprep.subr.bf16.mxu1 %v7296_v55  ;;  %v8899_v57 = vld [vmem:[#allocation53_spill] sm:$0xff]  ;;  %v8900_v55 = vld [vmem:[#allocation54_spill] sm:$0xff] }
 0x3e3   :  { %5490 = vmatpush1.bf16.msra.mxu0 %v7230_v63  ;;  %5522 = vmatpush1.bf16.msra.mxu1 %v7299_v62  ;;  %v8901_v63 = vld [vmem:[#allocation55_spill] sm:$0xff]  ;;  %v8902_v62 = vld [vmem:[#allocation56_spill] sm:$0xff] }
 0x3e4   :  { %5492 = vmatprep.subr.bf16.mxu0 %v8893_v26  ;;  %5524 = vmatprep.subr.bf16.mxu1 %v8894_v18  ;;  %v8912_v18 = vld [vmem:[#allocation66_spill] sm:$0xff]  ;;  %v8913_v26 = vld [vmem:[#allocation67_spill] sm:$0xff] }
 0x3e7   :  { %5494 = vmatpush1.bf16.msra.mxu0 %v8895_v27  ;;  %5526 = vmatpush1.bf16.msra.mxu1 %v8896_v20  ;;  %v8903_v27 = vld [vmem:[#allocation57_spill] sm:$0xff]  ;;  %v8904_v20 = vld [vmem:[#allocation58_spill] sm:$0xff] }
 0x3e8   :  { %5528 = vmatprep.subr.bf16.mxu0 %v8897_v47  ;;  %5560 = vmatprep.subr.bf16.mxu1 %v8898_v56  ;;  %v8905_v47 = vld [vmem:[#allocation59_spill] sm:$0xff]  ;;  %v8906_v56 = vld [vmem:[#allocation60_spill] sm:$0xff] }
 0x3ea   :  { %2169 = vmatmul.mubr.f32.vlgmr.msra.gmra.mrb[6].mxu0 %v1786_v40  ;;  %2240 = vmatmul.mubr.f32.vlgmr.msra.gmra.mrb[6].mxu1 %v1786_v40  ;;  %v8907_v40 = vld [vmem:[#allocation61_spill] sm:$0xff] }
 0x3eb   :  { %5530 = vmatpush1.bf16.msra.mxu0 %v8899_v57  ;;  %5562 = vmatpush1.bf16.msra.mxu1 %v8900_v55  ;;  %v8908_v57 = vld [vmem:[#allocation62_spill] sm:$0xff]  ;;  %v8909_v55 = vld [vmem:[#allocation63_spill] sm:$0xff] }
 0x3ec   :  { %5532 = vmatprep.subr.bf16.mxu0 %v8901_v63  ;;  %5564 = vmatprep.subr.bf16.mxu1 %v8902_v62  ;;  %v8910_v63 = vld [vmem:[#allocation64_spill] sm:$0xff]  ;;  %v8911_v62 = vld [vmem:[#allocation65_spill] sm:$0xff] }
 0x3ed   :  { %2338 = vmatprep.mubr.f32.mxu0 %v8752_v61  ;;  %2409 = vmatprep.mubr.f32.mxu1 %v8752_v61 }
 0x3ef   :  { %5534 = vmatpush1.bf16.msra.mxu0 %v8903_v27  ;;  %5566 = vmatpush1.bf16.msra.mxu1 %v8904_v20  ;;  %v8914_v27 = vld [vmem:[#allocation68_spill] sm:$0xff]  ;;  %v8915_v20 = vld [vmem:[#allocation69_spill] sm:$0xff] }
 0x3f0   :  { %5536 = vmatprep.subr.bf16.mxu0 %v8905_v47  ;;  %5568 = vmatprep.subr.bf16.mxu1 %v8906_v56  ;;  %v8916_v47 = vld [vmem:[#allocation70_spill] sm:$0xff]  ;;  %v8917_v56 = vld [vmem:[#allocation71_spill] sm:$0xff] }
 0x3f3   :  { %5538 = vmatpush1.bf16.msra.mxu0 %v8907_v40  ;;  %5570 = vmatpush1.bf16.msra.mxu1 %v8908_v57  ;;  %v8918_v40 = vld [vmem:[#allocation72_spill] sm:$0xff]  ;;  %v8919_v57 = vld [vmem:[#allocation73_spill] sm:$0xff] }
 0x3f4   :  { %5540 = vmatprep.subr.bf16.mxu0 %v8909_v55  ;;  %5572 = vmatprep.subr.bf16.mxu1 %v8910_v63  ;;  %v8920_v55 = vld [vmem:[#allocation74_spill] sm:$0xff]  ;;  %v8921_v63 = vld [vmem:[#allocation75_spill] sm:$0xff] }
 0x3f7   :  { %5542 = vmatpush1.bf16.msra.mxu0 %v8911_v62  ;;  %5574 = vmatpush1.bf16.msra.mxu1 %v8912_v18  ;;  %v8922_v62 = vld [vmem:[#allocation76_spill] sm:$0xff]  ;;  %v8923_v18 = vld [vmem:[#allocation77_spill] sm:$0xff] }
 0x3f8   :  { %5544 = vmatprep.subr.bf16.mxu0 %v8913_v26  ;;  %5576 = vmatprep.subr.bf16.mxu1 %v8914_v27  ;;  %v8924_v26 = vld [vmem:[#allocation78_spill] sm:$0xff]  ;;  %v8925_v27 = vld [vmem:[#allocation79_spill] sm:$0xff] }
 0x3fb   :  { %5546 = vmatpush1.bf16.msra.mxu0 %v8915_v20  ;;  %5578 = vmatpush1.bf16.msra.mxu1 %v8916_v47  ;;  %v8926_v20 = vld [vmem:[#allocation80_spill] sm:$0xff]  ;;  %v8927_v47 = vld [vmem:[#allocation81_spill] sm:$0xff] }
 0x3fc   :  { %5548 = vmatprep.subr.bf16.mxu0 %v8917_v56  ;;  %5580 = vmatprep.subr.bf16.mxu1 %v8918_v40  ;;  %v8928_v56 = vld [vmem:[#allocation82_spill] sm:$0xff]  ;;  %v8929_v40 = vld [vmem:[#allocation83_spill] sm:$0xff] }
 0x3ff   :  { %5550 = vmatpush1.bf16.msra.mxu0 %v8919_v57  ;;  %5582 = vmatpush1.bf16.msra.mxu1 %v8920_v55  ;;  %v8930_v57 = vld [vmem:[#allocation84_spill] sm:$0xff] }
 0x400   :  { %5552 = vmatprep.subr.bf16.mxu0 %v8921_v63  ;;  %5584 = vmatprep.subr.bf16.mxu1 %v8922_v62 }
 0x403   :  { %5554 = vmatpush1.bf16.msra.mxu0 %v8923_v18  ;;  %5586 = vmatpush1.bf16.msra.mxu1 %v8924_v26 }
 0x404   :  { %5556 = vmatprep.subr.bf16.mxu0 %v8925_v27  ;;  %5588 = vmatprep.subr.bf16.mxu1 %v8926_v20 }
 0x407   :  { %5558 = vmatpush1.bf16.msra.mxu0 %v8927_v47  ;;  %5590 = vmatpush1.bf16.msra.mxu1 %v8928_v56 }
 0x408   :  { %5592 = vmatprep.subr.bf16.mxu0 %v8929_v40  ;;  %5624 = vmatprep.subr.bf16.mxu1 %v8930_v57 }
 0x49d   :  { %v1995_v55 = vpop.f32.mrb[20].mxu0  ;;  %v2066_v63 = vpop.f32.mrb[22].mxu1 }
 0x49e   :  { %v2071_v62 = vadd.f32 %v1995_v55, %v8931_v54  ;;  %v1997_v50 = vpop.f32.mrb[21].mxu0  ;;  %v2068_v18 = vpop.f32.mrb[23].mxu1  ;;  %v2073_v56 = vadd.f32 %v2066_v63, %v8871_v6 }
 0x49f   :  { %v2072_v26 = vadd.f32 %v1997_v50, %v7618_v59  ;;  %v2074_v47 = vadd.f32 %v2068_v18, %v8870_v52 }
 0x4a0   :  { %v4777_v46 = vmul.f32 -1.442695, %v2071_v62 }
 0x4a1   :  { %v4778_v27 = vmul.f32 -1.442695, %v2072_v26  ;;  %v4779_v20 = vmul.f32 -1.442695, %v2074_v47 }
 0x4a2   :  { %6643 = vpow2.f32 %v4777_v46 }
 0x4a3   :  { %6645 = vpow2.f32 %v4778_v27 }
 0x4a4   :  { %6647 = vpow2.f32 %v4779_v20 }
 0x4a5   :  { %6649 = vtanh.f32 %v2073_v56 }
 0x4ac   :  { %v6644_v40 = vpop.eup %6643 }
 0x4ad   :  { %v6646_v49 = vpop.eup %6645  ;;  %v2078_v57 = vadd.f32 1.0, %v6644_v40 }
 0x4ae   :  { %v2084_v39 = vadd.f32 1.0, %v6646_v49  ;;  %v6648_v55 = vpop.eup %6647 }
 0x4af   :  { %6651 = vrcp.f32 %v2078_v57  ;;  %v6650_v54 = vpop.eup %6649  ;;  %v2091_v46 = vadd.f32 1.0, %v6648_v55 }
 0x4b0   :  { %6653 = vrcp.f32 %v2084_v39 }
 0x4b1   :  { %6655 = vrcp.f32 %v2091_v46 }
 0x4b9   :  { %v6652_v50 = vpop.eup %6651 }
 0x4ba   :  { %v6654_v62 = vpop.eup %6653  ;;  %v2095_v26 = vmul.f32 %v6652_v50, %v6650_v54 }
 0x4bb   :  { %v2094_v27 = vmul.f32 %v6654_v62, %v7754_v36  ;;  %v6656_v36 = vpop.eup %6655 }
 0x4bd   :  { %v7876_v18 = vadd.f32 %v2095_v26, %v2094_v27  ;;  %v2170_v47 = vpop.f32.mrb[6].mxu0  ;;  %v2241_v63 = vpop.f32.mrb[6].mxu1 }
 0x4be   :  { %v6463_v40 = vadd.f32 %v2170_v47, %v8811_v34  ;;  %v2172_v20 = vpop.f32.mrb[7].mxu0  ;;  %v2243_v56 = vpop.f32.mrb[7].mxu1  ;;  %v6479_v62 = vadd.f32 %v2241_v63, %v7530_v21  ;;  %v8933_v63 = vld [vmem:[#allocation89_spill] sm:$0xff] }
 0x4bf   :  { %v6464_v49 = vadd.f32 %v2172_v20, %v8812_v19  ;;  %6657 = vtanh.f32 %v7876_v18  ;;  %v6480_v54 = vadd.f32 %v2243_v56, %v7534_v11  ;;  %v8934_v20 = vld [vmem:[#allocation90_spill] sm:$0xff]  ;;  %v8935_v56 = vld [vmem:[#allocation91_spill] sm:$0xff] }
 0x4c0   :  { %v4780_v57 = vmul.f32 -1.442695, %v6463_v40 }
 0x4c1   :  { %v4781_v39 = vmul.f32 -1.442695, %v6464_v49  ;;  %v4782_v50 = vmul.f32 -1.442695, %v6480_v54  ;;  %v8936_v49 = vld [vmem:[#allocation92_spill] sm:$0xff]  ;;  %v8939_v54 = vld [vmem:[#allocation95_spill] sm:$0xff] }
 0x4c2   :  { %6659 = vpow2.f32 %v4780_v57  ;;  %v8937_v57 = vld [vmem:[#allocation93_spill] sm:$0xff] }
 0x4c3   :  { %6661 = vpow2.f32 %v4781_v39  ;;  %v8938_v39 = vld [vmem:[#allocation94_spill] sm:$0xff] }
 0x4c4   :  { %6663 = vpow2.f32 %v4782_v50 }
 0x4c5   :  { %6665 = vtanh.f32 %v6479_v62 }
 0x4c9   :  { %v6658_v55 = vpop.eup %6657 }
 0x4ca   :  { %v7883_v26 = vmul.f32 %v6658_v55, %v6656_v36  ;;  %v8940_v36 = vld [vmem:[#allocation96_spill] sm:$0xff] }
 0x4cc   :  { %8932 = vst [vmem:[#allocation98_spill] sm:$0xff] %v7883_v26  ;;  %v6660_v46 = vpop.eup %6659  ;;  %2339 = vmatmul.mubr.f32.vlgmr.msra.gmra.mrb[22].mxu0 %v7883_v26  ;;  %2410 = vmatmul.mubr.f32.vlgmr.msra.gmra.mrb[24].mxu1 %v7883_v26 }
 0x4cd   :  { %v6662_v27 = vpop.eup %6661  ;;  %v2253_v47 = vadd.f32 1.0, %v6660_v46  ;;  %5594 = vmatpush1.bf16.msra.mxu0 %v8873_v9  ;;  %5626 = vmatpush1.bf16.msra.mxu1 %v8874_v5  ;;  %v8941_v46 = vld [vmem:[#allocation97_spill] sm:$0xff] }
 0x4ce   :  { %v2259_v40 = vadd.f32 1.0, %v6662_v27  ;;  %5596 = vmatprep.subr.bf16.mxu0 %v8875_v2  ;;  %5628 = vmatprep.subr.bf16.mxu1 %v8876_v1  ;;  %v6664_v55 = vpop.eup %6663 }
 0x4cf   :  { %6667 = vrcp.f32 %v2253_v47  ;;  %2480 = vmatprep.mubr.f32.mxu0 %v8752_v61  ;;  %2551 = vmatprep.mubr.f32.mxu1 %v8752_v61  ;;  %v6666_v50 = vpop.eup %6665 }
 0x4d0   :  { %6669 = vrcp.f32 %v2259_v40  ;;  %v2266_v40 = vadd.f32 1.0, %v6664_v55 }
 0x4d1   :  { %5598 = vmatpush1.bf16.msra.mxu0 %v8933_v63  ;;  %5630 = vmatpush1.bf16.msra.mxu1 %v8934_v20 }
 0x4d2   :  { %5600 = vmatprep.subr.bf16.mxu0 %v8935_v56  ;;  %5632 = vmatprep.subr.bf16.mxu1 %v8936_v49  ;;  %6671 = vrcp.f32 %v2266_v40  ;;  %v8946_v40 = vld [vmem:[#allocation45_spill] sm:$0xff] }
 0x4d5   :  { %5602 = vmatpush1.bf16.msra.mxu0 %v8937_v57  ;;  %5634 = vmatpush1.bf16.msra.mxu1 %v8938_v39 }
 0x4d6   :  { %5604 = vmatprep.subr.bf16.mxu0 %v8939_v54  ;;  %5636 = vmatprep.subr.bf16.mxu1 %v8940_v36 }
 0x4d9   :  { %v6668_v62 = vpop.eup %6667  ;;  %5606 = vmatpush1.bf16.msra.mxu0 %v8941_v46  ;;  %5638 = vmatpush1.bf16.msra.mxu1 %v8827_v13 }
 0x4da   :  { %v6670_v27 = vpop.eup %6669  ;;  %v2270_v47 = vmul.f32 %v6668_v62, %v6666_v50  ;;  %5608 = vmatprep.subr.bf16.mxu0 %v8828_v10  ;;  %5640 = vmatprep.subr.bf16.mxu1 %v8829_v3  ;;  %v8942_v50 = vld [vmem:[#allocation43_spill] sm:$0xff] }
 0x4db   :  { %v2269_v26 = vmul.f32 %v6670_v27, %v7784_v30  ;;  %v8943_v62 = vld [vmem:[#allocation31_spill] sm:$0xff]  ;;  %v8944_v27 = vld [vmem:[#allocation44_spill] sm:$0xff] }
 0x4dc   :  { %v6672_v30 = vpop.eup %6671 }
 0x4dd   :  { %v7906_v39 = vadd.f32 %v2270_v47, %v2269_v26  ;;  %5610 = vmatpush1.bf16.msra.mxu0 %v8886_v44  ;;  %5642 = vmatpush1.bf16.msra.mxu1 %v8887_v12  ;;  %v8945_v47 = vld [vmem:[#allocation32_spill] sm:$0xff] }
 0x4de   :  { %5612 = vmatprep.subr.bf16.mxu0 %v8888_v51  ;;  %5644 = vmatprep.subr.bf16.mxu1 %v8889_v7 }
 0x4df   :  { %6673 = vtanh.f32 %v7906_v39 }
 0x4e1   :  { %5614 = vmatpush1.bf16.msra.mxu0 %v8890_v28  ;;  %5646 = vmatpush1.bf16.msra.mxu1 %v8891_v45 }
 0x4e2   :  { %5616 = vmatprep.subr.bf16.mxu0 %v8892_v60  ;;  %5648 = vmatprep.subr.bf16.mxu1 %v8837_v41 }
 0x4e5   :  { %5618 = vmatpush1.bf16.msra.mxu0 %v8838_v0  ;;  %5650 = vmatpush1.bf16.msra.mxu1 %v8839_v48 }
 0x4e6   :  { %5620 = vmatprep.subr.bf16.mxu0 %v8840_v35  ;;  %5652 = vmatprep.subr.bf16.mxu1 %v8841_v58 }
 0x4e9   :  { %v6674_v26 = vpop.eup %6673  ;;  %5622 = vmatpush1.bf16.msra.mxu0 %v8842_v8  ;;  %5654 = vmatpush1.bf16.msra.mxu1 %v8843_v53 }
 0x4ea   :  { %v2273_v55 = vmul.f32 %v6674_v26, %v6672_v30  ;;  %5656 = vmatprep.subr.bf16.mxu0 %v8844_v4  ;;  %5688 = vmatprep.subr.bf16.mxu1 %v8845_v37  ;;  %v8947_v30 = vld [vmem:[#allocation33_spill] sm:$0xff]  ;;  %v8948_v26 = vld [vmem:[#allocation46_spill] sm:$0xff] }
 0x4ec   :  { %2481 = vmatmul.mubr.f32.vlgmr.msra.gmra.mrb[22].mxu0 %v2273_v55  ;;  %2552 = vmatmul.mubr.f32.vlgmr.msra.gmra.mrb[24].mxu1 %v2273_v55 }
 0x4ed   :  { %5658 = vmatpush1.bf16.msra.mxu0 %v7148_v15  ;;  %5690 = vmatpush1.bf16.msra.mxu1 %v7253_v14 }
 0x4ee   :  { %5660 = vmatprep.subr.bf16.mxu0 %v7151_v16  ;;  %5692 = vmatprep.subr.bf16.mxu1 %v7256_v17 }
 0x4ef   :  { %2655 = vmatprep.mubr.f32.mxu0 %v8752_v61  ;;  %2726 = vmatprep.mubr.f32.mxu1 %v8752_v61 }
 0x4f1   :  { %5662 = vmatpush1.bf16.msra.mxu0 %v7159_v22  ;;  %5694 = vmatpush1.bf16.msra.mxu1 %v7262_v24 }
 0x4f2   :  { %5664 = vmatprep.subr.bf16.mxu0 %v7162_v23  ;;  %5696 = vmatprep.subr.bf16.mxu1 %v7266_v25 }
 0x4f5   :  { %5666 = vmatpush1.bf16.msra.mxu0 %v7170_v29  ;;  %5698 = vmatpush1.bf16.msra.mxu1 %v7271_v31 }
 0x4f6   :  { %5668 = vmatprep.subr.bf16.mxu0 %v7173_v32  ;;  %5700 = vmatprep.subr.bf16.mxu1 %v7274_v33  ;;  %v8949_v33 = vld [vmem:[#allocation34_spill] sm:$0xff] }
 0x4f9   :  { %5670 = vmatpush1.bf16.msra.mxu0 %v7193_v42  ;;  %5702 = vmatpush1.bf16.msra.mxu1 %v7279_v38  ;;  %v8950_v42 = vld [vmem:[#allocation47_spill] sm:$0xff] }
 0x4fa   :  { %5672 = vmatprep.subr.bf16.mxu0 %v7196_v43  ;;  %5704 = vmatprep.subr.bf16.mxu1 %v8942_v50  ;;  %v8951_v38 = vld [vmem:[#allocation35_spill] sm:$0xff]  ;;  %v8952_v43 = vld [vmem:[#allocation48_spill] sm:$0xff] }
 0x4fb   :  { %v8953_v50 = vld [vmem:[#allocation36_spill] sm:$0xff] }
 0x4fd   :  { %5674 = vmatpush1.bf16.msra.mxu0 %v8943_v62  ;;  %5706 = vmatpush1.bf16.msra.mxu1 %v8944_v27  ;;  %v8954_v62 = vld [vmem:[#allocation49_spill] sm:$0xff] }
 0x4fe   :  { %5676 = vmatprep.subr.bf16.mxu0 %v8945_v47  ;;  %5708 = vmatprep.subr.bf16.mxu1 %v8946_v40  ;;  %v8955_v27 = vld [vmem:[#allocation37_spill] sm:$0xff]  ;;  %v8956_v47 = vld [vmem:[#allocation50_spill] sm:$0xff]  ;;  %v8957_v40 = vld [vmem:[#allocation51_spill] sm:$0xff] }
 0x501   :  { %5678 = vmatpush1.bf16.msra.mxu0 %v8947_v30  ;;  %5710 = vmatpush1.bf16.msra.mxu1 %v8948_v26  ;;  %v8958_v30 = vld [vmem:[#allocation52_spill] sm:$0xff]  ;;  %v8991_v26 = vld [vmem:[#allocation117_spill] sm:$0xff] }
 0x502   :  { %5680 = vmatprep.subr.bf16.mxu0 %v8949_v33  ;;  %5712 = vmatprep.subr.bf16.mxu1 %v8950_v42  ;;  %v8959_v33 = vld [vmem:[#allocation53_spill] sm:$0xff]  ;;  %v8960_v42 = vld [vmem:[#allocation54_spill] sm:$0xff] }
 0x505   :  { %5682 = vmatpush1.bf16.msra.mxu0 %v8951_v38  ;;  %5714 = vmatpush1.bf16.msra.mxu1 %v8952_v43  ;;  %v8961_v38 = vld [vmem:[#allocation55_spill] sm:$0xff]  ;;  %v8962_v43 = vld [vmem:[#allocation56_spill] sm:$0xff] }
 0x506   :  { %5684 = vmatprep.subr.bf16.mxu0 %v8953_v50  ;;  %5716 = vmatprep.subr.bf16.mxu1 %v8954_v62  ;;  %v8972_v62 = vld [vmem:[#allocation66_spill] sm:$0xff]  ;;  %v8973_v50 = vld [vmem:[#allocation67_spill] sm:$0xff] }
 0x509   :  { %5686 = vmatpush1.bf16.msra.mxu0 %v8955_v27  ;;  %5718 = vmatpush1.bf16.msra.mxu1 %v8956_v47  ;;  %v8963_v27 = vld [vmem:[#allocation57_spill] sm:$0xff]  ;;  %v8964_v47 = vld [vmem:[#allocation58_spill] sm:$0xff] }
 0x50a   :  { %5720 = vmatprep.subr.bf16.mxu0 %v8957_v40  ;;  %5752 = vmatprep.subr.bf16.mxu1 %v8958_v30  ;;  %v8965_v40 = vld [vmem:[#allocation59_spill] sm:$0xff]  ;;  %v8966_v30 = vld [vmem:[#allocation60_spill] sm:$0xff] }
 0x50c   :  { %2656 = vmatmul.mubr.f32.vlgmr.msra.gmra.mrb[8].mxu0 %v2273_v55  ;;  %2727 = vmatmul.mubr.f32.vlgmr.msra.gmra.mrb[8].mxu1 %v2273_v55  ;;  %v8967_v55 = vld [vmem:[#allocation61_spill] sm:$0xff] }
 0x50d   :  { %5722 = vmatpush1.bf16.msra.mxu0 %v8959_v33  ;;  %5754 = vmatpush1.bf16.msra.mxu1 %v8960_v42  ;;  %v8968_v33 = vld [vmem:[#allocation62_spill] sm:$0xff]  ;;  %v8969_v42 = vld [vmem:[#allocation63_spill] sm:$0xff] }
 0x50e   :  { %5724 = vmatprep.subr.bf16.mxu0 %v8961_v38  ;;  %5756 = vmatprep.subr.bf16.mxu1 %v8962_v43  ;;  %v8970_v38 = vld [vmem:[#allocation64_spill] sm:$0xff]  ;;  %v8971_v43 = vld [vmem:[#allocation65_spill] sm:$0xff] }
 0x50f   :  { %2825 = vmatprep.mubr.f32.mxu0 %v8752_v61  ;;  %2896 = vmatprep.mubr.f32.mxu1 %v8752_v61 }
 0x511   :  { %5726 = vmatpush1.bf16.msra.mxu0 %v8963_v27  ;;  %5758 = vmatpush1.bf16.msra.mxu1 %v8964_v47  ;;  %v8974_v27 = vld [vmem:[#allocation68_spill] sm:$0xff]  ;;  %v8975_v47 = vld [vmem:[#allocation69_spill] sm:$0xff] }
 0x512   :  { %5728 = vmatprep.subr.bf16.mxu0 %v8965_v40  ;;  %5760 = vmatprep.subr.bf16.mxu1 %v8966_v30  ;;  %v8976_v40 = vld [vmem:[#allocation70_spill] sm:$0xff]  ;;  %v8977_v30 = vld [vmem:[#allocation71_spill] sm:$0xff] }
 0x515   :  { %5730 = vmatpush1.bf16.msra.mxu0 %v8967_v55  ;;  %5762 = vmatpush1.bf16.msra.mxu1 %v8968_v33  ;;  %v8978_v55 = vld [vmem:[#allocation72_spill] sm:$0xff]  ;;  %v8979_v33 = vld [vmem:[#allocation73_spill] sm:$0xff] }
 0x516   :  { %5732 = vmatprep.subr.bf16.mxu0 %v8969_v42  ;;  %5764 = vmatprep.subr.bf16.mxu1 %v8970_v38  ;;  %v8980_v42 = vld [vmem:[#allocation74_spill] sm:$0xff]  ;;  %v8981_v38 = vld [vmem:[#allocation75_spill] sm:$0xff] }
 0x519   :  { %5734 = vmatpush1.bf16.msra.mxu0 %v8971_v43  ;;  %5766 = vmatpush1.bf16.msra.mxu1 %v8972_v62  ;;  %v8982_v43 = vld [vmem:[#allocation76_spill] sm:$0xff]  ;;  %v8983_v62 = vld [vmem:[#allocation77_spill] sm:$0xff] }
 0x51a   :  { %5736 = vmatprep.subr.bf16.mxu0 %v8973_v50  ;;  %5768 = vmatprep.subr.bf16.mxu1 %v8974_v27  ;;  %v8984_v50 = vld [vmem:[#allocation78_spill] sm:$0xff]  ;;  %v8985_v27 = vld [vmem:[#allocation79_spill] sm:$0xff] }
 0x51d   :  { %5738 = vmatpush1.bf16.msra.mxu0 %v8975_v47  ;;  %5770 = vmatpush1.bf16.msra.mxu1 %v8976_v40  ;;  %v8986_v47 = vld [vmem:[#allocation80_spill] sm:$0xff]  ;;  %v8987_v40 = vld [vmem:[#allocation81_spill] sm:$0xff] }
 0x51e   :  { %5740 = vmatprep.subr.bf16.mxu0 %v8977_v30  ;;  %5772 = vmatprep.subr.bf16.mxu1 %v8978_v55  ;;  %v8988_v30 = vld [vmem:[#allocation82_spill] sm:$0xff]  ;;  %v8989_v55 = vld [vmem:[#allocation83_spill] sm:$0xff] }
 0x521   :  { %5742 = vmatpush1.bf16.msra.mxu0 %v8979_v33  ;;  %5774 = vmatpush1.bf16.msra.mxu1 %v8980_v42  ;;  %v8990_v33 = vld [vmem:[#allocation84_spill] sm:$0xff] }
 0x522   :  { %5744 = vmatprep.subr.bf16.mxu0 %v8981_v38  ;;  %5776 = vmatprep.subr.bf16.mxu1 %v8982_v43 }
 0x525   :  { %5746 = vmatpush1.bf16.msra.mxu0 %v8983_v62  ;;  %5778 = vmatpush1.bf16.msra.mxu1 %v8984_v50 }
 0x526   :  { %5748 = vmatprep.subr.bf16.mxu0 %v8985_v27  ;;  %5780 = vmatprep.subr.bf16.mxu1 %v8986_v47 }
 0x529   :  { %5750 = vmatpush1.bf16.msra.mxu0 %v8987_v40  ;;  %5782 = vmatpush1.bf16.msra.mxu1 %v8988_v30 }
 0x52a   :  { %5784 = vmatprep.subr.bf16.mxu0 %v8989_v55  ;;  %5816 = vmatprep.subr.bf16.mxu1 %v8990_v33 }
 0x5bf   :  { %v2482_v42 = vpop.f32.mrb[22].mxu0  ;;  %v2553_v38 = vpop.f32.mrb[24].mxu1 }
 0x5c0   :  { %v2558_v43 = vadd.f32 %v2482_v42, %v8991_v26  ;;  %v2484_v32 = vpop.f32.mrb[23].mxu0  ;;  %v2555_v62 = vpop.f32.mrb[25].mxu1  ;;  %v2560_v30 = vadd.f32 %v2553_v38, %v8871_v6 }
 0x5c1   :  { %v2559_v50 = vadd.f32 %v2484_v32, %v7618_v59  ;;  %v2561_v40 = vadd.f32 %v2555_v62, %v8870_v52 }
 0x5c2   :  { %v4783_v31 = vmul.f32 -1.442695, %v2558_v43 }
 0x5c3   :  { %v4784_v27 = vmul.f32 -1.442695, %v2559_v50  ;;  %v4785_v47 = vmul.f32 -1.442695, %v2561_v40 }
 0x5c4   :  { %6675 = vpow2.f32 %v4783_v31 }
 0x5c5   :  { %6677 = vpow2.f32 %v4784_v27 }
 0x5c6   :  { %6679 = vpow2.f32 %v4785_v47 }
 0x5c7   :  { %6681 = vtanh.f32 %v2560_v30 }
 0x5ce   :  { %v6676_v55 = vpop.eup %6675 }
 0x5cf   :  { %v6678_v29 = vpop.eup %6677  ;;  %v2565_v33 = vadd.f32 1.0, %v6676_v55 }
 0x5d0   :  { %v2571_v25 = vadd.f32 1.0, %v6678_v29  ;;  %v6680_v42 = vpop.eup %6679 }
 0x5d1   :  { %6683 = vrcp.f32 %v2565_v33  ;;  %v6682_v26 = vpop.eup %6681  ;;  %v2578_v31 = vadd.f32 1.0, %v6680_v42 }
 0x5d2   :  { %6685 = vrcp.f32 %v2571_v25 }
 0x5d3   :  { %6687 = vrcp.f32 %v2578_v31 }
 0x5db   :  { %v6684_v32 = vpop.eup %6683 }
 0x5dc   :  { %v6686_v43 = vpop.eup %6685  ;;  %v2582_v50 = vmul.f32 %v6684_v32, %v6682_v26 }
 0x5dd   :  { %v2581_v27 = vmul.f32 %v6686_v43, %v7876_v18  ;;  %v6688_v18 = vpop.eup %6687 }
 0x5df   :  { %v7998_v62 = vadd.f32 %v2582_v50, %v2581_v27  ;;  %v2657_v40 = vpop.f32.mrb[8].mxu0  ;;  %v2728_v38 = vpop.f32.mrb[8].mxu1 }
 0x5e0   :  { %v6465_v55 = vadd.f32 %v2657_v40, %v8811_v34  ;;  %v2659_v47 = vpop.f32.mrb[9].mxu0  ;;  %v2730_v30 = vpop.f32.mrb[9].mxu1  ;;  %v6481_v43 = vadd.f32 %v2728_v38, %v7530_v21  ;;  %v8993_v38 = vld [vmem:[#allocation94_spill] sm:$0xff] }
 0x5e1   :  { %v6466_v29 = vadd.f32 %v2659_v47, %v8812_v19  ;;  %6689 = vtanh.f32 %v7998_v62  ;;  %v6482_v26 = vadd.f32 %v2730_v30, %v7534_v11 }
 0x5e2   :  { %v4786_v25 = vmul.f32 -1.442695, %v6465_v55 }
 0x5e3   :  { %v4787_v33 = vmul.f32 -1.442695, %v6466_v29  ;;  %v4788_v32 = vmul.f32 -1.442695, %v6482_v26 }
 0x5e4   :  { %6691 = vpow2.f32 %v4786_v25 }
 0x5e5   :  { %6693 = vpow2.f32 %v4787_v33 }
 0x5e6   :  { %6695 = vpow2.f32 %v4788_v32 }
 0x5e7   :  { %6697 = vtanh.f32 %v6481_v43 }
 0x5eb   :  { %v6690_v42 = vpop.eup %6689 }
 0x5ec   :  { %v8005_v50 = vmul.f32 %v6690_v42, %v6688_v18 }
 0x5ee   :  { %8992 = vst [vmem:[#allocation99_spill] sm:$0xff] %v8005_v50  ;;  %v6692_v31 = vpop.eup %6691  ;;  %2826 = vmatmul.mubr.f32.vlgmr.msra.gmra.mrb[24].mxu0 %v8005_v50  ;;  %2897 = vmatmul.mubr.f32.vlgmr.msra.gmra.mrb[26].mxu1 %v8005_v50  ;;  %v9007_v50 = vld [vmem:[#allocation33_spill] sm:$0xff] }
 0x5ef   :  { %v6694_v27 = vpop.eup %6693  ;;  %v2740_v40 = vadd.f32 1.0, %v6692_v31  ;;  %5786 = vmatpush1.bf16.msra.mxu0 %v8873_v9  ;;  %5818 = vmatpush1.bf16.msra.mxu1 %v8874_v5  ;;  %v8994_v31 = vld [vmem:[#allocation39_spill] sm:$0xff] }
 0x5f0   :  { %v2746_v55 = vadd.f32 1.0, %v6694_v27  ;;  %5788 = vmatprep.subr.bf16.mxu0 %v8875_v2  ;;  %5820 = vmatprep.subr.bf16.mxu1 %v8876_v1  ;;  %v6696_v47 = vpop.eup %6695  ;;  %v8995_v27 = vld [vmem:[#allocation27_spill] sm:$0xff] }
 0x5f1   :  { %6699 = vrcp.f32 %v2740_v40  ;;  %2967 = vmatprep.mubr.f32.mxu0 %v8752_v61  ;;  %3038 = vmatprep.mubr.f32.mxu1 %v8752_v61  ;;  %v6698_v30 = vpop.eup %6697  ;;  %v2753_v26 = vadd.f32 1.0, %v6696_v47  ;;  %v8996_v40 = vld [vmem:[#allocation40_spill] sm:$0xff]  ;;  %v8998_v47 = vld [vmem:[#allocation41_spill] sm:$0xff] }
 0x5f2   :  { %6701 = vrcp.f32 %v2746_v55  ;;  %v8997_v55 = vld [vmem:[#allocation28_spill] sm:$0xff] }
 0x5f3   :  { %5790 = vmatpush1.bf16.msra.mxu0 %v8933_v63  ;;  %5822 = vmatpush1.bf16.msra.mxu1 %v8934_v20  ;;  %6703 = vrcp.f32 %v2753_v26  ;;  %v9003_v26 = vld [vmem:[#allocation31_spill] sm:$0xff] }
 0x5f4   :  { %5792 = vmatprep.subr.bf16.mxu0 %v8935_v56  ;;  %5824 = vmatprep.subr.bf16.mxu1 %v8936_v49 }
 0x5f7   :  { %5794 = vmatpush1.bf16.msra.mxu0 %v8937_v57  ;;  %5826 = vmatpush1.bf16.msra.mxu1 %v8993_v38 }
 0x5f8   :  { %5796 = vmatprep.subr.bf16.mxu0 %v8939_v54  ;;  %5828 = vmatprep.subr.bf16.mxu1 %v8940_v36 }
 0x5fb   :  { %v6700_v29 = vpop.eup %6699  ;;  %5798 = vmatpush1.bf16.msra.mxu0 %v8941_v46  ;;  %5830 = vmatpush1.bf16.msra.mxu1 %v8827_v13 }
 0x5fc   :  { %v6702_v25 = vpop.eup %6701  ;;  %v2757_v33 = vmul.f32 %v6700_v29, %v6698_v30  ;;  %5800 = vmatprep.subr.bf16.mxu0 %v8828_v10  ;;  %5832 = vmatprep.subr.bf16.mxu1 %v8829_v3  ;;  %v8999_v30 = vld [vmem:[#allocation29_spill] sm:$0xff]  ;;  %v9000_v29 = vld [vmem:[#allocation42_spill] sm:$0xff] }
 0x5fd   :  { %v2756_v18 = vmul.f32 %v6702_v25, %v7906_v39  ;;  %v6704_v39 = vpop.eup %6703  ;;  %v9001_v25 = vld [vmem:[#allocation30_spill] sm:$0xff] }
 0x5ff   :  { %v8028_v42 = vadd.f32 %v2757_v33, %v2756_v18  ;;  %5802 = vmatpush1.bf16.msra.mxu0 %v8886_v44  ;;  %5834 = vmatpush1.bf16.msra.mxu1 %v8887_v12  ;;  %v9002_v33 = vld [vmem:[#allocation43_spill] sm:$0xff]  ;;  %v9004_v18 = vld [vmem:[#allocation44_spill] sm:$0xff] }
 0x600   :  { %5804 = vmatprep.subr.bf16.mxu0 %v8888_v51  ;;  %5836 = vmatprep.subr.bf16.mxu1 %v8889_v7 }
 0x601   :  { %6705 = vtanh.f32 %v8028_v42 }
 0x603   :  { %5806 = vmatpush1.bf16.msra.mxu0 %v8890_v28  ;;  %5838 = vmatpush1.bf16.msra.mxu1 %v8891_v45 }
 0x604   :  { %5808 = vmatprep.subr.bf16.mxu0 %v8892_v60  ;;  %5840 = vmatprep.subr.bf16.mxu1 %v8837_v41 }
 0x607   :  { %5810 = vmatpush1.bf16.msra.mxu0 %v8838_v0  ;;  %5842 = vmatpush1.bf16.msra.mxu1 %v8839_v48 }
 0x608   :  { %5812 = vmatprep.subr.bf16.mxu0 %v8840_v35  ;;  %5844 = vmatprep.subr.bf16.mxu1 %v8841_v58 }
 0x60b   :  { %v6706_v32 = vpop.eup %6705  ;;  %5814 = vmatpush1.bf16.msra.mxu0 %v8842_v8  ;;  %5846 = vmatpush1.bf16.msra.mxu1 %v8843_v53 }
 0x60c   :  { %5848 = vmatprep.subr.bf16.mxu0 %v8844_v4  ;;  %5880 = vmatprep.subr.bf16.mxu1 %v8845_v37  ;;  %v2760_v43 = vmul.f32 %v6706_v32, %v6704_v39  ;;  %v9005_v39 = vld [vmem:[#allocation32_spill] sm:$0xff]  ;;  %v9006_v32 = vld [vmem:[#allocation45_spill] sm:$0xff] }
 0x60e   :  { %2968 = vmatmul.mubr.f32.vlgmr.msra.gmra.mrb[24].mxu0 %v2760_v43  ;;  %3039 = vmatmul.mubr.f32.vlgmr.msra.gmra.mrb[26].mxu1 %v2760_v43 }
 0x60f   :  { %5850 = vmatpush1.bf16.msra.mxu0 %v7148_v15  ;;  %5882 = vmatpush1.bf16.msra.mxu1 %v7253_v14 }
 0x610   :  { %5852 = vmatprep.subr.bf16.mxu0 %v7151_v16  ;;  %5884 = vmatprep.subr.bf16.mxu1 %v7256_v17 }
 0x611   :  { %3142 = vmatprep.mubr.f32.mxu0 %v8752_v61  ;;  %3213 = vmatprep.mubr.f32.mxu1 %v8752_v61 }
 0x613   :  { %5854 = vmatpush1.bf16.msra.mxu0 %v7159_v22  ;;  %5886 = vmatpush1.bf16.msra.mxu1 %v7262_v24 }
 0x614   :  { %5856 = vmatprep.subr.bf16.mxu0 %v7162_v23  ;;  %5888 = vmatprep.subr.bf16.mxu1 %v8994_v31 }
 0x617   :  { %5858 = vmatpush1.bf16.msra.mxu0 %v8995_v27  ;;  %5890 = vmatpush1.bf16.msra.mxu1 %v8996_v40 }
 0x618   :  { %5860 = vmatprep.subr.bf16.mxu0 %v8997_v55  ;;  %5892 = vmatprep.subr.bf16.mxu1 %v8998_v47  ;;  %v9008_v55 = vld [vmem:[#allocation46_spill] sm:$0xff] }
 0x619   :  { %v9009_v47 = vld [vmem:[#allocation34_spill] sm:$0xff] }
 0x61b   :  { %5862 = vmatpush1.bf16.msra.mxu0 %v8999_v30  ;;  %5894 = vmatpush1.bf16.msra.mxu1 %v9000_v29  ;;  %v9010_v30 = vld [vmem:[#allocation47_spill] sm:$0xff] }
 0x61c   :  { %5864 = vmatprep.subr.bf16.mxu0 %v9001_v25  ;;  %5896 = vmatprep.subr.bf16.mxu1 %v9002_v33  ;;  %v9011_v29 = vld [vmem:[#allocation35_spill] sm:$0xff]  ;;  %v9012_v25 = vld [vmem:[#allocation48_spill] sm:$0xff] }
 0x61d   :  { %v9013_v33 = vld [vmem:[#allocation36_spill] sm:$0xff] }
 0x61f   :  { %5866 = vmatpush1.bf16.msra.mxu0 %v9003_v26  ;;  %5898 = vmatpush1.bf16.msra.mxu1 %v9004_v18  ;;  %v9014_v26 = vld [vmem:[#allocation49_spill] sm:$0xff] }
 0x620   :  { %5868 = vmatprep.subr.bf16.mxu0 %v9005_v39  ;;  %5900 = vmatprep.subr.bf16.mxu1 %v9006_v32  ;;  %v9015_v18 = vld [vmem:[#allocation37_spill] sm:$0xff]  ;;  %v9016_v39 = vld [vmem:[#allocation50_spill] sm:$0xff]  ;;  %v9017_v32 = vld [vmem:[#allocation51_spill] sm:$0xff] }
 0x623   :  { %5870 = vmatpush1.bf16.msra.mxu0 %v9007_v50  ;;  %5902 = vmatpush1.bf16.msra.mxu1 %v9008_v55  ;;  %v9018_v50 = vld [vmem:[#allocation52_spill] sm:$0xff]  ;;  %v9051_v55 = vld [vmem:[#allocation117_spill] sm:$0xff] }
 0x624   :  { %5872 = vmatprep.subr.bf16.mxu0 %v9009_v47  ;;  %5904 = vmatprep.subr.bf16.mxu1 %v9010_v30  ;;  %v9019_v47 = vld [vmem:[#allocation53_spill] sm:$0xff]  ;;  %v9020_v30 = vld [vmem:[#allocation54_spill] sm:$0xff] }
 0x627   :  { %5874 = vmatpush1.bf16.msra.mxu0 %v9011_v29  ;;  %5906 = vmatpush1.bf16.msra.mxu1 %v9012_v25  ;;  %v9021_v29 = vld [vmem:[#allocation55_spill] sm:$0xff]  ;;  %v9022_v25 = vld [vmem:[#allocation56_spill] sm:$0xff] }
 0x628   :  { %5876 = vmatprep.subr.bf16.mxu0 %v9013_v33  ;;  %5908 = vmatprep.subr.bf16.mxu1 %v9014_v26  ;;  %v9032_v26 = vld [vmem:[#allocation66_spill] sm:$0xff]  ;;  %v9033_v33 = vld [vmem:[#allocation67_spill] sm:$0xff] }
 0x62b   :  { %5878 = vmatpush1.bf16.msra.mxu0 %v9015_v18  ;;  %5910 = vmatpush1.bf16.msra.mxu1 %v9016_v39  ;;  %v9023_v18 = vld [vmem:[#allocation57_spill] sm:$0xff]  ;;  %v9024_v39 = vld [vmem:[#allocation58_spill] sm:$0xff] }
 0x62c   :  { %5912 = vmatprep.subr.bf16.mxu0 %v9017_v32  ;;  %5944 = vmatprep.subr.bf16.mxu1 %v9018_v50  ;;  %v9025_v32 = vld [vmem:[#allocation59_spill] sm:$0xff]  ;;  %v9026_v50 = vld [vmem:[#allocation60_spill] sm:$0xff] }
 0x62e   :  { %3143 = vmatmul.mubr.f32.vlgmr.msra.gmra.mrb[10].mxu0 %v2760_v43  ;;  %3214 = vmatmul.mubr.f32.vlgmr.msra.gmra.mrb[10].mxu1 %v2760_v43  ;;  %v9027_v43 = vld [vmem:[#allocation61_spill] sm:$0xff] }
 0x62f   :  { %5914 = vmatpush1.bf16.msra.mxu0 %v9019_v47  ;;  %5946 = vmatpush1.bf16.msra.mxu1 %v9020_v30  ;;  %v9028_v47 = vld [vmem:[#allocation62_spill] sm:$0xff]  ;;  %v9029_v30 = vld [vmem:[#allocation63_spill] sm:$0xff] }
 0x630   :  { %5916 = vmatprep.subr.bf16.mxu0 %v9021_v29  ;;  %5948 = vmatprep.subr.bf16.mxu1 %v9022_v25  ;;  %v9030_v29 = vld [vmem:[#allocation64_spill] sm:$0xff]  ;;  %v9031_v25 = vld [vmem:[#allocation65_spill] sm:$0xff] }
 0x631   :  { %3312 = vmatprep.mubr.f32.mxu0 %v8752_v61  ;;  %3383 = vmatprep.mubr.f32.mxu1 %v8752_v61 }
 0x633   :  { %5918 = vmatpush1.bf16.msra.mxu0 %v9023_v18  ;;  %5950 = vmatpush1.bf16.msra.mxu1 %v9024_v39  ;;  %v9034_v18 = vld [vmem:[#allocation68_spill] sm:$0xff]  ;;  %v9035_v39 = vld [vmem:[#allocation69_spill] sm:$0xff] }
 0x634   :  { %5920 = vmatprep.subr.bf16.mxu0 %v9025_v32  ;;  %5952 = vmatprep.subr.bf16.mxu1 %v9026_v50  ;;  %v9036_v32 = vld [vmem:[#allocation70_spill] sm:$0xff]  ;;  %v9037_v50 = vld [vmem:[#allocation71_spill] sm:$0xff] }
 0x637   :  { %5922 = vmatpush1.bf16.msra.mxu0 %v9027_v43  ;;  %5954 = vmatpush1.bf16.msra.mxu1 %v9028_v47  ;;  %v9038_v43 = vld [vmem:[#allocation72_spill] sm:$0xff]  ;;  %v9039_v47 = vld [vmem:[#allocation73_spill] sm:$0xff] }
 0x638   :  { %5924 = vmatprep.subr.bf16.mxu0 %v9029_v30  ;;  %5956 = vmatprep.subr.bf16.mxu1 %v9030_v29  ;;  %v9040_v30 = vld [vmem:[#allocation74_spill] sm:$0xff]  ;;  %v9041_v29 = vld [vmem:[#allocation75_spill] sm:$0xff] }
 0x63b   :  { %5926 = vmatpush1.bf16.msra.mxu0 %v9031_v25  ;;  %5958 = vmatpush1.bf16.msra.mxu1 %v9032_v26  ;;  %v9042_v25 = vld [vmem:[#allocation76_spill] sm:$0xff]  ;;  %v9043_v26 = vld [vmem:[#allocation77_spill] sm:$0xff] }
 0x63c   :  { %5928 = vmatprep.subr.bf16.mxu0 %v9033_v33  ;;  %5960 = vmatprep.subr.bf16.mxu1 %v9034_v18  ;;  %v9044_v33 = vld [vmem:[#allocation78_spill] sm:$0xff]  ;;  %v9045_v18 = vld [vmem:[#allocation79_spill] sm:$0xff] }
 0x63f   :  { %5930 = vmatpush1.bf16.msra.mxu0 %v9035_v39  ;;  %5962 = vmatpush1.bf16.msra.mxu1 %v9036_v32  ;;  %v9046_v39 = vld [vmem:[#allocation80_spill] sm:$0xff]  ;;  %v9047_v32 = vld [vmem:[#allocation81_spill] sm:$0xff] }
 0x640   :  { %5932 = vmatprep.subr.bf16.mxu0 %v9037_v50  ;;  %5964 = vmatprep.subr.bf16.mxu1 %v9038_v43  ;;  %v9048_v50 = vld [vmem:[#allocation82_spill] sm:$0xff]  ;;  %v9049_v43 = vld [vmem:[#allocation83_spill] sm:$0xff] }
 0x643   :  { %5934 = vmatpush1.bf16.msra.mxu0 %v9039_v47  ;;  %5966 = vmatpush1.bf16.msra.mxu1 %v9040_v30  ;;  %v9050_v47 = vld [vmem:[#allocation84_spill] sm:$0xff] }
 0x644   :  { %5936 = vmatprep.subr.bf16.mxu0 %v9041_v29  ;;  %5968 = vmatprep.subr.bf16.mxu1 %v9042_v25 }
 0x647   :  { %5938 = vmatpush1.bf16.msra.mxu0 %v9043_v26  ;;  %5970 = vmatpush1.bf16.msra.mxu1 %v9044_v33 }
 0x648   :  { %5940 = vmatprep.subr.bf16.mxu0 %v9045_v18  ;;  %5972 = vmatprep.subr.bf16.mxu1 %v9046_v39 }
 0x64b   :  { %5942 = vmatpush1.bf16.msra.mxu0 %v9047_v32  ;;  %5974 = vmatpush1.bf16.msra.mxu1 %v9048_v50 }
 0x64c   :  { %5976 = vmatprep.subr.bf16.mxu0 %v9049_v43  ;;  %6008 = vmatprep.subr.bf16.mxu1 %v9050_v47 }
 0x6e1   :  { %v2969_v30 = vpop.f32.mrb[24].mxu0  ;;  %v3040_v29 = vpop.f32.mrb[26].mxu1 }
 0x6e2   :  { %v3045_v25 = vadd.f32 %v2969_v30, %v9051_v55  ;;  %v2971_v40 = vpop.f32.mrb[25].mxu0  ;;  %v3042_v26 = vpop.f32.mrb[27].mxu1  ;;  %v3047_v50 = vadd.f32 %v3040_v29, %v8871_v6 }
 0x6e3   :  { %v3046_v33 = vadd.f32 %v2971_v40, %v7618_v59  ;;  %v3048_v32 = vadd.f32 %v3042_v26, %v8870_v52 }
 0x6e4   :  { %v4789_v27 = vmul.f32 -1.442695, %v3045_v25 }
 0x6e5   :  { %v4790_v18 = vmul.f32 -1.442695, %v3046_v33  ;;  %v4791_v39 = vmul.f32 -1.442695, %v3048_v32 }
 0x6e6   :  { %6707 = vpow2.f32 %v4789_v27 }
 0x6e7   :  { %6709 = vpow2.f32 %v4790_v18 }
 0x6e8   :  { %6711 = vpow2.f32 %v4791_v39 }
 0x6e9   :  { %6713 = vtanh.f32 %v3047_v50 }
 0x6f0   :  { %v6708_v43 = vpop.eup %6707 }
 0x6f1   :  { %v6710_v31 = vpop.eup %6709  ;;  %v3052_v47 = vadd.f32 1.0, %v6708_v43 }
 0x6f2   :  { %v3058_v23 = vadd.f32 1.0, %v6710_v31  ;;  %v6712_v30 = vpop.eup %6711 }
 0x6f3   :  { %6715 = vrcp.f32 %v3052_v47  ;;  %v6714_v55 = vpop.eup %6713  ;;  %v3065_v27 = vadd.f32 1.0, %v6712_v30 }
 0x6f4   :  { %6717 = vrcp.f32 %v3058_v23 }
 0x6f5   :  { %6719 = vrcp.f32 %v3065_v27 }
 0x6fd   :  { %v6716_v40 = vpop.eup %6715 }
 0x6fe   :  { %v6718_v25 = vpop.eup %6717  ;;  %v3069_v33 = vmul.f32 %v6716_v40, %v6714_v55 }
 0x6ff   :  { %v3068_v18 = vmul.f32 %v6718_v25, %v7998_v62  ;;  %v6720_v62 = vpop.eup %6719 }
 0x701   :  { %v8120_v26 = vadd.f32 %v3069_v33, %v3068_v18  ;;  %v3144_v32 = vpop.f32.mrb[10].mxu0  ;;  %v3215_v29 = vpop.f32.mrb[10].mxu1 }
 0x702   :  { %v6467_v43 = vadd.f32 %v3144_v32, %v8811_v34  ;;  %v3146_v39 = vpop.f32.mrb[11].mxu0  ;;  %v3217_v50 = vpop.f32.mrb[11].mxu1  ;;  %v6483_v25 = vadd.f32 %v3215_v29, %v7530_v21 }
 0x703   :  { %v6468_v31 = vadd.f32 %v3146_v39, %v8812_v19  ;;  %6721 = vtanh.f32 %v8120_v26  ;;  %v6484_v55 = vadd.f32 %v3217_v50, %v7534_v11 }
 0x704   :  { %v4792_v23 = vmul.f32 -1.442695, %v6467_v43 }
 0x705   :  { %v4793_v47 = vmul.f32 -1.442695, %v6468_v31  ;;  %v4794_v40 = vmul.f32 -1.442695, %v6484_v55 }
 0x706   :  { %6723 = vpow2.f32 %v4792_v23 }
 0x707   :  { %6725 = vpow2.f32 %v4793_v47 }
 0x708   :  { %6727 = vpow2.f32 %v4794_v40 }
 0x709   :  { %6729 = vtanh.f32 %v6483_v25  ;;  %v9053_v25 = vld [vmem:[#allocation26_spill] sm:$0xff] }
 0x70d   :  { %v6722_v30 = vpop.eup %6721 }
 0x70e   :  { %v8127_v33 = vmul.f32 %v6722_v30, %v6720_v62 }
 0x710   :  { %9052 = vst [vmem:[#allocation100_spill] sm:$0xff] %v8127_v33  ;;  %v6724_v27 = vpop.eup %6723  ;;  %3313 = vmatmul.mubr.f32.vlgmr.msra.gmra.mrb[26].mxu0 %v8127_v33  ;;  %3384 = vmatmul.mubr.f32.vlgmr.msra.gmra.mrb[28].mxu1 %v8127_v33  ;;  %v9067_v33 = vld [vmem:[#allocation33_spill] sm:$0xff] }
 0x711   :  { %v6726_v18 = vpop.eup %6725  ;;  %v3227_v32 = vadd.f32 1.0, %v6724_v27  ;;  %5978 = vmatpush1.bf16.msra.mxu0 %v8873_v9  ;;  %6010 = vmatpush1.bf16.msra.mxu1 %v8874_v5  ;;  %v9054_v27 = vld [vmem:[#allocation39_spill] sm:$0xff] }
 0x712   :  { %v3233_v43 = vadd.f32 1.0, %v6726_v18  ;;  %5980 = vmatprep.subr.bf16.mxu0 %v8875_v2  ;;  %6012 = vmatprep.subr.bf16.mxu1 %v8876_v1  ;;  %v6728_v29 = vpop.eup %6727  ;;  %v9055_v18 = vld [vmem:[#allocation27_spill] sm:$0xff] }
 0x713   :  { %6731 = vrcp.f32 %v3227_v32  ;;  %3454 = vmatprep.mubr.f32.mxu0 %v8752_v61  ;;  %3525 = vmatprep.mubr.f32.mxu1 %v8752_v61  ;;  %v6730_v39 = vpop.eup %6729  ;;  %v3240_v47 = vadd.f32 1.0, %v6728_v29  ;;  %v9056_v32 = vld [vmem:[#allocation40_spill] sm:$0xff]  ;;  %v9058_v29 = vld [vmem:[#allocation41_spill] sm:$0xff] }
 0x714   :  { %6733 = vrcp.f32 %v3233_v43  ;;  %v9057_v43 = vld [vmem:[#allocation28_spill] sm:$0xff] }
 0x715   :  { %5982 = vmatpush1.bf16.msra.mxu0 %v8933_v63  ;;  %6014 = vmatpush1.bf16.msra.mxu1 %v8934_v20  ;;  %6735 = vrcp.f32 %v3240_v47  ;;  %v9063_v47 = vld [vmem:[#allocation31_spill] sm:$0xff] }
 0x716   :  { %5984 = vmatprep.subr.bf16.mxu0 %v8935_v56  ;;  %6016 = vmatprep.subr.bf16.mxu1 %v8936_v49 }
 0x719   :  { %5986 = vmatpush1.bf16.msra.mxu0 %v8937_v57  ;;  %6018 = vmatpush1.bf16.msra.mxu1 %v8993_v38 }
 0x71a   :  { %5988 = vmatprep.subr.bf16.mxu0 %v8939_v54  ;;  %6020 = vmatprep.subr.bf16.mxu1 %v8940_v36 }
 0x71d   :  { %v6732_v50 = vpop.eup %6731  ;;  %5990 = vmatpush1.bf16.msra.mxu0 %v8941_v46  ;;  %6022 = vmatpush1.bf16.msra.mxu1 %v8827_v13 }
 0x71e   :  { %v6734_v31 = vpop.eup %6733  ;;  %v3244_v23 = vmul.f32 %v6732_v50, %v6730_v39  ;;  %5992 = vmatprep.subr.bf16.mxu0 %v8828_v10  ;;  %6024 = vmatprep.subr.bf16.mxu1 %v8829_v3  ;;  %v9059_v39 = vld [vmem:[#allocation29_spill] sm:$0xff]  ;;  %v9060_v50 = vld [vmem:[#allocation42_spill] sm:$0xff] }
 0x71f   :  { %v3243_v55 = vmul.f32 %v6734_v31, %v8028_v42  ;;  %v6736_v42 = vpop.eup %6735  ;;  %v9061_v31 = vld [vmem:[#allocation30_spill] sm:$0xff] }
 0x721   :  { %v8150_v62 = vadd.f32 %v3244_v23, %v3243_v55  ;;  %5994 = vmatpush1.bf16.msra.mxu0 %v8886_v44  ;;  %6026 = vmatpush1.bf16.msra.mxu1 %v8887_v12  ;;  %v9062_v23 = vld [vmem:[#allocation43_spill] sm:$0xff]  ;;  %v9064_v55 = vld [vmem:[#allocation44_spill] sm:$0xff] }
 0x722   :  { %5996 = vmatprep.subr.bf16.mxu0 %v8888_v51  ;;  %6028 = vmatprep.subr.bf16.mxu1 %v8889_v7 }
 0x723   :  { %6737 = vtanh.f32 %v8150_v62 }
 0x725   :  { %5998 = vmatpush1.bf16.msra.mxu0 %v8890_v28  ;;  %6030 = vmatpush1.bf16.msra.mxu1 %v8891_v45 }
 0x726   :  { %6000 = vmatprep.subr.bf16.mxu0 %v8892_v60  ;;  %6032 = vmatprep.subr.bf16.mxu1 %v8837_v41 }
 0x729   :  { %6002 = vmatpush1.bf16.msra.mxu0 %v8838_v0  ;;  %6034 = vmatpush1.bf16.msra.mxu1 %v8839_v48 }
 0x72a   :  { %6004 = vmatprep.subr.bf16.mxu0 %v8840_v35  ;;  %6036 = vmatprep.subr.bf16.mxu1 %v8841_v58 }
 0x72d   :  { %v6738_v30 = vpop.eup %6737  ;;  %6006 = vmatpush1.bf16.msra.mxu0 %v8842_v8  ;;  %6038 = vmatpush1.bf16.msra.mxu1 %v8843_v53 }
 0x72e   :  { %v3247_v40 = vmul.f32 %v6738_v30, %v6736_v42  ;;  %6040 = vmatprep.subr.bf16.mxu0 %v8844_v4  ;;  %6072 = vmatprep.subr.bf16.mxu1 %v8845_v37  ;;  %v9065_v42 = vld [vmem:[#allocation32_spill] sm:$0xff]  ;;  %v9066_v30 = vld [vmem:[#allocation45_spill] sm:$0xff] }
 0x730   :  { %3455 = vmatmul.mubr.f32.vlgmr.msra.gmra.mrb[26].mxu0 %v3247_v40  ;;  %3526 = vmatmul.mubr.f32.vlgmr.msra.gmra.mrb[28].mxu1 %v3247_v40 }
 0x731   :  { %6042 = vmatpush1.bf16.msra.mxu0 %v7148_v15  ;;  %6074 = vmatpush1.bf16.msra.mxu1 %v7253_v14 }
 0x732   :  { %6044 = vmatprep.subr.bf16.mxu0 %v7151_v16  ;;  %6076 = vmatprep.subr.bf16.mxu1 %v7256_v17 }
 0x733   :  { %3629 = vmatprep.mubr.f32.mxu0 %v8752_v61  ;;  %3700 = vmatprep.mubr.f32.mxu1 %v8752_v61 }
 0x735   :  { %6046 = vmatpush1.bf16.msra.mxu0 %v7159_v22  ;;  %6078 = vmatpush1.bf16.msra.mxu1 %v7262_v24 }
 0x736   :  { %6048 = vmatprep.subr.bf16.mxu0 %v9053_v25  ;;  %6080 = vmatprep.subr.bf16.mxu1 %v9054_v27 }
 0x739   :  { %6050 = vmatpush1.bf16.msra.mxu0 %v9055_v18  ;;  %6082 = vmatpush1.bf16.msra.mxu1 %v9056_v32 }
 0x73a   :  { %6052 = vmatprep.subr.bf16.mxu0 %v9057_v43  ;;  %6084 = vmatprep.subr.bf16.mxu1 %v9058_v29  ;;  %v9068_v43 = vld [vmem:[#allocation46_spill] sm:$0xff] }
 0x73b   :  { %v9069_v29 = vld [vmem:[#allocation34_spill] sm:$0xff] }
 0x73d   :  { %6054 = vmatpush1.bf16.msra.mxu0 %v9059_v39  ;;  %6086 = vmatpush1.bf16.msra.mxu1 %v9060_v50  ;;  %v9070_v39 = vld [vmem:[#allocation47_spill] sm:$0xff] }
 0x73e   :  { %6056 = vmatprep.subr.bf16.mxu0 %v9061_v31  ;;  %6088 = vmatprep.subr.bf16.mxu1 %v9062_v23  ;;  %v9071_v50 = vld [vmem:[#allocation35_spill] sm:$0xff]  ;;  %v9072_v31 = vld [vmem:[#allocation48_spill] sm:$0xff] }
 0x73f   :  { %v9073_v23 = vld [vmem:[#allocation36_spill] sm:$0xff] }
 0x741   :  { %6058 = vmatpush1.bf16.msra.mxu0 %v9063_v47  ;;  %6090 = vmatpush1.bf16.msra.mxu1 %v9064_v55  ;;  %v9074_v47 = vld [vmem:[#allocation49_spill] sm:$0xff] }
 0x742   :  { %6060 = vmatprep.subr.bf16.mxu0 %v9065_v42  ;;  %6092 = vmatprep.subr.bf16.mxu1 %v9066_v30  ;;  %v9075_v55 = vld [vmem:[#allocation37_spill] sm:$0xff]  ;;  %v9076_v42 = vld [vmem:[#allocation50_spill] sm:$0xff]  ;;  %v9077_v30 = vld [vmem:[#allocation51_spill] sm:$0xff] }
 0x745   :  { %6062 = vmatpush1.bf16.msra.mxu0 %v9067_v33  ;;  %6094 = vmatpush1.bf16.msra.mxu1 %v9068_v43  ;;  %v9078_v33 = vld [vmem:[#allocation52_spill] sm:$0xff]  ;;  %v9111_v43 = vld [vmem:[#allocation117_spill] sm:$0xff] }
 0x746   :  { %6064 = vmatprep.subr.bf16.mxu0 %v9069_v29  ;;  %6096 = vmatprep.subr.bf16.mxu1 %v9070_v39  ;;  %v9079_v29 = vld [vmem:[#allocation53_spill] sm:$0xff]  ;;  %v9080_v39 = vld [vmem:[#allocation54_spill] sm:$0xff] }
 0x749   :  { %6066 = vmatpush1.bf16.msra.mxu0 %v9071_v50  ;;  %6098 = vmatpush1.bf16.msra.mxu1 %v9072_v31  ;;  %v9081_v50 = vld [vmem:[#allocation55_spill] sm:$0xff]  ;;  %v9082_v31 = vld [vmem:[#allocation56_spill] sm:$0xff] }
 0x74a   :  { %6068 = vmatprep.subr.bf16.mxu0 %v9073_v23  ;;  %6100 = vmatprep.subr.bf16.mxu1 %v9074_v47  ;;  %v9092_v47 = vld [vmem:[#allocation66_spill] sm:$0xff]  ;;  %v9093_v23 = vld [vmem:[#allocation67_spill] sm:$0xff] }
 0x74d   :  { %6070 = vmatpush1.bf16.msra.mxu0 %v9075_v55  ;;  %6102 = vmatpush1.bf16.msra.mxu1 %v9076_v42  ;;  %v9083_v55 = vld [vmem:[#allocation57_spill] sm:$0xff]  ;;  %v9084_v42 = vld [vmem:[#allocation58_spill] sm:$0xff] }
 0x74e   :  { %6104 = vmatprep.subr.bf16.mxu0 %v9077_v30  ;;  %6136 = vmatprep.subr.bf16.mxu1 %v9078_v33  ;;  %v9085_v30 = vld [vmem:[#allocation59_spill] sm:$0xff]  ;;  %v9086_v33 = vld [vmem:[#allocation60_spill] sm:$0xff] }
 0x750   :  { %3630 = vmatmul.mubr.f32.vlgmr.msra.gmra.mrb[12].mxu0 %v3247_v40  ;;  %3701 = vmatmul.mubr.f32.vlgmr.msra.gmra.mrb[12].mxu1 %v3247_v40  ;;  %v9087_v40 = vld [vmem:[#allocation61_spill] sm:$0xff] }
 0x751   :  { %6106 = vmatpush1.bf16.msra.mxu0 %v9079_v29  ;;  %6138 = vmatpush1.bf16.msra.mxu1 %v9080_v39  ;;  %v9088_v29 = vld [vmem:[#allocation62_spill] sm:$0xff]  ;;  %v9089_v39 = vld [vmem:[#allocation63_spill] sm:$0xff] }
 0x752   :  { %6108 = vmatprep.subr.bf16.mxu0 %v9081_v50  ;;  %6140 = vmatprep.subr.bf16.mxu1 %v9082_v31  ;;  %v9090_v50 = vld [vmem:[#allocation64_spill] sm:$0xff]  ;;  %v9091_v31 = vld [vmem:[#allocation65_spill] sm:$0xff] }
 0x753   :  { %3799 = vmatprep.mubr.f32.mxu0 %v8752_v61  ;;  %3870 = vmatprep.mubr.f32.mxu1 %v8752_v61 }
 0x755   :  { %6110 = vmatpush1.bf16.msra.mxu0 %v9083_v55  ;;  %6142 = vmatpush1.bf16.msra.mxu1 %v9084_v42  ;;  %v9094_v55 = vld [vmem:[#allocation68_spill] sm:$0xff]  ;;  %v9095_v42 = vld [vmem:[#allocation69_spill] sm:$0xff] }
 0x756   :  { %6112 = vmatprep.subr.bf16.mxu0 %v9085_v30  ;;  %6144 = vmatprep.subr.bf16.mxu1 %v9086_v33  ;;  %v9096_v30 = vld [vmem:[#allocation70_spill] sm:$0xff]  ;;  %v9097_v33 = vld [vmem:[#allocation71_spill] sm:$0xff] }
 0x759   :  { %6114 = vmatpush1.bf16.msra.mxu0 %v9087_v40  ;;  %6146 = vmatpush1.bf16.msra.mxu1 %v9088_v29  ;;  %v9098_v40 = vld [vmem:[#allocation72_spill] sm:$0xff]  ;;  %v9099_v29 = vld [vmem:[#allocation73_spill] sm:$0xff] }
 0x75a   :  { %6116 = vmatprep.subr.bf16.mxu0 %v9089_v39  ;;  %6148 = vmatprep.subr.bf16.mxu1 %v9090_v50  ;;  %v9100_v39 = vld [vmem:[#allocation74_spill] sm:$0xff]  ;;  %v9101_v50 = vld [vmem:[#allocation75_spill] sm:$0xff] }
 0x75d   :  { %6118 = vmatpush1.bf16.msra.mxu0 %v9091_v31  ;;  %6150 = vmatpush1.bf16.msra.mxu1 %v9092_v47  ;;  %v9102_v31 = vld [vmem:[#allocation76_spill] sm:$0xff]  ;;  %v9103_v47 = vld [vmem:[#allocation77_spill] sm:$0xff] }
 0x75e   :  { %6120 = vmatprep.subr.bf16.mxu0 %v9093_v23  ;;  %6152 = vmatprep.subr.bf16.mxu1 %v9094_v55  ;;  %v9104_v23 = vld [vmem:[#allocation78_spill] sm:$0xff]  ;;  %v9105_v55 = vld [vmem:[#allocation79_spill] sm:$0xff] }
 0x761   :  { %6122 = vmatpush1.bf16.msra.mxu0 %v9095_v42  ;;  %6154 = vmatpush1.bf16.msra.mxu1 %v9096_v30  ;;  %v9106_v42 = vld [vmem:[#allocation80_spill] sm:$0xff]  ;;  %v9107_v30 = vld [vmem:[#allocation81_spill] sm:$0xff] }
 0x762   :  { %6124 = vmatprep.subr.bf16.mxu0 %v9097_v33  ;;  %6156 = vmatprep.subr.bf16.mxu1 %v9098_v40  ;;  %v9108_v33 = vld [vmem:[#allocation82_spill] sm:$0xff]  ;;  %v9109_v40 = vld [vmem:[#allocation83_spill] sm:$0xff] }
 0x765   :  { %6126 = vmatpush1.bf16.msra.mxu0 %v9099_v29  ;;  %6158 = vmatpush1.bf16.msra.mxu1 %v9100_v39  ;;  %v9110_v29 = vld [vmem:[#allocation84_spill] sm:$0xff] }
 0x766   :  { %6128 = vmatprep.subr.bf16.mxu0 %v9101_v50  ;;  %6160 = vmatprep.subr.bf16.mxu1 %v9102_v31 }
 0x769   :  { %6130 = vmatpush1.bf16.msra.mxu0 %v9103_v47  ;;  %6162 = vmatpush1.bf16.msra.mxu1 %v9104_v23 }
 0x76a   :  { %6132 = vmatprep.subr.bf16.mxu0 %v9105_v55  ;;  %6164 = vmatprep.subr.bf16.mxu1 %v9106_v42 }
 0x76d   :  { %6134 = vmatpush1.bf16.msra.mxu0 %v9107_v30  ;;  %6166 = vmatpush1.bf16.msra.mxu1 %v9108_v33 }
 0x76e   :  { %6168 = vmatprep.subr.bf16.mxu0 %v9109_v40  ;;  %6200 = vmatprep.subr.bf16.mxu1 %v9110_v29 }
 0x803   :  { %v3456_v39 = vpop.f32.mrb[26].mxu0  ;;  %v3527_v50 = vpop.f32.mrb[28].mxu1 }
 0x804   :  { %v3532_v31 = vadd.f32 %v3456_v39, %v9111_v43  ;;  %v3458_v32 = vpop.f32.mrb[27].mxu0  ;;  %v3529_v47 = vpop.f32.mrb[29].mxu1  ;;  %v3534_v33 = vadd.f32 %v3527_v50, %v8871_v6 }
 0x805   :  { %v3533_v23 = vadd.f32 %v3458_v32, %v7618_v59  ;;  %v3535_v30 = vadd.f32 %v3529_v47, %v8870_v52 }
 0x806   :  { %v4795_v18 = vmul.f32 -1.442695, %v3532_v31 }
 0x807   :  { %v4796_v55 = vmul.f32 -1.442695, %v3533_v23  ;;  %v4797_v42 = vmul.f32 -1.442695, %v3535_v30 }
 0x808   :  { %6739 = vpow2.f32 %v4795_v18 }
 0x809   :  { %6741 = vpow2.f32 %v4796_v55 }
 0x80a   :  { %6743 = vpow2.f32 %v4797_v42 }
 0x80b   :  { %6745 = vtanh.f32 %v3534_v33 }
 0x812   :  { %v6740_v40 = vpop.eup %6739 }
 0x813   :  { %v6742_v27 = vpop.eup %6741  ;;  %v3539_v29 = vadd.f32 1.0, %v6740_v40 }
 0x814   :  { %v3545_v25 = vadd.f32 1.0, %v6742_v27  ;;  %v6744_v39 = vpop.eup %6743 }
 0x815   :  { %6747 = vrcp.f32 %v3539_v29  ;;  %v6746_v43 = vpop.eup %6745  ;;  %v3552_v18 = vadd.f32 1.0, %v6744_v39 }
 0x816   :  { %6749 = vrcp.f32 %v3545_v25 }
 0x817   :  { %6751 = vrcp.f32 %v3552_v18 }
 0x81f   :  { %v6748_v32 = vpop.eup %6747 }
 0x820   :  { %v6750_v31 = vpop.eup %6749  ;;  %v3556_v23 = vmul.f32 %v6748_v32, %v6746_v43 }
 0x821   :  { %v3555_v55 = vmul.f32 %v6750_v31, %v8120_v26  ;;  %v6752_v26 = vpop.eup %6751 }
 0x823   :  { %v8242_v47 = vadd.f32 %v3556_v23, %v3555_v55  ;;  %v3631_v30 = vpop.f32.mrb[12].mxu0  ;;  %v3702_v50 = vpop.f32.mrb[12].mxu1 }
 0x824   :  { %v6469_v40 = vadd.f32 %v3631_v30, %v8811_v34  ;;  %v3633_v42 = vpop.f32.mrb[13].mxu0  ;;  %v3704_v33 = vpop.f32.mrb[13].mxu1  ;;  %v6485_v31 = vadd.f32 %v3702_v50, %v7530_v21 }
 0x825   :  { %v6470_v27 = vadd.f32 %v3633_v42, %v8812_v19  ;;  %6753 = vtanh.f32 %v8242_v47  ;;  %v6486_v43 = vadd.f32 %v3704_v33, %v7534_v11 }
 0x826   :  { %v4798_v25 = vmul.f32 -1.442695, %v6469_v40 }
 0x827   :  { %v4799_v29 = vmul.f32 -1.442695, %v6470_v27  ;;  %v4800_v32 = vmul.f32 -1.442695, %v6486_v43 }
 0x828   :  { %6755 = vpow2.f32 %v4798_v25 }
 0x829   :  { %6757 = vpow2.f32 %v4799_v29 }
 0x82a   :  { %6759 = vpow2.f32 %v4800_v32 }
 0x82b   :  { %6761 = vtanh.f32 %v6485_v31  ;;  %v9114_v31 = vld [vmem:[#allocation27_spill] sm:$0xff] }
 0x82f   :  { %v6754_v39 = vpop.eup %6753 }
 0x830   :  { %v8249_v23 = vmul.f32 %v6754_v39, %v6752_v26 }
 0x832   :  { %v6756_v18 = vpop.eup %6755  ;;  %3800 = vmatmul.mubr.f32.vlgmr.msra.gmra.mrb[28].mxu0 %v8249_v23  ;;  %3871 = vmatmul.mubr.f32.vlgmr.msra.gmra.mrb[30].mxu1 %v8249_v23 }
 0x833   :  { %v6758_v55 = vpop.eup %6757  ;;  %v3714_v30 = vadd.f32 1.0, %v6756_v18  ;;  %6170 = vmatpush1.bf16.msra.mxu0 %v8873_v9  ;;  %6202 = vmatpush1.bf16.msra.mxu1 %v8874_v5  ;;  %v9119_v18 = vld [vmem:[#allocation42_spill] sm:$0xff] }
 0x834   :  { %v3720_v40 = vadd.f32 1.0, %v6758_v55  ;;  %6172 = vmatprep.subr.bf16.mxu0 %v8875_v2  ;;  %6204 = vmatprep.subr.bf16.mxu1 %v8876_v1  ;;  %v6760_v50 = vpop.eup %6759  ;;  %v9120_v55 = vld [vmem:[#allocation30_spill] sm:$0xff] }
 0x835   :  { %6763 = vrcp.f32 %v3714_v30  ;;  %3941 = vmatprep.mubr.f32.mxu0 %v8752_v61  ;;  %4012 = vmatprep.mubr.f32.mxu1 %v8752_v61  ;;  %v6762_v42 = vpop.eup %6761  ;;  %v3727_v29 = vadd.f32 1.0, %v6760_v50  ;;  %v9123_v30 = vld [vmem:[#allocation44_spill] sm:$0xff]  ;;  %v9125_v50 = vld [vmem:[#allocation45_spill] sm:$0xff] }
 0x836   :  { %6765 = vrcp.f32 %v3720_v40  ;;  %v9124_v40 = vld [vmem:[#allocation32_spill] sm:$0xff] }
 0x837   :  { %6174 = vmatpush1.bf16.msra.mxu0 %v8933_v63  ;;  %6206 = vmatpush1.bf16.msra.mxu1 %v8934_v20  ;;  %6767 = vrcp.f32 %v3727_v29  ;;  %v9130_v29 = vld [vmem:[#allocation35_spill] sm:$0xff] }
 0x838   :  { %6176 = vmatprep.subr.bf16.mxu0 %v8935_v56  ;;  %6208 = vmatprep.subr.bf16.mxu1 %v8936_v49 }
 0x83b   :  { %6178 = vmatpush1.bf16.msra.mxu0 %v8937_v57  ;;  %6210 = vmatpush1.bf16.msra.mxu1 %v8993_v38 }
 0x83c   :  { %6180 = vmatprep.subr.bf16.mxu0 %v8939_v54  ;;  %6212 = vmatprep.subr.bf16.mxu1 %v8940_v36 }
 0x83f   :  { %v6764_v33 = vpop.eup %6763  ;;  %6182 = vmatpush1.bf16.msra.mxu0 %v8941_v46  ;;  %6214 = vmatpush1.bf16.msra.mxu1 %v8827_v13 }
 0x840   :  { %v6766_v27 = vpop.eup %6765  ;;  %v3731_v25 = vmul.f32 %v6764_v33, %v6762_v42  ;;  %6184 = vmatprep.subr.bf16.mxu0 %v8828_v10  ;;  %6216 = vmatprep.subr.bf16.mxu1 %v8829_v3  ;;  %v9126_v42 = vld [vmem:[#allocation33_spill] sm:$0xff]  ;;  %v9127_v33 = vld [vmem:[#allocation46_spill] sm:$0xff] }
 0x841   :  { %v3730_v43 = vmul.f32 %v6766_v27, %v8150_v62  ;;  %v6768_v62 = vpop.eup %6767  ;;  %v9128_v27 = vld [vmem:[#allocation34_spill] sm:$0xff] }
 0x843   :  { %v8272_v26 = vadd.f32 %v3731_v25, %v3730_v43  ;;  %6186 = vmatpush1.bf16.msra.mxu0 %v8886_v44  ;;  %6218 = vmatpush1.bf16.msra.mxu1 %v8887_v12  ;;  %v9129_v25 = vld [vmem:[#allocation47_spill] sm:$0xff]  ;;  %v9131_v43 = vld [vmem:[#allocation48_spill] sm:$0xff] }
 0x844   :  { %6188 = vmatprep.subr.bf16.mxu0 %v8888_v51  ;;  %6220 = vmatprep.subr.bf16.mxu1 %v8889_v7 }
 0x845   :  { %6769 = vtanh.f32 %v8272_v26 }
 0x847   :  { %6190 = vmatpush1.bf16.msra.mxu0 %v8890_v28  ;;  %6222 = vmatpush1.bf16.msra.mxu1 %v8891_v45 }
 0x848   :  { %6192 = vmatprep.subr.bf16.mxu0 %v8892_v60  ;;  %6224 = vmatprep.subr.bf16.mxu1 %v8837_v41 }
 0x84b   :  { %6194 = vmatpush1.bf16.msra.mxu0 %v8838_v0  ;;  %6226 = vmatpush1.bf16.msra.mxu1 %v8839_v48 }
 0x84c   :  { %6196 = vmatprep.subr.bf16.mxu0 %v8840_v35  ;;  %6228 = vmatprep.subr.bf16.mxu1 %v8841_v58 }
 0x84f   :  { %v6770_v39 = vpop.eup %6769  ;;  %6198 = vmatpush1.bf16.msra.mxu0 %v8842_v8  ;;  %6230 = vmatpush1.bf16.msra.mxu1 %v8843_v53 }
 0x850   :  { %6232 = vmatprep.subr.bf16.mxu0 %v8844_v4  ;;  %6264 = vmatprep.subr.bf16.mxu1 %v8845_v37  ;;  %v3734_v32 = vmul.f32 %v6770_v39, %v6768_v62  ;;  %v9112_v4 = vld [vmem:[#allocation26_spill] sm:$0xff]  ;;  %v9113_v37 = vld [vmem:[#allocation39_spill] sm:$0xff]  ;;  %v9132_v62 = vld [vmem:[#allocation36_spill] sm:$0xff] }
 0x851   :  { %v9133_v39 = vld [vmem:[#allocation49_spill] sm:$0xff] }
 0x852   :  { %3942 = vmatmul.mubr.f32.vlgmr.msra.gmra.mrb[28].mxu0 %v3734_v32  ;;  %4013 = vmatmul.mubr.f32.vlgmr.msra.gmra.mrb[30].mxu1 %v3734_v32 }
 0x853   :  { %6234 = vmatpush1.bf16.msra.mxu0 %v7148_v15  ;;  %6266 = vmatpush1.bf16.msra.mxu1 %v7253_v14  ;;  %v9115_v15 = vld [vmem:[#allocation40_spill] sm:$0xff] }
 0x854   :  { %6236 = vmatprep.subr.bf16.mxu0 %v7151_v16  ;;  %6268 = vmatprep.subr.bf16.mxu1 %v7256_v17  ;;  %v9116_v14 = vld [vmem:[#allocation28_spill] sm:$0xff]  ;;  %v9117_v16 = vld [vmem:[#allocation41_spill] sm:$0xff] }
 0x855   :  { %4116 = vmatprep.mubr.f32.mxu0 %v8752_v61  ;;  %4187 = vmatprep.mubr.f32.mxu1 %v8752_v61  ;;  %v9118_v17 = vld [vmem:[#allocation29_spill] sm:$0xff] }
 0x857   :  { %6238 = vmatpush1.bf16.msra.mxu0 %v7159_v22  ;;  %6270 = vmatpush1.bf16.msra.mxu1 %v7262_v24  ;;  %v9121_v22 = vld [vmem:[#allocation43_spill] sm:$0xff] }
 0x858   :  { %6240 = vmatprep.subr.bf16.mxu0 %v9112_v4  ;;  %6272 = vmatprep.subr.bf16.mxu1 %v9113_v37  ;;  %v9122_v24 = vld [vmem:[#allocation31_spill] sm:$0xff]  ;;  %v9134_v4 = vld [vmem:[#allocation37_spill] sm:$0xff]  ;;  %v9135_v37 = vld [vmem:[#allocation50_spill] sm:$0xff] }
 0x85b   :  { %6242 = vmatpush1.bf16.msra.mxu0 %v9114_v31  ;;  %6274 = vmatpush1.bf16.msra.mxu1 %v9115_v15  ;;  %v9136_v31 = vld [vmem:[#allocation51_spill] sm:$0xff]  ;;  %v9137_v15 = vld [vmem:[#allocation52_spill] sm:$0xff] }
 0x85c   :  { %6244 = vmatprep.subr.bf16.mxu0 %v9116_v14  ;;  %6276 = vmatprep.subr.bf16.mxu1 %v9117_v16  ;;  %v9138_v14 = vld [vmem:[#allocation53_spill] sm:$0xff]  ;;  %v9139_v16 = vld [vmem:[#allocation54_spill] sm:$0xff] }
 0x85f   :  { %6246 = vmatpush1.bf16.msra.mxu0 %v9118_v17  ;;  %6278 = vmatpush1.bf16.msra.mxu1 %v9119_v18  ;;  %v9140_v17 = vld [vmem:[#allocation55_spill] sm:$0xff]  ;;  %v9141_v18 = vld [vmem:[#allocation56_spill] sm:$0xff] }
 0x860   :  { %6248 = vmatprep.subr.bf16.mxu0 %v9120_v55  ;;  %6280 = vmatprep.subr.bf16.mxu1 %v9121_v22  ;;  %v9142_v55 = vld [vmem:[#allocation57_spill] sm:$0xff]  ;;  %v9143_v22 = vld [vmem:[#allocation58_spill] sm:$0xff] }
 0x863   :  { %6250 = vmatpush1.bf16.msra.mxu0 %v9122_v24  ;;  %6282 = vmatpush1.bf16.msra.mxu1 %v9123_v30  ;;  %v9144_v24 = vld [vmem:[#allocation59_spill] sm:$0xff]  ;;  %v9145_v30 = vld [vmem:[#allocation60_spill] sm:$0xff] }
 0x864   :  { %6252 = vmatprep.subr.bf16.mxu0 %v9124_v40  ;;  %6284 = vmatprep.subr.bf16.mxu1 %v9125_v50  ;;  %v9147_v40 = vld [vmem:[#allocation62_spill] sm:$0xff]  ;;  %v9148_v50 = vld [vmem:[#allocation63_spill] sm:$0xff] }
 0x867   :  { %6254 = vmatpush1.bf16.msra.mxu0 %v9126_v42  ;;  %6286 = vmatpush1.bf16.msra.mxu1 %v9127_v33  ;;  %v9149_v42 = vld [vmem:[#allocation64_spill] sm:$0xff]  ;;  %v9150_v33 = vld [vmem:[#allocation65_spill] sm:$0xff] }
 0x868   :  { %6256 = vmatprep.subr.bf16.mxu0 %v9128_v27  ;;  %6288 = vmatprep.subr.bf16.mxu1 %v9129_v25  ;;  %v9151_v27 = vld [vmem:[#allocation66_spill] sm:$0xff]  ;;  %v9152_v25 = vld [vmem:[#allocation67_spill] sm:$0xff] }
 0x86b   :  { %6258 = vmatpush1.bf16.msra.mxu0 %v9130_v29  ;;  %6290 = vmatpush1.bf16.msra.mxu1 %v9131_v43  ;;  %v9153_v29 = vld [vmem:[#allocation68_spill] sm:$0xff]  ;;  %v9154_v43 = vld [vmem:[#allocation69_spill] sm:$0xff] }
 0x86c   :  { %6260 = vmatprep.subr.bf16.mxu0 %v9132_v62  ;;  %6292 = vmatprep.subr.bf16.mxu1 %v9133_v39  ;;  %v9155_v62 = vld [vmem:[#allocation70_spill] sm:$0xff]  ;;  %v9156_v39 = vld [vmem:[#allocation71_spill] sm:$0xff] }
 0x86f   :  { %6262 = vmatpush1.bf16.msra.mxu0 %v9134_v4  ;;  %6294 = vmatpush1.bf16.msra.mxu1 %v9135_v37  ;;  %v9157_v4 = vld [vmem:[#allocation72_spill] sm:$0xff]  ;;  %v9158_v37 = vld [vmem:[#allocation73_spill] sm:$0xff] }
 0x870   :  { %6296 = vmatprep.subr.bf16.mxu0 %v9136_v31  ;;  %6328 = vmatprep.subr.bf16.mxu1 %v9137_v15  ;;  %v9159_v31 = vld [vmem:[#allocation74_spill] sm:$0xff]  ;;  %v9160_v15 = vld [vmem:[#allocation75_spill] sm:$0xff] }
 0x872   :  { %4117 = vmatmul.mubr.f32.vlgmr.msra.gmra.mrb[14].mxu0 %v3734_v32  ;;  %4188 = vmatmul.mubr.f32.vlgmr.msra.gmra.mrb[14].mxu1 %v3734_v32  ;;  %v9146_v32 = vld [vmem:[#allocation61_spill] sm:$0xff] }
 0x873   :  { %6298 = vmatpush1.bf16.msra.mxu0 %v9138_v14  ;;  %6330 = vmatpush1.bf16.msra.mxu1 %v9139_v16  ;;  %v9161_v14 = vld [vmem:[#allocation76_spill] sm:$0xff]  ;;  %v9162_v16 = vld [vmem:[#allocation77_spill] sm:$0xff] }
 0x874   :  { %6300 = vmatprep.subr.bf16.mxu0 %v9140_v17  ;;  %6332 = vmatprep.subr.bf16.mxu1 %v9141_v18  ;;  %v9163_v17 = vld [vmem:[#allocation78_spill] sm:$0xff]  ;;  %v9164_v18 = vld [vmem:[#allocation79_spill] sm:$0xff] }
 0x875   :  { %4286 = vmatprep.mubr.f32.mxu0 %v8752_v61  ;;  %4357 = vmatprep.mubr.f32.mxu1 %v8752_v61 }
 0x877   :  { %6302 = vmatpush1.bf16.msra.mxu0 %v9142_v55  ;;  %6334 = vmatpush1.bf16.msra.mxu1 %v9143_v22  ;;  %v9165_v55 = vld [vmem:[#allocation80_spill] sm:$0xff]  ;;  %v9166_v22 = vld [vmem:[#allocation81_spill] sm:$0xff] }
 0x878   :  { %6304 = vmatprep.subr.bf16.mxu0 %v9144_v24  ;;  %6336 = vmatprep.subr.bf16.mxu1 %v9145_v30  ;;  %v9167_v24 = vld [vmem:[#allocation82_spill] sm:$0xff]  ;;  %v9168_v30 = vld [vmem:[#allocation83_spill] sm:$0xff] }
 0x87b   :  { %6306 = vmatpush1.bf16.msra.mxu0 %v9146_v32  ;;  %6338 = vmatpush1.bf16.msra.mxu1 %v9147_v40  ;;  %v9169_v32 = vld [vmem:[#allocation84_spill] sm:$0xff] }
 0x87c   :  { %6308 = vmatprep.subr.bf16.mxu0 %v9148_v50  ;;  %6340 = vmatprep.subr.bf16.mxu1 %v9149_v42  ;;  %v9170_v42 = vld [vmem:[#allocation117_spill] sm:$0xff] }
 0x87f   :  { %6310 = vmatpush1.bf16.msra.mxu0 %v9150_v33  ;;  %6342 = vmatpush1.bf16.msra.mxu1 %v9151_v27 }
 0x880   :  { %6312 = vmatprep.subr.bf16.mxu0 %v9152_v25  ;;  %6344 = vmatprep.subr.bf16.mxu1 %v9153_v29 }
 0x883   :  { %6314 = vmatpush1.bf16.msra.mxu0 %v9154_v43  ;;  %6346 = vmatpush1.bf16.msra.mxu1 %v9155_v62 }
 0x884   :  { %6316 = vmatprep.subr.bf16.mxu0 %v9156_v39  ;;  %6348 = vmatprep.subr.bf16.mxu1 %v9157_v4 }
 0x887   :  { %6318 = vmatpush1.bf16.msra.mxu0 %v9158_v37  ;;  %6350 = vmatpush1.bf16.msra.mxu1 %v9159_v31 }
 0x888   :  { %6320 = vmatprep.subr.bf16.mxu0 %v9160_v15  ;;  %6352 = vmatprep.subr.bf16.mxu1 %v9161_v14 }
 0x88b   :  { %6322 = vmatpush1.bf16.msra.mxu0 %v9162_v16  ;;  %6354 = vmatpush1.bf16.msra.mxu1 %v9163_v17 }
 0x88c   :  { %6324 = vmatprep.subr.bf16.mxu0 %v9164_v18  ;;  %6356 = vmatprep.subr.bf16.mxu1 %v9165_v55 }
 0x88f   :  { %6326 = vmatpush1.bf16.msra.mxu0 %v9166_v22  ;;  %6358 = vmatpush1.bf16.msra.mxu1 %v9167_v24 }
 0x890   :  { %6360 = vmatprep.subr.bf16.mxu0 %v9168_v30  ;;  %6392 = vmatprep.subr.bf16.mxu1 %v9169_v32 }
 0x925   :  { %v3943_v40 = vpop.f32.mrb[28].mxu0  ;;  %v4014_v50 = vpop.f32.mrb[30].mxu1 }
 0x926   :  { %v4019_v33 = vadd.f32 %v3943_v40, %v9170_v42  ;;  %v3945_v27 = vpop.f32.mrb[29].mxu0  ;;  %v4016_v25 = vpop.f32.mrb[31].mxu1  ;;  %v4021_v37 = vadd.f32 %v4014_v50, %v8871_v6 }
 0x927   :  { %v4020_v29 = vadd.f32 %v3945_v27, %v7618_v59  ;;  %v4022_v39 = vadd.f32 %v4016_v25, %v8870_v52 }
 0x928   :  { %v4801_v43 = vmul.f32 -1.442695, %v4019_v33 }
 0x929   :  { %v4802_v62 = vmul.f32 -1.442695, %v4020_v29  ;;  %v4803_v4 = vmul.f32 -1.442695, %v4022_v39 }
 0x92a   :  { %6771 = vpow2.f32 %v4801_v43 }
 0x92b   :  { %6773 = vpow2.f32 %v4802_v62 }
 0x92c   :  { %6775 = vpow2.f32 %v4803_v4 }
 0x92d   :  { %6777 = vtanh.f32 %v4021_v37 }
 0x934   :  { %v6772_v31 = vpop.eup %6771 }
 0x935   :  { %v6774_v15 = vpop.eup %6773  ;;  %v4026_v14 = vadd.f32 1.0, %v6772_v31 }
 0x936   :  { %v4032_v16 = vadd.f32 1.0, %v6774_v15  ;;  %v6776_v17 = vpop.eup %6775 }
 0x937   :  { %6779 = vrcp.f32 %v4026_v14  ;;  %v6778_v18 = vpop.eup %6777  ;;  %v4039_v30 = vadd.f32 1.0, %v6776_v17  ;;  %v4561_v17 = vld [vmem:[#allocation14 + $0x70] sm:$0xff] }
 0x938   :  { %6781 = vrcp.f32 %v4032_v16 }
 0x939   :  { %6783 = vrcp.f32 %v4039_v30  ;;  %v9174_v30 = vld [vmem:[#allocation99_spill] sm:$0xff] }
 0x941   :  { %v6780_v55 = vpop.eup %6779 }
 0x942   :  { %v6782_v22 = vpop.eup %6781  ;;  %v4043_v24 = vmul.f32 %v6780_v55, %v6778_v18  ;;  %v4562_v18 = vld [vmem:[#allocation14 + $0x78] sm:$0xff] }
 0x943   :  { %v4042_v32 = vmul.f32 %v6782_v22, %v8242_v47  ;;  %v6784_v47 = vpop.eup %6783  ;;  %v6451_v55 = vpack.c.bf16 %v4562_v18, %v4561_v17  ;;  %v9172_v22 = vld [vmem:[#allocation116_spill] sm:$0xff] }
 0x945   :  { %v8364_v40 = vadd.f32 %v4043_v24, %v4042_v32  ;;  %v4118_v33 = vpop.f32.mrb[14].mxu0  ;;  %v4189_v50 = vpop.f32.mrb[14].mxu1  ;;  %v9173_v24 = vld [vmem:[#allocation98_spill] sm:$0xff]  ;;  %v9175_v32 = vld [vmem:[#allocation100_spill] sm:$0xff] }
 0x946   :  { %v6471_v27 = vadd.f32 %v4118_v33, %v8811_v34  ;;  %v4120_v25 = vpop.f32.mrb[15].mxu0  ;;  %v4191_v29 = vpop.f32.mrb[15].mxu1  ;;  %v6487_v15 = vadd.f32 %v4189_v50, %v7530_v21 }
 0x947   :  { %v6472_v43 = vadd.f32 %v4120_v25, %v8812_v19  ;;  %6785 = vtanh.f32 %v8364_v40  ;;  %v6488_v4 = vadd.f32 %v4191_v29, %v7534_v11 }
 0x948   :  { %v4804_v62 = vmul.f32 -1.442695, %v6471_v27 }
 0x949   :  { %v4805_v39 = vmul.f32 -1.442695, %v6472_v43  ;;  %v4806_v31 = vmul.f32 -1.442695, %v6488_v4 }
 0x94a   :  { %6787 = vpow2.f32 %v4804_v62 }
 0x94b   :  { %6789 = vpow2.f32 %v4805_v39 }
 0x94c   :  { %6791 = vpow2.f32 %v4806_v31 }
 0x94d   :  { %6793 = vtanh.f32 %v6487_v15 }
 0x951   :  { %v6786_v37 = vpop.eup %6785 }
 0x952   :  { %v8371_v14 = vmul.f32 %v6786_v37, %v6784_v47 }
 0x954   :  { %v6788_v34 = vpop.eup %6787  ;;  %4287 = vmatmul.mubr.f32.vlgmr.msra.gmra.mrb[30].mxu0 %v8371_v14  ;;  %4358 = vmatmul.mubr.f32.vlgmr.msra.gmra.mrb[32].mxu1 %v8371_v14 }
 0x955   :  { %v6790_v19 = vpop.eup %6789  ;;  %v4201_v16 = vadd.f32 1.0, %v6788_v34  ;;  %6362 = vmatpush1.bf16.msra.mxu0 %v8873_v9  ;;  %6394 = vmatpush1.bf16.msra.mxu1 %v8874_v5 }
 0x956   :  { %v4207_v11 = vadd.f32 1.0, %v6790_v19  ;;  %6364 = vmatprep.subr.bf16.mxu0 %v8875_v2  ;;  %6396 = vmatprep.subr.bf16.mxu1 %v8876_v1  ;;  %v6792_v21 = vpop.eup %6791 }
 0x957   :  { %6795 = vrcp.f32 %v4201_v16  ;;  %4428 = vmatprep.mubr.f32.mxu0 %v8752_v61  ;;  %4499 = vmatprep.mubr.f32.mxu1 %v8752_v61  ;;  %v6794_v9 = vpop.eup %6793  ;;  %v4214_v1 = vadd.f32 1.0, %v6792_v21 }
 0x958   :  { %6797 = vrcp.f32 %v4207_v11 }
 0x959   :  { %6366 = vmatpush1.bf16.msra.mxu0 %v8933_v63  ;;  %6398 = vmatpush1.bf16.msra.mxu1 %v8934_v20  ;;  %6799 = vrcp.f32 %v4214_v1 }
 0x95a   :  { %6368 = vmatprep.subr.bf16.mxu0 %v8935_v56  ;;  %6400 = vmatprep.subr.bf16.mxu1 %v8936_v49  ;;  %v4555_v56 = vld [vmem:[#allocation14 + $0x40] sm:$0xff] }
 0x95d   :  { %6370 = vmatpush1.bf16.msra.mxu0 %v8937_v57  ;;  %6402 = vmatpush1.bf16.msra.mxu1 %v8993_v38  ;;  %v4557_v57 = vld [vmem:[#allocation14 + $0x50] sm:$0xff]  ;;  %v4560_v38 = vld [vmem:[#allocation14 + $0x68] sm:$0xff] }
 0x95e   :  { %6372 = vmatprep.subr.bf16.mxu0 %v8939_v54  ;;  %6404 = vmatprep.subr.bf16.mxu1 %v8940_v36  ;;  %v4558_v54 = vld [vmem:[#allocation14 + $0x58] sm:$0xff] }
 0x95f   :  { %v6443_v36 = vpack.c.bf16 %v4558_v54, %v4557_v57 }
 0x961   :  { %v6796_v61 = vpop.eup %6795  ;;  %6374 = vmatpush1.bf16.msra.mxu0 %v8941_v46  ;;  %6406 = vmatpush1.bf16.msra.mxu1 %v8827_v13  ;;  %v4548_v13 = vld [vmem:[#allocation14 + $0x8] sm:$0xff]  ;;  %v4559_v46 = vld [vmem:[#allocation14 + $0x60] sm:$0xff] }
 0x962   :  { %v6798_v5 = vpop.eup %6797  ;;  %v4218_v2 = vmul.f32 %v6796_v61, %v6794_v9  ;;  %6376 = vmatprep.subr.bf16.mxu0 %v8828_v10  ;;  %6408 = vmatprep.subr.bf16.mxu1 %v8829_v3  ;;  %v4547_v10 = vld [vmem:[#allocation14] sm:$0xff] }
 0x963   :  { %v4217_v63 = vmul.f32 %v6798_v5, %v8272_v26  ;;  %v6423_v3 = vpack.c.bf16 %v4548_v13, %v4547_v10  ;;  %v6447_v26 = vpack.c.bf16 %v4560_v38, %v4559_v46 }
 0x965   :  { %v4219_v20 = vadd.f32 %v4218_v2, %v4217_v63  ;;  %6378 = vmatpush1.bf16.msra.mxu0 %v8886_v44  ;;  %6410 = vmatpush1.bf16.msra.mxu1 %v8887_v12  ;;  %v4550_v44 = vld [vmem:[#allocation14 + $0x18] sm:$0xff]  ;;  %v6800_v12 = vpop.eup %6799 }
 0x966   :  { %6380 = vmatprep.subr.bf16.mxu0 %v8888_v51  ;;  %6412 = vmatprep.subr.bf16.mxu1 %v8889_v7  ;;  %v4549_v51 = vld [vmem:[#allocation14 + $0x10] sm:$0xff] }
 0x967   :  { %4692 = vst [vmem:[#allocation19] sm:$0xff] %v4219_v20  ;;  %6801 = vtanh.f32 %v4219_v20 }
 0x969   :  { %6382 = vmatpush1.bf16.msra.mxu0 %v8890_v28  ;;  %6414 = vmatpush1.bf16.msra.mxu1 %v8891_v45  ;;  %v6427_v28 = vpack.c.bf16 %v4550_v44, %v4549_v51  ;;  %v4551_v45 = vld [vmem:[#allocation14 + $0x20] sm:$0xff] }
 0x96a   :  { %6384 = vmatprep.subr.bf16.mxu0 %v8892_v60  ;;  %6416 = vmatprep.subr.bf16.mxu1 %v8837_v41  ;;  %v4554_v60 = vld [vmem:[#allocation14 + $0x38] sm:$0xff] }
 0x96d   :  { %6386 = vmatpush1.bf16.msra.mxu0 %v8838_v0  ;;  %6418 = vmatpush1.bf16.msra.mxu1 %v8839_v48  ;;  %v4552_v0 = vld [vmem:[#allocation14 + $0x28] sm:$0xff]  ;;  %v9171_v48 = vld [vmem:[#allocation115_spill] sm:$0xff] }
 0x96e   :  { %6388 = vmatprep.subr.bf16.mxu0 %v8840_v35  ;;  %6420 = vmatprep.subr.bf16.mxu1 %v8841_v58  ;;  %v6431_v35 = vpack.c.bf16 %v4552_v0, %v4551_v45  ;;  %v4553_v58 = vld [vmem:[#allocation14 + $0x30] sm:$0xff] }
 0x971   :  { %v6802_v7 = vpop.eup %6801  ;;  %6390 = vmatpush1.bf16.msra.mxu0 %v8842_v8  ;;  %6422 = vmatpush1.bf16.msra.mxu1 %v8843_v53  ;;  %v6435_v8 = vpack.c.bf16 %v4554_v60, %v4553_v58  ;;  %v4556_v53 = vld [vmem:[#allocation14 + $0x48] sm:$0xff] }
 0x972   :  { %v4221_v41 = vmul.f32 %v6802_v7, %v6800_v12  ;;  %6424 = vmatprep.subr.bf16.mxu0 %v6423_v3  ;;  %v6439_v49 = vpack.c.bf16 %v4556_v53, %v4555_v56 }
 0x974   :  { %4429 = vmatmul.mubr.f32.vlgmr.msra.gmra.mrb[30].mxu0 %v4221_v41  ;;  %4687 = vst [vmem:[#allocation17] sm:$0xff] %v4221_v41  ;;  %4500 = vmatmul.mubr.f32.vlgmr.msra.gmra.mrb[32].mxu1 %v4221_v41 }
 0x975   :  { %6426 = vmatpush3.bf16.msra.mxu0 %v6423_v3  ;;  %4867 = vmatprep.mubr.f32.mxu0 %v9171_v48 }
 0x976   :  { %6428 = vmatprep.subr.bf16.mxu0 %v6427_v28 }
 0x979   :  { %6430 = vmatpush3.bf16.msra.mxu0 %v6427_v28 }
 0x97a   :  { %6432 = vmatprep.subr.bf16.mxu0 %v6431_v35 }
 0x97d   :  { %6434 = vmatpush3.bf16.msra.mxu0 %v6431_v35 }
 0x97e   :  { %6436 = vmatprep.subr.bf16.mxu0 %v6435_v8 }
 0x981   :  { %6438 = vmatpush3.bf16.msra.mxu0 %v6435_v8 }
 0x982   :  { %6440 = vmatprep.subr.bf16.mxu0 %v6439_v49 }
 0x985   :  { %6442 = vmatpush3.bf16.msra.mxu0 %v6439_v49 }
 0x986   :  { %6444 = vmatprep.subr.bf16.mxu0 %v6443_v36 }
 0x989   :  { %6446 = vmatpush3.bf16.msra.mxu0 %v6443_v36 }
 0x98a   :  { %6448 = vmatprep.subr.bf16.mxu0 %v6447_v26 }
 0x98d   :  { %6450 = vmatpush3.bf16.msra.mxu0 %v6447_v26 }
 0x98e   :  { %6452 = vmatprep.subr.bf16.mxu0 %v6451_v55 }
 0x991   :  { %6454 = vmatpush3.bf16.msra.mxu0 %v6451_v55 }
 0x994   :  { %4868 = vmatmul.mubr.f32.vlgmr.msra.gmra.mrb[32].mxu0 %v9172_v22 }
 0x995   :  { %4870 = vmatprep.mubr.f32.mxu0 %v9173_v24 }
 0x998   :  { %4871 = vmatmul.mubr.f32.gmra.mrb[34].mxu0 %v9174_v30 }
 0x999   :  { %4873 = vmatprep.mubr.f32.mxu0 %v9175_v32 }
 0x99c   :  { %4874 = vmatmul.mubr.f32.gmra.mrb[36].mxu0 %v8249_v23 }
 0x99d   :  { %4876 = vmatprep.mubr.f32.mxu0 %v8371_v14 }
 0xa47   :  { %v4430_v33 = vpop.f32.mrb[30].mxu0  ;;  %v4501_v50 = vpop.f32.mrb[32].mxu1 }
 0xa48   :  { %v4506_v27 = vadd.f32 %v4430_v33, %v9170_v42  ;;  %v4432_v25 = vpop.f32.mrb[31].mxu0  ;;  %v4503_v29 = vpop.f32.mrb[33].mxu1  ;;  %v4508_v37 = vadd.f32 %v4501_v50, %v8871_v6 }
 0xa49   :  { %v4507_v43 = vadd.f32 %v4432_v25, %v7618_v59  ;;  %v4509_v4 = vadd.f32 %v4503_v29, %v8870_v52  ;;  %v8423_v52 = vld [vmem:[%s8486_s8] ss:$0 sm:$0xff]  ;;  %s6992_s8 = smov [#allocation17]  }
 0xa4a   :  { %v4807_v62 = vmul.f32 -1.442695, %v4506_v27  ;;  %s4713_s23 = sshll.u32 %s6992_s8, 4  ;;  %s4714_s23 = int_to_ptr.vmem [resolvable:$true] %s4713_s23 }
 0xa4b   :  { %v4808_v39 = vmul.f32 -1.442695, %v4507_v43  ;;  %v4809_v47 = vmul.f32 -1.442695, %v4509_v4  ;;  %s6907_s4 = scalar_lea.vmem %s4714_s23, 256  ;;  %p6912_p5 = scmp.lt.s32.totalorder %s4714_s23, %s4714_s23 }
 0xa4c   :  { %6803 = vpow2.f32 %v4807_v62  ;;  %p6908_p4 = scmp.ne.s32.totalorder %s4714_s23, %s6907_s4  ;;  %p6913_p6 = scmp.lt.s32.totalorder %s6907_s4, %s6907_s4 }
 0xa4d   :  { %6805 = vpow2.f32 %v4808_v39 }
 0xa4e   :  { %6807 = vpow2.f32 %v4809_v47  ;;  %p6914_p7 = por %p6913_p6, %p6912_p5 }
 0xa4f   :  { %6809 = vtanh.f32 %v4508_v37 }
 0xa50   :  { %p6915_p8 = pnand %p6914_p7, %p6908_p4 }
 0xa56   :  { %v6804_v23 = vpop.eup %6803 }
 0xa57   :  { %v6806_v31 = vpop.eup %6805  ;;  %v4513_v15 = vadd.f32 1.0, %v6804_v23 }
 0xa58   :  { %v4519_v14 = vadd.f32 1.0, %v6806_v31  ;;  %v6808_v42 = vpop.eup %6807 }
 0xa59   :  { %6811 = vrcp.f32 %v4513_v15  ;;  %v6810_v34 = vpop.eup %6809  ;;  %v4526_v11 = vadd.f32 1.0, %v6808_v42 }
 0xa5a   :  { %6813 = vrcp.f32 %v4519_v14 }
 0xa5b   :  { %6815 = vrcp.f32 %v4526_v11 }
 0xa63   :  { %v6812_v59 = vpop.eup %6811 }
 0xa64   :  { %v6814_v19 = vpop.eup %6813  ;;  %v4530_v16 = vmul.f32 %v6812_v59, %v6810_v34 }
 0xa65   :  { %v4529_v21 = vmul.f32 %v6814_v19, %v8364_v40  ;;  %v6816_v44 = vpop.eup %6815 }
 0xa67   :  { %v4869_v6 = vpop.f32.mrb[32].mxu0  ;;  %v4531_v9 = vadd.f32 %v4530_v16, %v4529_v21 }
 0xa68   :  { %v4642_v61 = vadd.f32 %v4869_v6, %v8423_v52  ;;  %v4636_v5 = vpop.f32.mrb[33].mxu0 }
 0xa69   :  { %v4637_v2 = vadd.f32 %v8423_v52, %v4636_v5  ;;  %6817 = vtanh.f32 %v4531_v9  ;;  %4695 = vst [vmem:[#allocation19 + $0x8] sm:$0xff] %v4531_v9 }
 0xa6a   :  { %4676 = vst [vmem:[#allocation16 + $0x8] sm:$0xff] %v4642_v61 }
 0xa6b   :  { %4675 = vst [vmem:[#allocation16] sm:$0xff] %v4637_v2  ;;  %v4872_v1 = vpop.f32.mrb[34].mxu0 }
 0xa6c   :  { %v4652_v40 = vadd.f32 %v4872_v1, %v8423_v52  ;;  %v4646_v63 = vpop.f32.mrb[35].mxu0 }
 0xa6d   :  { %v4647_v20 = vadd.f32 %v8423_v52, %v4646_v63 }
 0xa6e   :  { %4678 = vst [vmem:[#allocation16 + $0x18] sm:$0xff] %v4652_v40 }
 0xa6f   :  { %4677 = vst [vmem:[#allocation16 + $0x10] sm:$0xff] %v4647_v20  ;;  %v4875_v10 = vpop.f32.mrb[36].mxu0 }
 0xa70   :  { %v4662_v13 = vadd.f32 %v4875_v10, %v8423_v52  ;;  %v4656_v3 = vpop.f32.mrb[37].mxu0 }
 0xa71   :  { %v4657_v51 = vadd.f32 %v8423_v52, %v4656_v3 }
 0xa72   :  { %4680 = vst [vmem:[#allocation16 + $0x28] sm:$0xff] %v4662_v13 }
 0xa73   :  { %v6818_v12 = vpop.eup %6817  ;;  %4679 = vst [vmem:[#allocation16 + $0x20] sm:$0xff] %v4657_v51 }
 0xa74   :  { %v4533_v7 = vmul.f32 %v6818_v12, %v6816_v44 }
 0xa76   :  { %4877 = vmatmul.mubr.f32.gmra.mrb[38].mxu0 %v4533_v7  ;;  %4690 = vst [vmem:[#allocation17 + $0x8] sm:$0xff] %v4533_v7 }
 0xa77   :  { %6918 = shalt.err (!%p6915_p8)
}
 0xa78   :  { %s6919_s26 = scalar_lea.hbm %s8488_s10, 256 }
 0xa79   :  { %p6920_p9 = scmp.ne.s32.totalorder %s8488_s10, %s6919_s26  ;;  %p6923_p10 = scmp.lt.u32.totalorder %s6919_s26, %s8488_s10 }
 0xa7b   :  { %p6925_p11 = pnand %p6923_p10, %p6920_p9 }
 0xa7d   :  { %6928 = shalt.err (!%p6925_p11)
}
 0xa7e   :  { %4719 = dma.vmem_to_hbm [thread:$0]  %s4714_s23, 256, %s8488_s10, [#allocation18], %s6989_s5, %s6989_s5, %s6990_s29  }
 0xa7f   :  { %s6993_s1 = smov [#allocation19]  }
 0xa80   :  { %s4725_s15 = sshll.u32 %s6993_s1, 4  ;;  %s4726_s15 = int_to_ptr.vmem [resolvable:$true] %s4725_s15 }
 0xa81   :  { %s6929_s7 = scalar_lea.vmem %s4726_s15, 256  ;;  %p6934_p13 = scmp.lt.s32.totalorder %s4726_s15, %s4726_s15 }
 0xa82   :  { %p6930_p12 = scmp.ne.s32.totalorder %s4726_s15, %s6929_s7  ;;  %p6935_p0 = scmp.lt.s32.totalorder %s6929_s7, %s6929_s7 }
 0xa84   :  { %p6936_p1 = por %p6935_p0, %p6934_p13 }
 0xa86   :  { %p6937_p2 = pnand %p6936_p1, %p6930_p12 }
 0xa88   :  { %6940 = shalt.err (!%p6937_p2)
}
 0xa89   :  { %s6941_s17 = scalar_lea.hbm %s8489_s11, 256 }
 0xa8a   :  { %p6942_p3 = scmp.ne.s32.totalorder %s8489_s11, %s6941_s17  ;;  %p6945_p4 = scmp.lt.u32.totalorder %s6941_s17, %s8489_s11 }
 0xa8c   :  { %p6947_p5 = pnand %p6945_p4, %p6942_p3 }
 0xa8e   :  { %6950 = shalt.err (!%p6947_p5)
}
 0xa8f   :  { %4731 = dma.vmem_to_hbm [thread:$0]  %s4726_s15, 256, %s8489_s11, [#allocation18], %s6989_s5, %s6989_s5, %s6990_s29  }
 0xa90   :  { %s6994_s21 = smov [#allocation16]  }
 0xa91   :  { %s4701_s6 = sshll.u32 %s6994_s21, 4  ;;  %s4702_s6 = int_to_ptr.vmem [resolvable:$true] %s4701_s6 }
 0xa92   :  { %s6951_s22 = scalar_lea.vmem %s4702_s6, 1024  ;;  %p6956_p7 = scmp.lt.s32.totalorder %s4702_s6, %s4702_s6 }
 0xa93   :  { %p6952_p6 = scmp.ne.s32.totalorder %s4702_s6, %s6951_s22  ;;  %p6957_p8 = scmp.lt.s32.totalorder %s6951_s22, %s6951_s22 }
 0xa95   :  { %p6958_p9 = por %p6957_p8, %p6956_p7 }
 0xa97   :  { %p6959_p10 = pnand %p6958_p9, %p6952_p6 }
 0xb49   :  { %v4878_v41 = vpop.f32.mrb[38].mxu0 }
 0xb4a   :  { %v4672_v28 = vadd.f32 %v4878_v41, %v8423_v52  ;;  %v4666_v45 = vpop.f32.mrb[39].mxu0 }
 0xb4b   :  { %v4667_v0 = vadd.f32 %v8423_v52, %v4666_v45 }
 0xb4c   :  { %4682 = vst [vmem:[#allocation16 + $0x38] sm:$0xff] %v4672_v28 }
 0xb4d   :  { %4681 = vst [vmem:[#allocation16 + $0x30] sm:$0xff] %v4667_v0 }
 0xb4e   :  { %6962 = shalt.err (!%p6959_p10)
}
 0xb4f   :  { %s6963_s23 = scalar_lea.hbm %s8487_s9, 1024 }
 0xb50   :  { %p6964_p11 = scmp.ne.s32.totalorder %s8487_s9, %s6963_s23  ;;  %p6967_p12 = scmp.lt.u32.totalorder %s6963_s23, %s8487_s9 }
 0xb52   :  { %p6969_p13 = pnand %p6967_p12, %p6964_p11 }
 0xb54   :  { %6972 = shalt.err (!%p6969_p13)
}
 0xb55   :  { %4707 = dma.vmem_to_hbm [thread:$0]  %s4702_s6, 1024, %s8487_s9, [#allocation10], %s6989_s5, %s6989_s5, %s6990_s29  }
 0xb56   :  { %6979 = dma.done.wait [#allocation10], 1024  }
 0xb57   :  { %6980 = vsyncadd [#allocation10], 4294966272 }
 0xb58   :  { %6981 = dma.done.wait [#allocation18], 512  }
 0xb59   :  { %6982 = vsyncadd [#allocation18], 4294966784 }
 0xb5a   :  { %4741 = vsyncpa [#allocation9], 1 }
 0xb5b   :  { %4742 = vsyncpa [#allocation12], 1 }
 0xb5c   :  { %4743 = vsyncpa [#allocation15], 1 }
 0xb5d   :  { %4744 = vsyncpa [#allocation10], 1 }
 0xb5e   :  { %4745 = vsyncpa [#allocation18], 1 }

</bundles_post_ra>
